<compile_context>
chip_gen: v5e
topology: v5e:2x2
jax: 0.10.0
libtpu: 0.0.40
codegen_flags: <defaults>
</compile_context>

<pallas_src>
import functools

import jax
import jax.numpy as jnp
from jax import lax
from jax.experimental import pallas as pl
from jax.experimental.pallas import tpu as pltpu

EPS = 1e-5


def _pass1_kernel(rates, rmax, H, W, Cout,
                  xpad_ref, wctr_ref, wtap_ref, wg_ref,
                  zcat_ref, stats_ref, gap_ref, zacc_ref):
    """Pass 1 (one image per grid step, fully parallel):
    all branch convs from halo-shifted slices, cache pre-BN outputs (bf16),
    per-image BN partial sums and the GAP 1x1-conv output."""
    Cin = xpad_ref.shape[-1]
    HW = H * W
    x_img = xpad_ref[0]                                           # (Hp, Wp, Cin) bf16
    xf = x_img[rmax:rmax + H, rmax:rmax + W, :].reshape(HW, Cin)  # center crop

    # fused: 1x1 branch + the center tap of every atrous rate (shared LHS),
    # one wide MXU matmul covering all (R+1)*Cout lanes.
    zacc_ref[...] = jnp.dot(xf, wctr_ref[...],
                            preferred_element_type=jnp.float32)

    # off-center taps: accumulated per-tap matmuls (no 9x im2col slab).
    for r_idx, rate in enumerate(rates):
        off = rmax - rate
        lo = (1 + r_idx) * Cout
        acc = None
        tap = 0
        for dy in range(3):
            for dx in range(3):
                if dy == 1 and dx == 1:
                    continue
                sl = x_img[off + dy * rate: off + dy * rate + H,
                           off + dx * rate: off + dx * rate + W, :].reshape(HW, Cin)
                p = jnp.dot(sl, wtap_ref[r_idx, tap],
                            preferred_element_type=jnp.float32)
                acc = p if acc is None else acc + p
                tap += 1
        zacc_ref[:, lo:lo + Cout] += acc

    zacc = zacc_ref[...]
    zcat_ref[0] = zacc.astype(jnp.bfloat16)                       # cache for pass 2
    zsum = jnp.sum(zacc, axis=0, keepdims=True)                   # (1, lanes)
    zsq = jnp.sum(zacc * zacc, axis=0, keepdims=True)             # (1, lanes)
    stats_ref[0] = jnp.concatenate([zsum, zsq], axis=0)           # (2, lanes)

    # global-average-pool branch: spatial mean -> tiny 1x1 conv (f32)
    gp = jnp.mean(xf.astype(jnp.float32), axis=0, keepdims=True)  # (1, Cin)
    gap_ref[0] = jnp.dot(gp, wg_ref[...],
                         preferred_element_type=jnp.float32)      # (1, Cout)


def _pass2_kernel(N, H, W, Cout, lanes,
                  zcat_ref, stats_ref, gap_ref, wft_ref,
                  g_ref, b_ref, g2_ref, b2_ref, out_ref, ycat_ref):
    """Pass 2 (one image per grid step, fully parallel):
    reduce per-image BN partials, normalize with folded scale/offset + ReLU,
    add the broadcast GAP branch, fused final 1x1 projection, channels-major
    lane-dense store."""
    i = pl.program_id(0)
    HW = H * W
    inv_m = 1.0 / float(N * H * W)

    # global per-lane BN stats from the per-image partial sums (biased var).
    stats = stats_ref[...]                                        # (N, 2, lanes) f32
    mu = jnp.sum(stats[:, 0, :], axis=0, keepdims=True) * inv_m
    var = jnp.sum(stats[:, 1, :], axis=0, keepdims=True) * inv_m - mu * mu
    s = g_ref[...] * lax.rsqrt(var + EPS)                         # folded BN scale
    t = b_ref[...] - mu * s                                       # folded BN offset

    y = jnp.maximum(zcat_ref[0].astype(jnp.float32) * s + t, 0.0)
    ycat_ref[:, :lanes] = y.astype(jnp.bfloat16)

    # GAP branch: BN over the N pooled 1x1 outputs, pick this image's row,
    # broadcast over the spatial extent (bilinear upsample from 1x1 == bcast).
    zg = gap_ref[...][:, 0, :]                                    # (N, Cout) f32
    mu_g = jnp.mean(zg, axis=0, keepdims=True)
    var_g = jnp.mean(zg * zg, axis=0, keepdims=True) - mu_g * mu_g
    sg = g2_ref[...] * lax.rsqrt(var_g + EPS)
    tg = b2_ref[...] - mu_g * sg
    yg_i = jnp.maximum(gap_ref[i] * sg + tg, 0.0)                 # (1, Cout)
    ycat_ref[:, lanes:] = jnp.broadcast_to(yg_i.astype(jnp.bfloat16), (HW, Cout))

    # fused final 1x1 projection: contract on the lane axis so the result is
    # already channels-major (Cout, HW) -> unmasked lane-dense stores.
    # (For realistic Cout >= 128 prefer ycat @ wft.T instead, to avoid
    # transposing the large activation in front of the MXU.)
    out_ref[0] = lax.dot_general(
        wft_ref[...], ycat_ref[...],
        dimension_numbers=(((1,), (1,)), ((), ())),
        preferred_element_type=jnp.float32)


def aspp_forward(x_nchw, params, atrous_rates):
    N, Cin, H, W = x_nchw.shape
    Cout = params["w_1x1"].shape[0]
    R = len(atrous_rates)
    rates = tuple(int(r) for r in atrous_rates)
    rmax = max(rates)
    Hp, Wp = H + 2 * rmax, W + 2 * rmax
    HW = H * W
    lanes = (R + 1) * Cout
    Ccat = (R + 2) * Cout

    # channels-last + halo padding once, in bf16 (halves the HBM traffic of the
    # XLA transpose/pad; inputs are bf16-representable so numerics unchanged).
    x_nhwc = jnp.transpose(x_nchw.astype(jnp.bfloat16), (0, 2, 3, 1))
    xpad = jnp.pad(x_nhwc, ((0, 0), (rmax, rmax), (rmax, rmax), (0, 0)))

    # torch OIHW weights -> matmul layouts (bf16 MXU operands).
    w1 = jnp.transpose(params["w_1x1"][:, :, 0, 0])                       # (Cin, Cout)
    ctrs = [jnp.transpose(w[:, :, 1, 1]) for w in params["w_atrous"]]
    wctr = jnp.concatenate([w1] + ctrs, axis=-1).astype(jnp.bfloat16)     # (Cin, (R+1)*Cout)
    taps = []
    for w in params["w_atrous"]:
        t = [jnp.transpose(w[:, :, dy, dx])
             for dy in range(3) for dx in range(3) if not (dy == 1 and dx == 1)]
        taps.append(jnp.stack(t, axis=0))                                 # (8, Cin, Cout)
    wtap = jnp.stack(taps, axis=0).astype(jnp.bfloat16)                   # (R, 8, Cin, Cout)
    wg = jnp.transpose(params["w_gap"][:, :, 0, 0]).astype(jnp.float32)   # (Cin, Cout)
    wft = params["w_final"][:, :, 0, 0].astype(jnp.bfloat16)              # (Cout, Ccat)

    # shared BN affine tiled to the concatenated (branch, channel) lane layout
    g_t = jnp.tile(params["bn_gamma"].reshape(1, Cout), (1, R + 1)).astype(jnp.float32)
    b_t = jnp.tile(params["bn_beta"].reshape(1, Cout), (1, R + 1)).astype(jnp.float32)
    g2 = params["bn2_gamma"].reshape(1, Cout).astype(jnp.float32)
    b2 = params["bn2_beta"].reshape(1, Cout).astype(jnp.float32)

    full = lambda shape: pl.BlockSpec(shape, lambda i, _n=len(shape): (0,) * _n)
    img_spec = pl.BlockSpec((1, Hp, Wp, Cin), lambda i: (i, 0, 0, 0))
    zcat_spec = pl.BlockSpec((1, HW, lanes), lambda i: (i, 0, 0))
    vmem_limit = 32 * 1024 * 1024
    # TODO(synk): for realistic ASPP sizes (Cin 256-2048, H*W ~65x65) add
    # spatial tiling (grid (N, H//TH) with an rmax halo in the index_map) and
    # derive vmem_limit_bytes from the actual tile footprint per chip.

    # pass 1: branch convs once per image; cache pre-BN outputs + BN partials.
    zcat, stats, gap = pl.pallas_call(
        functools.partial(_pass1_kernel, rates, rmax, H, W, Cout),
        out_shape=(jax.ShapeDtypeStruct((N, HW, lanes), jnp.bfloat16),
                   jax.ShapeDtypeStruct((N, 2, lanes), jnp.float32),
                   jax.ShapeDtypeStruct((N, 1, Cout), jnp.float32)),
        grid=(N,),
        in_specs=[img_spec, full((Cin, lanes)), full((R, 8, Cin, Cout)),
                  full((Cin, Cout))],
        out_specs=(zcat_spec,
                   pl.BlockSpec((1, 2, lanes), lambda i: (i, 0, 0)),
                   pl.BlockSpec((1, 1, Cout), lambda i: (i, 0, 0))),
        scratch_shapes=[pltpu.VMEM((HW, lanes), jnp.float32)],
        compiler_params=pltpu.CompilerParams(
            dimension_semantics=("parallel",), vmem_limit_bytes=vmem_limit),
    )(xpad, wctr, wtap, wg)

    # pass 2: reduce BN partials, normalize + ReLU, GAP broadcast, fused final
    # projection; output is already (N, Cout, H*W) -> reshape only, no transpose.
    out = pl.pallas_call(
        functools.partial(_pass2_kernel, N, H, W, Cout, lanes),
        out_shape=jax.ShapeDtypeStruct((N, Cout, HW), jnp.float32),
        grid=(N,),
        in_specs=[zcat_spec, full((N, 2, lanes)), full((N, 1, Cout)),
                  full((Cout, Ccat)),
                  full((1, lanes)), full((1, lanes)),
                  full((1, Cout)), full((1, Cout))],
        out_specs=pl.BlockSpec((1, Cout, HW), lambda i: (i, 0, 0)),
        scratch_shapes=[pltpu.VMEM((HW, Ccat), jnp.bfloat16)],
        compiler_params=pltpu.CompilerParams(
            dimension_semantics=("parallel",), vmem_limit_bytes=vmem_limit),
    )(zcat, stats, gap, wft, g_t, b_t, g2, b2)

    return out.reshape(N, Cout, H, W)


def aspp_reference(x, params, atrous_rates):
    """Pure-JAX (XLA conv, f32 HIGHEST precision) reference, same semantics."""
    def bn_relu(z, g, b):
        mu = jnp.mean(z, axis=(0, 2, 3), keepdims=True)
        var = jnp.mean((z - mu) ** 2, axis=(0, 2, 3), keepdims=True)
        y = (z - mu) * jax.lax.rsqrt(var + EPS) * g.reshape(1, -1, 1, 1) \
            + b.reshape(1, -1, 1, 1)
        return jnp.maximum(y, 0.0)

    def conv(x, w, pad=0, dil=1):
        return jax.lax.conv_general_dilated(
            x, w, window_strides=(1, 1),
            padding=[(pad, pad), (pad, pad)],
            rhs_dilation=(dil, dil),
            dimension_numbers=("NCHW", "OIHW", "NCHW"),
            precision=jax.lax.Precision.HIGHEST)

    res = [bn_relu(conv(x, params["w_1x1"]), params["bn_gamma"], params["bn_beta"])]
    for rate, w in zip(atrous_rates, params["w_atrous"]):
        res.append(bn_relu(conv(x, w, pad=rate, dil=rate),
                           params["bn_gamma"], params["bn_beta"]))
    gp = jnp.mean(x, axis=(2, 3), keepdims=True)
    gp = bn_relu(conv(gp, params["w_gap"]), params["bn2_gamma"], params["bn2_beta"])
    res.append(jnp.broadcast_to(gp, (x.shape[0], gp.shape[1],
                                     x.shape[2], x.shape[3])))
    cat = jnp.concatenate(res, axis=1)
    return conv(cat, params["w_final"])


if __name__ == "__main__":
    N, Cin, H, W = 2, 4, 16, 16
    Cout = 8
    rates = (1, 2, 3)

    # pre-round x and conv weights to bf16-representable values so the kernel
    # (bf16 MXU operands) and the f32 reference see identical inputs.
    bf = lambda a: a.astype(jnp.bfloat16).astype(jnp.float32)

    ks = jax.random.split(jax.random.PRNGKey(0), 10)
    params = {
        "w_1x1":    bf(0.3 * jax.random.normal(ks[0], (Cout, Cin, 1, 1), jnp.float32)),
        "w_atrous": [bf(0.3 * jax.random.normal(ks[1 + i], (Cout, Cin, 3, 3), jnp.float32))
                     for i in range(len(rates))],
        "w_gap":    bf(0.3 * jax.random.normal(ks[4], (Cout, Cin, 1, 1), jnp.float32)),
        "w_final":  bf(0.3 * jax.random.normal(
            ks[5], (Cout, Cout * (len(rates) + 2), 1, 1), jnp.float32)),
        "bn_gamma":  1.0 + 0.1 * jax.random.normal(ks[6], (Cout,), jnp.float32),
        "bn_beta":   0.1 * jax.random.normal(ks[7], (Cout,), jnp.float32),
        "bn2_gamma": 1.0 + 0.1 * jax.random.normal(ks[8], (Cout,), jnp.float32),
        "bn2_beta":  0.1 * jax.random.normal(ks[9], (Cout,), jnp.float32),
    }
    x = bf(jax.random.normal(jax.random.PRNGKey(42), (N, Cin, H, W), jnp.float32))

    out = jax.block_until_ready(aspp_forward(x, params, rates))
    ref = jax.block_until_ready(aspp_reference(x, params, rates))

    assert out.shape == (N, Cout, H, W), out.shape
    # tolerance reflects the bf16 rounding of the cached pre-BN conv outputs
    # and of the BN+ReLU activations feeding the fused final projection.
    if not jnp.allclose(out, ref, atol=5e-2, rtol=5e-2):
        raise AssertionError(
            f"mismatch vs reference, max abs err {float(jnp.max(jnp.abs(out - ref)))}")
    print("KERNEL_OK")
</pallas_src>

<mosaic_0001>
module attributes {stable_mosaic.version = 11 : i64} {
  func.func @_pass1_kernel(%arg0: i32, %arg1: memref<1x22x22x4xbf16, #tpu.memory_space<vmem>>, %arg2: memref<4x32xbf16, #tpu.memory_space<vmem>>, %arg3: memref<3x8x4x8xbf16, #tpu.memory_space<vmem>>, %arg4: memref<4x8xf32, #tpu.memory_space<vmem>>, %arg5: memref<1x256x32xbf16, #tpu.memory_space<vmem>>, %arg6: memref<1x2x32xf32, #tpu.memory_space<vmem>>, %arg7: memref<1x1x8xf32, #tpu.memory_space<vmem>>, %arg8: memref<256x32xf32, #tpu.memory_space<vmem>>) attributes {dimension_semantics = [#tpu.dimension_semantics<parallel>], iteration_bounds = array<i64: 2>, scalar_prefetch = 0 : i64, scratch_operands = 1 : i64, tpu.core_type = #tpu.core_type<tc>, window_params = [{transform_indices = @transform_0, window_bounds = array<i64: 1, 22, 22, 4>}, {pipeline_mode = #tpu.pipeline_mode<synchronous>, transform_indices = @transform_1, window_bounds = array<i64: 4, 32>}, {pipeline_mode = #tpu.pipeline_mode<synchronous>, transform_indices = @transform_2, window_bounds = array<i64: 3, 8, 4, 8>}, {pipeline_mode = #tpu.pipeline_mode<synchronous>, transform_indices = @transform_3, window_bounds = array<i64: 4, 8>}, {transform_indices = @transform_4, window_bounds = array<i64: 1, 256, 32>}, {transform_indices = @transform_5, window_bounds = array<i64: 1, 2, 32>}, {transform_indices = @transform_6, window_bounds = array<i64: 1, 1, 8>}]} {
    %c0 = arith.constant 0 : index
    %c0_0 = arith.constant 0 : index
    %c0_1 = arith.constant 0 : index
    %c0_2 = arith.constant 0 : index
    %0 = vector.load %arg1[%c0, %c0_0, %c0_1, %c0_2] : memref<1x22x22x4xbf16, #tpu.memory_space<vmem>>, vector<1x22x22x4xbf16>
    %1 = vector.shape_cast %0 : vector<1x22x22x4xbf16> to vector<22x22x4xbf16>
    %2 = vector.extract_strided_slice %1 {offsets = [3, 3, 0], sizes = [16, 16, 4], strides = [1, 1, 1]} : vector<22x22x4xbf16> to vector<16x16x4xbf16>
    %3 = vector.shape_cast %2 : vector<16x16x4xbf16> to vector<256x4xbf16>
    %c0_3 = arith.constant 0 : index
    %c0_4 = arith.constant 0 : index
    %4 = vector.load %arg2[%c0_3, %c0_4] : memref<4x32xbf16, #tpu.memory_space<vmem>>, vector<4x32xbf16>
    %cst = arith.constant dense<0.000000e+00> : vector<256x32xf32>
    %5 = tpu.matmul %3, %4, %cst {dimension_numbers = #tpu.dot_dimension_numbers<[1], [0], [0], [1], [0, 0, 1, 1], [], []>} : vector<256x4xbf16>, vector<4x32xbf16>, vector<256x32xf32> -> vector<256x32xf32>
    %c0_5 = arith.constant 0 : index
    %c0_6 = arith.constant 0 : index
    %6 = vector.load %arg8[%c0_5, %c0_6] : memref<256x32xf32, #tpu.memory_space<vmem>>, vector<256x32xf32>
    tpu.vector_store %arg8[%c0_5, %c0_6], %5 {strides = array<i32>} : memref<256x32xf32, #tpu.memory_space<vmem>>, vector<256x32xf32>,
    %7 = vector.extract_strided_slice %1 {offsets = [2, 2, 0], sizes = [16, 16, 4], strides = [1, 1, 1]} : vector<22x22x4xbf16> to vector<16x16x4xbf16>
    %8 = vector.shape_cast %7 : vector<16x16x4xbf16> to vector<256x4xbf16>
    %c0_7 = arith.constant 0 : index
    %c0_8 = arith.constant 0 : index
    %c0_9 = arith.constant 0 : index
    %c0_10 = arith.constant 0 : index
    %9 = vector.load %arg3[%c0_7, %c0_8, %c0_9, %c0_10] : memref<3x8x4x8xbf16, #tpu.memory_space<vmem>>, vector<1x1x4x8xbf16>
    %10 = vector.shape_cast %9 : vector<1x1x4x8xbf16> to vector<4x8xbf16>
    %cst_11 = arith.constant dense<0.000000e+00> : vector<256x8xf32>
    %11 = tpu.matmul %8, %10, %cst_11 {dimension_numbers = #tpu.dot_dimension_numbers<[1], [0], [0], [1], [0, 0, 1, 1], [], []>} : vector<256x4xbf16>, vector<4x8xbf16>, vector<256x8xf32> -> vector<256x8xf32>
    %12 = vector.extract_strided_slice %1 {offsets = [2, 3, 0], sizes = [16, 16, 4], strides = [1, 1, 1]} : vector<22x22x4xbf16> to vector<16x16x4xbf16>
    %13 = vector.shape_cast %12 : vector<16x16x4xbf16> to vector<256x4xbf16>
    %c0_12 = arith.constant 0 : index
    %c1 = arith.constant 1 : index
    %c0_13 = arith.constant 0 : index
    %c0_14 = arith.constant 0 : index
    %14 = vector.load %arg3[%c0_12, %c1, %c0_13, %c0_14] : memref<3x8x4x8xbf16, #tpu.memory_space<vmem>>, vector<1x1x4x8xbf16>
    %15 = vector.shape_cast %14 : vector<1x1x4x8xbf16> to vector<4x8xbf16>
    %cst_15 = arith.constant dense<0.000000e+00> : vector<256x8xf32>
    %16 = tpu.matmul %13, %15, %cst_15 {dimension_numbers = #tpu.dot_dimension_numbers<[1], [0], [0], [1], [0, 0, 1, 1], [], []>} : vector<256x4xbf16>, vector<4x8xbf16>, vector<256x8xf32> -> vector<256x8xf32>
    %17 = arith.addf %11, %16 : vector<256x8xf32>
    %18 = vector.extract_strided_slice %1 {offsets = [2, 4, 0], sizes = [16, 16, 4], strides = [1, 1, 1]} : vector<22x22x4xbf16> to vector<16x16x4xbf16>
    %19 = vector.shape_cast %18 : vector<16x16x4xbf16> to vector<256x4xbf16>
    %c0_16 = arith.constant 0 : index
    %c2 = arith.constant 2 : index
    %c0_17 = arith.constant 0 : index
    %c0_18 = arith.constant 0 : index
    %20 = vector.load %arg3[%c0_16, %c2, %c0_17, %c0_18] : memref<3x8x4x8xbf16, #tpu.memory_space<vmem>>, vector<1x1x4x8xbf16>
    %21 = vector.shape_cast %20 : vector<1x1x4x8xbf16> to vector<4x8xbf16>
    %cst_19 = arith.constant dense<0.000000e+00> : vector<256x8xf32>
    %22 = tpu.matmul %19, %21, %cst_19 {dimension_numbers = #tpu.dot_dimension_numbers<[1], [0], [0], [1], [0, 0, 1, 1], [], []>} : vector<256x4xbf16>, vector<4x8xbf16>, vector<256x8xf32> -> vector<256x8xf32>
    %23 = arith.addf %17, %22 : vector<256x8xf32>
    %24 = vector.extract_strided_slice %1 {offsets = [3, 2, 0], sizes = [16, 16, 4], strides = [1, 1, 1]} : vector<22x22x4xbf16> to vector<16x16x4xbf16>
    %25 = vector.shape_cast %24 : vector<16x16x4xbf16> to vector<256x4xbf16>
    %c0_20 = arith.constant 0 : index
    %c3 = arith.constant 3 : index
    %c0_21 = arith.constant 0 : index
    %c0_22 = arith.constant 0 : index
    %26 = vector.load %arg3[%c0_20, %c3, %c0_21, %c0_22] : memref<3x8x4x8xbf16, #tpu.memory_space<vmem>>, vector<1x1x4x8xbf16>
    %27 = vector.shape_cast %26 : vector<1x1x4x8xbf16> to vector<4x8xbf16>
    %cst_23 = arith.constant dense<0.000000e+00> : vector<256x8xf32>
    %28 = tpu.matmul %25, %27, %cst_23 {dimension_numbers = #tpu.dot_dimension_numbers<[1], [0], [0], [1], [0, 0, 1, 1], [], []>} : vector<256x4xbf16>, vector<4x8xbf16>, vector<256x8xf32> -> vector<256x8xf32>
    %29 = arith.addf %23, %28 : vector<256x8xf32>
    %30 = vector.extract_strided_slice %1 {offsets = [3, 4, 0], sizes = [16, 16, 4], strides = [1, 1, 1]} : vector<22x22x4xbf16> to vector<16x16x4xbf16>
    %31 = vector.shape_cast %30 : vector<16x16x4xbf16> to vector<256x4xbf16>
    %c0_24 = arith.constant 0 : index
    %c4 = arith.constant 4 : index
    %c0_25 = arith.constant 0 : index
    %c0_26 = arith.constant 0 : index
    %32 = vector.load %arg3[%c0_24, %c4, %c0_25, %c0_26] : memref<3x8x4x8xbf16, #tpu.memory_space<vmem>>, vector<1x1x4x8xbf16>
    %33 = vector.shape_cast %32 : vector<1x1x4x8xbf16> to vector<4x8xbf16>
    %cst_27 = arith.constant dense<0.000000e+00> : vector<256x8xf32>
    %34 = tpu.matmul %31, %33, %cst_27 {dimension_numbers = #tpu.dot_dimension_numbers<[1], [0], [0], [1], [0, 0, 1, 1], [], []>} : vector<256x4xbf16>, vector<4x8xbf16>, vector<256x8xf32> -> vector<256x8xf32>
    %35 = arith.addf %29, %34 : vector<256x8xf32>
    %36 = vector.extract_strided_slice %1 {offsets = [4, 2, 0], sizes = [16, 16, 4], strides = [1, 1, 1]} : vector<22x22x4xbf16> to vector<16x16x4xbf16>
    %37 = vector.shape_cast %36 : vector<16x16x4xbf16> to vector<256x4xbf16>
    %c0_28 = arith.constant 0 : index
    %c5 = arith.constant 5 : index
    %c0_29 = arith.constant 0 : index
    %c0_30 = arith.constant 0 : index
    %38 = vector.load %arg3[%c0_28, %c5, %c0_29, %c0_30] : memref<3x8x4x8xbf16, #tpu.memory_space<vmem>>, vector<1x1x4x8xbf16>
    %39 = vector.shape_cast %38 : vector<1x1x4x8xbf16> to vector<4x8xbf16>
    %cst_31 = arith.constant dense<0.000000e+00> : vector<256x8xf32>
    %40 = tpu.matmul %37, %39, %cst_31 {dimension_numbers = #tpu.dot_dimension_numbers<[1], [0], [0], [1], [0, 0, 1, 1], [], []>} : vector<256x4xbf16>, vector<4x8xbf16>, vector<256x8xf32> -> vector<256x8xf32>
    %41 = arith.addf %35, %40 : vector<256x8xf32>
    %42 = vector.extract_strided_slice %1 {offsets = [4, 3, 0], sizes = [16, 16, 4], strides = [1, 1, 1]} : vector<22x22x4xbf16> to vector<16x16x4xbf16>
    %43 = vector.shape_cast %42 : vector<16x16x4xbf16> to vector<256x4xbf16>
    %c0_32 = arith.constant 0 : index
    %c6 = arith.constant 6 : index
    %c0_33 = arith.constant 0 : index
    %c0_34 = arith.constant 0 : index
    %44 = vector.load %arg3[%c0_32, %c6, %c0_33, %c0_34] : memref<3x8x4x8xbf16, #tpu.memory_space<vmem>>, vector<1x1x4x8xbf16>
    %45 = vector.shape_cast %44 : vector<1x1x4x8xbf16> to vector<4x8xbf16>
    %cst_35 = arith.constant dense<0.000000e+00> : vector<256x8xf32>
    %46 = tpu.matmul %43, %45, %cst_35 {dimension_numbers = #tpu.dot_dimension_numbers<[1], [0], [0], [1], [0, 0, 1, 1], [], []>} : vector<256x4xbf16>, vector<4x8xbf16>, vector<256x8xf32> -> vector<256x8xf32>
    %47 = arith.addf %41, %46 : vector<256x8xf32>
    %48 = vector.extract_strided_slice %1 {offsets = [4, 4, 0], sizes = [16, 16, 4], strides = [1, 1, 1]} : vector<22x22x4xbf16> to vector<16x16x4xbf16>
    %49 = vector.shape_cast %48 : vector<16x16x4xbf16> to vector<256x4xbf16>
    %c0_36 = arith.constant 0 : index
    %c7 = arith.constant 7 : index
    %c0_37 = arith.constant 0 : index
    %c0_38 = arith.constant 0 : index
    %50 = vector.load %arg3[%c0_36, %c7, %c0_37, %c0_38] : memref<3x8x4x8xbf16, #tpu.memory_space<vmem>>, vector<1x1x4x8xbf16>
    %51 = vector.shape_cast %50 : vector<1x1x4x8xbf16> to vector<4x8xbf16>
    %cst_39 = arith.constant dense<0.000000e+00> : vector<256x8xf32>
    %52 = tpu.matmul %49, %51, %cst_39 {dimension_numbers = #tpu.dot_dimension_numbers<[1], [0], [0], [1], [0, 0, 1, 1], [], []>} : vector<256x4xbf16>, vector<4x8xbf16>, vector<256x8xf32> -> vector<256x8xf32>
    %53 = arith.addf %47, %52 : vector<256x8xf32>
    %c0_40 = arith.constant 0 : index
    %c8 = arith.constant 8 : index
    %54 = vector.load %arg8[%c0_40, %c8] : memref<256x32xf32, #tpu.memory_space<vmem>>, vector<256x8xf32>
    %55 = arith.addf %54, %53 : vector<256x8xf32>
    %c0_41 = arith.constant 0 : index
    %c8_42 = arith.constant 8 : index
    %56 = vector.load %arg8[%c0_41, %c8_42] : memref<256x32xf32, #tpu.memory_space<vmem>>, vector<256x8xf32>
    tpu.vector_store %arg8[%c0_41, %c8_42], %55 {strides = array<i32>} : memref<256x32xf32, #tpu.memory_space<vmem>>, vector<256x8xf32>,
    %57 = vector.extract_strided_slice %1 {offsets = [1, 1, 0], sizes = [16, 16, 4], strides = [1, 1, 1]} : vector<22x22x4xbf16> to vector<16x16x4xbf16>
    %58 = vector.shape_cast %57 : vector<16x16x4xbf16> to vector<256x4xbf16>
    %c1_43 = arith.constant 1 : index
    %c0_44 = arith.constant 0 : index
    %c0_45 = arith.constant 0 : index
    %c0_46 = arith.constant 0 : index
    %59 = vector.load %arg3[%c1_43, %c0_44, %c0_45, %c0_46] : memref<3x8x4x8xbf16, #tpu.memory_space<vmem>>, vector<1x1x4x8xbf16>
    %60 = vector.shape_cast %59 : vector<1x1x4x8xbf16> to vector<4x8xbf16>
    %cst_47 = arith.constant dense<0.000000e+00> : vector<256x8xf32>
    %61 = tpu.matmul %58, %60, %cst_47 {dimension_numbers = #tpu.dot_dimension_numbers<[1], [0], [0], [1], [0, 0, 1, 1], [], []>} : vector<256x4xbf16>, vector<4x8xbf16>, vector<256x8xf32> -> vector<256x8xf32>
    %62 = vector.extract_strided_slice %1 {offsets = [1, 3, 0], sizes = [16, 16, 4], strides = [1, 1, 1]} : vector<22x22x4xbf16> to vector<16x16x4xbf16>
    %63 = vector.shape_cast %62 : vector<16x16x4xbf16> to vector<256x4xbf16>
    %c1_48 = arith.constant 1 : index
    %c1_49 = arith.constant 1 : index
    %c0_50 = arith.constant 0 : index
    %c0_51 = arith.constant 0 : index
    %64 = vector.load %arg3[%c1_48, %c1_49, %c0_50, %c0_51] : memref<3x8x4x8xbf16, #tpu.memory_space<vmem>>, vector<1x1x4x8xbf16>
    %65 = vector.shape_cast %64 : vector<1x1x4x8xbf16> to vector<4x8xbf16>
    %cst_52 = arith.constant dense<0.000000e+00> : vector<256x8xf32>
    %66 = tpu.matmul %63, %65, %cst_52 {dimension_numbers = #tpu.dot_dimension_numbers<[1], [0], [0], [1], [0, 0, 1, 1], [], []>} : vector<256x4xbf16>, vector<4x8xbf16>, vector<256x8xf32> -> vector<256x8xf32>
    %67 = arith.addf %61, %66 : vector<256x8xf32>
    %68 = vector.extract_strided_slice %1 {offsets = [1, 5, 0], sizes = [16, 16, 4], strides = [1, 1, 1]} : vector<22x22x4xbf16> to vector<16x16x4xbf16>
    %69 = vector.shape_cast %68 : vector<16x16x4xbf16> to vector<256x4xbf16>
    %c1_53 = arith.constant 1 : index
    %c2_54 = arith.constant 2 : index
    %c0_55 = arith.constant 0 : index
    %c0_56 = arith.constant 0 : index
    %70 = vector.load %arg3[%c1_53, %c2_54, %c0_55, %c0_56] : memref<3x8x4x8xbf16, #tpu.memory_space<vmem>>, vector<1x1x4x8xbf16>
    %71 = vector.shape_cast %70 : vector<1x1x4x8xbf16> to vector<4x8xbf16>
    %cst_57 = arith.constant dense<0.000000e+00> : vector<256x8xf32>
    %72 = tpu.matmul %69, %71, %cst_57 {dimension_numbers = #tpu.dot_dimension_numbers<[1], [0], [0], [1], [0, 0, 1, 1], [], []>} : vector<256x4xbf16>, vector<4x8xbf16>, vector<256x8xf32> -> vector<256x8xf32>
    %73 = arith.addf %67, %72 : vector<256x8xf32>
    %74 = vector.extract_strided_slice %1 {offsets = [3, 1, 0], sizes = [16, 16, 4], strides = [1, 1, 1]} : vector<22x22x4xbf16> to vector<16x16x4xbf16>
    %75 = vector.shape_cast %74 : vector<16x16x4xbf16> to vector<256x4xbf16>
    %c1_58 = arith.constant 1 : index
    %c3_59 = arith.constant 3 : index
    %c0_60 = arith.constant 0 : index
    %c0_61 = arith.constant 0 : index
    %76 = vector.load %arg3[%c1_58, %c3_59, %c0_60, %c0_61] : memref<3x8x4x8xbf16, #tpu.memory_space<vmem>>, vector<1x1x4x8xbf16>
    %77 = vector.shape_cast %76 : vector<1x1x4x8xbf16> to vector<4x8xbf16>
    %cst_62 = arith.constant dense<0.000000e+00> : vector<256x8xf32>
    %78 = tpu.matmul %75, %77, %cst_62 {dimension_numbers = #tpu.dot_dimension_numbers<[1], [0], [0], [1], [0, 0, 1, 1], [], []>} : vector<256x4xbf16>, vector<4x8xbf16>, vector<256x8xf32> -> vector<256x8xf32>
    %79 = arith.addf %73, %78 : vector<256x8xf32>
    %80 = vector.extract_strided_slice %1 {offsets = [3, 5, 0], sizes = [16, 16, 4], strides = [1, 1, 1]} : vector<22x22x4xbf16> to vector<16x16x4xbf16>
    %81 = vector.shape_cast %80 : vector<16x16x4xbf16> to vector<256x4xbf16>
    %c1_63 = arith.constant 1 : index
    %c4_64 = arith.constant 4 : index
    %c0_65 = arith.constant 0 : index
    %c0_66 = arith.constant 0 : index
    %82 = vector.load %arg3[%c1_63, %c4_64, %c0_65, %c0_66] : memref<3x8x4x8xbf16, #tpu.memory_space<vmem>>, vector<1x1x4x8xbf16>
    %83 = vector.shape_cast %82 : vector<1x1x4x8xbf16> to vector<4x8xbf16>
    %cst_67 = arith.constant dense<0.000000e+00> : vector<256x8xf32>
    %84 = tpu.matmul %81, %83, %cst_67 {dimension_numbers = #tpu.dot_dimension_numbers<[1], [0], [0], [1], [0, 0, 1, 1], [], []>} : vector<256x4xbf16>, vector<4x8xbf16>, vector<256x8xf32> -> vector<256x8xf32>
    %85 = arith.addf %79, %84 : vector<256x8xf32>
    %86 = vector.extract_strided_slice %1 {offsets = [5, 1, 0], sizes = [16, 16, 4], strides = [1, 1, 1]} : vector<22x22x4xbf16> to vector<16x16x4xbf16>
    %87 = vector.shape_cast %86 : vector<16x16x4xbf16> to vector<256x4xbf16>
    %c1_68 = arith.constant 1 : index
    %c5_69 = arith.constant 5 : index
    %c0_70 = arith.constant 0 : index
    %c0_71 = arith.constant 0 : index
    %88 = vector.load %arg3[%c1_68, %c5_69, %c0_70, %c0_71] : memref<3x8x4x8xbf16, #tpu.memory_space<vmem>>, vector<1x1x4x8xbf16>
    %89 = vector.shape_cast %88 : vector<1x1x4x8xbf16> to vector<4x8xbf16>
    %cst_72 = arith.constant dense<0.000000e+00> : vector<256x8xf32>
    %90 = tpu.matmul %87, %89, %cst_72 {dimension_numbers = #tpu.dot_dimension_numbers<[1], [0], [0], [1], [0, 0, 1, 1], [], []>} : vector<256x4xbf16>, vector<4x8xbf16>, vector<256x8xf32> -> vector<256x8xf32>
    %91 = arith.addf %85, %90 : vector<256x8xf32>
    %92 = vector.extract_strided_slice %1 {offsets = [5, 3, 0], sizes = [16, 16, 4], strides = [1, 1, 1]} : vector<22x22x4xbf16> to vector<16x16x4xbf16>
    %93 = vector.shape_cast %92 : vector<16x16x4xbf16> to vector<256x4xbf16>
    %c1_73 = arith.constant 1 : index
    %c6_74 = arith.constant 6 : index
    %c0_75 = arith.constant 0 : index
    %c0_76 = arith.constant 0 : index
    %94 = vector.load %arg3[%c1_73, %c6_74, %c0_75, %c0_76] : memref<3x8x4x8xbf16, #tpu.memory_space<vmem>>, vector<1x1x4x8xbf16>
    %95 = vector.shape_cast %94 : vector<1x1x4x8xbf16> to vector<4x8xbf16>
    %cst_77 = arith.constant dense<0.000000e+00> : vector<256x8xf32>
    %96 = tpu.matmul %93, %95, %cst_77 {dimension_numbers = #tpu.dot_dimension_numbers<[1], [0], [0], [1], [0, 0, 1, 1], [], []>} : vector<256x4xbf16>, vector<4x8xbf16>, vector<256x8xf32> -> vector<256x8xf32>
    %97 = arith.addf %91, %96 : vector<256x8xf32>
    %98 = vector.extract_strided_slice %1 {offsets = [5, 5, 0], sizes = [16, 16, 4], strides = [1, 1, 1]} : vector<22x22x4xbf16> to vector<16x16x4xbf16>
    %99 = vector.shape_cast %98 : vector<16x16x4xbf16> to vector<256x4xbf16>
    %c1_78 = arith.constant 1 : index
    %c7_79 = arith.constant 7 : index
    %c0_80 = arith.constant 0 : index
    %c0_81 = arith.constant 0 : index
    %100 = vector.load %arg3[%c1_78, %c7_79, %c0_80, %c0_81] : memref<3x8x4x8xbf16, #tpu.memory_space<vmem>>, vector<1x1x4x8xbf16>
    %101 = vector.shape_cast %100 : vector<1x1x4x8xbf16> to vector<4x8xbf16>
    %cst_82 = arith.constant dense<0.000000e+00> : vector<256x8xf32>
    %102 = tpu.matmul %99, %101, %cst_82 {dimension_numbers = #tpu.dot_dimension_numbers<[1], [0], [0], [1], [0, 0, 1, 1], [], []>} : vector<256x4xbf16>, vector<4x8xbf16>, vector<256x8xf32> -> vector<256x8xf32>
    %103 = arith.addf %97, %102 : vector<256x8xf32>
    %c0_83 = arith.constant 0 : index
    %c16 = arith.constant 16 : index
    %104 = vector.load %arg8[%c0_83, %c16] : memref<256x32xf32, #tpu.memory_space<vmem>>, vector<256x8xf32>
    %105 = arith.addf %104, %103 : vector<256x8xf32>
    %c0_84 = arith.constant 0 : index
    %c16_85 = arith.constant 16 : index
    %106 = vector.load %arg8[%c0_84, %c16_85] : memref<256x32xf32, #tpu.memory_space<vmem>>, vector<256x8xf32>
    tpu.vector_store %arg8[%c0_84, %c16_85], %105 {strides = array<i32>} : memref<256x32xf32, #tpu.memory_space<vmem>>, vector<256x8xf32>,
    %107 = vector.extract_strided_slice %1 {offsets = [0, 0, 0], sizes = [16, 16, 4], strides = [1, 1, 1]} : vector<22x22x4xbf16> to vector<16x16x4xbf16>
    %108 = vector.shape_cast %107 : vector<16x16x4xbf16> to vector<256x4xbf16>
    %c2_86 = arith.constant 2 : index
    %c0_87 = arith.constant 0 : index
    %c0_88 = arith.constant 0 : index
    %c0_89 = arith.constant 0 : index
    %109 = vector.load %arg3[%c2_86, %c0_87, %c0_88, %c0_89] : memref<3x8x4x8xbf16, #tpu.memory_space<vmem>>, vector<1x1x4x8xbf16>
    %110 = vector.shape_cast %109 : vector<1x1x4x8xbf16> to vector<4x8xbf16>
    %cst_90 = arith.constant dense<0.000000e+00> : vector<256x8xf32>
    %111 = tpu.matmul %108, %110, %cst_90 {dimension_numbers = #tpu.dot_dimension_numbers<[1], [0], [0], [1], [0, 0, 1, 1], [], []>} : vector<256x4xbf16>, vector<4x8xbf16>, vector<256x8xf32> -> vector<256x8xf32>
    %112 = vector.extract_strided_slice %1 {offsets = [0, 3, 0], sizes = [16, 16, 4], strides = [1, 1, 1]} : vector<22x22x4xbf16> to vector<16x16x4xbf16>
    %113 = vector.shape_cast %112 : vector<16x16x4xbf16> to vector<256x4xbf16>
    %c2_91 = arith.constant 2 : index
    %c1_92 = arith.constant 1 : index
    %c0_93 = arith.constant 0 : index
    %c0_94 = arith.constant 0 : index
    %114 = vector.load %arg3[%c2_91, %c1_92, %c0_93, %c0_94] : memref<3x8x4x8xbf16, #tpu.memory_space<vmem>>, vector<1x1x4x8xbf16>
    %115 = vector.shape_cast %114 : vector<1x1x4x8xbf16> to vector<4x8xbf16>
    %cst_95 = arith.constant dense<0.000000e+00> : vector<256x8xf32>
    %116 = tpu.matmul %113, %115, %cst_95 {dimension_numbers = #tpu.dot_dimension_numbers<[1], [0], [0], [1], [0, 0, 1, 1], [], []>} : vector<256x4xbf16>, vector<4x8xbf16>, vector<256x8xf32> -> vector<256x8xf32>
    %117 = arith.addf %111, %116 : vector<256x8xf32>
    %118 = vector.extract_strided_slice %1 {offsets = [0, 6, 0], sizes = [16, 16, 4], strides = [1, 1, 1]} : vector<22x22x4xbf16> to vector<16x16x4xbf16>
    %119 = vector.shape_cast %118 : vector<16x16x4xbf16> to vector<256x4xbf16>
    %c2_96 = arith.constant 2 : index
    %c2_97 = arith.constant 2 : index
    %c0_98 = arith.constant 0 : index
    %c0_99 = arith.constant 0 : index
    %120 = vector.load %arg3[%c2_96, %c2_97, %c0_98, %c0_99] : memref<3x8x4x8xbf16, #tpu.memory_space<vmem>>, vector<1x1x4x8xbf16>
    %121 = vector.shape_cast %120 : vector<1x1x4x8xbf16> to vector<4x8xbf16>
    %cst_100 = arith.constant dense<0.000000e+00> : vector<256x8xf32>
    %122 = tpu.matmul %119, %121, %cst_100 {dimension_numbers = #tpu.dot_dimension_numbers<[1], [0], [0], [1], [0, 0, 1, 1], [], []>} : vector<256x4xbf16>, vector<4x8xbf16>, vector<256x8xf32> -> vector<256x8xf32>
    %123 = arith.addf %117, %122 : vector<256x8xf32>
    %124 = vector.extract_strided_slice %1 {offsets = [3, 0, 0], sizes = [16, 16, 4], strides = [1, 1, 1]} : vector<22x22x4xbf16> to vector<16x16x4xbf16>
    %125 = vector.shape_cast %124 : vector<16x16x4xbf16> to vector<256x4xbf16>
    %c2_101 = arith.constant 2 : index
    %c3_102 = arith.constant 3 : index
    %c0_103 = arith.constant 0 : index
    %c0_104 = arith.constant 0 : index
    %126 = vector.load %arg3[%c2_101, %c3_102, %c0_103, %c0_104] : memref<3x8x4x8xbf16, #tpu.memory_space<vmem>>, vector<1x1x4x8xbf16>
    %127 = vector.shape_cast %126 : vector<1x1x4x8xbf16> to vector<4x8xbf16>
    %cst_105 = arith.constant dense<0.000000e+00> : vector<256x8xf32>
    %128 = tpu.matmul %125, %127, %cst_105 {dimension_numbers = #tpu.dot_dimension_numbers<[1], [0], [0], [1], [0, 0, 1, 1], [], []>} : vector<256x4xbf16>, vector<4x8xbf16>, vector<256x8xf32> -> vector<256x8xf32>
    %129 = arith.addf %123, %128 : vector<256x8xf32>
    %130 = vector.extract_strided_slice %1 {offsets = [3, 6, 0], sizes = [16, 16, 4], strides = [1, 1, 1]} : vector<22x22x4xbf16> to vector<16x16x4xbf16>
    %131 = vector.shape_cast %130 : vector<16x16x4xbf16> to vector<256x4xbf16>
    %c2_106 = arith.constant 2 : index
    %c4_107 = arith.constant 4 : index
    %c0_108 = arith.constant 0 : index
    %c0_109 = arith.constant 0 : index
    %132 = vector.load %arg3[%c2_106, %c4_107, %c0_108, %c0_109] : memref<3x8x4x8xbf16, #tpu.memory_space<vmem>>, vector<1x1x4x8xbf16>
    %133 = vector.shape_cast %132 : vector<1x1x4x8xbf16> to vector<4x8xbf16>
    %cst_110 = arith.constant dense<0.000000e+00> : vector<256x8xf32>
    %134 = tpu.matmul %131, %133, %cst_110 {dimension_numbers = #tpu.dot_dimension_numbers<[1], [0], [0], [1], [0, 0, 1, 1], [], []>} : vector<256x4xbf16>, vector<4x8xbf16>, vector<256x8xf32> -> vector<256x8xf32>
    %135 = arith.addf %129, %134 : vector<256x8xf32>
    %136 = vector.extract_strided_slice %1 {offsets = [6, 0, 0], sizes = [16, 16, 4], strides = [1, 1, 1]} : vector<22x22x4xbf16> to vector<16x16x4xbf16>
    %137 = vector.shape_cast %136 : vector<16x16x4xbf16> to vector<256x4xbf16>
    %c2_111 = arith.constant 2 : index
    %c5_112 = arith.constant 5 : index
    %c0_113 = arith.constant 0 : index
    %c0_114 = arith.constant 0 : index
    %138 = vector.load %arg3[%c2_111, %c5_112, %c0_113, %c0_114] : memref<3x8x4x8xbf16, #tpu.memory_space<vmem>>, vector<1x1x4x8xbf16>
    %139 = vector.shape_cast %138 : vector<1x1x4x8xbf16> to vector<4x8xbf16>
    %cst_115 = arith.constant dense<0.000000e+00> : vector<256x8xf32>
    %140 = tpu.matmul %137, %139, %cst_115 {dimension_numbers = #tpu.dot_dimension_numbers<[1], [0], [0], [1], [0, 0, 1, 1], [], []>} : vector<256x4xbf16>, vector<4x8xbf16>, vector<256x8xf32> -> vector<256x8xf32>
    %141 = arith.addf %135, %140 : vector<256x8xf32>
    %142 = vector.extract_strided_slice %1 {offsets = [6, 3, 0], sizes = [16, 16, 4], strides = [1, 1, 1]} : vector<22x22x4xbf16> to vector<16x16x4xbf16>
    %143 = vector.shape_cast %142 : vector<16x16x4xbf16> to vector<256x4xbf16>
    %c2_116 = arith.constant 2 : index
    %c6_117 = arith.constant 6 : index
    %c0_118 = arith.constant 0 : index
    %c0_119 = arith.constant 0 : index
    %144 = vector.load %arg3[%c2_116, %c6_117, %c0_118, %c0_119] : memref<3x8x4x8xbf16, #tpu.memory_space<vmem>>, vector<1x1x4x8xbf16>
    %145 = vector.shape_cast %144 : vector<1x1x4x8xbf16> to vector<4x8xbf16>
    %cst_120 = arith.constant dense<0.000000e+00> : vector<256x8xf32>
    %146 = tpu.matmul %143, %145, %cst_120 {dimension_numbers = #tpu.dot_dimension_numbers<[1], [0], [0], [1], [0, 0, 1, 1], [], []>} : vector<256x4xbf16>, vector<4x8xbf16>, vector<256x8xf32> -> vector<256x8xf32>
    %147 = arith.addf %141, %146 : vector<256x8xf32>
    %148 = vector.extract_strided_slice %1 {offsets = [6, 6, 0], sizes = [16, 16, 4], strides = [1, 1, 1]} : vector<22x22x4xbf16> to vector<16x16x4xbf16>
    %149 = vector.shape_cast %148 : vector<16x16x4xbf16> to vector<256x4xbf16>
    %c2_121 = arith.constant 2 : index
    %c7_122 = arith.constant 7 : index
    %c0_123 = arith.constant 0 : index
    %c0_124 = arith.constant 0 : index
    %150 = vector.load %arg3[%c2_121, %c7_122, %c0_123, %c0_124] : memref<3x8x4x8xbf16, #tpu.memory_space<vmem>>, vector<1x1x4x8xbf16>
    %151 = vector.shape_cast %150 : vector<1x1x4x8xbf16> to vector<4x8xbf16>
    %cst_125 = arith.constant dense<0.000000e+00> : vector<256x8xf32>
    %152 = tpu.matmul %149, %151, %cst_125 {dimension_numbers = #tpu.dot_dimension_numbers<[1], [0], [0], [1], [0, 0, 1, 1], [], []>} : vector<256x4xbf16>, vector<4x8xbf16>, vector<256x8xf32> -> vector<256x8xf32>
    %153 = arith.addf %147, %152 : vector<256x8xf32>
    %c0_126 = arith.constant 0 : index
    %c24 = arith.constant 24 : index
    %154 = vector.load %arg8[%c0_126, %c24] : memref<256x32xf32, #tpu.memory_space<vmem>>, vector<256x8xf32>
    %155 = arith.addf %154, %153 : vector<256x8xf32>
    %c0_127 = arith.constant 0 : index
    %c24_128 = arith.constant 24 : index
    %156 = vector.load %arg8[%c0_127, %c24_128] : memref<256x32xf32, #tpu.memory_space<vmem>>, vector<256x8xf32>
    tpu.vector_store %arg8[%c0_127, %c24_128], %155 {strides = array<i32>} : memref<256x32xf32, #tpu.memory_space<vmem>>, vector<256x8xf32>,
    %c0_129 = arith.constant 0 : index
    %c0_130 = arith.constant 0 : index
    %157 = vector.load %arg8[%c0_129, %c0_130] : memref<256x32xf32, #tpu.memory_space<vmem>>, vector<256x32xf32>
    %158 = arith.truncf %157 : vector<256x32xf32> to vector<256x32xbf16>
    %c0_131 = arith.constant 0 : index
    %c0_132 = arith.constant 0 : index
    %c0_133 = arith.constant 0 : index
    %159 = vector.load %arg5[%c0_131, %c0_132, %c0_133] : memref<1x256x32xbf16, #tpu.memory_space<vmem>>, vector<1x256x32xbf16>
    %160 = vector.shape_cast %159 : vector<1x256x32xbf16> to vector<256x32xbf16>
    %161 = vector.shape_cast %158 : vector<256x32xbf16> to vector<1x256x32xbf16>
    tpu.vector_store %arg5[%c0_131, %c0_132, %c0_133], %161 {strides = array<i32>} : memref<1x256x32xbf16, #tpu.memory_space<vmem>>, vector<1x256x32xbf16>,
    %cst_134 = arith.constant dense<0.000000e+00> : vector<32xf32>
    %162 = vector.multi_reduction <add>, %157, %cst_134 [0] : vector<256x32xf32> to vector<32xf32>
    %163 = vector.shape_cast %162 : vector<32xf32> to vector<1x32xf32>
    %164 = arith.mulf %157, %157 : vector<256x32xf32>
    %cst_135 = arith.constant dense<0.000000e+00> : vector<32xf32>
    %165 = vector.multi_reduction <add>, %164, %cst_135 [0] : vector<256x32xf32> to vector<32xf32>
    %166 = vector.shape_cast %165 : vector<32xf32> to vector<1x32xf32>
    %167 = tpu.concatenate %163, %166 in 0 : vector<1x32xf32>, vector<1x32xf32> -> vector<2x32xf32>
    %c0_136 = arith.constant 0 : index
    %c0_137 = arith.constant 0 : index
    %c0_138 = arith.constant 0 : index
    %168 = vector.load %arg6[%c0_136, %c0_137, %c0_138] : memref<1x2x32xf32, #tpu.memory_space<vmem>>, vector<1x2x32xf32>
    %169 = vector.shape_cast %168 : vector<1x2x32xf32> to vector<2x32xf32>
    %170 = vector.shape_cast %167 : vector<2x32xf32> to vector<1x2x32xf32>
    tpu.vector_store %arg6[%c0_136, %c0_137, %c0_138], %170 {strides = array<i32>} : memref<1x2x32xf32, #tpu.memory_space<vmem>>, vector<1x2x32xf32>,
    %171 = arith.extf %3 : vector<256x4xbf16> to vector<256x4xf32>
    %cst_139 = arith.constant dense<0.000000e+00> : vector<4xf32>
    %172 = vector.multi_reduction <add>, %171, %cst_139 [0] : vector<256x4xf32> to vector<4xf32>
    %173 = vector.shape_cast %172 : vector<4xf32> to vector<1x4xf32>
    %cst_140 = arith.constant 2.560000e+02 : f32
    %174 = vector.broadcast %cst_140 : f32 to vector<1x4xf32>
    %175 = arith.divf %173, %174 : vector<1x4xf32>
    %c0_141 = arith.constant 0 : index
    %c0_142 = arith.constant 0 : index
    %176 = vector.load %arg4[%c0_141, %c0_142] : memref<4x8xf32, #tpu.memory_space<vmem>>, vector<4x8xf32>
    %cst_143 = arith.constant dense<0.000000e+00> : vector<1x8xf32>
    %177 = tpu.matmul %175, %176, %cst_143 {dimension_numbers = #tpu.dot_dimension_numbers<[1], [0], [0], [1], [0, 0, 1, 1], [], []>} : vector<1x4xf32>, vector<4x8xf32>, vector<1x8xf32> -> vector<1x8xf32>
    %c0_144 = arith.constant 0 : index
    %c0_145 = arith.constant 0 : index
    %c0_146 = arith.constant 0 : index
    %178 = vector.load %arg7[%c0_144, %c0_145, %c0_146] : memref<1x1x8xf32, #tpu.memory_space<vmem>>, vector<1x1x8xf32>
    %179 = vector.shape_cast %178 : vector<1x1x8xf32> to vector<1x8xf32>
    %180 = vector.shape_cast %177 : vector<1x8xf32> to vector<1x1x8xf32>
    tpu.vector_store %arg7[%c0_144, %c0_145, %c0_146], %180 {strides = array<i32>} : memref<1x1x8xf32, #tpu.memory_space<vmem>>, vector<1x1x8xf32>,
    return
  }
  func.func @transform_0(%arg0: i32) -> (i32, i32, i32, i32) {
    %c0_i32 = arith.constant 0 : i32
    %c0_i32_0 = arith.constant 0 : i32
    %c0_i32_1 = arith.constant 0 : i32
    %c0_i32_2 = arith.constant 0 : i32
    return %arg0, %c0_i32, %c0_i32_0, %c0_i32_1 : i32, i32, i32, i32
  }
  func.func @transform_1(%arg0: i32) -> (i32, i32) {
    %c0_i32 = arith.constant 0 : i32
    %c0_i32_0 = arith.constant 0 : i32
    %c0_i32_1 = arith.constant 0 : i32
    return %c0_i32, %c0_i32_0 : i32, i32
  }
  func.func @transform_2(%arg0: i32) -> (i32, i32, i32, i32) {
    %c0_i32 = arith.constant 0 : i32
    %c0_i32_0 = arith.constant 0 : i32
    %c0_i32_1 = arith.constant 0 : i32
    %c0_i32_2 = arith.constant 0 : i32
    %c0_i32_3 = arith.constant 0 : i32
    return %c0_i32, %c0_i32_0, %c0_i32_1, %c0_i32_2 : i32, i32, i32, i32
  }
  func.func @transform_3(%arg0: i32) -> (i32, i32) {
    %c0_i32 = arith.constant 0 : i32
    %c0_i32_0 = arith.constant 0 : i32
    %c0_i32_1 = arith.constant 0 : i32
    return %c0_i32, %c0_i32_0 : i32, i32
  }
  func.func @transform_4(%arg0: i32) -> (i32, i32, i32) {
    %c0_i32 = arith.constant 0 : i32
    %c0_i32_0 = arith.constant 0 : i32
    %c0_i32_1 = arith.constant 0 : i32
    return %arg0, %c0_i32, %c0_i32_0 : i32, i32, i32
  }
  func.func @transform_5(%arg0: i32) -> (i32, i32, i32) {
    %c0_i32 = arith.constant 0 : i32
    %c0_i32_0 = arith.constant 0 : i32
    %c0_i32_1 = arith.constant 0 : i32
    return %arg0, %c0_i32, %c0_i32_0 : i32, i32, i32
  }
  func.func @transform_6(%arg0: i32) -> (i32, i32, i32) {
    %c0_i32 = arith.constant 0 : i32
    %c0_i32_0 = arith.constant 0 : i32
    %c0_i32_1 = arith.constant 0 : i32
    return %arg0, %c0_i32, %c0_i32_0 : i32, i32, i32
  }
}

</mosaic_0001>

<bundles_post_ra>
// kernel: tpu_custom_call.1
= control target key start
LH: loop header
LB: loop body
LE: loop exit
PB: predicated region body
PF: predicated region fallthrough
CT: control target
= control target key end

     0   :  { %12 = vsyncpa [#allocation4], 0  ;;  %s11983_s0 = inlined_call_operand.vmem [shape: bf16[2,22,22,4], index: 0, kind: input, shape index: {}]   ;;  %s11984_s1 = inlined_call_operand.vmem [shape: bf16[4,32], index: 1, kind: input, shape index: {}]   ;;  %s11985_s2 = inlined_call_operand.vmem [shape: bf16[3,8,4,8], index: 2, kind: input, shape index: {}]   ;;  %s11986_s3 = inlined_call_operand.vmem [shape: f32[4,8], index: 3, kind: input, shape index: {}]   ;;  %s11987_s4 = inlined_call_operand.vmem [shape: bf16[2,256,32], index: 4, kind: output, shape index: {0}]   ;;  %s11988_s5 = inlined_call_operand.hbm [shape: f32[2,2,32], index: 5, kind: output, shape index: {1}]   ;;  %s11989_s6 = inlined_call_operand.hbm [shape: f32[2,1,8], index: 6, kind: output, shape index: {2}]  }
   0x1   :  { %14 = vsyncpa [#allocation4 + $0x1], 0 }
   0x2   :  { %15 = vsyncpa [#allocation6], 0 }
   0x3   :  { %17 = vsyncpa [#allocation6 + $0x1], 0  ;;  %s7894_s21 = smov 0   ;;  %s7896_s22 = smov 0  }
   0x4   :  { %s7898_s23 = smov 0   ;;  %s7900_s24 = smov 0  }
   0x5 LB: > { %s7915_s25 = sadd.s32 4294967295, %s7853_s24   ;;  %s7006_s26 = sadd.s32 4294967294, %s7853_s24   ;;  %s7853_s24 = sphi %s7900_s24, %s12755_s24   ;;  %s7849_s23 = sphi %s7898_s23, %s12754_s23   ;;  %s7845_s22 = sphi %s7896_s22, %s12753_s22   ;;  %s7841_s21 = sphi %s7894_s21, %s12752_s21  }
   0x6   : > { %s7919_s27 = sadd.s32 1, %s7853_s24   ;;  %s145_s28 = sadd.s32 1, %s7849_s23 }
   0x7   : > { %s142_s29 = ssub.s32 %s7853_s24, %s7919_s27  ;;  %p155_p0 = scmp.ne.s32.totalorder %s7849_s23, %s7845_s22 }
   0x8   : > { %p143_p1 = scmp.eq.s32.totalorder %s142_s29, 0  ;;  %p156_p2 = scmp.eq.s32.totalorder %s7915_s25, 1 }
   0x9   : > { %p161_p3 = scmp.ne.s32.totalorder %s7845_s22, %s7841_s21  ;;  %p162_p4 = scmp.eq.s32.totalorder %s7006_s26, 1 }
   0xa   : > { %s7930_s30 = scalar_select %p143_p1, %s7849_s23, %s145_s28  }
   0xb   : > { %p7932_p5 = por %p156_p2, %p155_p0  ;;  %p7936_p6 = por %p162_p4, %p161_p3 }
   0xc   : > { %p7009_p7 = scmp.ge.s32.totalorder %s7853_s24, 1  ;;  %p223_p8 = scmp.lt.s32.totalorder %s7853_s24, 3 }
   0xe   : > { %p224_p9 = pnand %p7009_p7, %p223_p8 }
  0x10   : > { %227 = sbr.rel (%p224_p9) target bundleno = 1974 (0x7b6), region = 36 }
  0x15   : > { %v822_v0 = vld [vmem:[%s11984_s1] sm:$0x3]  ;;  %vm920_vm0 = vcmask 1041408   ;;  %p262_p10 = scmp.lt.s32.totalorder %s7915_s25, 1  ;;  %vm339_vm1 = vsmask.f32 2304  ;;  %s6889_s28 = scalar_lea.hbm %s11989_s6, %s7915_s25 }
  0x16   : > { %v922_v1 = vsel %vm920_vm0, %v822_v0, 0  ;;  %v1209_v2 = vld [vmem:[%s11985_s2] sm:$0x3]  ;;  %vm340_vm2 = vsmask.f32 6416  ;;  %v12286_v29 = vmov 0 }
  0x17   : > { %7612 = vmatpush.bf16.msra.mxu1 %v922_v1  ;;  %7613 = vmatpush.bf16.msra.mxu2 %v922_v1  ;;  %s7951_s13 = scalar_select %p262_p10, %s7915_s25, 1  ;;  %v1435_v3 = vsel %vm920_vm0, %v1209_v2, 0  ;;  %vm8000_vm3 = vmor %vm339_vm1, %vm340_vm2  ;;  %vm871_vm4 = vcmask 31744   ;;  %vm1094_vm5 = vcmask 1042432   ;;  %vm1095_vm6 = vcmask 1046532  }
  0x18   : > { %7614 = vmatpush.bf16.msra.mxu3 %v922_v1  ;;  %931 = vmatpush.bf16.msra.mxu0 %v922_v1  ;;  %v12287_v29 = vsel %vm8000_vm3, 4294967295, %v12286_v29  ;;  %vm8685_vm7 = vmor %vm1094_vm5, %vm1095_vm6  ;;  %vm1527_vm8 = vcmask 1045508   ;;  %vm1013_vm10 = vcmask 261120   ;;  %s7855_s12 = smov 8   ;;  %vm2810_vm11 = vsmask.f32 3328 }
  0x19   : > { %s7615_s14 = smul.u32 264, %s7951_s13  ;;  %12288 = vst [vmem:[#allocation20_spill] sm:$0xff] %v12287_v29  ;;  %vm8713_vm9 = vmor %vm920_vm0, %vm1527_vm8  ;;  %vm2811_vm12 = vsmask.f32 7440  ;;  %vm3307_vm14 = vsmask.f32 1280 }
  0x1a   : > { %vm9727_vm13 = vmor %vm2810_vm11, %vm2811_vm12  ;;  %vm3308_vm15 = vsmask.f32 5392  ;;  %vm2777_vm2 = vcmask 130112   ;;  %s7856_s18 = smov 16   ;;  %vm4740_vm5 = vcmask 195712   ;;  %vm5098_vm6 = vcmask 1044484  }
  0x1b   : > { %1444 = vmatpush.bf16.msrb.mxu2 %v1435_v3  ;;  %s7958_s17 = scalar_lea.vmem %s11983_s0, %s7615_s14  ;;  %vm9762_vm1 = vmor %vm3307_vm14, %vm3308_vm15  ;;  %vm6827_vm8 = vcmask 1043456   ;;  %s7857_s15 = smov 24  }
  0x1c   : > { %v297_v4 = vld [vmem:[%s7958_s17 + $0x60] sm:$0xf]  ;;  %v298_v5 = vld [vmem:[%s7958_s17 + $0x64] sm:$0xf]  ;;  %v7963_v6 = vld [vmem:[%s7958_s17 + $0x68] sm:$0x7] }
  0x1d   : > { %12275 = vst [vmem:[#allocation9_spill] sm:$0xff] %v7963_v6  ;;  %v7965_v7 = vshrl.u32 %v297_v4, 16  ;;  %v7967_v8 = vshll.u32 %v297_v4, 16  ;;  %v7969_v9 = vshrl.u32 %v298_v5, 16  ;;  %v7971_v10 = vshll.u32 %v298_v5, 16  ;;  %s11904_s10 = sshll.u32 %s6889_s28, 4  ;;  %s6894_s10 = int_to_ptr.hbm [resolvable:$true] %s11904_s10 }
  0x1e   : > { %v300_v11 = vld [vmem:[%s7958_s17 + $0x6c] sm:$0xf]  ;;  %v11993_v12 = vshrl.u32 %v7963_v6, 16  ;;  %v7976_v13 = vshll.u32 %v7963_v6, 16  ;;  %v301_v14 = vld [vmem:[%s7958_s17 + $0x70] sm:$0xf] }
  0x1f   : > { %12276 = vst [vmem:[#allocation10_spill] sm:$0xff] %v7965_v7  ;;  %v485_v15 = vrot.slane %v7965_v7, 5  ;;  %v488_v16 = vrot.slane %v7967_v8, 6  ;;  %v494_v17 = vrot.slane %v7969_v9, 5  ;;  %v497_v18 = vrot.slane %v7971_v10, 6  ;;  %s7779_s16 = scalar_lea.hbm %s11989_s6, 2 }
  0x20   : > { %12277 = vst [vmem:[#allocation11_spill] sm:$0xff] %v7967_v8  ;;  %v7984_v19 = vld [vmem:[%s7958_s17 + $0x74] sm:$0x7]  ;;  %v504_v20 = vrot.slane %v11993_v12, 5  ;;  %v507_v21 = vrot.slane %v7976_v13, 6  ;;  %v7989_v22 = vshrl.u32 %v300_v11, 16 }
  0x21   : > { %12278 = vst [vmem:[#allocation12_spill] sm:$0xff] %v7969_v9  ;;  %v7991_v23 = vshll.u32 %v300_v11, 16  ;;  %v489_v24 = vor.u32 %v488_v16, %v485_v15  ;;  %v498_v25 = vor.u32 %v497_v18, %v494_v17  ;;  %v7993_v26 = vshrl.u32 %v301_v14, 16  ;;  %v315_v28 = vld [vmem:[%s7958_s17 + $0xa8] sm:$0xf] }
  0x22   : > { %12279 = vst [vmem:[#allocation13_spill] sm:$0xff] %v7971_v10  ;;  %v7995_v27 = vshll.u32 %v301_v14, 16  ;;  %v508_v30 = vor.u32 %v507_v21, %v504_v20  ;;  %v513_v31 = vrot.slane %v7989_v22, 5  ;;  %v11991_v33 = vshrl.u32 %v7984_v19, 16  ;;  %v316_v48 = vld [vmem:[%s7958_s17 + $0xac] sm:$0xf] }
  0x23   : > { %12280 = vst [vmem:[#allocation14_spill] sm:$0xff] %v7976_v13  ;;  %v516_v32 = vrot.slane %v7991_v23, 6  ;;  %v490_v34 = vrot.slane %v489_v24, 4  ;;  %v500_v35 = vrot.slane %v498_v25, 4  ;;  %v522_v36 = vrot.slane %v7993_v26, 5 }
  0x24   : > { %12281 = vst [vmem:[#allocation15_spill] sm:$0xff] %v7984_v19  ;;  %v525_v37 = vrot.slane %v7995_v27, 6  ;;  %v532_v39 = vrot.slane %v11991_v33, 5  ;;  %v8012_v40 = vshll.u32 %v7984_v19, 16  ;;  %v8014_v41 = vshrl.u32 %v315_v28, 16 }
  0x25   : > { %12282 = vst [vmem:[#allocation16_spill] sm:$0xff] %v7989_v22  ;;  %v517_v38 = vor.u32 %v516_v32, %v513_v31  ;;  %v8018_v42 = vsel %vm8000_vm3, %v490_v34, %v498_v25  ;;  %v8022_v43 = vsel %vm8000_vm3, %v500_v35, %v508_v30  ;;  %v8024_v45 = vshll.u32 %v315_v28, 16  ;;  %v8031_v52 = vld [vmem:[%s7958_s17 + $0xb0] sm:$0x7]  ;;  %v8050_v63 = vld [vmem:[%s7958_s17 + $0x24] sm:$0xf] }
  0x26   : > { %12283 = vst [vmem:[#allocation17_spill] sm:$0xff] %v7991_v23  ;;  %v526_v44 = vor.u32 %v525_v37, %v522_v36  ;;  %v833_v46 = vunpack.c.l.b16 %v8018_v42  ;;  %v834_v47 = vunpack.c.l.b16 %v8022_v43  ;;  %v535_v51 = vrot.slane %v8012_v40, 6  ;;  %v8062_v4 = vld [vmem:[%s7958_s17 + $0x28] sm:$0xf]  ;;  %v8074_v20 = vld [vmem:[%s7958_s17 + $0x2c] sm:$0x7] }
  0x27   : > { %12284 = vst [vmem:[#allocation18_spill] sm:$0xff] %v7993_v26  ;;  %v518_v49 = vrot.slane %v517_v38, 4  ;;  %v653_v53 = vrot.slane %v8014_v41, 5  ;;  %v656_v55 = vrot.slane %v8024_v45, 6  ;;  %v8041_v58 = vshrl.u32 %v316_v48, 16 }
  0x28   : > { %12285 = vst [vmem:[#allocation19_spill] sm:$0xff] %v7995_v27  ;;  %v528_v50 = vrot.slane %v526_v44, 4  ;;  %v8034_v54 = vpack.c.b16 %v834_v47, %v833_v46  ;;  %v536_v57 = vor.u32 %v535_v51, %v532_v39  ;;  %v8043_v59 = vshll.u32 %v316_v48, 16  ;;  %v7113_v48 = vld [vmem:[%s11985_s2 + $0x6] sm:$0x3] }
  0x29   : > { %12289 = vst [vmem:[#allocation21_spill] sm:$0xff] %v8012_v40  ;;  %v8039_v56 = vsel %vm8000_vm3, %v518_v49, %v526_v44  ;;  %v657_v61 = vor.u32 %v656_v55, %v653_v53  ;;  %v11990_v62 = vshrl.u32 %v8031_v52, 16  ;;  %v662_v1 = vrot.slane %v8041_v58, 5  ;;  %v7095_v44 = vld [vmem:[%s11985_s2 + $0x4] sm:$0x3] }
  0x2a   : > { %12290 = vst [vmem:[#allocation22_spill] sm:$0xff] %v8014_v41  ;;  %7019 = vmatmul.msk.bf16.vlgmr.msra.gmra.mxu1 %vm871_vm4, %v8034_v54  ;;  %v835_v60 = vunpack.c.l.b16 %v8039_v56  ;;  %v8054_v0 = vsel %vm8000_vm3, %v528_v50, %v536_v57  ;;  %v665_v2 = vrot.slane %v8043_v59, 6  ;;  %v8059_v3 = vshll.u32 %v8031_v52, 16  ;;  %v7046_v49 = vld [vmem:[%s11985_s2 + $0x2] sm:$0x3] }
  0x2b   : > { %12291 = vst [vmem:[#allocation23_spill] sm:$0xff] %v8024_v45  ;;  %v836_v5 = vunpack.c.l.b16 %v8054_v0  ;;  %v658_v11 = vrot.slane %v657_v61, 4  ;;  %v672_v15 = vrot.slane %v11990_v62, 5  ;;  %v8069_v17 = vshrl.u32 %v8050_v63, 16  ;;  %v303_v50 = vld [vmem:[%s7958_s17 + $0x78] sm:$0xf] }
  0x2c   : > { %12292 = vst [vmem:[#allocation24_spill] sm:$0xff] %v8031_v52  ;;  %v666_v14 = vor.u32 %v665_v2, %v662_v1  ;;  %v675_v16 = vrot.slane %v8059_v3, 6  ;;  %v8077_v21 = vshll.u32 %v8050_v63, 16  ;;  %v8080_v24 = vshrl.u32 %v8062_v4, 16  ;;  %v304_v57 = vld [vmem:[%s7958_s17 + $0x7c] sm:$0xf] }
  0x2d   : > { %12293 = vst [vmem:[#allocation25_spill] sm:$0xff] %v8034_v54  ;;  %v8071_v18 = vpack.c.b16 %v836_v5, %v835_v60  ;;  %v345_v31 = vrot.slane %v8069_v17, 5  ;;  %v8097_v37 = vshll.u32 %v8062_v4, 16  ;;  %v11994_v38 = vshrl.u32 %v8074_v20, 16  ;;  %v8122_v1 = vld [vmem:[%s7958_s17 + $0x80] sm:$0x7] }
  0x2e   : > { %12294 = vst [vmem:[#allocation26_spill] sm:$0xff] %v8041_v58  ;;  %v8084_v25 = vsel %vm8000_vm3, %v658_v11, %v666_v14  ;;  %v668_v28 = vrot.slane %v666_v14, 4  ;;  %v676_v30 = vor.u32 %v675_v16, %v672_v15  ;;  %v348_v34 = vrot.slane %v8077_v21, 6  ;;  %v8162_v12 = vld [vmem:[%s7958_s17 + $0xbc] sm:$0x7] }
  0x2f   : > { %12295 = vst [vmem:[#allocation27_spill] sm:$0xff] %v8043_v59  ;;  %7020 = vmatmul.msk.bf16.vlgmr.msra.gmra.mxu2 %vm871_vm4, %v8071_v18  ;;  %v845_v32 = vunpack.c.l.b16 %v8084_v25  ;;  %v354_v35 = vrot.slane %v8080_v24, 5  ;;  %v8101_v39 = vshll.u32 %v8074_v20, 16  ;;  %v357_v51 = vrot.slane %v8097_v37, 6  ;;  %v8270_v40 = vld [vmem:[%s7958_s17 + $0x40] sm:$0xf] }
  0x30   : > { %12296 = vst [vmem:[#allocation28_spill] sm:$0xff] %v8059_v3  ;;  %v8094_v36 = vsel %vm8000_vm3, %v668_v28, %v676_v30  ;;  %v349_v47 = vor.u32 %v348_v34, %v345_v31  ;;  %v364_v53 = vrot.slane %v11994_v38, 5  ;;  %v1740_v11 = vsel %vm920_vm0, %v7095_v44, 0  ;;  %v307_v7 = vld [vmem:[%s7958_s17 + $0x88] sm:$0xf] }
  0x31   : > { %12297 = vst [vmem:[#allocation29_spill] sm:$0xff] %v8069_v17  ;;  %v846_v46 = vunpack.c.l.b16 %v8094_v36  ;;  %v367_v55 = vrot.slane %v8101_v39, 6  ;;  %v358_v2 = vor.u32 %v357_v51, %v354_v35  ;;  %v1882_v14 = vsel %vm920_vm0, %v7113_v48, 0  ;;  %1749 = vmatpush.bf16.msrb.mxu3 %v1740_v11 }
  0x32   : > { %12298 = vst [vmem:[#allocation30_spill] sm:$0xff] %v8071_v18  ;;  %v350_v61 = vrot.slane %v349_v47, 4  ;;  %1891 = vmatpush.bf16.msrb.mxu0 %v1882_v14  ;;  %v1247_v15 = vsel %vm920_vm0, %v7046_v49, 0  ;;  %v8129_v16 = vshrl.u32 %v303_v50, 16  ;;  %v8131_v28 = vshll.u32 %v303_v50, 16 }
  0x33   : > { %12299 = vst [vmem:[#allocation31_spill] sm:$0xff] %v8074_v20  ;;  %v8119_v60 = vpack.c.b16 %v846_v46, %v845_v32  ;;  %v368_v5 = vor.u32 %v367_v55, %v364_v53  ;;  %v8133_v30 = vshrl.u32 %v304_v57, 16  ;;  %v360_v32 = vrot.slane %v358_v2, 4  ;;  %1256 = vmatpush.bf16.msrb.mxu1 %v1247_v15  ;;  %v318_v49 = vld [vmem:[%s7958_s17 + $0xb4] sm:$0xf] }
  0x34   : > { %12300 = vst [vmem:[#allocation32_spill] sm:$0xff] %v8077_v21  ;;  %v359_v31 = vsel %vm8000_vm3, %v350_v61, %v358_v2  ;;  %v8137_v34 = vshll.u32 %v304_v57, 16  ;;  %v11992_v35 = vshrl.u32 %v8122_v1, 16  ;;  %v541_v47 = vrot.slane %v8129_v16, 5  ;;  %v319_v57 = vld [vmem:[%s7958_s17 + $0xb8] sm:$0xf] }
  0x35   : > { %12301 = vst [vmem:[#allocation33_spill] sm:$0xff] %v8080_v24  ;;  %7025 = vmatmul.msk.bf16.vlgmr.msra.gmra.mxu3 %vm871_vm4, %v8119_v60  ;;  %v823_v44 = vunpack.c.l.b16 %v359_v31  ;;  %v6714_v46 = vunpack.c.l.bf16 %v359_v31  ;;  %v544_v48 = vrot.slane %v8131_v28, 6  ;;  %v369_v50 = vsel %vm8000_vm3, %v360_v32, %v368_v5  ;;  %v324_v24 = vld [vmem:[%s7958_s17 + $0xcc] sm:$0xf] }
  0x36   : > { %12302 = vst [vmem:[#allocation34_spill] sm:$0xff] %v8097_v37  ;;  %v550_v51 = vrot.slane %v8133_v30, 5  ;;  %v553_v53 = vrot.slane %v8137_v34, 6  ;;  %v560_v55 = vrot.slane %v11992_v35, 5  ;;  %v824_v61 = vunpack.c.l.b16 %v369_v50 }
  0x37   : > { %12303 = vst [vmem:[#allocation35_spill] sm:$0xff] %v8101_v39  ;;  %v6715_v2 = vunpack.c.l.bf16 %v369_v50  ;;  %v6746_v11 = vsel %vm871_vm4, %v6714_v46, 0.0  ;;  %v545_v14 = vor.u32 %v544_v48, %v541_v47  ;;  %v8152_v31 = vshll.u32 %v8122_v1, 16 }
  0x38   : > { %12304 = vst [vmem:[#allocation36_spill] sm:$0xff] %v8119_v60  ;;  %v554_v15 = vor.u32 %v553_v53, %v550_v51  ;;  %v8154_v5 = vshrl.u32 %v318_v49, 16  ;;  %v8156_v32 = vshll.u32 %v318_v49, 16  ;;  %v8158_v62 = vpack.c.b16 %v824_v61, %v823_v44  ;;  %v8171_v51 = vld [vmem:[%s7958_s17 + $0x18] sm:$0xf] }
  0x39   : > { %12305 = vst [vmem:[#allocation37_spill] sm:$0xff] %v8122_v1  ;;  %v6747_v33 = vsel %vm871_vm4, %v6715_v2, 0.0  ;;  %v546_v35 = vrot.slane %v545_v14, 4  ;;  %v8164_v50 = vshrl.u32 %v319_v57, 16  ;;  %v563_v47 = vrot.slane %v8152_v31, 6 }
  0x3a   : > { %12306 = vst [vmem:[#allocation38_spill] sm:$0xff] %v8129_v16  ;;  %v8166_v38 = vadd.f32 %v6747_v33, %v6746_v11  ;;  %v556_v46 = vrot.slane %v554_v15, 4  ;;  %v681_v48 = vrot.slane %v8154_v5, 5  ;;  %7014 = vmatmul.msk.bf16.vlgmr.msra.gmra.mxu0 %vm871_vm4, %v8158_v62  ;;  %v684_v49 = vrot.slane %v8156_v32, 6 }
  0x3b   : > { %12307 = vst [vmem:[#allocation39_spill] sm:$0xff] %v8131_v28  ;;  %v8177_v44 = vsel %vm8000_vm3, %v546_v35, %v554_v15  ;;  %v690_v33 = vrot.slane %v8164_v50, 5  ;;  %v8181_v53 = vshll.u32 %v319_v57, 16  ;;  %v564_v61 = vor.u32 %v563_v47, %v560_v55  ;;  %v8190_v35 = vld [vmem:[%s7958_s17 + $0x1c] sm:$0xf] }
  0x3c   : > { %12308 = vst [vmem:[#allocation40_spill] sm:$0xff] %v8133_v30  ;;  %v837_v2 = vunpack.c.l.b16 %v8177_v44  ;;  %v12006_v11 = vshrl.u32 %v8162_v12, 16  ;;  %v685_v14 = vor.u32 %v684_v49, %v681_v48  ;;  %v8193_v15 = vshrl.u32 %v8171_v51, 16 }
  0x3d   : > { %12309 = vst [vmem:[#allocation41_spill] sm:$0xff] %v8137_v34  ;;  %v693_v52 = vrot.slane %v8181_v53, 6  ;;  %v8197_v57 = vsel %vm8000_vm3, %v556_v46, %v564_v61  ;;  %v8202_v47 = vshll.u32 %v8171_v51, 16  ;;  %v8212_v61 = vshrl.u32 %v8190_v35, 16 }
  0x3e   : > { %12310 = vst [vmem:[#allocation42_spill] sm:$0xff] %v8152_v31  ;;  %v700_v55 = vrot.slane %v12006_v11, 5  ;;  %v838_v48 = vunpack.c.l.b16 %v8197_v57  ;;  %v686_v49 = vrot.slane %v685_v14, 4  ;;  %v1213_v3 = vrot.slane %v8193_v15, 5 }
  0x3f   : > { %12311 = vst [vmem:[#allocation43_spill] sm:$0xff] %v8154_v5  ;;  %v8187_v5 = vshll.u32 %v8162_v12, 16  ;;  %v1216_v46 = vrot.slane %v8202_v47, 6  ;;  %v1222_v59 = vrot.slane %v8212_v61, 5 }
  0x40   : > { %12312 = vst [vmem:[#allocation44_spill] sm:$0xff] %v8156_v32  ;;  %v8207_v32 = vld [vmem:[%s7958_s17 + $0x20] sm:$0x7]  ;;  %v8214_v11 = vpack.c.b16 %v838_v48, %v837_v2  ;;  %v8228_v2 = vshll.u32 %v8190_v35, 16 }
  0x41   : > { %12313 = vst [vmem:[#allocation45_spill] sm:$0xff] %v8158_v62  ;;  %v1217_v58 = vor.u32 %v1216_v46, %v1213_v3  ;;  %v12328_v1 = vshrl.u32 %v8207_v32, 16 }
  0x42   : > { %12314 = vst [vmem:[#allocation46_spill] sm:$0xff] %v8162_v12  ;;  %7021 = vmatmul.msk.bf16.gmra.mxu2 %vm871_vm4, %v8214_v11  ;;  %v1225_v41 = vrot.slane %v8228_v2, 6 }
  0x43   : > { %12315 = vst [vmem:[#allocation47_spill] sm:$0xff] %v8164_v50  ;;  %v694_v50 = vor.u32 %v693_v52, %v690_v33  ;;  %v8221_v33 = vld [vmem:[%s7958_s17 + $0x30] sm:$0xf]  ;;  %v1218_v3 = vrot.slane %v1217_v58, 4  ;;  %v1232_v19 = vrot.slane %v12328_v1, 5 }
  0x44   : > { %12316 = vst [vmem:[#allocation48_spill] sm:$0xff] %v8181_v53  ;;  %v703_v53 = vrot.slane %v8187_v5, 6  ;;  %v8245_v46 = vshrl.u32 %v8221_v33, 16  ;;  %v8248_v45 = vshll.u32 %v8221_v33, 16  ;;  %v1226_v28 = vor.u32 %v1225_v41, %v1222_v59 }
  0x45   : > { %12317 = vst [vmem:[#allocation49_spill] sm:$0xff] %v8187_v5  ;;  %v8218_v12 = vsel %vm8000_vm3, %v686_v49, %v694_v50  ;;  %v696_v52 = vrot.slane %v694_v50, 4  ;;  %v8232_v49 = vshll.u32 %v8207_v32, 16  ;;  %v8235_v50 = vld [vmem:[%s7958_s17 + $0x34] sm:$0xf] }
  0x46   : > { %12318 = vst [vmem:[#allocation50_spill] sm:$0xff] %v8193_v15  ;;  %v704_v14 = vor.u32 %v703_v53, %v700_v55  ;;  %v847_v5 = vunpack.c.l.b16 %v8218_v12  ;;  %v8242_v55 = vld [vmem:[%s7958_s17 + $0x38] sm:$0x7]  ;;  %v373_v58 = vrot.slane %v8245_v46, 5  ;;  %v376_v31 = vrot.slane %v8248_v45, 6 }
  0x47   : > { %12319 = vst [vmem:[#allocation51_spill] sm:$0xff] %v8202_v47  ;;  %v8261_v6 = vshrl.u32 %v8235_v50, 16  ;;  %v8264_v30 = vshll.u32 %v8235_v50, 16  ;;  %v12045_v1 = vshrl.u32 %v8242_v55, 16  ;;  %v8275_v22 = vshll.u32 %v8242_v55, 16 }
  0x48   : > { %12320 = vst [vmem:[#allocation52_spill] sm:$0xff] %v8207_v32  ;;  %v8239_v53 = vsel %vm8000_vm3, %v696_v52, %v704_v14  ;;  %v1235_v52 = vrot.slane %v8232_v49, 6  ;;  %v8256_v14 = vld [vmem:[%s7958_s17 + $0x3c] sm:$0xf]  ;;  %v377_v26 = vor.u32 %v376_v31, %v373_v58  ;;  %v1227_v41 = vsel %vm8000_vm3, %v1218_v3, %v1226_v28 }
  0x49   : > { %12321 = vst [vmem:[#allocation53_spill] sm:$0xff] %v8212_v61  ;;  %v848_v48 = vunpack.c.l.b16 %v8239_v53  ;;  %v382_v27 = vrot.slane %v8261_v6, 5  ;;  %v385_v23 = vrot.slane %v8264_v30, 6  ;;  %v392_v59 = vrot.slane %v12045_v1, 5  ;;  %v306_v1 = vld [vmem:[%s7958_s17 + $0x84] sm:$0xf] }
  0x4a   : > { %12322 = vst [vmem:[#allocation54_spill] sm:$0xff] %v8214_v11  ;;  %v1236_v16 = vor.u32 %v1235_v52, %v1232_v19  ;;  %v1228_v19 = vrot.slane %v1226_v28, 4  ;;  %v8284_v31 = vshrl.u32 %v8256_v14, 16  ;;  %v395_v58 = vrot.slane %v8275_v22, 6  ;;  %v309_v61 = vld [vmem:[%s7958_s17 + $0x90] sm:$0xf] }
  0x4b   : > { %12323 = vst [vmem:[#allocation55_spill] sm:$0xff] %v8228_v2  ;;  %v8266_v34 = vpack.c.b16 %v848_v48, %v847_v5  ;;  %v1240_v5 = vunpack.c.l.b16 %v1227_v41  ;;  %v378_v48 = vrot.slane %v377_v26, 4  ;;  %v386_v52 = vor.u32 %v385_v23, %v382_v27 }
  0x4c   : > { %12324 = vst [vmem:[#allocation56_spill] sm:$0xff] %v8232_v49  ;;  %v1237_v13 = vsel %vm8000_vm3, %v1228_v19, %v1236_v16  ;;  %v401_v9 = vrot.slane %v8284_v31, 5  ;;  %v8291_v3 = vshll.u32 %v8256_v14, 16  ;;  %v8294_v28 = vshrl.u32 %v8270_v40, 16 }
  0x4d   : > { %12325 = vst [vmem:[#allocation57_spill] sm:$0xff] %v8242_v55  ;;  %7026 = vmatmul.msk.bf16.gmra.mxu3 %vm871_vm4, %v8266_v34  ;;  %v1241_v10 = vunpack.c.l.b16 %v1237_v13  ;;  %v387_v26 = vsel %vm8000_vm3, %v378_v48, %v386_v52  ;;  %v388_v41 = vrot.slane %v386_v52, 4  ;;  %v396_v23 = vor.u32 %v395_v58, %v392_v59 }
  0x4e   : > { %12326 = vst [vmem:[#allocation58_spill] sm:$0xff] %v8245_v46  ;;  %v404_v27 = vrot.slane %v8291_v3, 6  ;;  %v410_v16 = vrot.slane %v8294_v28, 5  ;;  %v8302_v19 = vshll.u32 %v8270_v40, 16  ;;  %v825_v8 = vunpack.c.l.b16 %v387_v26 }
  0x4f   : > { %12327 = vst [vmem:[#allocation59_spill] sm:$0xff] %v8248_v45  ;;  %v397_v13 = vsel %vm8000_vm3, %v388_v41, %v396_v23  ;;  %v8309_v48 = vshrl.u32 %v306_v1, 16  ;;  %v8319_v41 = vshll.u32 %v306_v1, 16  ;;  %v322_v1 = vld [vmem:[%s7958_s17 + $0xc4] sm:$0xf]  ;;  %v8456_v37 = vshll.u32 %v309_v61, 16 }
  0x50   : > { %12329 = vst [vmem:[#allocation60_spill] sm:$0xff] %v8261_v6  ;;  %v405_v59 = vor.u32 %v404_v27, %v401_v9  ;;  %v413_v52 = vrot.slane %v8302_v19, 6  ;;  %v826_v58 = vunpack.c.l.b16 %v397_v13  ;;  %v8370_v46 = vshll.u32 %v322_v1, 16 }
  0x51   : > { %12330 = vst [vmem:[#allocation61_spill] sm:$0xff] %v8264_v30 }
  0x52   : > { %12331 = vst [vmem:[#allocation62_spill] sm:$0xff] %v8266_v34  ;;  %v406_v23 = vrot.slane %v405_v59, 4  ;;  %v8323_v9 = vor.u32 %v413_v52, %v410_v16  ;;  %v8325_v27 = vpack.c.b16 %v826_v58, %v825_v8 }
  0x53   : > { %12332 = vst [vmem:[#allocation63_spill] sm:$0xff] %v8275_v22  ;;  %v6716_v22 = vunpack.c.l.bf16 %v387_v26  ;;  %v8321_v26 = vshrl.u32 %v307_v7, 16 }
  0x54   : > { %12333 = vst [vmem:[#allocation64_spill] sm:$0xff] %v8284_v31  ;;  %v8305_v31 = vpack.c.b16 %v1241_v10, %v1240_v5  ;;  %v8316_v10 = vld [vmem:[%s7958_s17 + $0x8c] sm:$0x7]  ;;  %v569_v5 = vrot.slane %v8309_v48, 5  ;;  %v8338_v16 = vsel %vm8000_vm3, %v406_v23, %v8323_v9  ;;  %7015 = vmatmul.msk.bf16.gmra.mxu0 %vm871_vm4, %v8325_v27 }
  0x55   : > { %12334 = vst [vmem:[#allocation65_spill] sm:$0xff] %v8291_v3  ;;  %v6717_v3 = vunpack.c.l.bf16 %v397_v13  ;;  %v578_v6 = vrot.slane %v8321_v26, 5 }
  0x56   : > { %12335 = vst [vmem:[#allocation66_spill] sm:$0xff] %v8294_v28  ;;  %7047 = vmatmul.msk.bf16.vlgmr.msrb.gmra.mxu1 %vm871_vm4, %v8305_v31  ;;  %v6749_v28 = vsel %vm871_vm4, %v6716_v22, 0.0  ;;  %v572_v22 = vrot.slane %v8319_v41, 6 }
  0x57   : > { %12336 = vst [vmem:[#allocation67_spill] sm:$0xff] %v8302_v19  ;;  %v6750_v13 = vadd.f32 %v6749_v28, %v8166_v38  ;;  %v321_v19 = vld [vmem:[%s7958_s17 + $0xc0] sm:$0xf]  ;;  %v6751_v49 = vsel %vm871_vm4, %v6717_v3, 0.0  ;;  %v12077_v38 = vshrl.u32 %v8316_v10, 16  ;;  %v8344_v3 = vshll.u32 %v8316_v10, 16 }
  0x58   : > { %12337 = vst [vmem:[#allocation68_spill] sm:$0xff] %v8305_v31  ;;  %v6718_v28 = vunpack.c.l.bf16 %v8338_v16  ;;  %v573_v59 = vor.u32 %v572_v22, %v569_v5  ;;  %v8348_v52 = vshrl.u32 %v321_v19, 16 }
  0x59   : > { %12338 = vst [vmem:[#allocation69_spill] sm:$0xff] %v8309_v48  ;;  %v8332_v48 = vshll.u32 %v307_v7, 16  ;;  %v6752_v8 = vadd.f32 %v6751_v49, %v6750_v13  ;;  %v588_v58 = vrot.slane %v12077_v38, 5  ;;  %v591_v23 = vrot.slane %v8344_v3, 6 }
  0x5a   : > { %12339 = vst [vmem:[#allocation70_spill] sm:$0xff] %v8316_v10  ;;  %v8356_v49 = vshll.u32 %v321_v19, 16  ;;  %v8358_v13 = vshrl.u32 %v322_v1, 16  ;;  %v574_v30 = vrot.slane %v573_v59, 4  ;;  %v709_v22 = vrot.slane %v8348_v52, 5 }
  0x5b   : > { %12340 = vst [vmem:[#allocation71_spill] sm:$0xff] %v8319_v41  ;;  %v581_v7 = vrot.slane %v8332_v48, 6  ;;  %v6753_v41 = vsel %vm871_vm4, %v6718_v28, 0.0  ;;  %v592_v10 = vor.u32 %v591_v23, %v588_v58  ;;  %v8388_v58 = vld [vmem:[%s7958_s17 + $0x48] sm:$0xf] }
  0x5c   : > { %12341 = vst [vmem:[#allocation72_spill] sm:$0xff] %v8321_v26  ;;  %v8354_v26 = vld [vmem:[%s7958_s17 + $0xc8] sm:$0x7]  ;;  %v712_v38 = vrot.slane %v8356_v49, 6 }
  0x5d   : > { %12342 = vst [vmem:[#allocation73_spill] sm:$0xff] %v8325_v27  ;;  %v582_v5 = vor.u32 %v581_v7, %v578_v6  ;;  %v12089_v28 = vshrl.u32 %v8354_v26, 16 }
  0x5e   : > { %12343 = vst [vmem:[#allocation74_spill] sm:$0xff] %v8332_v48  ;;  %v8362_v48 = vadd.f32 %v6753_v41, %v6752_v8  ;;  %v713_v59 = vor.u32 %v712_v38, %v709_v22  ;;  %v8375_v41 = vshll.u32 %v8354_v26, 16  ;;  %v8378_v8 = vld [vmem:[%s7958_s17 + $0x44] sm:$0x7] }
  0x5f   : > { %12344 = vst [vmem:[#allocation75_spill] sm:$0xff] %v8344_v3  ;;  %v718_v3 = vrot.slane %v8358_v13, 5  ;;  %v8368_v19 = vsel %vm8000_vm3, %v574_v30, %v582_v5  ;;  %v584_v45 = vrot.slane %v582_v5, 4  ;;  %v721_v30 = vrot.slane %v8370_v46, 6 }
  0x60   : > { %12345 = vst [vmem:[#allocation76_spill] sm:$0xff] %v8348_v52  ;;  %v839_v6 = vunpack.c.l.b16 %v8368_v19  ;;  %v728_v1 = vrot.slane %v12089_v28, 5  ;;  %v714_v38 = vrot.slane %v713_v59, 4  ;;  %v731_v22 = vrot.slane %v8375_v41, 6 }
  0x61   : > { %12346 = vst [vmem:[#allocation77_spill] sm:$0xff] %v8354_v26  ;;  %v8382_v7 = vsel %vm8000_vm3, %v584_v45, %v592_v10  ;;  %v722_v5 = vor.u32 %v721_v30, %v718_v3  ;;  %v8399_v10 = vld [vmem:[%s7958_s17 + $0x4c] sm:$0xf]  ;;  %v8402_v26 = vshrl.u32 %v8388_v58, 16  ;;  %v8405_v28 = vshll.u32 %v8388_v58, 16 }
  0x62   : > { %12347 = vst [vmem:[#allocation78_spill] sm:$0xff] %v8356_v49  ;;  %v840_v23 = vunpack.c.l.b16 %v8382_v7  ;;  %v8394_v49 = vshll.u32 %v8378_v8, 16  ;;  %v732_v30 = vor.u32 %v731_v22, %v728_v1  ;;  %v8430_v22 = vshrl.u32 %v8399_v10, 16 }
  0x63   : > { %12348 = vst [vmem:[#allocation79_spill] sm:$0xff] %v8358_v13  ;;  %v8409_v3 = vsel %vm8000_vm3, %v714_v38, %v722_v5  ;;  %v724_v59 = vrot.slane %v722_v5, 4  ;;  %v8412_v13 = vld [vmem:[%s7958_s17 + $0x50] sm:$0x7]  ;;  %v429_v38 = vrot.slane %v8402_v26, 5  ;;  %v432_v5 = vrot.slane %v8405_v28, 6 }
  0x64   : > { %12349 = vst [vmem:[#allocation80_spill] sm:$0xff] %v8370_v46  ;;  %v8396_v45 = vpack.c.b16 %v840_v23, %v839_v6  ;;  %v12357_v6 = vshrl.u32 %v8378_v8, 16  ;;  %v416_v46 = vrot.slane %v8323_v9, 4  ;;  %v423_v52 = vrot.slane %v8394_v49, 6 }
  0x65   : > { %12350 = vst [vmem:[#allocation81_spill] sm:$0xff] %v8375_v41  ;;  %v849_v41 = vunpack.c.l.b16 %v8409_v3  ;;  %v8424_v1 = vsel %vm8000_vm3, %v724_v59, %v732_v30  ;;  %v433_v2 = vor.u32 %v432_v5, %v429_v38  ;;  %v438_v59 = vrot.slane %v8430_v22, 5 }
  0x66   : > { %12351 = vst [vmem:[#allocation82_spill] sm:$0xff] %v8378_v8  ;;  %v420_v23 = vrot.slane %v12357_v6, 5  ;;  %7022 = vmatmul.msk.bf16.gmra.mxu2 %vm871_vm4, %v8396_v45  ;;  %7048 = vmatmul.msk.bf16.gmra.mxu1 %vm871_vm4, %v8158_v62  ;;  %v8433_v6 = vshll.u32 %v8399_v10, 16  ;;  %v850_v9 = vunpack.c.l.b16 %v8424_v1  ;;  %v8441_v47 = vshll.u32 %v8412_v13, 16 }
  0x67   : > { %12352 = vst [vmem:[#allocation83_spill] sm:$0xff] %v8394_v49  ;;  %v434_v38 = vrot.slane %v433_v2, 4 }
  0x68   : > { %12353 = vst [vmem:[#allocation84_spill] sm:$0xff] %v8396_v45  ;;  %v424_v49 = vor.u32 %v423_v52, %v420_v23  ;;  %v441_v30 = vrot.slane %v8433_v6, 6  ;;  %v8444_v15 = vpack.c.b16 %v850_v9, %v849_v41  ;;  %v827_v23 = vunpack.c.l.b16 %v8338_v16 }
  0x69   : > { %12354 = vst [vmem:[#allocation85_spill] sm:$0xff] %v8402_v26  ;;  %v12118_v26 = vshrl.u32 %v8412_v13, 16  ;;  %v8454_v9 = vshrl.u32 %v309_v61, 16 }
  0x6a   : > { %12355 = vst [vmem:[#allocation86_spill] sm:$0xff] %v8405_v28  ;;  %v310_v28 = vld [vmem:[%s7958_s17 + $0x94] sm:$0xf]  ;;  %v425_v39 = vsel %vm8000_vm3, %v416_v46, %v424_v49  ;;  %v442_v5 = vor.u32 %v441_v30, %v438_v59  ;;  %7027 = vmatmul.msk.bf16.gmra.mxu3 %vm871_vm4, %v8444_v15  ;;  %v8467_v30 = vld [vmem:[%s7958_s17 + $0x98] sm:$0x7] }
  0x6b   : > { %12356 = vst [vmem:[#allocation87_spill] sm:$0xff] %v8412_v13  ;;  %v448_v52 = vrot.slane %v12118_v26, 5  ;;  %v6719_v41 = vunpack.c.l.bf16 %v425_v39  ;;  %v8458_v46 = vshrl.u32 %v310_v28, 16  ;;  %v597_v61 = vrot.slane %v8454_v9, 5 }
  0x6c   : > { %12358 = vst [vmem:[#allocation88_spill] sm:$0xff] %v8430_v22  ;;  %v451_v22 = vrot.slane %v8441_v47, 6  ;;  %v8462_v49 = vsel %vm8000_vm3, %v434_v38, %v442_v5  ;;  %v444_v2 = vrot.slane %v442_v5, 4 }
  0x6d   : > { %12359 = vst [vmem:[#allocation89_spill] sm:$0xff] %v8433_v6  ;;  %v828_v6 = vunpack.c.l.b16 %v425_v39  ;;  %v6720_v26 = vunpack.c.l.bf16 %v8462_v49  ;;  %v6755_v39 = vsel %vm871_vm4, %v6719_v41, 0.0 }
  0x6e   : > { %12360 = vst [vmem:[#allocation90_spill] sm:$0xff] %v8441_v47  ;;  %v452_v16 = vor.u32 %v451_v22, %v448_v52  ;;  %v600_v47 = vrot.slane %v8456_v37, 6  ;;  %v6756_v22 = vadd.f32 %v6755_v39, %v8362_v48  ;;  %v8480_v52 = vshll.u32 %v310_v28, 16 }
  0x6f   : > { %12361 = vst [vmem:[#allocation91_spill] sm:$0xff] %v8444_v15  ;;  %v8464_v59 = vpack.c.b16 %v828_v6, %v827_v23  ;;  %v606_v6 = vrot.slane %v8458_v46, 5  ;;  %v6757_v5 = vsel %vm871_vm4, %v6720_v26, 0.0  ;;  %v8492_v48 = vshrl.u32 %v324_v24, 16 }
  0x70   : > { %12362 = vst [vmem:[#allocation92_spill] sm:$0xff] %v8454_v9  ;;  %v453_v38 = vsel %vm8000_vm3, %v444_v2, %v452_v16  ;;  %v601_v41 = vor.u32 %v600_v47, %v597_v61  ;;  %v12139_v9 = vshrl.u32 %v8467_v30, 16  ;;  %v6758_v21 = vadd.f32 %v6757_v5, %v6756_v22  ;;  %v8490_v16 = vld [vmem:[%s7958_s17 + $0xd4] sm:$0x7] }
  0x71   : > { %12363 = vst [vmem:[#allocation93_spill] sm:$0xff] %v8456_v37  ;;  %7016 = vmatmul.msk.bf16.gmra.mxu0 %vm871_vm4, %v8464_v59  ;;  %v6721_v23 = vunpack.c.l.bf16 %v453_v38  ;;  %v325_v37 = vld [vmem:[%s7958_s17 + $0xd0] sm:$0xf]  ;;  %v609_v17 = vrot.slane %v8480_v52, 6  ;;  %v8487_v2 = vshll.u32 %v8467_v30, 16  ;;  %v8497_v47 = vshll.u32 %v324_v24, 16 }
  0x72   : > { %12364 = vst [vmem:[#allocation94_spill] sm:$0xff] %v8458_v46  ;;  %v602_v39 = vrot.slane %v601_v41, 4  ;;  %v616_v26 = vrot.slane %v12139_v9, 5  ;;  %v737_v46 = vrot.slane %v8492_v48, 5  ;;  %v8504_v62 = vshrl.u32 %v325_v37, 16 }
  0x73   : > { %12365 = vst [vmem:[#allocation95_spill] sm:$0xff] %v8464_v59  ;;  %v6759_v28 = vsel %vm871_vm4, %v6721_v23, 0.0  ;;  %v610_v22 = vor.u32 %v609_v17, %v606_v6  ;;  %v619_v5 = vrot.slane %v8487_v2, 6  ;;  %v8506_v31 = vshll.u32 %v325_v37, 16 }
  0x74   : > { %12366 = vst [vmem:[#allocation96_spill] sm:$0xff] %v8467_v30  ;;  %v8499_v61 = vadd.f32 %v6759_v28, %v6758_v21  ;;  %v8514_v6 = vshll.u32 %v8490_v16, 16  ;;  %v746_v9 = vrot.slane %v8504_v62, 5 }
  0x75   : > { %12367 = vst [vmem:[#allocation97_spill] sm:$0xff] %v8480_v52  ;;  %v740_v52 = vrot.slane %v8497_v47, 6  ;;  %v8511_v24 = vsel %vm8000_vm3, %v602_v39, %v610_v22  ;;  %v612_v21 = vrot.slane %v610_v22, 4  ;;  %v620_v17 = vor.u32 %v619_v5, %v616_v26  ;;  %v8529_v22 = vld [vmem:[%s7958_s17 + $0x9c] sm:$0xf] }
  0x76   : > { %12368 = vst [vmem:[#allocation98_spill] sm:$0xff] %v8487_v2  ;;  %v841_v41 = vunpack.c.l.b16 %v8511_v24  ;;  %v749_v23 = vrot.slane %v8506_v31, 6  ;;  %v12375_v39 = vshrl.u32 %v8490_v16, 16  ;;  %v759_v26 = vrot.slane %v8514_v6, 6  ;;  %7049 = vmatmul.msk.bf16.gmra.mxu1 %vm871_vm4, %v8325_v27  ;;  %v8533_v5 = vld [vmem:[%s7958_s17 + $0xa0] sm:$0xf] }
  0x77   : > { %12369 = vst [vmem:[#allocation99_spill] sm:$0xff] %v8490_v16  ;;  %v741_v28 = vor.u32 %v740_v52, %v737_v46  ;;  %v8520_v37 = vsel %vm8000_vm3, %v612_v21, %v620_v17  ;;  %v829_v17 = vunpack.c.l.b16 %v8462_v49  ;;  %v8554_v49 = vshrl.u32 %v8533_v5, 16 }
  0x78   : > { %12370 = vst [vmem:[#allocation100_spill] sm:$0xff] %v8492_v48  ;;  %v842_v46 = vunpack.c.l.b16 %v8520_v37  ;;  %v8545_v48 = vshll.u32 %v8529_v22, 16 }
  0x79   : > { %12371 = vst [vmem:[#allocation101_spill] sm:$0xff] %v8497_v47  ;;  %v756_v47 = vrot.slane %v12375_v39, 5  ;;  %v742_v52 = vrot.slane %v741_v28, 4  ;;  %v8539_v39 = vld [vmem:[%s7958_s17 + $0xa4] sm:$0x7] }
  0x7a   : > { %12372 = vst [vmem:[#allocation102_spill] sm:$0xff] %v8504_v62  ;;  %v750_v62 = vor.u32 %v749_v23, %v746_v9  ;;  %v8536_v16 = vpack.c.b16 %v842_v46, %v841_v41  ;;  %v628_v41 = vrot.slane %v8545_v48, 6  ;;  %v8570_v46 = vshll.u32 %v8533_v5, 16 }
  0x7b   : > { %12373 = vst [vmem:[#allocation103_spill] sm:$0xff] %v8506_v31  ;;  %v760_v21 = vor.u32 %v759_v26, %v756_v47  ;;  %v830_v31 = vunpack.c.l.b16 %v453_v38  ;;  %v8562_v26 = vld [vmem:[%s7958_s17 + $0x54] sm:$0xf] }
  0x7c   : > { %12374 = vst [vmem:[#allocation104_spill] sm:$0xff] %v8514_v6  ;;  %v8542_v6 = vshrl.u32 %v8529_v22, 16  ;;  %v8549_v28 = vsel %vm8000_vm3, %v742_v52, %v750_v62  ;;  %v752_v9 = vrot.slane %v750_v62, 4  ;;  %7023 = vmatmul.msk.bf16.gmra.mxu2 %vm871_vm4, %v8536_v16  ;;  %v12166_v52 = vshrl.u32 %v8539_v39, 16 }
  0x7d   : > { %12376 = vst [vmem:[#allocation105_spill] sm:$0xff] %v8529_v22  ;;  %v8551_v47 = vpack.c.b16 %v830_v31, %v829_v17  ;;  %v851_v38 = vunpack.c.l.b16 %v8549_v28  ;;  %v634_v31 = vrot.slane %v8554_v49, 5  ;;  %v8574_v17 = vld [vmem:[%s7958_s17 + $0x58] sm:$0xf]  ;;  %v8589_v2 = vshrl.u32 %v8562_v26, 16 }
  0x7e   : > { %12377 = vst [vmem:[#allocation106_spill] sm:$0xff] %v8533_v5  ;;  %v625_v23 = vrot.slane %v8542_v6, 5  ;;  %v8566_v62 = vsel %vm8000_vm3, %v752_v9, %v760_v21  ;;  %v644_v21 = vrot.slane %v12166_v52, 5  ;;  %v8583_v9 = vshll.u32 %v8539_v39, 16 }
  0x7f   : > { %12378 = vst [vmem:[#allocation107_spill] sm:$0xff] %v8536_v16  ;;  %v852_v30 = vunpack.c.l.b16 %v8566_v62  ;;  %v8597_v15 = vshrl.u32 %v8574_v17, 16  ;;  %v8602_v22 = vshll.u32 %v8574_v17, 16  ;;  %v328_v16 = vld [vmem:[%s7958_s17 + $0xdc] sm:$0xf] }
  0x80   : > { %12379 = vst [vmem:[#allocation108_spill] sm:$0xff] %v8539_v39  ;;  %v647_v52 = vrot.slane %v8583_v9, 6  ;;  %v457_v39 = vrot.slane %v8589_v2, 5 }
  0x81   : > { %12380 = vst [vmem:[#allocation109_spill] sm:$0xff] %v8542_v6  ;;  %v629_v6 = vor.u32 %v628_v41, %v625_v23  ;;  %7017 = vmatmul.msk.bf16.gmra.mxu0 %vm871_vm4, %v8551_v47  ;;  %v8591_v27 = vpack.c.b16 %v852_v30, %v851_v38  ;;  %v8594_v41 = vshll.u32 %v8562_v26, 16  ;;  %v327_v30 = vld [vmem:[%s7958_s17 + $0xd8] sm:$0xf]  ;;  %v466_v38 = vrot.slane %v8597_v15, 5 }
  0x82   : > { %12381 = vst [vmem:[#allocation110_spill] sm:$0xff] %v8545_v48  ;;  %v637_v48 = vrot.slane %v8570_v46, 6  ;;  %v469_v34 = vrot.slane %v8602_v22, 6 }
  0x83   : > { %12382 = vst [vmem:[#allocation111_spill] sm:$0xff] %v8554_v49  ;;  %v8586_v49 = vld [vmem:[%s7958_s17 + $0x5c] sm:$0x7]  ;;  %v630_v23 = vrot.slane %v629_v6, 4  ;;  %7028 = vmatmul.msk.bf16.gmra.mxu3 %vm871_vm4, %v8591_v27  ;;  %v460_v6 = vrot.slane %v8594_v41, 6 }
  0x84   : > { %12383 = vst [vmem:[#allocation112_spill] sm:$0xff] %v8570_v46  ;;  %v638_v46 = vor.u32 %v637_v48, %v634_v31  ;;  %v12193_v5 = vshrl.u32 %v8586_v49, 16  ;;  %v8611_v48 = vshll.u32 %v8586_v49, 16  ;;  %v470_v45 = vor.u32 %v469_v34, %v466_v38 }
  0x85   : > { %12384 = vst [vmem:[#allocation113_spill] sm:$0xff] %v8583_v9  ;;  %v461_v60 = vor.u32 %v460_v6, %v457_v39  ;;  %v6724_v34 = vunpack.c.l.bf16 %v8018_v42  ;;  %v8643_v38 = vshrl.u32 %v328_v16, 16 }
  0x86   : > { %12385 = vst [vmem:[#allocation114_spill] sm:$0xff] %v8586_v49  ;;  %v8615_v31 = vsel %vm8000_vm3, %v630_v23, %v638_v46  ;;  %v640_v9 = vrot.slane %v638_v46, 4  ;;  %v479_v11 = vrot.slane %v8611_v48, 6  ;;  %v8627_v23 = vshrl.u32 %v327_v30, 16  ;;  %7050 = vmatmul.msk.bf16.gmra.mxu1 %vm871_vm4, %v8464_v59 }
  0x87   : > { %12386 = vst [vmem:[#allocation115_spill] sm:$0xff] %v8589_v2  ;;  %v648_v2 = vor.u32 %v647_v52, %v644_v21  ;;  %v8631_v52 = vld [vmem:[%s7958_s17 + $0xe0] sm:$0x7]  ;;  %v462_v21 = vrot.slane %v461_v60, 4  ;;  %v6727_v49 = vunpack.c.l.bf16 %v8054_v0 }
  0x88   : > { %12387 = vst [vmem:[#allocation116_spill] sm:$0xff] %v8591_v27  ;;  %v843_v27 = vunpack.c.l.b16 %v8615_v31  ;;  %v765_v6 = vrot.slane %v8627_v23, 5  ;;  %v8653_v42 = vshll.u32 %v8631_v52, 16 }
  0x89   : > { %12388 = vst [vmem:[#allocation117_spill] sm:$0xff] %v8594_v41  ;;  %v8623_v41 = vsel %vm8000_vm3, %v640_v9, %v648_v2  ;;  %v471_v9 = vsel %vm8000_vm3, %v462_v21, %v470_v45 }
  0x8a   : > { %12389 = vst [vmem:[#allocation118_spill] sm:$0xff] %v8597_v15  ;;  %v476_v15 = vrot.slane %v12193_v5, 5  ;;  %v844_v46 = vunpack.c.l.b16 %v8623_v41  ;;  %v8634_v5 = vshll.u32 %v327_v30, 16  ;;  %v12205_v30 = vshrl.u32 %v8631_v52, 16 }
  0x8b   : > { %12390 = vst [vmem:[#allocation119_spill] sm:$0xff] %v8602_v22  ;;  %v472_v22 = vrot.slane %v470_v45, 4 }
  0x8c   : > { %12391 = vst [vmem:[#allocation120_spill] sm:$0xff] %v8611_v48  ;;  %v480_v39 = vor.u32 %v479_v11, %v476_v15  ;;  %v8639_v2 = vpack.c.b16 %v844_v46, %v843_v27  ;;  %v768_v11 = vrot.slane %v8634_v5, 6  ;;  %v8648_v15 = vshll.u32 %v328_v16, 16 }
  0x8d   : > { %12392 = vst [vmem:[#allocation121_spill] sm:$0xff] %v8627_v23  ;;  %v774_v23 = vrot.slane %v8643_v38, 5  ;;  %v6722_v27 = vunpack.c.l.bf16 %v471_v9  ;;  %v784_v21 = vrot.slane %v12205_v30, 5  ;;  %v787_v16 = vrot.slane %v8653_v42, 6 }
  0x8e   : > { %12393 = vst [vmem:[#allocation122_spill] sm:$0xff] %v8631_v52  ;;  %v481_v60 = vsel %vm8000_vm3, %v472_v22, %v480_v39  ;;  %v769_v48 = vor.u32 %v768_v11, %v765_v6  ;;  %v777_v45 = vrot.slane %v8648_v15, 6  ;;  %v6725_v22 = vunpack.c.l.bf16 %v8022_v43  ;;  %7024 = vmatmul.msk.bf16.gmra.mxu2 %vm871_vm4, %v8639_v2 }
  0x8f   : > { %12394 = vst [vmem:[#allocation123_spill] sm:$0xff] %v8634_v5  ;;  %v6723_v46 = vunpack.c.l.bf16 %v481_v60  ;;  %v6761_v39 = vsel %vm871_vm4, %v6722_v27, 0.0  ;;  %v6765_v5 = vsel %vm871_vm4, %v6724_v34, 0.0  ;;  %v6726_v52 = vunpack.c.l.bf16 %v8039_v56 }
  0x90   : > { %12395 = vst [vmem:[#allocation124_spill] sm:$0xff] %v8639_v2  ;;  %v770_v59 = vrot.slane %v769_v48, 4  ;;  %v778_v6 = vor.u32 %v777_v45, %v774_v23  ;;  %v6762_v11 = vadd.f32 %v6761_v39, %v8499_v61  ;;  %v788_v30 = vor.u32 %v787_v16, %v784_v21 }
  0x91   : > { %12396 = vst [vmem:[#allocation125_spill] sm:$0xff] %v8643_v38  ;;  %v6763_v38 = vsel %vm871_vm4, %v6723_v46, 0.0  ;;  %v832_v43 = vunpack.c.l.b16 %v481_v60  ;;  %v6767_v46 = vsel %vm871_vm4, %v6725_v22, 0.0  ;;  %v6728_v56 = vunpack.c.l.bf16 %v8177_v44 }
  0x92   : > { %12397 = vst [vmem:[#allocation126_spill] sm:$0xff] %v8648_v15  ;;  %v831_v15 = vunpack.c.l.b16 %v471_v9  ;;  %v780_v27 = vrot.slane %v778_v6, 4  ;;  %v6764_v2 = vadd.f32 %v6763_v38, %v6762_v11  ;;  %v7030_v38 = vrot.slane %v8171_v51, 9 }
  0x93   : > { %12398 = vst [vmem:[#allocation127_spill] sm:$0xff] %v8653_v42  ;;  %v8670_v42 = vsel %vm8000_vm3, %v770_v59, %v778_v6  ;;  %v6769_v59 = vsel %vm871_vm4, %v6726_v52, 0.0  ;;  %v1099_v44 = vrot.slane %v8190_v35, 5  ;;  %v6771_v60 = vsel %vm871_vm4, %v6727_v49, 0.0 }
  0x94   : > { %v853_v48 = vunpack.c.l.b16 %v8670_v42  ;;  %v8674_v23 = vpack.c.b16 %v832_v43, %v831_v15  ;;  %v8679_v61 = vsel %vm8000_vm3, %v780_v27, %v788_v30  ;;  %v6766_v0 = vadd.f32 %v6765_v5, %v6764_v2 }
  0x95   : > { %v854_v34 = vunpack.c.l.b16 %v8679_v61  ;;  %v6729_v5 = vunpack.c.l.bf16 %v8197_v57  ;;  %v1102_v52 = vrot.slane %v8207_v32, 5  ;;  %v1100_v30 = vsel %vm8685_vm7, %v7030_v38, %v1099_v44 }
  0x96   : > { %12399 = vst [vmem:[#allocation128_spill] sm:$0xff] %v8674_v23  ;;  %7018 = vmatmul.msk.bf16.gmra.mxu0 %vm871_vm4, %v8674_v23  ;;  %v6768_v2 = vadd.f32 %v6767_v46, %v6766_v0  ;;  %v1101_v45 = vrot.slane %v1099_v44, 4  ;;  %v1531_v21 = vrot.slane %v8190_v35, 6  ;;  %v6773_v22 = vsel %vm871_vm4, %v6728_v56, 0.0  ;;  %7051 = vmatmul.msk.bf16.gmra.mxu1 %vm871_vm4, %v8551_v47 }
  0x97   : > { %v8694_v15 = vpack.c.b16 %v854_v34, %v853_v48  ;;  %v1338_v39 = vunpack.c.l.b16 %v1100_v30  ;;  %v6730_v49 = vunpack.c.l.bf16 %v8368_v19  ;;  %v7079_v6 = vrot.slane %v8171_v51, 10 }
  0x98   : > { %v6770_v16 = vadd.f32 %v6769_v59, %v6768_v2  ;;  %v1103_v57 = vsel %vm8685_vm7, %v1101_v45, %v1102_v52  ;;  %v7031_v11 = vrot.slane %v8050_v63, 9  ;;  %v1533_v27 = vrot.slane %v1531_v21, 4 }
  0x99   : > { %12402 = vst [vmem:[#allocation129_spill] sm:$0xff] %v8694_v15  ;;  %7029 = vmatmul.msk.bf16.gmra.mxu3 %vm871_vm4, %v8694_v15  ;;  %v1339_v35 = vunpack.c.l.b16 %v1103_v57  ;;  %v1534_v46 = vrot.slane %v8207_v32, 6  ;;  %v6775_v19 = vsel %vm871_vm4, %v6729_v5, 0.0  ;;  %v6731_v48 = vunpack.c.l.bf16 %v8382_v7 }
  0x9a   : > { %v6772_v43 = vadd.f32 %v6771_v60, %v6770_v16  ;;  %v1106_v51 = vrot.slane %v8062_v4, 5  ;;  %v1109_v0 = vrot.slane %v8074_v20, 5  ;;  %v6777_v38 = vsel %vm871_vm4, %v6730_v49, 0.0 }
  0x9b   : > { %v1370_v34 = vpack.c.b16 %v1339_v35, %v1338_v39  ;;  %v6732_v44 = vunpack.c.l.bf16 %v8511_v24  ;;  %v1532_v2 = vsel %vm8713_vm9, %v7079_v6, %v1531_v21  ;;  %v1535_v52 = vsel %vm8713_vm9, %v1533_v27, %v1534_v46 }
  0x9c   : > { %v6774_v59 = vadd.f32 %v6773_v22, %v6772_v43  ;;  %v1107_v60 = vsel %vm8685_vm7, %v7031_v11, %v1106_v51  ;;  %v1108_v5 = vrot.slane %v1106_v51, 4  ;;  %v6779_v45 = vsel %vm871_vm4, %v6731_v48, 0.0 }
  0x9d   : > { %v1340_v30 = vunpack.c.l.b16 %v1107_v60  ;;  %v6733_v22 = vunpack.c.l.bf16 %v8520_v37  ;;  %v6781_v49 = vsel %vm871_vm4, %v6732_v44, 0.0  ;;  %v6734_v57 = vunpack.c.l.bf16 %v8615_v31 }
  0x9e   : > { %v6776_v7 = vadd.f32 %v6775_v19, %v6774_v59  ;;  %7063 = vmatmul.msk.bf16.vlgmr.msrb.gmra.mxu2 %vm871_vm4, %v1370_v34  ;;  %v1110_v24 = vsel %vm8685_vm7, %v1108_v5, %v1109_v0  ;;  %v1643_v21 = vunpack.c.l.b16 %v1532_v2  ;;  %v1644_v6 = vunpack.c.l.b16 %v1535_v52  ;;  %v7166_v2 = vld [vmem:[%s11985_s2 + $0xc] sm:$0x3]  ;;  %v7131_v52 = vld [vmem:[%s11985_s2 + $0x8] sm:$0x3] }
  0x9f   : > { %v1341_v39 = vunpack.c.l.b16 %v1110_v24  ;;  %v1113_v35 = vrot.slane %v8235_v50, 5  ;;  %v6736_v27 = vunpack.c.l.bf16 %v8084_v25  ;;  %v6783_v37 = vsel %vm871_vm4, %v6733_v22, 0.0 }
  0xa0   : > { %v6778_v16 = vadd.f32 %v6777_v38, %v6776_v7  ;;  %v6735_v46 = vunpack.c.l.bf16 %v8623_v41  ;;  %v6737_v48 = vunpack.c.l.bf16 %v8094_v36  ;;  %v6785_v51 = vsel %vm871_vm4, %v6734_v57, 0.0 }
  0xa1   : > { %v1371_v43 = vpack.c.b16 %v1341_v39, %v1340_v30  ;;  %v1675_v0 = vpack.c.b16 %v1644_v6, %v1643_v21  ;;  %v1538_v31 = vrot.slane %v8062_v4, 6  ;;  %v7032_v34 = vrot.slane %v8221_v33, 9  ;;  %v7149_v4 = vld [vmem:[%s11985_s2 + $0xa] sm:$0x3] }
  0xa2   : > { %v6780_v11 = vadd.f32 %v6779_v45, %v6778_v16  ;;  %v1115_v38 = vrot.slane %v1113_v35, 4  ;;  %v1116_v25 = vrot.slane %v8242_v55, 5  ;;  %v6789_v44 = vsel %vm871_vm4, %v6736_v27, 0.0  ;;  %v7184_v45 = vld [vmem:[%s11985_s2 + $0xe] sm:$0x3] }
  0xa3   : > { %v6787_v41 = vsel %vm871_vm4, %v6735_v46, 0.0  ;;  %v7080_v60 = vrot.slane %v8050_v63, 10  ;;  %v1541_v36 = vrot.slane %v8074_v20, 6  ;;  %v6738_v5 = vunpack.c.l.bf16 %v8218_v12 }
  0xa4   : > { %v6782_v19 = vadd.f32 %v6781_v49, %v6780_v11  ;;  %v2163_v63 = vsel %vm920_vm0, %v7149_v4, 0  ;;  %v2323_v30 = vsel %vm920_vm0, %v7166_v2, 0  ;;  %v2021_v12 = vsel %vm920_vm0, %v7131_v52, 0 }
  0xa5   : > { %v1540_v22 = vrot.slane %v1538_v31, 4  ;;  %2172 = vmatpush.bf16.msra.mxu2 %v2163_v63  ;;  %2332 = vmatpush.bf16.msra.mxu3 %v2323_v30  ;;  %v2462_v16 = vsel %vm920_vm0, %v7184_v45, 0  ;;  %v1114_v39 = vsel %vm8685_vm7, %v7032_v34, %v1113_v35  ;;  %v1117_v49 = vsel %vm8685_vm7, %v1115_v38, %v1116_v25 }
  0xa6   : > { %7114 = vmatmul.msk.bf16.vlgmr.msrb.gmra.mxu0 %vm871_vm4, %v1371_v43  ;;  %v6784_v59 = vadd.f32 %v6783_v37, %v6782_v19  ;;  %v6739_v57 = vunpack.c.l.bf16 %v8239_v53  ;;  %v6791_v21 = vsel %vm871_vm4, %v6737_v48, 0.0  ;;  %2030 = vmatpush.bf16.msra.mxu1 %v2021_v12  ;;  %v6740_v11 = vunpack.c.l.bf16 %v8409_v3 }
  0xa7   : > { %2471 = vmatpush.bf16.msra.mxu0 %v2462_v16  ;;  %7052 = vmatmul.msk.bf16.gmra.mxu1 %vm871_vm4, %v8674_v23  ;;  %v6793_v27 = vsel %vm871_vm4, %v6738_v5, 0.0  ;;  %v1342_v37 = vunpack.c.l.b16 %v1114_v39  ;;  %v1343_v46 = vunpack.c.l.b16 %v1117_v49  ;;  %v1539_v19 = vsel %vm8713_vm9, %v7080_v60, %v1538_v31  ;;  %v958_v48 = vpop.f32.mrf.mxu1 }
  0xa8   : > { %v6786_v7 = vadd.f32 %v6785_v51, %v6784_v59  ;;  %v1542_v53 = vsel %vm8713_vm9, %v1540_v22, %v1541_v36  ;;  %v6741_v51 = vunpack.c.l.bf16 %v8424_v1  ;;  %1024 = vst.msk [vmem:[#allocation2 + $0x50] sm:$0xff] %vm1013_vm10, %v958_v48  ;;  %v6742_v3 = vunpack.c.l.bf16 %v8549_v28 }
  0xa9   : > { %7096 = vmatmul.msk.bf16.vlgmr.msrb.gmra.mxu3 %vm871_vm4, %v1675_v0  ;;  %v6795_v0 = vsel %vm871_vm4, %v6739_v57, 0.0  ;;  %v6797_v34 = vsel %vm871_vm4, %v6740_v11, 0.0  ;;  %v1645_v38 = vunpack.c.l.b16 %v1539_v19  ;;  %v1646_v31 = vunpack.c.l.b16 %v1542_v53 }
  0xaa   : > { %v6788_v24 = vadd.f32 %v6787_v41, %v6786_v7  ;;  %v8786_v25 = vpack.c.b16 %v1343_v46, %v1342_v37  ;;  %v1120_v41 = vrot.slane %v8270_v40, 5  ;;  %v6743_v1 = vunpack.c.l.bf16 %v8566_v62 }
  0xab   : > { %v6799_v60 = vsel %vm871_vm4, %v6741_v51, 0.0  ;;  %v6744_v5 = vunpack.c.l.bf16 %v8670_v42  ;;  %v8793_v28 = vpack.c.b16 %v1646_v31, %v1645_v38  ;;  %v1545_v7 = vrot.slane %v8235_v50, 6 }
  0xac   : > { %v6790_v6 = vadd.f32 %v6789_v44, %v6788_v24  ;;  %v7033_v2 = vrot.slane %v8256_v14, 9  ;;  %v1122_v52 = vrot.slane %v1120_v41, 4  ;;  %v1123_v62 = vrot.slane %v8378_v8, 5 }
  0xad   : > { %v6745_v63 = vunpack.c.l.bf16 %v8679_v61  ;;  %v6803_v30 = vsel %vm871_vm4, %v6743_v1, 0.0  ;;  %v6805_v42 = vsel %vm871_vm4, %v6744_v5, 0.0  ;;  %v7081_v45 = vrot.slane %v8221_v33, 10 }
  0xae   : > { %v6792_v35 = vadd.f32 %v6791_v21, %v6790_v6  ;;  %7064 = vmatmul.msk.bf16.gmra.mxu2 %vm871_vm4, %v1371_v43  ;;  %v6801_v43 = vsel %vm871_vm4, %v6742_v3, 0.0  ;;  %v1547_v22 = vrot.slane %v1545_v7, 4  ;;  %v1548_v16 = vrot.slane %v8242_v55, 6  ;;  %v12412_v55 = vld [vmem:[#allocation62_spill] sm:$0xff] }
  0xaf   : > { %v960_v50 = vpop.f32.mrf.mxu1  ;;  %v1121_v39 = vsel %vm8685_vm7, %v7033_v2, %v1120_v41  ;;  %v1124_v61 = vsel %vm8685_vm7, %v1122_v52, %v1123_v62  ;;  %v6807_v57 = vsel %vm871_vm4, %v6745_v63, 0.0  ;;  %v1127_v51 = vrot.slane %v8399_v10, 5 }
  0xb0   : > { %v6794_v59 = vadd.f32 %v6793_v27, %v6792_v35  ;;  %1025 = vst.msk [vmem:[#allocation2 + $0x58] sm:$0xff] %vm1013_vm10, %v960_v50  ;;  %v1344_v33 = vunpack.c.l.b16 %v1121_v39  ;;  %v1345_v6 = vunpack.c.l.b16 %v1124_v61  ;;  %v1546_v27 = vsel %vm8713_vm9, %v7081_v45, %v1545_v7  ;;  %v12406_v50 = vld [vmem:[#allocation114_spill] sm:$0xff] }
  0xb1   : > { %v1549_v37 = vsel %vm8713_vm9, %v1547_v22, %v1548_v16  ;;  %v1647_v35 = vunpack.c.l.b16 %v1546_v27  ;;  %v1129_v38 = vrot.slane %v1127_v51, 4  ;;  %v1130_v31 = vrot.slane %v8412_v13, 5  ;;  %v12407_v27 = vld [vmem:[#allocation54_spill] sm:$0xff] }
  0xb2   : > { %v6796_v44 = vadd.f32 %v6795_v0, %v6794_v59  ;;  %v963_v49 = vpop.f32.mrf.mxu2  ;;  %v1648_v19 = vunpack.c.l.b16 %v1549_v37  ;;  %v8824_v53 = vpack.c.b16 %v1345_v6, %v1344_v33  ;;  %v1552_v59 = vrot.slane %v8270_v40, 6 }
  0xb3   : > { %1026 = vst.msk [vmem:[#allocation2 + $0x60] sm:$0xff] %vm1013_vm10, %v963_v49  ;;  %v7082_v41 = vrot.slane %v8256_v14, 10  ;;  %v1131_v40 = vsel %vm8685_vm7, %v1129_v38, %v1130_v31  ;;  %v7035_v45 = vrot.slane %v8562_v26, 9  ;;  %v7083_v49 = vrot.slane %v8388_v58, 10  ;;  %v7666_v38 = vld [vmem:[%s7958_s17 + $0x64] sm:$0xf] }
  0xb4   : > { %v6798_v36 = vadd.f32 %v6797_v34, %v6796_v44  ;;  %v8830_v3 = vpack.c.b16 %v1648_v19, %v1647_v35  ;;  %v7034_v34 = vrot.slane %v8388_v58, 9  ;;  %v1554_v1 = vrot.slane %v1552_v59, 4 }
  0xb5   : > { %v1347_v7 = vunpack.c.l.b16 %v1131_v40  ;;  %v1553_v14 = vsel %vm8713_vm9, %v7082_v41, %v1552_v59  ;;  %v1141_v31 = vrot.slane %v7666_v38, 5  ;;  %v1566_v41 = vrot.slane %v8574_v17, 6  ;;  %v7668_v40 = vld [vmem:[%s7958_s17 + $0x68] sm:$0x7] }
  0xb6   : > { %7115 = vmatmul.msk.bf16.gmra.mxu0 %vm871_vm4, %v8786_v25  ;;  %v6800_v4 = vadd.f32 %v6799_v60, %v6798_v36  ;;  %v1555_v60 = vrot.slane %v8378_v8, 6  ;;  %v1128_v36 = vsel %vm8685_vm7, %v7034_v34, %v1127_v51  ;;  %v1649_v52 = vunpack.c.l.b16 %v1553_v14 }
  0xb7   : > { %7053 = vmatmul.msk.bf16.gmra.mxu1 %vm871_vm4, %v8034_v54  ;;  %v933_v48 = vpop.f32.mrf.mxu0  ;;  %v1346_v5 = vunpack.c.l.b16 %v1128_v36  ;;  %v1143_v36 = vrot.slane %v1141_v31, 4  ;;  %v1568_v14 = vrot.slane %v1566_v41, 4 }
  0xb8   : > { %v6802_v12 = vadd.f32 %v6801_v43, %v6800_v4  ;;  %v988_v46 = vpop.f32.mrf.mxu3  ;;  %1014 = vst.msk [vmem:[#allocation2] sm:$0xff] %vm1013_vm10, %v933_v48  ;;  %v1556_v4 = vsel %vm8713_vm9, %v1554_v1, %v1555_v60  ;;  %v7667_v1 = vld [vmem:[%s7958_s17 + $0x60] sm:$0xf] }
  0xb9   : > { %7097 = vmatmul.msk.bf16.gmra.mxu3 %vm871_vm4, %v8793_v28  ;;  %1036 = vst.msk [vmem:[#allocation2 + $0xb0] sm:$0xff] %vm1013_vm10, %v988_v46  ;;  %v1650_v62 = vunpack.c.l.b16 %v1556_v4  ;;  %v8855_v63 = vpack.c.b16 %v1347_v7, %v1346_v5  ;;  %v7036_v60 = vrot.slane %v7667_v1, 9  ;;  %v7084_v7 = vrot.slane %v8562_v26, 10 }
  0xba   : > { %v6804_v24 = vadd.f32 %v6803_v30, %v6802_v12  ;;  %v965_v0 = vpop.f32.mrf.mxu2  ;;  %v1134_v30 = vrot.slane %v8574_v17, 5  ;;  %v1569_v4 = vrot.slane %v12406_v50, 6 }
  0xbb   : > { %1027 = vst.msk [vmem:[#allocation2 + $0x68] sm:$0xff] %vm1013_vm10, %v965_v0  ;;  %v8859_v12 = vpack.c.b16 %v1650_v62, %v1649_v52  ;;  %v12408_v52 = vld [vmem:[#allocation84_spill] sm:$0xff]  ;;  %v1567_v26 = vsel %vm8713_vm9, %v7084_v7, %v1566_v41  ;;  %v12409_v7 = vld [vmem:[#allocation107_spill] sm:$0xff] }
  0xbc   : > { %v6806_v21 = vadd.f32 %v6805_v42, %v6804_v24  ;;  %v1559_v42 = vrot.slane %v8399_v10, 6  ;;  %v1136_v22 = vrot.slane %v1134_v30, 4  ;;  %v1137_v24 = vrot.slane %v12406_v50, 5 }
  0xbd   : > { %v1135_v33 = vsel %vm8685_vm7, %v7035_v45, %v1134_v30  ;;  %v1570_v45 = vsel %vm8713_vm9, %v1568_v14, %v1569_v4 }
  0xbe   : > { %v8816_v11 = vadd.f32 %v6807_v57, %v6806_v21  ;;  %7065 = vmatmul.msk.bf16.gmra.mxu2 %vm871_vm4, %v8786_v25  ;;  %v1561_v10 = vrot.slane %v1559_v42, 4  ;;  %v1562_v21 = vrot.slane %v8412_v13, 6  ;;  %v1138_v6 = vsel %vm8685_vm7, %v1136_v22, %v1137_v24 }
  0xbf   : > { %v935_v43 = vpop.f32.mrf.mxu0  ;;  %v1348_v37 = vunpack.c.l.b16 %v1135_v33  ;;  %v1349_v58 = vunpack.c.l.b16 %v1138_v6  ;;  %v1560_v46 = vsel %vm8713_vm9, %v7083_v49, %v1559_v42 }
  0xc0   : > { %12405 = vst [vmem:[#allocation130_spill] sm:$0xff] %v8816_v11  ;;  %v990_v44 = vpop.f32.mrf.mxu3  ;;  %v1563_v35 = vsel %vm8713_vm9, %v1561_v10, %v1562_v21  ;;  %v1651_v51 = vunpack.c.l.b16 %v1560_v46  ;;  %v8926_v10 = vld [vmem:[%s7958_s17 + $0x70] sm:$0xf] }
  0xc1   : > { %1037 = vst.msk [vmem:[#allocation2 + $0xb8] sm:$0xff] %vm1013_vm10, %v990_v44  ;;  %v1652_v0 = vunpack.c.l.b16 %v1563_v35  ;;  %v8890_v59 = vpack.c.b16 %v1349_v58, %v1348_v37  ;;  %v1148_v21 = vrot.slane %v8926_v10, 5  ;;  %v1573_v37 = vrot.slane %v7666_v38, 6  ;;  %v7670_v58 = vld [vmem:[%s7958_s17 + $0x6c] sm:$0xf] }
  0xc2   : > { %1015 = vst.msk [vmem:[#allocation2 + $0x8] sm:$0xff] %vm1013_vm10, %v935_v43  ;;  %v1144_v43 = vrot.slane %v7668_v40, 5  ;;  %v7037_v46 = vrot.slane %v7670_v58, 9 }
  0xc3   : > { %v8894_v44 = vpack.c.b16 %v1652_v0, %v1651_v51  ;;  %v1150_v35 = vrot.slane %v1148_v21, 4 }
  0xc4   : > { %v1145_v17 = vsel %vm8685_vm7, %v1143_v36, %v1144_v43  ;;  %v1576_v36 = vrot.slane %v7668_v40, 6  ;;  %v1149_v38 = vsel %vm8685_vm7, %v7037_v46, %v1148_v21 }
  0xc5   : > { %v968_v2 = vpop.f32.mrf.mxu2  ;;  %v1351_v42 = vunpack.c.l.b16 %v1145_v17  ;;  %v1352_v14 = vunpack.c.l.b16 %v1149_v38 }
  0xc6   : > { %7116 = vmatmul.msk.bf16.gmra.mxu0 %vm871_vm4, %v8824_v53  ;;  %1028 = vst.msk [vmem:[#allocation2 + $0x70] sm:$0xff] %vm1013_vm10, %v968_v2  ;;  %v1142_v2 = vsel %vm8685_vm7, %v7036_v60, %v1141_v31  ;;  %v7085_v31 = vrot.slane %v7667_v1, 10  ;;  %v1575_v60 = vrot.slane %v1573_v37, 4 }
  0xc7   : > { %7054 = vmatmul.msk.bf16.gmra.mxu1 %vm871_vm4, %v8071_v18  ;;  %v1350_v30 = vunpack.c.l.b16 %v1142_v2 }
  0xc8   : > { %v1574_v1 = vsel %vm8713_vm9, %v7085_v31, %v1573_v37  ;;  %v1577_v40 = vsel %vm8713_vm9, %v1575_v60, %v1576_v36  ;;  %v7674_v37 = vld [vmem:[%s7958_s17 + $0x80] sm:$0x7]  ;;  %v7086_v31 = vrot.slane %v7670_v58, 10 }
  0xc9   : > { %7098 = vmatmul.msk.bf16.gmra.mxu3 %vm871_vm4, %v8830_v3  ;;  %v8923_v49 = vpack.c.b16 %v1351_v42, %v1350_v30  ;;  %v1656_v30 = vunpack.c.l.b16 %v1577_v40  ;;  %v1158_v46 = vrot.slane %v7674_v37, 5 }
  0xcd   : > { %v970_v61 = vpop.f32.mrf.mxu2 }
  0xce   : > { %7066 = vmatmul.msk.bf16.gmra.mxu2 %vm871_vm4, %v8824_v53  ;;  %1029 = vst.msk [vmem:[#allocation2 + $0x78] sm:$0xff] %vm1013_vm10, %v970_v61  ;;  %v1654_v61 = vunpack.c.l.b16 %v1570_v45  ;;  %v8961_v45 = vld [vmem:[%s7958_s17 + $0x7c] sm:$0xf] }
  0xd0   : > { %v993_v16 = vpop.f32.mrf.mxu3 }
  0xd1   : > { %1038 = vst.msk [vmem:[#allocation2 + $0xc0] sm:$0xff] %vm1013_vm10, %v993_v16  ;;  %v938_v57 = vpop.f32.mrf.mxu0  ;;  %v1653_v16 = vunpack.c.l.b16 %v1567_v26 }
  0xd2   : > { %1016 = vst.msk [vmem:[#allocation2 + $0x10] sm:$0xff] %vm1013_vm10, %v938_v57 }
  0xd3   : > { %v8866_v39 = vpop.f32.mrf.mxu1  ;;  %v8930_v6 = vpack.c.b16 %v1654_v61, %v1653_v16  ;;  %v1580_v61 = vrot.slane %v8926_v10, 6 }
  0xd5   : > { %v1582_v60 = vrot.slane %v1580_v61, 4  ;;  %v1581_v58 = vsel %vm8713_vm9, %v7086_v31, %v1580_v61  ;;  %v8997_v61 = vld [vmem:[%s7958_s17 + $0x88] sm:$0xf] }
  0xd6   : > { %7117 = vmatmul.msk.bf16.gmra.mxu0 %vm871_vm4, %v8855_v63 }
  0xd7   : > { %7055 = vmatmul.msk.bf16.gmra.mxu1 %vm871_vm4, %v12407_v27 }
  0xd8   : > { %v995_v19 = vpop.f32.mrf.mxu3 }
  0xd9   : > { %7099 = vmatmul.msk.bf16.gmra.mxu3 %vm871_vm4, %v8859_v12  ;;  %1039 = vst.msk [vmem:[#allocation2 + $0xc8] sm:$0xff] %vm1013_vm10, %v995_v19  ;;  %v940_v34 = vpop.f32.mrf.mxu0  ;;  %v7671_v19 = vld [vmem:[%s7958_s17 + $0x74] sm:$0x7] }
  0xda   : > { %1017 = vst.msk [vmem:[#allocation2 + $0x18] sm:$0xff] %vm1013_vm10, %v940_v34  ;;  %v1151_v51 = vrot.slane %v7671_v19, 5  ;;  %v1583_v10 = vrot.slane %v7671_v19, 6 }
  0xdb   : > { %v8887_v48 = vpop.f32.mrf.mxu1 }
  0xdc   : > { %v1152_v43 = vsel %vm8685_vm7, %v1150_v35, %v1151_v51  ;;  %v1584_v19 = vsel %vm8713_vm9, %v1582_v60, %v1583_v10 }
  0xdd   : > { %v1353_v4 = vunpack.c.l.b16 %v1152_v43  ;;  %v12410_v43 = vld [vmem:[#allocation124_spill] sm:$0xff] }
  0xde   : > { %7067 = vmatmul.msk.bf16.gmra.mxu2 %vm871_vm4, %v8855_v63 }
  0xdf   : > { %v8958_v42 = vpack.c.b16 %v1353_v4, %v1352_v14 }
  0xe3   : > { %v8901_v5 = vpop.f32.mrf.mxu1 }
  0xe6   : > { %7118 = vmatmul.msk.bf16.gmra.mxu0 %vm871_vm4, %v8890_v59 }
  0xe7   : > { %7056 = vmatmul.msk.bf16.gmra.mxu1 %vm871_vm4, %v12408_v52 }
  0xe9   : > { %7100 = vmatmul.msk.bf16.gmra.mxu3 %vm871_vm4, %v8894_v44  ;;  %v973_v62 = vpop.f32.mrf.mxu2 }
  0xea   : > { %1030 = vst.msk [vmem:[#allocation2 + $0x80] sm:$0xff] %vm1013_vm10, %v973_v62  ;;  %v1655_v62 = vunpack.c.l.b16 %v1574_v1 }
  0xeb   : > { %v8920_v24 = vpop.f32.mrf.mxu1 }
  0xec   : > { %v8965_v16 = vpack.c.b16 %v1656_v30, %v1655_v62  ;;  %v1658_v62 = vunpack.c.l.b16 %v1584_v19 }
  0xed   : > { %v998_v57 = vpop.f32.mrf.mxu3 }
  0xee   : > { %v943_v22 = vpop.f32.mrf.mxu0  ;;  %7068 = vmatmul.msk.bf16.gmra.mxu2 %vm871_vm4, %v8890_v59  ;;  %1040 = vst.msk [vmem:[#allocation2 + $0xd0] sm:$0xff] %vm1013_vm10, %v998_v57  ;;  %v7673_v57 = vld [vmem:[%s7958_s17 + $0x78] sm:$0xf] }
  0xef   : > { %1018 = vst.msk [vmem:[#allocation2 + $0x20] sm:$0xff] %vm1013_vm10, %v943_v22  ;;  %v1155_v22 = vrot.slane %v8961_v45, 5  ;;  %v7038_v21 = vrot.slane %v7673_v57, 9 }
  0xf1   : > { %v975_v33 = vpop.f32.mrf.mxu2  ;;  %v1156_v36 = vsel %vm8685_vm7, %v7038_v21, %v1155_v22  ;;  %v1162_v21 = vrot.slane %v8997_v61, 5 }
  0xf2   : > { %1031 = vst.msk [vmem:[#allocation2 + $0x88] sm:$0xff] %vm1013_vm10, %v975_v33  ;;  %v1157_v33 = vrot.slane %v1155_v22, 4  ;;  %v1354_v14 = vunpack.c.l.b16 %v1156_v36  ;;  %v7087_v36 = vrot.slane %v7673_v57, 10 }
  0xf3   : > { %v8937_v34 = vpop.f32.mrf.mxu1  ;;  %v1164_v31 = vrot.slane %v1162_v21, 4 }
  0xf4   : > { %v1159_v38 = vsel %vm8685_vm7, %v1157_v33, %v1158_v46  ;;  %v1587_v46 = vrot.slane %v8961_v45, 6 }
  0xf5   : > { %v1000_v41 = vpop.f32.mrf.mxu3  ;;  %v1355_v4 = vunpack.c.l.b16 %v1159_v38 }
  0xf6   : > { %7119 = vmatmul.msk.bf16.gmra.mxu0 %vm871_vm4, %v8923_v49  ;;  %v945_v0 = vpop.f32.mrf.mxu0  ;;  %1041 = vst.msk [vmem:[#allocation2 + $0xd8] sm:$0xff] %vm1013_vm10, %v1000_v41 }
  0xf7   : > { %1019 = vst.msk [vmem:[#allocation2 + $0x28] sm:$0xff] %vm1013_vm10, %v945_v0  ;;  %7057 = vmatmul.msk.bf16.gmra.mxu1 %vm871_vm4, %v12409_v7  ;;  %v8994_v30 = vpack.c.b16 %v1355_v4, %v1354_v14  ;;  %v1589_v4 = vrot.slane %v1587_v46, 4 }
  0xf9   : > { %7101 = vmatmul.msk.bf16.gmra.mxu3 %vm871_vm4, %v8930_v6 }
  0xfb   : > { %v8955_v17 = vpop.f32.mrf.mxu1 }
  0xfe   : > { %v948_v2 = vpop.f32.mrf.mxu0  ;;  %7069 = vmatmul.msk.bf16.gmra.mxu2 %vm871_vm4, %v8923_v49 }
  0xff   : > { %1020 = vst.msk [vmem:[#allocation2 + $0x30] sm:$0xff] %vm1013_vm10, %v948_v2  ;;  %v978_v26 = vpop.f32.mrf.mxu2  ;;  %v1657_v2 = vunpack.c.l.b16 %v1581_v58  ;;  %v1590_v58 = vrot.slane %v7674_v37, 6  ;;  %v1588_v37 = vsel %vm8713_vm9, %v7087_v36, %v1587_v46 }
 0x100   : > { %1032 = vst.msk [vmem:[#allocation2 + $0x90] sm:$0xff] %vm1013_vm10, %v978_v26 }
 0x101   : > { %v9002_v33 = vpack.c.b16 %v1658_v62, %v1657_v2  ;;  %v12411_v2 = vld [vmem:[#allocation36_spill] sm:$0xff] }
 0x103   : > { %v8972_v51 = vpop.f32.mrf.mxu1 }
 0x106   : > { %7120 = vmatmul.msk.bf16.gmra.mxu0 %vm871_vm4, %v8958_v42  ;;  %v950_v35 = vpop.f32.mrf.mxu0  ;;  %v1003_v0 = vpop.f32.mrf.mxu3 }
 0x107   : > { %1021 = vst.msk [vmem:[#allocation2 + $0x38] sm:$0xff] %vm1013_vm10, %v950_v35  ;;  %v980_v41 = vpop.f32.mrf.mxu2  ;;  %7058 = vmatmul.msk.bf16.gmra.mxu1 %vm871_vm4, %v12410_v43  ;;  %v7676_v35 = vld [vmem:[%s7958_s17 + $0x84] sm:$0xf] }
 0x108   : > { %1042 = vst.msk [vmem:[#allocation2 + $0xe0] sm:$0xff] %vm1013_vm10, %v1003_v0  ;;  %v7039_v0 = vrot.slane %v7676_v35, 9 }
 0x109   : > { %7102 = vmatmul.msk.bf16.gmra.mxu3 %vm871_vm4, %v8965_v16  ;;  %1033 = vst.msk [vmem:[#allocation2 + $0x98] sm:$0xff] %vm1013_vm10, %v980_v41  ;;  %v7677_v41 = vld [vmem:[%s7958_s17 + $0x8c] sm:$0x7] }
 0x10a   : > { %v1165_v60 = vrot.slane %v7677_v41, 5  ;;  %v1163_v19 = vsel %vm8685_vm7, %v7039_v0, %v1162_v21  ;;  %v1659_v21 = vunpack.c.l.b16 %v1588_v37  ;;  %v1597_v50 = vrot.slane %v7677_v41, 6 }
 0x10b   : > { %v8991_v1 = vpop.f32.mrf.mxu1  ;;  %v1356_v57 = vunpack.c.l.b16 %v1163_v19  ;;  %v7679_v19 = vld [vmem:[%s7958_s17 + $0x90] sm:$0xf] }
 0x10c   : > { %v1166_v45 = vsel %vm8685_vm7, %v1164_v31, %v1165_v60 }
 0x10d   : > { %v1357_v62 = vunpack.c.l.b16 %v1166_v45  ;;  %v7040_v45 = vrot.slane %v7679_v19, 9 }
 0x10e   : > { %7070 = vmatmul.msk.bf16.gmra.mxu2 %vm871_vm4, %v8958_v42  ;;  %v1005_v40 = vpop.f32.mrf.mxu3 }
 0x10f   : > { %1043 = vst.msk [vmem:[#allocation2 + $0xe8] sm:$0xff] %vm1013_vm10, %v1005_v40  ;;  %v9030_v31 = vpack.c.b16 %v1357_v62, %v1356_v57  ;;  %v7680_v57 = vld [vmem:[%s7958_s17 + $0x98] sm:$0x7] }
 0x110   : > { %v1172_v62 = vrot.slane %v7680_v57, 5 }
 0x111   : > { %v983_v22 = vpop.f32.mrf.mxu2 }
 0x112   : > { %1034 = vst.msk [vmem:[#allocation2 + $0xa0] sm:$0xff] %vm1013_vm10, %v983_v22 }
 0x113   : > { %v953_v26 = vpop.f32.mrf.mxu0  ;;  %v9009_v10 = vpop.f32.mrf.mxu1 }
 0x114   : > { %1022 = vst.msk [vmem:[#allocation2 + $0x40] sm:$0xff] %vm1013_vm10, %v953_v26  ;;  %v1591_v26 = vsel %vm8713_vm9, %v1589_v4, %v1590_v58  ;;  %v1594_v58 = vrot.slane %v8997_v61, 6 }
 0x115   : > { %v1660_v0 = vunpack.c.l.b16 %v1591_v26 }
 0x116   : > { %7121 = vmatmul.msk.bf16.gmra.mxu0 %vm871_vm4, %v8994_v30  ;;  %v1596_v11 = vrot.slane %v1594_v58, 4 }
 0x117   : > { %7059 = vmatmul.msk.bf16.gmra.mxu1 %vm871_vm4, %v12411_v2  ;;  %v9037_v4 = vpack.c.b16 %v1660_v0, %v1659_v21  ;;  %v7686_v2 = vld [vmem:[%s7958_s17 + $0xa4] sm:$0x7] }
 0x118   : > { %v1611_v43 = vrot.slane %v7686_v2, 6 }
 0x119   : > { %7103 = vmatmul.msk.bf16.gmra.mxu3 %vm871_vm4, %v9002_v33  ;;  %v985_v14 = vpop.f32.mrf.mxu2 }
 0x11a   : > { %1035 = vst.msk [vmem:[#allocation2 + $0xa8] sm:$0xff] %vm1013_vm10, %v985_v14  ;;  %v9033_v14 = vld [vmem:[%s7958_s17 + $0x94] sm:$0xf] }
 0x11b   : > { %v955_v38 = vpop.f32.mrf.mxu0  ;;  %v9028_v22 = vpop.f32.mrf.mxu1  ;;  %v1169_v46 = vrot.slane %v9033_v14, 5 }
 0x11c   : > { %1023 = vst.msk [vmem:[#allocation2 + $0x48] sm:$0xff] %vm1013_vm10, %v955_v38  ;;  %v1008_v40 = vpop.f32.mrf.mxu3 }
 0x11d   : > { %1044 = vst.msk [vmem:[#allocation2 + $0xf0] sm:$0xff] %vm1013_vm10, %v1008_v40  ;;  %v1171_v40 = vrot.slane %v1169_v46, 4  ;;  %v1170_v61 = vsel %vm8685_vm7, %v7040_v45, %v1169_v46 }
 0x11e   : > { %7071 = vmatmul.msk.bf16.gmra.mxu2 %vm871_vm4, %v8994_v30  ;;  %v1358_v32 = vunpack.c.l.b16 %v1170_v61  ;;  %v12414_v61 = vld [vmem:[#allocation106_spill] sm:$0xff] }
 0x11f   : > { %v1173_v13 = vsel %vm8685_vm7, %v1171_v40, %v1172_v62 }
 0x121   : > { %v1446_v38 = vpop.f32.mrf.mxu2 }
 0x122   : > { %v1447_v37 = vadd.f32 %v1446_v38, %v8866_v39  ;;  %v1359_v39 = vunpack.c.l.b16 %v1173_v13  ;;  %v1598_v38 = vsel %vm8713_vm9, %v1596_v11, %v1597_v50  ;;  %v12415_v50 = vld [vmem:[#allocation105_spill] sm:$0xff] }
 0x123   : > { %v1893_v60 = vpop.f32.mrf.mxu0  ;;  %v1662_v40 = vunpack.c.l.b16 %v1598_v38 }
 0x124   : > { %v1010_v36 = vpop.f32.mrf.mxu3  ;;  %v9047_v26 = vpop.f32.mrf.mxu1  ;;  %v9064_v62 = vpack.c.b16 %v1359_v39, %v1358_v32  ;;  %v12416_v32 = vld [vmem:[#allocation108_spill] sm:$0xff] }
 0x125   : > { %1045 = vst.msk [vmem:[#allocation2 + $0xf8] sm:$0xff] %vm1013_vm10, %v1010_v36  ;;  %v7088_v36 = vrot.slane %v7676_v35, 10 }
 0x126   : > { %7122 = vmatmul.msk.bf16.gmra.mxu0 %vm871_vm4, %v9030_v31 }
 0x127   : > { %7060 = vmatmul.msk.bf16.gmra.mxu1 %vm871_vm4, %v12412_v55  ;;  %v1595_v35 = vsel %vm8713_vm9, %v7088_v36, %v1594_v58  ;;  %v1176_v58 = vrot.slane %v12414_v61, 5 }
 0x128   : > { %v1661_v45 = vunpack.c.l.b16 %v1595_v35 }
 0x129   : > { %7104 = vmatmul.msk.bf16.gmra.mxu3 %vm871_vm4, %v9037_v4  ;;  %v1448_v0 = vpop.f32.mrf.mxu2 }
 0x12a   : > { %v1449_v46 = vadd.f32 %v1448_v0, %v8887_v48  ;;  %v9069_v11 = vpack.c.b16 %v1662_v40, %v1661_v45  ;;  %v7041_v48 = vrot.slane %v12415_v50, 9  ;;  %v1179_v0 = vrot.slane %v12416_v32, 5 }
 0x12b   : > { %v1895_v21 = vpop.f32.mrf.mxu0 }
 0x12c   : > { %v1751_v8 = vpop.f32.mrf.mxu3 }
 0x12d   : > { %v1831_v20 = vadd.f32 %v1751_v8, %v1447_v37  ;;  %v9066_v8 = vpop.f32.mrf.mxu1 }
 0x12e   : > { %7072 = vmatmul.msk.bf16.gmra.mxu2 %vm871_vm4, %v9030_v31 }
 0x12f   : > { %v9061_v41 = vadd.f32 %v1893_v60, %v1831_v20  ;;  %v1601_v20 = vrot.slane %v9033_v14, 6  ;;  %v1178_v60 = vrot.slane %v1176_v58, 4  ;;  %v1177_v14 = vsel %vm8685_vm7, %v7041_v48, %v1176_v58 }
 0x131   : > { %12413 = vst [vmem:[#allocation131_spill] sm:$0xff] %v9061_v41  ;;  %v1451_v37 = vpop.f32.mrf.mxu2  ;;  %v1603_v61 = vrot.slane %v1601_v20, 4  ;;  %v1180_v50 = vsel %vm8685_vm7, %v1178_v60, %v1179_v0 }
 0x132   : > { %v1452_v35 = vadd.f32 %v1451_v37, %v8901_v5  ;;  %v1360_v5 = vunpack.c.l.b16 %v1177_v14  ;;  %v1361_v37 = vunpack.c.l.b16 %v1180_v50  ;;  %v9103_v50 = vld [vmem:[%s7958_s17 + $0xac] sm:$0xf] }
 0x133   : > { %v1898_v13 = vpop.f32.mrf.mxu0 }
 0x134   : > { %v1753_v36 = vpop.f32.mrf.mxu3 }
 0x135   : > { %v1832_v15 = vadd.f32 %v1753_v36, %v1449_v46  ;;  %v9081_v38 = vpop.f32.mrf.mxu1  ;;  %v7089_v46 = vrot.slane %v7679_v19, 10  ;;  %v1604_v36 = vrot.slane %v7680_v57, 6 }
 0x136   : > { %7123 = vmatmul.msk.bf16.gmra.mxu0 %vm871_vm4, %v9064_v62 }
 0x137   : > { %v9076_v39 = vadd.f32 %v1895_v21, %v1832_v15  ;;  %v12418_v21 = vld [vmem:[#allocation91_spill] sm:$0xff]  ;;  %v1602_v19 = vsel %vm8713_vm9, %v7089_v46, %v1601_v20  ;;  %v1605_v57 = vsel %vm8713_vm9, %v1603_v61, %v1604_v36  ;;  %v1183_v61 = vrot.slane %v9103_v50, 5 }
 0x138   : > { %7061 = vmatmul.msk.bf16.gmra.mxu1 %vm871_vm4, %v12418_v21  ;;  %v1663_v60 = vunpack.c.l.b16 %v1602_v19  ;;  %v1664_v0 = vunpack.c.l.b16 %v1605_v57  ;;  %v7684_v19 = vld [vmem:[%s7958_s17 + $0xb0] sm:$0x7] }
 0x139   : > { %12417 = vst [vmem:[#allocation106_spill] sm:$0xff] %v9076_v39  ;;  %7105 = vmatmul.msk.bf16.gmra.mxu3 %vm871_vm4, %v9069_v11  ;;  %v1453_v40 = vpop.f32.mrf.mxu2  ;;  %v1186_v57 = vrot.slane %v7684_v19, 5 }
 0x13a   : > { %v1454_v48 = vadd.f32 %v1453_v40, %v8920_v24  ;;  %v7682_v24 = vld [vmem:[%s7958_s17 + $0xa0] sm:$0xf] }
 0x13b   : > { %v1900_v45 = vpop.f32.mrf.mxu0  ;;  %v1608_v40 = vrot.slane %v7682_v24, 6 }
 0x13c   : > { %v1756_v15 = vpop.f32.mrf.mxu3 }
 0x13d   : > { %v1833_v32 = vadd.f32 %v1756_v15, %v1452_v35  ;;  %v9098_v35 = vpack.c.b16 %v1361_v37, %v1360_v5  ;;  %v9100_v14 = vpop.f32.mrf.mxu1  ;;  %v9112_v15 = vld [vmem:[%s7958_s17 + $0xa8] sm:$0xf]  ;;  %v1185_v37 = vrot.slane %v1183_v61, 4  ;;  %v1610_v29 = vrot.slane %v1608_v40, 4 }
 0x13e   : > { %7073 = vmatmul.msk.bf16.gmra.mxu2 %vm871_vm4, %v9064_v62  ;;  %v7042_v5 = vrot.slane %v9112_v15, 9 }
 0x13f   : > { %v9095_v58 = vadd.f32 %v1898_v13, %v1833_v32  ;;  %12420 = vst [vmem:[#allocation132_spill] sm:$0xff] %v9098_v35  ;;  %v9106_v32 = vpack.c.b16 %v1664_v0, %v1663_v60  ;;  %v7685_v0 = vld [vmem:[%s7958_s17 + $0x9c] sm:$0xf]  ;;  %v1612_v2 = vsel %vm8713_vm9, %v1610_v29, %v1611_v43 }
 0x141   : > { %12419 = vst [vmem:[#allocation105_spill] sm:$0xff] %v9095_v58  ;;  %v1456_v46 = vpop.f32.mrf.mxu2  ;;  %v1184_v58 = vsel %vm8685_vm7, %v7042_v5, %v1183_v61 }
 0x143   : > { %v1903_v20 = vpop.f32.mrf.mxu0 }
 0x144   : > { %v1758_v36 = vpop.f32.mrf.mxu3 }
 0x145   : > { %v1834_v13 = vadd.f32 %v1758_v36, %v1454_v48  ;;  %v1457_v48 = vadd.f32 %v1456_v46, %v8937_v34  ;;  %v9121_v60 = vpop.f32.mrf.mxu1  ;;  %v7090_v36 = vrot.slane %v7685_v0, 10  ;;  %v1362_v46 = vunpack.c.l.b16 %v1184_v58 }
 0x146   : > { %7124 = vmatmul.msk.bf16.gmra.mxu0 %vm871_vm4, %v9098_v35 }
 0x147   : > { %v9116_v21 = vadd.f32 %v1900_v45, %v1834_v13  ;;  %v1187_v45 = vsel %vm8685_vm7, %v1185_v37, %v1186_v57  ;;  %v1609_v0 = vsel %vm8713_vm9, %v7090_v36, %v1608_v40  ;;  %v1666_v57 = vunpack.c.l.b16 %v1612_v2  ;;  %v9145_v36 = vld [vmem:[%s7958_s17 + $0xb8] sm:$0xf] }
 0x148   : > { %v1363_v39 = vunpack.c.l.b16 %v1187_v45  ;;  %v1665_v37 = vunpack.c.l.b16 %v1609_v0  ;;  %v1190_v29 = vrot.slane %v9145_v36, 5 }
 0x149   : > { %12421 = vst [vmem:[#allocation133_spill] sm:$0xff] %v9116_v21  ;;  %7106 = vmatmul.msk.bf16.gmra.mxu3 %vm871_vm4, %v9106_v32  ;;  %v1458_v24 = vpop.f32.mrf.mxu2  ;;  %v12422_v21 = vld [vmem:[#allocation116_spill] sm:$0xff] }
 0x14a   : > { %7062 = vmatmul.msk.bf16.gmra.mxu1 %vm871_vm4, %v12422_v21  ;;  %v1459_v5 = vadd.f32 %v1458_v24, %v8955_v17  ;;  %v9148_v21 = vpack.c.b16 %v1666_v57, %v1665_v37  ;;  %v1615_v17 = vrot.slane %v9103_v50, 6  ;;  %v1192_v24 = vrot.slane %v1190_v29, 4 }
 0x14b   : > { %v1905_v55 = vpop.f32.mrf.mxu0  ;;  %v7091_v37 = vrot.slane %v9112_v15, 10  ;;  %v1618_v50 = vrot.slane %v7684_v19, 6 }
 0x14c   : > { %v1761_v13 = vpop.f32.mrf.mxu3 }
 0x14d   : > { %v1835_v34 = vadd.f32 %v1761_v13, %v1457_v48  ;;  %v9140_v48 = vpack.c.b16 %v1363_v39, %v1362_v46  ;;  %v9142_v58 = vpop.f32.mrf.mxu1  ;;  %v1616_v15 = vsel %vm8713_vm9, %v7091_v37, %v1615_v17  ;;  %v9183_v37 = vld [vmem:[%s7958_s17 + $0xc4] sm:$0xf] }
 0x14e   : > { %7074 = vmatmul.msk.bf16.gmra.mxu2 %vm871_vm4, %v9098_v35 }
 0x14f   : > { %v9137_v61 = vadd.f32 %v1903_v20, %v1835_v34  ;;  %12424 = vst [vmem:[#allocation135_spill] sm:$0xff] %v9140_v48  ;;  %v7688_v20 = vld [vmem:[%s7958_s17 + $0xb4] sm:$0xf]  ;;  %v7689_v34 = vld [vmem:[%s7958_s17 + $0xbc] sm:$0x7] }
 0x150   : > { %v7043_v39 = vrot.slane %v7688_v20, 9  ;;  %v1193_v46 = vrot.slane %v7689_v34, 5 }
 0x151   : > { %12423 = vst [vmem:[#allocation134_spill] sm:$0xff] %v9137_v61  ;;  %v1461_v40 = vpop.f32.mrf.mxu2  ;;  %v1617_v61 = vrot.slane %v1615_v17, 4 }
 0x152   : > { %v1462_v2 = vadd.f32 %v1461_v40, %v8972_v51  ;;  %v1191_v35 = vsel %vm8685_vm7, %v7043_v39, %v1190_v29 }
 0x153   : > { %v1908_v45 = vpop.f32.mrf.mxu0  ;;  %v1364_v40 = vunpack.c.l.b16 %v1191_v35  ;;  %v1619_v19 = vsel %vm8713_vm9, %v1617_v61, %v1618_v50  ;;  %v1197_v61 = vrot.slane %v9183_v37, 5 }
 0x154   : > { %v1763_v43 = vpop.f32.mrf.mxu3 }
 0x155   : > { %v1836_v13 = vadd.f32 %v1763_v43, %v1459_v5  ;;  %v9160_v5 = vpop.f32.mrf.mxu1 }
 0x156   : > { %7125 = vmatmul.msk.bf16.gmra.mxu0 %vm871_vm4, %v9140_v48 }
 0x157   : > { %v9155_v0 = vadd.f32 %v1905_v55, %v1836_v13  ;;  %v1194_v55 = vsel %vm8685_vm7, %v1192_v24, %v1193_v46  ;;  %v1667_v24 = vunpack.c.l.b16 %v1616_v15 }
 0x159   : > { %12425 = vst [vmem:[#allocation136_spill] sm:$0xff] %v9155_v0  ;;  %7107 = vmatmul.msk.bf16.gmra.mxu3 %vm871_vm4, %v9148_v21  ;;  %v1463_v43 = vpop.f32.mrf.mxu2  ;;  %v1365_v0 = vunpack.c.l.b16 %v1194_v55 }
 0x15a   : > { %7132 = vmatmul.msk.bf16.vlgmr.msra.gmra.mxu1 %vm871_vm4, %v8793_v28  ;;  %v1464_v39 = vadd.f32 %v1463_v43, %v8991_v1  ;;  %v1668_v28 = vunpack.c.l.b16 %v1619_v19  ;;  %v1622_v1 = vrot.slane %v9145_v36, 6  ;;  %v1199_v43 = vrot.slane %v1197_v61, 4 }
 0x15b   : > { %v1910_v57 = vpop.f32.mrf.mxu0  ;;  %v9178_v46 = vpack.c.b16 %v1365_v0, %v1364_v40 }
 0x15c   : > { %v1766_v13 = vpop.f32.mrf.mxu3 }
 0x15d   : > { %v1837_v51 = vadd.f32 %v1766_v13, %v1462_v2  ;;  %12427 = vst [vmem:[#allocation138_spill] sm:$0xff] %v9178_v46  ;;  %v9180_v35 = vpop.f32.mrf.mxu1  ;;  %v9186_v13 = vpack.c.b16 %v1668_v28, %v1667_v24  ;;  %v7092_v24 = vrot.slane %v7688_v20, 10 }
 0x15e   : > { %7075 = vmatmul.msk.bf16.gmra.mxu2 %vm871_vm4, %v9140_v48  ;;  %v1625_v48 = vrot.slane %v7689_v34, 6 }
 0x15f   : > { %v9175_v29 = vadd.f32 %v1908_v45, %v1837_v51  ;;  %v7691_v45 = vld [vmem:[%s7958_s17 + $0xc0] sm:$0xf]  ;;  %v7692_v51 = vld [vmem:[%s7958_s17 + $0xc8] sm:$0x7]  ;;  %v1623_v20 = vsel %vm8713_vm9, %v7092_v24, %v1622_v1  ;;  %v9220_v24 = vld [vmem:[%s7958_s17 + $0xd0] sm:$0xf] }
 0x160   : > { %v7044_v0 = vrot.slane %v7691_v45, 9  ;;  %v1200_v40 = vrot.slane %v7692_v51, 5 }
 0x161   : > { %12426 = vst [vmem:[#allocation137_spill] sm:$0xff] %v9175_v29  ;;  %v1466_v17 = vpop.f32.mrf.mxu2  ;;  %v1624_v29 = vrot.slane %v1622_v1, 4 }
 0x162   : > { %v1467_v19 = vadd.f32 %v1466_v17, %v9009_v10  ;;  %v1198_v36 = vsel %vm8685_vm7, %v7044_v0, %v1197_v61  ;;  %v1201_v7 = vsel %vm8685_vm7, %v1199_v43, %v1200_v40  ;;  %v1669_v43 = vunpack.c.l.b16 %v1623_v20 }
 0x163   : > { %v1913_v2 = vpop.f32.mrf.mxu0  ;;  %v1366_v10 = vunpack.c.l.b16 %v1198_v36  ;;  %v1367_v17 = vunpack.c.l.b16 %v1201_v7  ;;  %v1626_v34 = vsel %vm8713_vm9, %v1624_v29, %v1625_v48  ;;  %v1204_v48 = vrot.slane %v9220_v24, 5 }
 0x164   : > { %v1768_v50 = vpop.f32.mrf.mxu3  ;;  %v1670_v40 = vunpack.c.l.b16 %v1626_v34 }
 0x165   : > { %v1838_v55 = vadd.f32 %v1768_v50, %v1464_v39  ;;  %v9198_v39 = vpop.f32.mrf.mxu1 }
 0x166   : > { %7126 = vmatmul.msk.bf16.gmra.mxu0 %vm871_vm4, %v9178_v46 }
 0x167   : > { %v9193_v15 = vadd.f32 %v1910_v57, %v1838_v55 }
 0x169   : > { %12428 = vst [vmem:[#allocation139_spill] sm:$0xff] %v9193_v15  ;;  %7108 = vmatmul.msk.bf16.gmra.mxu3 %vm871_vm4, %v9186_v13  ;;  %v1468_v50 = vpop.f32.mrf.mxu2  ;;  %v9223_v15 = vpack.c.b16 %v1670_v40, %v1669_v43  ;;  %v7093_v43 = vrot.slane %v7691_v45, 10 }
 0x16a   : > { %7133 = vmatmul.msk.bf16.gmra.mxu1 %vm871_vm4, %v8830_v3  ;;  %v1469_v0 = vadd.f32 %v1468_v50, %v9028_v22  ;;  %v1629_v22 = vrot.slane %v9183_v37, 6 }
 0x16b   : > { %v1915_v28 = vpop.f32.mrf.mxu0 }
 0x16c   : > { %v1771_v57 = vpop.f32.mrf.mxu3  ;;  %v1630_v45 = vsel %vm8713_vm9, %v7093_v43, %v1629_v22  ;;  %v9263_v43 = vld [vmem:[%s7958_s17 + $0xdc] sm:$0xf] }
 0x16d   : > { %v1839_v55 = vadd.f32 %v1771_v57, %v1467_v19  ;;  %v9215_v19 = vpack.c.b16 %v1367_v17, %v1366_v10  ;;  %v9217_v7 = vpop.f32.mrf.mxu1  ;;  %v9233_v10 = vld [vmem:[%s7958_s17 + $0xd4] sm:$0x7] }
 0x16e   : > { %7076 = vmatmul.msk.bf16.gmra.mxu2 %vm871_vm4, %v9178_v46  ;;  %v1207_v17 = vrot.slane %v9233_v10, 5 }
 0x16f   : > { %v9212_v61 = vadd.f32 %v1913_v2, %v1839_v55  ;;  %12430 = vst [vmem:[#allocation141_spill] sm:$0xff] %v9215_v19  ;;  %v9229_v2 = vld [vmem:[%s7958_s17 + $0xcc] sm:$0xf]  ;;  %v1206_v55 = vrot.slane %v1204_v48, 4 }
 0x170   : > { %v7045_v50 = vrot.slane %v9229_v2, 9 }
 0x171   : > { %12429 = vst [vmem:[#allocation140_spill] sm:$0xff] %v9212_v61  ;;  %v1471_v1 = vpop.f32.mrf.mxu2  ;;  %v1632_v61 = vrot.slane %v7692_v51, 6  ;;  %v1208_v41 = vsel %vm8685_vm7, %v1206_v55, %v1207_v17  ;;  %v1671_v55 = vunpack.c.l.b16 %v1630_v45 }
 0x172   : > { %v1472_v34 = vadd.f32 %v1471_v1, %v9047_v26  ;;  %v1205_v46 = vsel %vm8685_vm7, %v7045_v50, %v1204_v48  ;;  %v1369_v1 = vunpack.c.l.b16 %v1208_v41 }
 0x173   : > { %v1918_v36 = vpop.f32.mrf.mxu0  ;;  %v1368_v26 = vunpack.c.l.b16 %v1205_v46 }
 0x174   : > { %v1773_v29 = vpop.f32.mrf.mxu3 }
 0x175   : > { %v1840_v57 = vadd.f32 %v1773_v29, %v1469_v0  ;;  %v9241_v0 = vpop.f32.mrf.mxu1  ;;  %v1631_v29 = vrot.slane %v1629_v22, 4 }
 0x176   : > { %7127 = vmatmul.msk.bf16.gmra.mxu0 %vm871_vm4, %v9215_v19 }
 0x177   : > { %v9236_v20 = vadd.f32 %v1915_v28, %v1840_v57  ;;  %v1633_v51 = vsel %vm8713_vm9, %v1631_v29, %v1632_v61  ;;  %v1868_v61 = vrot.slane %v9263_v43, 5 }
 0x178   : > { %v1672_v17 = vunpack.c.l.b16 %v1633_v51  ;;  %v7094_v51 = vrot.slane %v9229_v2, 10 }
 0x179   : > { %12431 = vst [vmem:[#allocation142_spill] sm:$0xff] %v9236_v20  ;;  %7109 = vmatmul.msk.bf16.gmra.mxu3 %vm871_vm4, %v9223_v15  ;;  %v1473_v40 = vpop.f32.mrf.mxu2 }
 0x17a   : > { %7134 = vmatmul.msk.bf16.gmra.mxu1 %vm871_vm4, %v8859_v12  ;;  %v1474_v50 = vadd.f32 %v1473_v40, %v9066_v8  ;;  %v9266_v20 = vpack.c.b16 %v1672_v17, %v1671_v55  ;;  %v1636_v8 = vrot.slane %v9220_v24, 6  ;;  %v1639_v17 = vrot.slane %v9233_v10, 6 }
 0x17b   : > { %v1920_v37 = vpop.f32.mrf.mxu0 }
 0x17c   : > { %v1776_v28 = vpop.f32.mrf.mxu3  ;;  %v1638_v24 = vrot.slane %v1636_v8, 4 }
 0x17d   : > { %v1841_v57 = vadd.f32 %v1776_v28, %v1472_v34  ;;  %v9258_v34 = vpack.c.b16 %v1369_v1, %v1368_v26  ;;  %v9260_v41 = vpop.f32.mrf.mxu1  ;;  %v9276_v26 = vld [vmem:[%s7958_s17 + $0xe0] sm:$0x7] }
 0x17e   : > { %7077 = vmatmul.msk.bf16.gmra.mxu2 %vm871_vm4, %v9215_v19  ;;  %12434 = vst [vmem:[#allocation145_spill] sm:$0xff] %v9276_v26  ;;  %v1871_v1 = vrot.slane %v9276_v26, 5 }
 0x17f   : > { %v9255_v48 = vadd.f32 %v1918_v36, %v1841_v57  ;;  %v9272_v36 = vld [vmem:[%s7958_s17 + $0xd8] sm:$0xf]  ;;  %v1870_v57 = vrot.slane %v1868_v61, 4 }
 0x180   : > { %12433 = vst [vmem:[#allocation144_spill] sm:$0xff] %v9272_v36  ;;  %v7112_v40 = vrot.slane %v9272_v36, 9 }
 0x181   : > { %12432 = vst [vmem:[#allocation143_spill] sm:$0xff] %v9255_v48  ;;  %v1476_v22 = vpop.f32.mrf.mxu2 }
 0x183   : > { %v1923_v46 = vpop.f32.mrf.mxu0 }
 0x184   : > { %v1778_v29 = vpop.f32.mrf.mxu3 }
 0x185   : > { %v1842_v28 = vadd.f32 %v1778_v29, %v1474_v50  ;;  %v1477_v50 = vadd.f32 %v1476_v22, %v9081_v38  ;;  %v9285_v55 = vpop.f32.mrf.mxu1  ;;  %v7201_v29 = vld [vmem:[%s11985_s2 + $0x10] sm:$0x3]  ;;  %v1872_v38 = vsel %vm8685_vm7, %v1870_v57, %v1871_v1  ;;  %v1637_v57 = vsel %vm8713_vm9, %v7094_v51, %v1636_v8 }
 0x186   : > { %7128 = vmatmul.msk.bf16.gmra.mxu0 %vm871_vm4, %v9258_v34  ;;  %v3216_v22 = vsel %vm920_vm0, %v7201_v29, 0  ;;  %v1876_v36 = vunpack.c.l.b16 %v1872_v38  ;;  %v1640_v1 = vsel %vm8713_vm9, %v1638_v24, %v1639_v17 }
 0x187   : > { %v9279_v45 = vadd.f32 %v1920_v37, %v1842_v28  ;;  %v7235_v37 = vld [vmem:[%s11985_s2 + $0x14] sm:$0x3]  ;;  %3225 = vmatpush.bf16.msrb.mxu2 %v3216_v22  ;;  %v1674_v38 = vunpack.c.l.b16 %v1640_v1 }
 0x188   : > { %v3617_v10 = vsel %vm920_vm0, %v7235_v37, 0  ;;  %v1673_v37 = vunpack.c.l.b16 %v1637_v57 }
 0x189   : > { %12435 = vst [vmem:[#allocation146_spill] sm:$0xff] %v9279_v45  ;;  %7110 = vmatmul.msk.bf16.gmra.mxu3 %vm871_vm4, %v9266_v20  ;;  %v1478_v2 = vpop.f32.mrf.mxu2  ;;  %v1869_v45 = vsel %vm8685_vm7, %v7112_v40, %v1868_v61  ;;  %v7202_v61 = vld [vmem:[%s11985_s2 + $0x12] sm:$0x3]  ;;  %v7252_v40 = vld [vmem:[%s11985_s2 + $0x16] sm:$0x3] }
 0x18a   : > { %3626 = vmatpush.bf16.msrb.mxu3 %v3617_v10  ;;  %7135 = vmatmul.msk.bf16.gmra.mxu1 %vm871_vm4, %v8894_v44  ;;  %v1875_v26 = vunpack.c.l.b16 %v1869_v45  ;;  %v3028_v29 = vsel %vm920_vm0, %v7202_v61, 0  ;;  %v9323_v61 = vpack.c.b16 %v1674_v38, %v1673_v37  ;;  %v12436_v38 = vld [vmem:[#allocation73_spill] sm:$0xff] }
 0x18b   : > { %v1925_v28 = vpop.f32.mrf.mxu0  ;;  %3037 = vmatpush.bf16.msrb.mxu1 %v3028_v29 }
 0x18c   : > { %v1781_v48 = vpop.f32.mrf.mxu3  ;;  %v9319_v22 = vpack.c.b16 %v1876_v36, %v1875_v26 }
 0x18d   : > { %v1843_v19 = vadd.f32 %v1781_v48, %v1477_v50  ;;  %v3777_v48 = vsel %vm920_vm0, %v7252_v40, 0  ;;  %v1479_v50 = vadd.f32 %v1478_v2, %v9100_v14  ;;  %v9321_v8 = vpop.f32.mrf.mxu1 }
 0x18e   : > { %7078 = vmatmul.msk.bf16.gmra.mxu2 %vm871_vm4, %v9258_v34  ;;  %3786 = vmatpush.bf16.msrb.mxu0 %v3777_v48 }
 0x18f   : > { %v9316_v45 = vadd.f32 %v1923_v46, %v1843_v19 }
 0x191   : > { %v1481_v24 = vpop.f32.mrf.mxu2 }
 0x192   : > { %v1482_v14 = vadd.f32 %v1481_v24, %v9121_v60 }
 0x193   : > { %v1928_v51 = vpop.f32.mrf.mxu0 }
 0x194   : > { %v1783_v17 = vpop.f32.mrf.mxu3 }
 0x195   : > { %v1844_v10 = vadd.f32 %v1783_v17, %v1479_v50  ;;  %v9332_v46 = vpop.f32.mrf.mxu1 }
 0x196   : > { %7129 = vmatmul.msk.bf16.gmra.mxu0 %vm871_vm4, %v9319_v22 }
 0x197   : > { %v9327_v19 = vadd.f32 %v1925_v28, %v1844_v10 }
 0x199   : > { %7111 = vmatmul.msk.bf16.gmra.mxu3 %vm871_vm4, %v9323_v61  ;;  %v1483_v26 = vpop.f32.mrf.mxu2 }
 0x19a   : > { %7136 = vmatmul.msk.bf16.gmra.mxu1 %vm871_vm4, %v8930_v6  ;;  %v1484_v28 = vadd.f32 %v1483_v26, %v9142_v58 }
 0x19b   : > { %v1930_v36 = vpop.f32.mrf.mxu0 }
 0x19c   : > { %v1786_v2 = vpop.f32.mrf.mxu3 }
 0x19d   : > { %v1845_v40 = vadd.f32 %v1786_v2, %v1482_v14  ;;  %v9341_v1 = vpop.f32.mrf.mxu1 }
 0x19e   : > { %7150 = vmatmul.msk.bf16.vlgmr.msra.gmra.mxu2 %vm871_vm4, %v8786_v25 }
 0x19f   : > { %v9338_v57 = vadd.f32 %v1928_v51, %v1845_v40 }
 0x1a1   : > { %v1486_v60 = vpop.f32.mrf.mxu2 }
 0x1a2   : > { %v1487_v25 = vadd.f32 %v1486_v60, %v9160_v5  ;;  %v12437_v60 = vld [vmem:[#allocation95_spill] sm:$0xff] }
 0x1a3   : > { %v1933_v29 = vpop.f32.mrf.mxu0 }
 0x1a4   : > { %v1788_v48 = vpop.f32.mrf.mxu3 }
 0x1a5   : > { %v1846_v50 = vadd.f32 %v1788_v48, %v1484_v28  ;;  %v9350_v51 = vpop.f32.mrf.mxu1 }
 0x1a6   : > { %7185 = vmatmul.msk.bf16.vlgmr.msra.gmra.mxu0 %vm871_vm4, %v8830_v3 }
 0x1a7   : > { %v9345_v37 = vadd.f32 %v1930_v36, %v1846_v50 }
 0x1a9   : > { %7167 = vmatmul.msk.bf16.vlgmr.msra.gmra.mxu3 %vm871_vm4, %v12436_v38  ;;  %v1488_v58 = vpop.f32.mrf.mxu2 }
 0x1aa   : > { %7137 = vmatmul.msk.bf16.gmra.mxu1 %vm871_vm4, %v8965_v16  ;;  %v1489_v14 = vadd.f32 %v1488_v58, %v9180_v35 }
 0x1ab   : > { %v1935_v24 = vpop.f32.mrf.mxu0 }
 0x1ac   : > { %v1791_v17 = vpop.f32.mrf.mxu3 }
 0x1ad   : > { %v1847_v10 = vadd.f32 %v1791_v17, %v1487_v25  ;;  %v9359_v36 = vpop.f32.mrf.mxu1 }
 0x1ae   : > { %7151 = vmatmul.msk.bf16.gmra.mxu2 %vm871_vm4, %v8824_v53 }
 0x1af   : > { %v9356_v3 = vadd.f32 %v1933_v29, %v1847_v10 }
 0x1b1   : > { %v1491_v5 = vpop.f32.mrf.mxu2 }
 0x1b2   : > { %v1492_v53 = vadd.f32 %v1491_v5, %v9198_v39 }
 0x1b3   : > { %v1938_v26 = vpop.f32.mrf.mxu0 }
 0x1b4   : > { %v1793_v2 = vpop.f32.mrf.mxu3 }
 0x1b5   : > { %v1848_v40 = vadd.f32 %v1793_v2, %v1489_v14  ;;  %v9368_v29 = vpop.f32.mrf.mxu1 }
 0x1b6   : > { %7186 = vmatmul.msk.bf16.gmra.mxu0 %vm871_vm4, %v8859_v12 }
 0x1b7   : > { %v9363_v28 = vadd.f32 %v1935_v24, %v1848_v40 }
 0x1b9   : > { %7168 = vmatmul.msk.bf16.gmra.mxu3 %vm871_vm4, %v12437_v60  ;;  %v1493_v35 = vpop.f32.mrf.mxu2 }
 0x1ba   : > { %7138 = vmatmul.msk.bf16.gmra.mxu1 %vm871_vm4, %v9002_v33  ;;  %v1494_v24 = vadd.f32 %v1493_v35, %v9217_v7 }
 0x1bb   : > { %v1940_v48 = vpop.f32.mrf.mxu0 }
 0x1bc   : > { %v1796_v50 = vpop.f32.mrf.mxu3 }
 0x1bd   : > { %v1849_v25 = vadd.f32 %v1796_v50, %v1492_v53  ;;  %v9377_v58 = vpop.f32.mrf.mxu1 }
 0x1be   : > { %7152 = vmatmul.msk.bf16.gmra.mxu2 %vm871_vm4, %v8855_v63 }
 0x1bf   : > { %v9374_v12 = vadd.f32 %v1938_v26, %v1849_v25 }
 0x1c1   : > { %v1496_v39 = vpop.f32.mrf.mxu2 }
 0x1c2   : > { %v1497_v63 = vadd.f32 %v1496_v39, %v9241_v0 }
 0x1c3   : > { %v1943_v17 = vpop.f32.mrf.mxu0 }
 0x1c4   : > { %v1798_v10 = vpop.f32.mrf.mxu3 }
 0x1c5   : > { %v1850_v14 = vadd.f32 %v1798_v10, %v1494_v24 }
 0x1c6   : > { %7187 = vmatmul.msk.bf16.gmra.mxu0 %vm871_vm4, %v8894_v44 }
 0x1c7   : > { %v9381_v5 = vadd.f32 %v1940_v48, %v1850_v14  ;;  %v9386_v26 = vpop.f32.mrf.mxu1 }
 0x1c9   : > { %7169 = vmatmul.msk.bf16.gmra.mxu3 %vm871_vm4, %v8551_v47  ;;  %v1498_v7 = vpop.f32.mrf.mxu2 }
 0x1ca   : > { %7139 = vmatmul.msk.bf16.gmra.mxu1 %vm871_vm4, %v9037_v4  ;;  %v1499_v48 = vadd.f32 %v1498_v7, %v9260_v41 }
 0x1cb   : > { %v1945_v2 = vpop.f32.mrf.mxu0 }
 0x1cc   : > { %v1801_v40 = vpop.f32.mrf.mxu3 }
 0x1cd   : > { %v1851_v53 = vadd.f32 %v1801_v40, %v1497_v63 }
 0x1ce   : > { %7153 = vmatmul.msk.bf16.gmra.mxu2 %vm871_vm4, %v8890_v59 }
 0x1cf   : > { %v9392_v44 = vadd.f32 %v1943_v17, %v1851_v53  ;;  %v9395_v35 = vpop.f32.mrf.mxu1 }
 0x1d1   : > { %v1501_v0 = vpop.f32.mrf.mxu2 }
 0x1d2   : > { %v1502_v59 = vadd.f32 %v1501_v0, %v9285_v55 }
 0x1d3   : > { %v1948_v50 = vpop.f32.mrf.mxu0 }
 0x1d4   : > { %v1803_v25 = vpop.f32.mrf.mxu3 }
 0x1d5   : > { %v1852_v24 = vadd.f32 %v1803_v25, %v1499_v48 }
 0x1d6   : > { %7188 = vmatmul.msk.bf16.gmra.mxu0 %vm871_vm4, %v8930_v6 }
 0x1d7   : > { %v9399_v39 = vadd.f32 %v1945_v2, %v1852_v24  ;;  %v9404_v17 = vpop.f32.mrf.mxu1 }
 0x1d9   : > { %7170 = vmatmul.msk.bf16.gmra.mxu3 %vm871_vm4, %v8674_v23  ;;  %v1503_v41 = vpop.f32.mrf.mxu2 }
 0x1da   : > { %7140 = vmatmul.msk.bf16.gmra.mxu1 %vm871_vm4, %v9069_v11  ;;  %v1504_v2 = vadd.f32 %v1503_v41, %v9321_v8 }
 0x1db   : > { %v1950_v10 = vpop.f32.mrf.mxu0 }
 0x1dc   : > { %v1806_v14 = vpop.f32.mrf.mxu3 }
 0x1dd   : > { %v1853_v63 = vadd.f32 %v1806_v14, %v1502_v59 }
 0x1de   : > { %7154 = vmatmul.msk.bf16.gmra.mxu2 %vm871_vm4, %v8923_v49 }
 0x1df   : > { %v9410_v6 = vadd.f32 %v1948_v50, %v1853_v63  ;;  %v9413_v7 = vpop.f32.mrf.mxu1 }
 0x1e1   : > { %v1506_v55 = vpop.f32.mrf.mxu2 }
 0x1e2   : > { %v1507_v49 = vadd.f32 %v1506_v55, %v9332_v46 }
 0x1e3   : > { %v1953_v40 = vpop.f32.mrf.mxu0 }
 0x1e4   : > { %v1808_v53 = vpop.f32.mrf.mxu3 }
 0x1e5   : > { %v1854_v48 = vadd.f32 %v1808_v53, %v1504_v2 }
 0x1e6   : > { %7189 = vmatmul.msk.bf16.gmra.mxu0 %vm871_vm4, %v8965_v16 }
 0x1e7   : > { %v9417_v0 = vadd.f32 %v1950_v10, %v1854_v48  ;;  %v9422_v50 = vpop.f32.mrf.mxu1 }
 0x1e9   : > { %12438 = vst [vmem:[#allocation147_spill] sm:$0xff] %v9417_v0  ;;  %7171 = vmatmul.msk.bf16.gmra.mxu3 %vm871_vm4, %v8034_v54  ;;  %v1508_v8 = vpop.f32.mrf.mxu2 }
 0x1ea   : > { %7141 = vmatmul.msk.bf16.gmra.mxu1 %vm871_vm4, %v9106_v32  ;;  %v1509_v10 = vadd.f32 %v1508_v8, %v9341_v1 }
 0x1eb   : > { %v1955_v25 = vpop.f32.mrf.mxu0 }
 0x1ec   : > { %v1811_v24 = vpop.f32.mrf.mxu3 }
 0x1ed   : > { %v1855_v59 = vadd.f32 %v1811_v24, %v1507_v49 }
 0x1ee   : > { %7155 = vmatmul.msk.bf16.gmra.mxu2 %vm871_vm4, %v8958_v42 }
 0x1ef   : > { %v9428_v16 = vadd.f32 %v1953_v40, %v1855_v59  ;;  %v9431_v41 = vpop.f32.mrf.mxu1 }
 0x1f1   : > { %12439 = vst [vmem:[#allocation148_spill] sm:$0xff] %v9428_v16  ;;  %v1511_v46 = vpop.f32.mrf.mxu2 }
 0x1f2   : > { %v1512_v42 = vadd.f32 %v1511_v46, %v9350_v51 }
 0x1f3   : > { %v1958_v14 = vpop.f32.mrf.mxu0 }
 0x1f4   : > { %v1813_v63 = vpop.f32.mrf.mxu3 }
 0x1f5   : > { %v1856_v2 = vadd.f32 %v1813_v63, %v1509_v10 }
 0x1f6   : > { %7190 = vmatmul.msk.bf16.gmra.mxu0 %vm871_vm4, %v9002_v33 }
 0x1f7   : > { %v9435_v55 = vadd.f32 %v1955_v25, %v1856_v2  ;;  %v9440_v40 = vpop.f32.mrf.mxu1 }
 0x1f9   : > { %12440 = vst [vmem:[#allocation149_spill] sm:$0xff] %v9435_v55  ;;  %7172 = vmatmul.msk.bf16.gmra.mxu3 %vm871_vm4, %v8071_v18  ;;  %v1513_v1 = vpop.f32.mrf.mxu2 }
 0x1fa   : > { %7142 = vmatmul.msk.bf16.gmra.mxu1 %vm871_vm4, %v9148_v21  ;;  %v1514_v25 = vadd.f32 %v1513_v1, %v9359_v36 }
 0x1fb   : > { %v1960_v53 = vpop.f32.mrf.mxu0 }
 0x1fc   : > { %v1816_v48 = vpop.f32.mrf.mxu3 }
 0x1fd   : > { %v1857_v49 = vadd.f32 %v1816_v48, %v1512_v42 }
 0x1fe   : > { %7156 = vmatmul.msk.bf16.gmra.mxu2 %vm871_vm4, %v8994_v30 }
 0x1ff   : > { %v9446_v33 = vadd.f32 %v1958_v14, %v1857_v49  ;;  %v9449_v8 = vpop.f32.mrf.mxu1 }
 0x201   : > { %12441 = vst [vmem:[#allocation150_spill] sm:$0xff] %v9446_v33  ;;  %v1516_v51 = vpop.f32.mrf.mxu2  ;;  %v12458_v33 = vld [vmem:[#allocation36_spill] sm:$0xff] }
 0x202   : > { %v1517_v30 = vadd.f32 %v1516_v51, %v9368_v29 }
 0x203   : > { %v1963_v24 = vpop.f32.mrf.mxu0 }
 0x204   : > { %v1818_v59 = vpop.f32.mrf.mxu3 }
 0x205   : > { %v1858_v10 = vadd.f32 %v1818_v59, %v1514_v25 }
 0x206   : > { %7191 = vmatmul.msk.bf16.gmra.mxu0 %vm871_vm4, %v9037_v4 }
 0x207   : > { %v9453_v46 = vadd.f32 %v1960_v53, %v1858_v10  ;;  %v9458_v14 = vpop.f32.mrf.mxu1 }
 0x209   : > { %12442 = vst [vmem:[#allocation151_spill] sm:$0xff] %v9453_v46  ;;  %7173 = vmatmul.msk.bf16.gmra.mxu3 %vm871_vm4, %v12407_v27  ;;  %v1518_v36 = vpop.f32.mrf.mxu2 }
 0x20a   : > { %7143 = vmatmul.msk.bf16.gmra.mxu1 %vm871_vm4, %v9186_v13  ;;  %v1519_v53 = vadd.f32 %v1518_v36, %v9377_v58 }
 0x20b   : > { %v1965_v63 = vpop.f32.mrf.mxu0 }
 0x20c   : > { %v1821_v2 = vpop.f32.mrf.mxu3 }
 0x20d   : > { %v1859_v42 = vadd.f32 %v1821_v2, %v1517_v30 }
 0x20e   : > { %7157 = vmatmul.msk.bf16.gmra.mxu2 %vm871_vm4, %v9030_v31 }
 0x20f   : > { %v9464_v4 = vadd.f32 %v1963_v24, %v1859_v42  ;;  %v9467_v1 = vpop.f32.mrf.mxu1 }
 0x211   : > { %12443 = vst [vmem:[#allocation152_spill] sm:$0xff] %v9464_v4  ;;  %v1521_v29 = vpop.f32.mrf.mxu2 }
 0x212   : > { %v1522_v31 = vadd.f32 %v1521_v29, %v9386_v26  ;;  %v12446_v29 = vld [vmem:[#allocation131_spill] sm:$0xff] }
 0x213   : > { %v1968_v48 = vpop.f32.mrf.mxu0 }
 0x214   : > { %v1823_v49 = vpop.f32.mrf.mxu3 }
 0x215   : > { %v1860_v25 = vadd.f32 %v1823_v49, %v1519_v53  ;;  %v2112_v49 = vadd.f32 %v9404_v17, %v12446_v29  ;;  %v12450_v17 = vld [vmem:[#allocation132_spill] sm:$0xff] }
 0x216   : > { %7192 = vmatmul.msk.bf16.gmra.mxu0 %vm871_vm4, %v9069_v11 }
 0x217   : > { %v9471_v51 = vadd.f32 %v1965_v63, %v1860_v25  ;;  %v9476_v24 = vpop.f32.mrf.mxu1 }
 0x219   : > { %12444 = vst [vmem:[#allocation153_spill] sm:$0xff] %v9471_v51  ;;  %7174 = vmatmul.msk.bf16.gmra.mxu3 %vm871_vm4, %v12408_v52  ;;  %v1523_v58 = vpop.f32.mrf.mxu2 }
 0x21a   : > { %7144 = vmatmul.msk.bf16.gmra.mxu1 %vm871_vm4, %v9223_v15  ;;  %v1524_v63 = vadd.f32 %v1523_v58, %v9395_v35 }
 0x21b   : > { %v1970_v59 = vpop.f32.mrf.mxu0 }
 0x21c   : > { %v1826_v10 = vpop.f32.mrf.mxu3 }
 0x21d   : > { %v1861_v30 = vadd.f32 %v1826_v10, %v1522_v31  ;;  %v12448_v31 = vld [vmem:[#allocation107_spill] sm:$0xff] }
 0x21e   : > { %7158 = vmatmul.msk.bf16.gmra.mxu2 %vm871_vm4, %v9064_v62 }
 0x21f   : > { %v9482_v11 = vadd.f32 %v1968_v48, %v1861_v30  ;;  %v9485_v36 = vpop.f32.mrf.mxu1 }
 0x221   : > { %12445 = vst [vmem:[#allocation154_spill] sm:$0xff] %v9482_v11  ;;  %v2174_v26 = vpop.f32.mrf.mxu2 }
 0x222   : > { %v2254_v62 = vadd.f32 %v2174_v26, %v2112_v49 }
 0x223   : > { %v2473_v2 = vpop.f32.mrf.mxu0 }
 0x224   : > { %v1828_v42 = vpop.f32.mrf.mxu3 }
 0x225   : > { %v1862_v53 = vadd.f32 %v1828_v42, %v1524_v63  ;;  %v12449_v63 = vld [vmem:[#allocation106_spill] sm:$0xff] }
 0x226   : > { %7193 = vmatmul.msk.bf16.gmra.mxu0 %vm871_vm4, %v9106_v32  ;;  %v2113_v32 = vadd.f32 %v9413_v7, %v12449_v63  ;;  %v2007_v63 = vrot.slane %v9263_v43, 6  ;;  %v12456_v43 = vld [vmem:[#allocation135_spill] sm:$0xff] }
 0x227   : > { %v9491_v25 = vadd.f32 %v1970_v59, %v1862_v53  ;;  %v9495_v48 = vpop.f32.mrf.mxu1 }
 0x229   : > { %12447 = vst [vmem:[#allocation131_spill] sm:$0xff] %v9491_v25  ;;  %7175 = vmatmul.msk.bf16.gmra.mxu3 %vm871_vm4, %v12448_v31  ;;  %v2176_v58 = vpop.f32.mrf.mxu2 }
 0x22a   : > { %7145 = vmatmul.msk.bf16.gmra.mxu1 %vm871_vm4, %v9266_v20  ;;  %v2255_v59 = vadd.f32 %v2176_v58, %v2113_v32 }
 0x22b   : > { %v2475_v35 = vpop.f32.mrf.mxu0 }
 0x22c   : > { %v2334_v10 = vpop.f32.mrf.mxu3 }
 0x22d   : > { %v2414_v30 = vadd.f32 %v2334_v10, %v2254_v62  ;;  %v12451_v62 = vld [vmem:[#allocation105_spill] sm:$0xff]  ;;  %v12452_v10 = vld [vmem:[#allocation124_spill] sm:$0xff] }
 0x22e   : > { %7159 = vmatmul.msk.bf16.gmra.mxu2 %vm871_vm4, %v12450_v17  ;;  %v2114_v7 = vadd.f32 %v9422_v50, %v12451_v62  ;;  %v276_v62 = vld [vmem:[%s7958_s17 + $0xc] sm:$0xf] }
 0x22f   : > { %v2553_v42 = vadd.f32 %v2473_v2, %v2414_v30  ;;  %v9504_v26 = vpop.f32.mrf.mxu1  ;;  %v9528_v51 = vshrl.u32 %v276_v62, 16 }
 0x231   : > { %2649 = vrot.lane.b32.xlu0 %v2553_v42, %s7855_s12  ;;  %v2179_v29 = vpop.f32.mrf.mxu2 }
 0x232   : > { %v2256_v58 = vadd.f32 %v2179_v29, %v2114_v7  ;;  %v12455_v29 = vld [vmem:[#allocation133_spill] sm:$0xff] }
 0x233   : > { %v2478_v53 = vpop.f32.mrf.mxu0  ;;  %v2115_v7 = vadd.f32 %v9431_v41, %v12455_v29  ;;  %v9538_v41 = vld [vmem:[%s7958_s17 + $0x14] sm:$0x7] }
 0x234   : > { %v2336_v49 = vpop.f32.mrf.mxu3  ;;  %v9545_v31 = vshll.u32 %v9538_v41, 16 }
 0x235   : > { %v2415_v25 = vadd.f32 %v2336_v49, %v2255_v59  ;;  %v12454_v59 = vld [vmem:[#allocation145_spill] sm:$0xff] }
 0x236   : > { %7194 = vmatmul.msk.bf16.gmra.mxu0 %vm871_vm4, %v9148_v21  ;;  %v12453_v21 = vld [vmem:[#allocation144_spill] sm:$0xff]  ;;  %v2010_v49 = vrot.slane %v12454_v59, 6  ;;  %v3016_v27 = vrot.slane %v9545_v31, 6 }
 0x237   : > { %v2554_v2 = vadd.f32 %v2475_v35, %v2415_v25  ;;  %v9513_v30 = vpop.f32.mrf.mxu1  ;;  %v7130_v50 = vrot.slane %v12453_v21, 10  ;;  %v2009_v35 = vrot.slane %v2007_v63, 4  ;;  %v9530_v21 = vshll.u32 %v276_v62, 16 }
 0x239   : > { %7176 = vmatmul.msk.bf16.gmra.mxu3 %vm871_vm4, %v12452_v10  ;;  %2651 = vrot.lane.b32.xlu0 %v2554_v2, %s7855_s12  ;;  %v2181_v42 = vpop.f32.mrf.mxu2  ;;  %v277_v2 = vld [vmem:[%s7958_s17 + $0x10] sm:$0xf]  ;;  %v2008_v11 = vsel %vm8713_vm9, %v7130_v50, %v2007_v63  ;;  %v2011_v59 = vsel %vm8713_vm9, %v2009_v35, %v2010_v49  ;;  %v2819_v9 = vrot.slane %v9530_v21, 5 }
 0x23a   : > { %7146 = vmatmul.msk.bf16.gmra.mxu1 %vm871_vm4, %v9323_v61  ;;  %v2014_v50 = vunpack.c.l.b16 %v2008_v11  ;;  %v2015_v62 = vunpack.c.l.b16 %v2011_v59  ;;  %v12457_v11 = vld [vmem:[#allocation134_spill] sm:$0xff] }
 0x23b   : > { %v2480_v32 = vpop.f32.mrf.mxu0  ;;  %v2116_v59 = vadd.f32 %v9440_v40, %v12457_v11 }
 0x23c   : > { %v2339_v17 = vpop.f32.mrf.mxu3  ;;  %v9556_v46 = vpack.c.b16 %v2015_v62, %v2014_v50 }
 0x23d   : > { %v2416_v25 = vadd.f32 %v2339_v17, %v2256_v58  ;;  %v2257_v58 = vadd.f32 %v2181_v42, %v2115_v7  ;;  %v3005_v42 = vrot.slane %v9530_v21, 6 }
 0x23e   : > { %7160 = vmatmul.msk.bf16.gmra.mxu2 %vm871_vm4, %v12456_v43 }
 0x23f   : > { %v2555_v10 = vadd.f32 %v2478_v53, %v2416_v25  ;;  %v9533_v17 = vpop.f32.mrf.mxu1  ;;  %v9540_v53 = vshll.u32 %v277_v2, 16  ;;  %v9542_v25 = vshrl.u32 %v277_v2, 16  ;;  %v12233_v2 = vshrl.u32 %v9538_v41, 16 }
 0x241   : > { %2653 = vrot.lane.b32.xlu1 %v2555_v10, %s7855_s12  ;;  %v2184_v63 = vpop.f32.mrf.mxu2  ;;  %v3004_v10 = vrot.slane %v9528_v51, 5  ;;  %v3008_v35 = vrot.slane %v9542_v25, 5  ;;  %v3009_v49 = vrot.slane %v9540_v53, 6  ;;  %v3015_v55 = vrot.slane %v12233_v2, 5 }
 0x243   : > { %v2483_v29 = vpop.f32.mrf.mxu0  ;;  %v3006_v52 = vor.u32 %v3005_v42, %v3004_v10  ;;  %v3017_v42 = vor.u32 %v3016_v27, %v3015_v55 }
 0x244   : > { %v2341_v43 = vpop.f32.mrf.mxu3 }
 0x245   : > { %v2417_v7 = vadd.f32 %v2341_v43, %v2257_v58  ;;  %v2258_v58 = vadd.f32 %v2184_v63, %v2116_v59  ;;  %v3010_v43 = vor.u32 %v3009_v49, %v3008_v35  ;;  %v3007_v62 = vrot.slane %v3006_v52, 4  ;;  %v12460_v35 = vld [vmem:[#allocation138_spill] sm:$0xff] }
 0x246   : > { %7195 = vmatmul.msk.bf16.gmra.mxu0 %vm871_vm4, %v9186_v13 }
 0x247   : > { %v2556_v4 = vadd.f32 %v2480_v32, %v2417_v7  ;;  %v9561_v13 = vpop.f32.mrf.mxu1  ;;  %v3012_v10 = vrot.slane %v3010_v43, 4  ;;  %v3011_v2 = vsel %vm8000_vm3, %v3007_v62, %v3010_v43 }
 0x249   : > { %7177 = vmatmul.msk.bf16.gmra.mxu3 %vm871_vm4, %v12458_v33  ;;  %2655 = vrot.lane.b32.xlu1 %v2556_v4, %s7855_s12  ;;  %v2186_v40 = vpop.f32.mrf.mxu2  ;;  %v12459_v4 = vld [vmem:[#allocation136_spill] sm:$0xff]  ;;  %v3018_v52 = vsel %vm8000_vm3, %v3012_v10, %v3017_v42 }
 0x24a   : > { %7147 = vmatmul.msk.bf16.gmra.mxu1 %vm871_vm4, %v9556_v46  ;;  %v2117_v63 = vadd.f32 %v9449_v8, %v12459_v4  ;;  %v3022_v8 = vunpack.c.l.b16 %v3018_v52 }
 0x24b   : > { %v2485_v16 = vpop.f32.mrf.mxu0 }
 0x24c   : > { %v2344_v32 = vpop.f32.mrf.mxu3  ;;  %v2259_v49 = vadd.f32 %v2186_v40, %v2117_v63 }
 0x24d   : > { %v2418_v50 = vadd.f32 %v2344_v32, %v2258_v58  ;;  %v3021_v32 = vunpack.c.l.b16 %v3011_v2 }
 0x24e   : > { %7161 = vmatmul.msk.bf16.gmra.mxu2 %vm871_vm4, %v12460_v35  ;;  %v12465_v35 = vld [vmem:[#allocation139_spill] sm:$0xff] }
 0x24f   : > { %v2557_v7 = vadd.f32 %v2483_v29, %v2418_v50  ;;  %v9573_v11 = vpop.f32.mrf.mxu1  ;;  %v12462_v50 = vld [vmem:[#allocation137_spill] sm:$0xff]  ;;  %v9583_v63 = vpack.c.b16 %v3022_v8, %v3021_v32 }
 0x250   : > { %v2118_v40 = vadd.f32 %v9458_v14, %v12462_v50  ;;  %v12467_v50 = vld [vmem:[#allocation140_spill] sm:$0xff] }
 0x251   : > { %2657 = vrot.lane.b32.xlu2 %v2557_v7, %s7855_s12  ;;  %v2189_v27 = vpop.f32.mrf.mxu2  ;;  %12463 = vst [vmem:[#allocation106_spill] sm:$0xff] %v9583_v63  ;;  %v12464_v7 = vld [vmem:[#allocation62_spill] sm:$0xff] }
 0x252   : > { %v2260_v43 = vadd.f32 %v2189_v27, %v2118_v40  ;;  %v2120_v40 = vadd.f32 %v9476_v24, %v12467_v50  ;;  %v9620_v50 = vld [vmem:[%s7958_s17 + $0xe4] sm:$0xf] }
 0x253   : > { %v2488_v58 = vpop.f32.mrf.mxu0 }
 0x254   : > { %v2346_v55 = vpop.f32.mrf.mxu3 }
 0x255   : > { %v2419_v29 = vadd.f32 %v2346_v55, %v2259_v49  ;;  %v12466_v49 = vld [vmem:[#allocation141_spill] sm:$0xff] }
 0x256   : > { %7196 = vmatmul.msk.bf16.gmra.mxu0 %vm871_vm4, %v9223_v15 }
 0x257   : > { %v2558_v4 = vadd.f32 %v2485_v16, %v2419_v29  ;;  %v9588_v62 = vpop.f32.mrf.mxu1  ;;  %v2119_v16 = vadd.f32 %v9467_v1, %v12465_v35  ;;  %v12469_v35 = vld [vmem:[#allocation68_spill] sm:$0xff] }
 0x259   : > { %7178 = vmatmul.msk.bf16.gmra.mxu3 %vm871_vm4, %v12464_v7  ;;  %2659 = vrot.lane.b32.xlu2 %v2558_v4, %s7855_s12  ;;  %v2191_v10 = vpop.f32.mrf.mxu2 }
 0x25a   : > { %7203 = vmatmul.msk.bf16.vlgmr.msrb.gmra.mxu1 %vm871_vm4, %v9583_v63  ;;  %v2261_v52 = vadd.f32 %v2191_v10, %v2119_v16  ;;  %v12470_v16 = vld [vmem:[#allocation142_spill] sm:$0xff] }
 0x25b   : > { %v2490_v2 = vpop.f32.mrf.mxu0  ;;  %v2121_v24 = vadd.f32 %v9485_v36, %v12470_v16  ;;  %v12471_v36 = vld [vmem:[#allocation143_spill] sm:$0xff] }
 0x25c   : > { %v2349_v42 = vpop.f32.mrf.mxu3 }
 0x25d   : > { %v2420_v15 = vadd.f32 %v2349_v42, %v2260_v43 }
 0x25e   : > { %7162 = vmatmul.msk.bf16.gmra.mxu2 %vm871_vm4, %v12466_v49 }
 0x25f   : > { %v2559_v14 = vadd.f32 %v2488_v58, %v2420_v15  ;;  %v9597_v27 = vpop.f32.mrf.mxu1  ;;  %v12468_v58 = vld [vmem:[#allocation91_spill] sm:$0xff] }
 0x261   : > { %2661 = vrot.lane.b32.xlu0 %v2559_v14, %s7855_s12  ;;  %v2194_v32 = vpop.f32.mrf.mxu2 }
 0x262   : > { %v2262_v4 = vadd.f32 %v2194_v32, %v2120_v40 }
 0x263   : > { %v2493_v55 = vpop.f32.mrf.mxu0 }
 0x264   : > { %v2351_v8 = vpop.f32.mrf.mxu3 }
 0x265   : > { %v2421_v29 = vadd.f32 %v2351_v8, %v2261_v52 }
 0x266   : > { %7197 = vmatmul.msk.bf16.gmra.mxu0 %vm871_vm4, %v9266_v20 }
 0x267   : > { %v2560_v1 = vadd.f32 %v2490_v2, %v2421_v29  ;;  %v9606_v43 = vpop.f32.mrf.mxu1 }
 0x269   : > { %7179 = vmatmul.msk.bf16.gmra.mxu3 %vm871_vm4, %v12468_v58  ;;  %2663 = vrot.lane.b32.xlu1 %v2560_v1, %s7855_s12  ;;  %v2196_v42 = vpop.f32.mrf.mxu2  ;;  %v12472_v1 = vld [vmem:[#allocation116_spill] sm:$0xff] }
 0x26a   : > { %7204 = vmatmul.msk.bf16.gmra.mxu1 %vm871_vm4, %v12469_v35  ;;  %v2263_v14 = vadd.f32 %v2196_v42, %v2121_v24  ;;  %v9645_v24 = vld [vmem:[%s7958_s17 + $0xec] sm:$0x7] }
 0x26b   : > { %v2495_v10 = vpop.f32.mrf.mxu0  ;;  %12477 = vst [vmem:[#allocation133_spill] sm:$0xff] %v9645_v24  ;;  %v9656_v63 = vshll.u32 %v9645_v24, 16 }
 0x26c   : > { %v2354_v15 = vpop.f32.mrf.mxu3 }
 0x26d   : > { %v2422_v20 = vadd.f32 %v2354_v15, %v2262_v4  ;;  %v9633_v15 = vshrl.u32 %v9620_v50, 16  ;;  %12479 = vst [vmem:[#allocation135_spill] sm:$0xff] %v9656_v63 }
 0x26e   : > { %7163 = vmatmul.msk.bf16.gmra.mxu2 %vm871_vm4, %v9258_v34  ;;  %v9625_v34 = vld [vmem:[%s7958_s17 + $0xe8] sm:$0xf] }
 0x26f   : > { %v2561_v2 = vadd.f32 %v2493_v55, %v2422_v20  ;;  %v9615_v49 = vpop.f32.mrf.mxu1  ;;  %v2122_v55 = vadd.f32 %v9495_v48, %v12471_v36  ;;  %12473 = vst [vmem:[#allocation132_spill] sm:$0xff] %v9633_v15  ;;  %v9639_v48 = vshrl.u32 %v9625_v34, 16  ;;  %v2448_v35 = vrot.slane %v9625_v34, 6 }
 0x271   : > { %2665 = vrot.lane.b32.xlu2 %v2561_v2, %s7855_s12  ;;  %v2199_v32 = vpop.f32.mrf.mxu2  ;;  %12475 = vst [vmem:[#allocation144_spill] sm:$0xff] %v9639_v48 }
 0x272   : > { %v2264_v4 = vadd.f32 %v2199_v32, %v2122_v55  ;;  %v2149_v32 = vrot.slane %v9625_v34, 5  ;;  %v2298_v55 = vrot.slane %v9639_v48, 5 }
 0x273   : > { %v2498_v52 = vpop.f32.mrf.mxu0 }
 0x274   : > { %v2356_v8 = vpop.f32.mrf.mxu3 }
 0x275   : > { %v2423_v29 = vadd.f32 %v2356_v8, %v2263_v14  ;;  %v12478_v14 = vld [vmem:[#allocation45_spill] sm:$0xff] }
 0x276   : > { %7198 = vmatmul.msk.bf16.gmra.mxu0 %vm871_vm4, %v9323_v61  ;;  %v9636_v61 = vshll.u32 %v9620_v50, 16 }
 0x277   : > { %v2562_v40 = vadd.f32 %v2495_v10, %v2423_v29  ;;  %v9630_v42 = vpop.f32.mrf.mxu1  ;;  %v9642_v10 = vshll.u32 %v9625_v34, 16  ;;  %v2289_v29 = vrot.slane %v9633_v15, 5 }
 0x278   : > { %12474 = vst [vmem:[#allocation105_spill] sm:$0xff] %v9636_v61  ;;  %v2292_v36 = vrot.slane %v9636_v61, 6  ;;  %v2152_v61 = vrot.slane %v9645_v24, 5 }
 0x279   : > { %7180 = vmatmul.msk.bf16.gmra.mxu3 %vm871_vm4, %v12472_v1  ;;  %2667 = vrot.lane.b32.xlu0 %v2562_v40, %s7855_s12  ;;  %v2201_v16 = vpop.f32.mrf.mxu2  ;;  %12476 = vst [vmem:[#allocation145_spill] sm:$0xff] %v9642_v10  ;;  %v2301_v40 = vrot.slane %v9642_v10, 6  ;;  %v12480_v1 = vld [vmem:[#allocation146_spill] sm:$0xff] }
 0x27a   : > { %7205 = vmatmul.msk.bf16.gmra.mxu1 %vm871_vm4, %v12478_v14  ;;  %v2123_v58 = vadd.f32 %v9504_v26, %v12480_v1  ;;  %v2293_v33 = vor.u32 %v2292_v36, %v2289_v29  ;;  %v7183_v29 = vrot.slane %v9620_v50, 10  ;;  %v2450_v36 = vrot.slane %v2448_v35, 4 }
 0x27b   : > { %v2500_v20 = vpop.f32.mrf.mxu0  ;;  %v2302_v26 = vor.u32 %v2301_v40, %v2298_v55  ;;  %v2451_v55 = vrot.slane %v9645_v24, 6 }
 0x27c   : > { %v2359_v2 = vpop.f32.mrf.mxu3  ;;  %v2265_v48 = vadd.f32 %v2201_v16, %v2123_v58 }
 0x27d   : > { %v2424_v8 = vadd.f32 %v2359_v2, %v2264_v4  ;;  %v7148_v4 = vrot.slane %v9620_v50, 9  ;;  %v2151_v2 = vrot.slane %v2149_v32, 4  ;;  %v12483_v50 = vld [vmem:[#allocation129_spill] sm:$0xff] }
 0x27e   : > { %7164 = vmatmul.msk.bf16.gmra.mxu2 %vm871_vm4, %v9319_v22  ;;  %v2311_v22 = vrot.slane %v9656_v63, 6  ;;  %v2304_v63 = vrot.slane %v2302_v26, 4 }
 0x27f   : > { %v2563_v14 = vadd.f32 %v2498_v52, %v2424_v8  ;;  %v9665_v10 = vpop.f32.mrf.mxu1  ;;  %v12481_v52 = vshrl.u32 %v9645_v24, 16  ;;  %v2150_v8 = vsel %vm8685_vm7, %v7148_v4, %v2149_v32  ;;  %v2153_v16 = vsel %vm8685_vm7, %v2151_v2, %v2152_v61 }
 0x280   : > { %v2156_v40 = vunpack.c.l.b16 %v2150_v8  ;;  %v2157_v0 = vunpack.c.l.b16 %v2153_v16  ;;  %v2829_v61 = vrot.slane %v9542_v25, 4  ;;  %v7303_v8 = vld [vmem:[%s11985_s2 + $0x1c] sm:$0x3] }
 0x281   : > { %2669 = vrot.lane.b32.xlu1 %v2563_v14, %s7855_s12  ;;  %v2204_v7 = vpop.f32.mrf.mxu2  ;;  %v2308_v1 = vrot.slane %v12481_v52, 5  ;;  %v2124_v14 = vadd.f32 %v9513_v30, %v9316_v45  ;;  %v2294_v52 = vrot.slane %v2293_v33, 4  ;;  %v2816_v45 = vrot.slane %v9528_v51, 4 }
 0x282   : > { %v2825_v30 = vrot.slane %v9540_v53, 5  ;;  %v4261_v56 = vsel %vm920_vm0, %v7303_v8, 0 }
 0x283   : > { %v2503_v15 = vpop.f32.mrf.mxu0  ;;  %v2312_v32 = vor.u32 %v2311_v22, %v2308_v1  ;;  %v2266_v33 = vadd.f32 %v2204_v7, %v2124_v14  ;;  %v2452_v1 = vsel %vm8713_vm9, %v2450_v36, %v2451_v55  ;;  %v7286_v22 = vld [vmem:[%s11985_s2 + $0x1a] sm:$0x3]  ;;  %v2303_v14 = vsel %vm8000_vm3, %v2294_v52, %v2302_v26  ;;  %4270 = vmatpush.bf16.msra.mxu3 %v4261_v56 }
 0x284   : > { %v2361_v58 = vpop.f32.mrf.mxu3  ;;  %v2158_v55 = vpack.c.b16 %v2157_v0, %v2156_v40  ;;  %v2830_v26 = vor.u32 %v2829_v61, %v2825_v30  ;;  %v3310_v52 = vrot.slane %v9528_v51, 6  ;;  %v3311_v0 = vrot.slane %v9530_v21, 7 }
 0x285   : > { %v2425_v34 = vadd.f32 %v2361_v58, %v2265_v48  ;;  %v12485_v58 = vld [vmem:[#allocation32_spill] sm:$0xff]  ;;  %v2316_v40 = vunpack.c.l.b16 %v2303_v14  ;;  %v3315_v51 = vrot.slane %v9540_v53, 7 }
 0x286   : > { %7199 = vmatmul.msk.bf16.gmra.mxu0 %vm871_vm4, %v9556_v46  ;;  %v12482_v46 = vld [vmem:[#allocation29_spill] sm:$0xff]  ;;  %v2849_v16 = vrot.slane %v12485_v58, 5  ;;  %v3312_v14 = vor.u32 %v3311_v0, %v3310_v52  ;;  %v12492_v0 = vld [vmem:[#allocation35_spill] sm:$0xff] }
 0x287   : > { %v2564_v4 = vadd.f32 %v2500_v20, %v2425_v34  ;;  %v2848_v48 = vrot.slane %v12482_v46, 4  ;;  %v9689_v2 = vpop.f32.mrf.mxu1  ;;  %v2449_v20 = vsel %vm8713_vm9, %v7183_v29, %v2448_v35  ;;  %v4114_v35 = vsel %vm920_vm0, %v7286_v22, 0  ;;  %v12486_v29 = vld [vmem:[#allocation33_spill] sm:$0xff] }
 0x288   : > { %12484 = vst [vmem:[#allocation134_spill] sm:$0xff] %v9689_v2  ;;  %v2854_v36 = vrot.slane %v12486_v29, 4  ;;  %4123 = vmatpush.bf16.msra.mxu2 %v4114_v35  ;;  %v2455_v18 = vunpack.c.l.b16 %v2449_v20  ;;  %v2456_v2 = vunpack.c.l.b16 %v2452_v1  ;;  %vm6507_vm9 = vcmask 257024  }
 0x289   : > { %7181 = vmatmul.msk.bf16.gmra.mxu3 %vm871_vm4, %v12483_v50  ;;  %2671 = vrot.lane.b32.xlu2 %v2564_v4, %s7855_s12  ;;  %v2206_v7 = vpop.f32.mrf.mxu2  ;;  %v2313_v4 = vsel %vm8000_vm3, %v2304_v63, %v2312_v32  ;;  %v2820_v50 = vor.u32 %v2819_v9, %v2816_v45  ;;  %v2125_v63 = vadd.f32 %v9533_v17, %v9327_v19  ;;  %v3314_v32 = vrot.slane %v9542_v25, 6  ;;  %v12487_v45 = vld [vmem:[#allocation34_spill] sm:$0xff]  ;;  %v7320_v19 = vld [vmem:[%s11985_s2 + $0x1e] sm:$0x3] }
 0x28a   : > { %7206 = vmatmul.msk.bf16.gmra.mxu1 %vm871_vm4, %v12436_v38  ;;  %v2852_v9 = vrot.slane %v12487_v45, 5  ;;  %v2317_v20 = vunpack.c.l.b16 %v2313_v4  ;;  %v2831_v17 = vrot.slane %v2830_v26, 4  ;;  %v2835_v25 = vrot.slane %v9545_v31, 5 }
 0x28b   : > { %v9702_v34 = vpop.f32.mrf.mxu0  ;;  %v2821_v61 = vrot.slane %v2820_v50, 4  ;;  %v4425_v50 = vsel %vm920_vm0, %v7320_v19, 0  ;;  %v2267_v53 = vadd.f32 %v2206_v7, %v2125_v63 }
 0x28c   : > { %v2364_v24 = vpop.f32.mrf.mxu3  ;;  %v2855_v4 = vor.u32 %v2854_v36, %v2852_v9  ;;  %4434 = vmatpush.bf16.msra.mxu0 %v4425_v50  ;;  %v9744_v7 = vpack.c.b16 %v2317_v20, %v2316_v40 }
 0x28d   : > { %v2426_v22 = vadd.f32 %v2364_v24, %v2266_v33  ;;  %v7269_v24 = vld [vmem:[%s11985_s2 + $0x18] sm:$0x3]  ;;  %v2457_v33 = vpack.c.b16 %v2456_v2, %v2455_v18  ;;  %v2826_v26 = vsel %vm9727_vm13, %v2821_v61, %v2825_v30  ;;  %v2126_v18 = vadd.f32 %v9561_v13, %v9338_v57 }
 0x28e   : > { %7165 = vmatmul.msk.bf16.gmra.mxu2 %vm871_vm4, %v2158_v55  ;;  %v2850_v55 = vor.u32 %v2849_v16, %v2848_v48  ;;  %12491 = vst [vmem:[#allocation136_spill] sm:$0xff] %v9744_v7  ;;  %v2836_v48 = vsel %vm9727_vm13, %v2831_v17, %v2835_v25  ;;  %v3313_v30 = vrot.slane %v3312_v14, 4  ;;  %v3119_v36 = vunpack.c.l.b16 %v2826_v26  ;;  %v12494_v61 = vld [vmem:[#allocation51_spill] sm:$0xff] }
 0x28f   : > { %v2565_v8 = vadd.f32 %v2503_v15, %v2426_v22  ;;  %v3941_v15 = vsel %vm920_vm0, %v7269_v24, 0  ;;  %v9735_v1 = vpop.f32.mrf.mxu1  ;;  %v3316_v22 = vor.u32 %v3315_v51, %v3314_v32  ;;  %v12490_v24 = vshrl.u32 %v9538_v41, 16  ;;  %v12493_v32 = vld [vmem:[#allocation50_spill] sm:$0xff]  ;;  %v12495_v17 = vld [vmem:[#allocation55_spill] sm:$0xff] }
 0x290   : > { %3950 = vmatpush.bf16.msra.mxu1 %v3941_v15  ;;  %v2851_v41 = vrot.slane %v2850_v55, 4  ;;  %v2856_v52 = vrot.slane %v2855_v4, 4  ;;  %v3120_v57 = vunpack.c.l.b16 %v2836_v48  ;;  %v2837_v20 = vrot.slane %v12493_v32, 4  ;;  %v12496_v15 = vld [vmem:[#allocation53_spill] sm:$0xff] }
 0x291   : > { %2673 = vrot.lane.b32.xlu0 %v2565_v8, %s7855_s12  ;;  %v2209_v56 = vpop.f32.mrf.mxu2  ;;  %v3319_v19 = vrot.slane %v12490_v24, 6  ;;  %v3320_v8 = vrot.slane %v9545_v31, 7  ;;  %v2857_v31 = vrot.slane %v12492_v0, 5  ;;  %v3318_v13 = vrot.slane %v3316_v22, 4 }
 0x292   : > { %v2838_v51 = vrot.slane %v12494_v61, 5  ;;  %v2841_v25 = vrot.slane %v12495_v17, 5  ;;  %v2843_v50 = vrot.slane %v12496_v15, 4  ;;  %v2853_v4 = vsel %vm9727_vm13, %v2851_v41, %v2852_v9 }
 0x293   : > { %v2508_v35 = vpop.f32.mrf.mxu0  ;;  %v3321_v40 = vor.u32 %v3320_v8, %v3319_v19  ;;  %v2858_v26 = vsel %vm9727_vm13, %v2856_v52, %v2857_v31  ;;  %v3151_v24 = vpack.c.b16 %v3120_v57, %v3119_v36  ;;  %v2127_v48 = vadd.f32 %v9573_v11, %v9345_v37  ;;  %v12499_v52 = vld [vmem:[#allocation58_spill] sm:$0xff]  ;;  %v12500_v31 = vld [vmem:[#allocation59_spill] sm:$0xff]  ;;  %v12501_v57 = vld [vmem:[#allocation61_spill] sm:$0xff] }
 0x294   : > { %v2366_v2 = vpop.f32.mrf.mxu3  ;;  %v3124_v41 = vunpack.c.l.b16 %v2858_v26  ;;  %v2859_v36 = vrot.slane %v12499_v52, 4  ;;  %v2863_v38 = vrot.slane %v12501_v57, 5  ;;  %v12503_v11 = vld [vmem:[#allocation56_spill] sm:$0xff] }
 0x295   : > { %v2427_v16 = vadd.f32 %v2366_v2, %v2267_v53  ;;  %v2268_v53 = vadd.f32 %v2209_v56, %v2126_v18  ;;  %v3317_v56 = vsel %vm9762_vm1, %v3313_v30, %v3316_v22  ;;  %v3322_v8 = vsel %vm9762_vm1, %v3318_v13, %v3321_v40 }
 0x296   : > { %7200 = vmatmul.msk.bf16.gmra.mxu0 %vm871_vm4, %v2457_v33  ;;  %v2839_v18 = vor.u32 %v2838_v51, %v2837_v20  ;;  %v2844_v2 = vor.u32 %v2843_v50, %v2841_v25  ;;  %v3520_v30 = vunpack.c.l.b16 %v3317_v56  ;;  %v3521_v13 = vunpack.c.l.b16 %v3322_v8 }
 0x297   : > { %v2566_v63 = vadd.f32 %v9702_v34, %v2427_v16  ;;  %v9758_v33 = vpop.f32.mrf.mxu1  ;;  %v3123_v16 = vunpack.c.l.b16 %v2853_v4  ;;  %v3323_v40 = vrot.slane %v12493_v32, 6  ;;  %v2846_v51 = vrot.slane %v12503_v11, 5 }
 0x298   : > { %v2840_v20 = vrot.slane %v2839_v18, 4  ;;  %v2845_v37 = vrot.slane %v2844_v2, 4  ;;  %v3324_v50 = vrot.slane %v12494_v61, 7  ;;  %v2585_v18 = vld [vmem:[#allocation2] sm:$0xff] }
 0x299   : > { %7182 = vmatmul.msk.bf16.gmra.mxu3 %vm871_vm4, %v9744_v7  ;;  %2675 = vrot.lane.b32.xlu1 %v2566_v63, %s7855_s12  ;;  %v2211_v55 = vpop.f32.mrf.mxu2  ;;  %v2860_v63 = vrot.slane %v12500_v31, 5  ;;  %v12502_v7 = vld [vmem:[#allocation60_spill] sm:$0xff]  ;;  %v9787_v4 = vpack.c.b16 %v3124_v41, %v3123_v16 }
 0x29a   : > { %7207 = vmatmul.msk.bf16.gmra.mxu1 %vm871_vm4, %v12437_v60  ;;  %v2865_v59 = vrot.slane %v12502_v7, 4  ;;  %v3325_v16 = vor.u32 %v3324_v50, %v3323_v40  ;;  %v12504_v41 = vld [vmem:[#allocation52_spill] sm:$0xff] }
 0x29b   : > { %v2510_v14 = vpop.f32.mrf.mxu0  ;;  %v2861_v32 = vor.u32 %v2860_v63, %v2859_v36  ;;  %v3333_v63 = vrot.slane %v12503_v11, 7 }
 0x29c   : > { %v2369_v19 = vpop.f32.mrf.mxu3  ;;  %v2866_v8 = vor.u32 %v2865_v59, %v2863_v38  ;;  %v12505_v59 = vshrl.u32 %v12504_v41, 16  ;;  %v3326_v50 = vrot.slane %v3325_v16, 4 }
 0x29d   : > { %v2428_v9 = vadd.f32 %v2369_v19, %v2268_v53  ;;  %v2269_v53 = vadd.f32 %v2211_v55, %v2127_v48  ;;  %v2842_v55 = vsel %vm9727_vm13, %v2840_v20, %v2841_v25  ;;  %v2847_v48 = vsel %vm9727_vm13, %v2845_v37, %v2846_v51 }
 0x29e   : > { %7219 = vmatmul.msk.bf16.vlgmr.msrb.gmra.mxu2 %vm871_vm4, %v3151_v24  ;;  %v3328_v24 = vrot.slane %v12495_v17, 7  ;;  %v3332_v36 = vrot.slane %v12505_v59, 6  ;;  %v2128_v20 = vadd.f32 %v9588_v62, %v9356_v3  ;;  %v3121_v37 = vunpack.c.l.b16 %v2842_v55  ;;  %v2589_v62 = vld [vmem:[#allocation2 + $0x20] sm:$0xff] }
 0x29f   : > { %v2567_v22 = vadd.f32 %v2508_v35, %v2428_v9  ;;  %v9789_v26 = vpop.f32.mrf.mxu1  ;;  %v3327_v35 = vrot.slane %v12496_v15, 6  ;;  %v3552_v9 = vpack.c.b16 %v3521_v13, %v3520_v30  ;;  %v2867_v30 = vrot.slane %v2866_v8, 4  ;;  %v12506_v13 = vld [vmem:[#allocation63_spill] sm:$0xff]  ;;  %v12507_v59 = vld [vmem:[#allocation64_spill] sm:$0xff] }
 0x2a0   : > { %v2868_v25 = vrot.slane %v12506_v13, 5  ;;  %v3122_v51 = vunpack.c.l.b16 %v2847_v48 }
 0x2a1   : > { %2677 = vrot.lane.b32.xlu2 %v2567_v22, %s7855_s12  ;;  %v2214_v56 = vpop.f32.mrf.mxu2  ;;  %v3329_v17 = vor.u32 %v3328_v24, %v3327_v35  ;;  %v2862_v22 = vrot.slane %v2861_v32, 4 }
 0x2a2   : > { %v2869_v3 = vsel %vm9727_vm13, %v2867_v30, %v2868_v25  ;;  %v12509_v30 = vld [vmem:[#allocation67_spill] sm:$0xff] }
 0x2a3   : > { %v2513_v19 = vpop.f32.mrf.mxu0  ;;  %v2650_v2 = vpop.permute.xlu0 %2649  ;;  %v3331_v11 = vrot.slane %v3329_v17, 4  ;;  %v2864_v8 = vsel %vm9727_vm13, %v2862_v22, %v2863_v38  ;;  %v3330_v48 = vsel %vm9762_vm1, %v3326_v50, %v3329_v17  ;;  %v3126_v41 = vunpack.c.l.b16 %v2869_v3 }
 0x2a4   : > { %v2371_v61 = vpop.f32.mrf.mxu3  ;;  %v2745_v60 = vadd.f32 %v2650_v2, %v2585_v18  ;;  %v2586_v18 = vld [vmem:[#allocation2 + $0x8] sm:$0xff]  ;;  %v2874_v25 = vrot.slane %v12509_v30, 5 }
 0x2a5   : > { %v2429_v15 = vadd.f32 %v2371_v61, %v2269_v53  ;;  %v2270_v53 = vadd.f32 %v2214_v56, %v2128_v20  ;;  %v12510_v20 = vld [vmem:[#allocation66_spill] sm:$0xff] }
 0x2a6   : > { %7253 = vmatmul.msk.bf16.vlgmr.msrb.gmra.mxu0 %vm871_vm4, %v9787_v4  ;;  %2778 = vst.msk [vmem:[#allocation2] sm:$0xff] %vm2777_vm2, %v2745_v60  ;;  %v3334_v60 = vor.u32 %v3333_v63, %v3332_v36  ;;  %v2870_v36 = vrot.slane %v12507_v59, 4  ;;  %v12508_v63 = vld [vmem:[#allocation65_spill] sm:$0xff] }
 0x2a7   : > { %v2568_v40 = vadd.f32 %v2510_v14, %v2429_v15  ;;  %v9808_v35 = vpop.f32.mrf.mxu1  ;;  %v3125_v15 = vunpack.c.l.b16 %v2864_v8  ;;  %v2871_v22 = vrot.slane %v12508_v63, 5 }
 0x2a8   : > { %v3335_v38 = vsel %vm9762_vm1, %v3331_v11, %v3334_v60  ;;  %v3337_v11 = vrot.slane %v12485_v58, 7 }
 0x2a9   : > { %7236 = vmatmul.msk.bf16.vlgmr.msrb.gmra.mxu3 %vm871_vm4, %v3552_v9  ;;  %2679 = vrot.lane.b32.xlu0 %v2568_v40, %s7855_s12  ;;  %v2216_v32 = vpop.f32.mrf.mxu2  ;;  %v3152_v9 = vpack.c.b16 %v3122_v51, %v3121_v37  ;;  %v2876_v40 = vrot.slane %v12510_v20, 4  ;;  %v2129_v37 = vadd.f32 %v9597_v27, %v9363_v28  ;;  %v3522_v51 = vunpack.c.l.b16 %v3330_v48 }
 0x2aa   : > { %7208 = vmatmul.msk.bf16.gmra.mxu1 %vm871_vm4, %v8551_v47  ;;  %v3523_v50 = vunpack.c.l.b16 %v3335_v38  ;;  %v9832_v8 = vpack.c.b16 %v3126_v41, %v3125_v15  ;;  %v3340_v28 = vrot.slane %v12486_v29, 6  ;;  %v3341_v27 = vrot.slane %v12487_v45, 7  ;;  %v12511_v38 = vld [vmem:[#allocation31_spill] sm:$0xff] }
 0x2ab   : > { %v2515_v24 = vpop.f32.mrf.mxu0  ;;  %v2658_v14 = vpop.permute.xlu2 %2657  ;;  %v2271_v60 = vadd.f32 %v2216_v32, %v2129_v37  ;;  %v12512_v45 = vshrl.u32 %v12511_v38, 16  ;;  %v3346_v41 = vrot.slane %v12492_v0, 7  ;;  %v12517_v38 = vld [vmem:[#allocation88_spill] sm:$0xff] }
 0x2ac   : > { %v2652_v2 = vpop.permute.xlu0 %2651  ;;  %v2374_v61 = vpop.f32.mrf.mxu3  ;;  %v2749_v55 = vadd.f32 %v2658_v14, %v2589_v62  ;;  %v2872_v14 = vor.u32 %v2871_v22, %v2870_v36  ;;  %v3553_v32 = vpack.c.b16 %v3523_v50, %v3522_v51  ;;  %v3342_v29 = vor.u32 %v3341_v27, %v3340_v28 }
 0x2ad   : > { %v2746_v56 = vadd.f32 %v2652_v2, %v2586_v18  ;;  %v2430_v16 = vadd.f32 %v2374_v61, %v2270_v53  ;;  %v3336_v53 = vrot.slane %v12482_v46, 6  ;;  %v2877_v18 = vor.u32 %v2876_v40, %v2874_v25  ;;  %v2590_v2 = vld [vmem:[#allocation2 + $0x28] sm:$0xff]  ;;  %v2587_v46 = vld [vmem:[#allocation2 + $0x10] sm:$0xff] }
 0x2ae   : > { %2782 = vst.msk [vmem:[#allocation2 + $0x20] sm:$0xff] %vm2777_vm2, %v2749_v55  ;;  %7220 = vmatmul.msk.bf16.gmra.mxu2 %vm871_vm4, %v3152_v9  ;;  %v3345_v15 = vrot.slane %v12512_v45, 6  ;;  %v2873_v36 = vrot.slane %v2872_v14, 4  ;;  %v12513_v40 = vld [vmem:[#allocation83_spill] sm:$0xff]  ;;  %v3344_v0 = vrot.slane %v3342_v29, 4  ;;  %v2887_v45 = vrot.slane %v12517_v38, 4 }
 0x2af   : > { %v2569_v17 = vadd.f32 %v2513_v19, %v2430_v16  ;;  %2779 = vst.msk [vmem:[#allocation2 + $0x8] sm:$0xff] %vm2777_vm2, %v2746_v56  ;;  %v9834_v3 = vpop.f32.mrf.mxu1  ;;  %v3338_v48 = vor.u32 %v3337_v11, %v3336_v53  ;;  %v2878_v22 = vrot.slane %v2877_v18, 4  ;;  %v2879_v37 = vrot.slane %v12513_v40, 5 }
 0x2b0   : > { %v2875_v14 = vsel %vm9727_vm13, %v2873_v36, %v2874_v25  ;;  %v12514_v25 = vld [vmem:[#allocation85_spill] sm:$0xff] }
 0x2b1   : > { %2681 = vrot.lane.b32.xlu1 %v2569_v17, %s7855_s12  ;;  %v2219_v62 = vpop.f32.mrf.mxu2  ;;  %v2130_v17 = vadd.f32 %v9606_v43, %v9374_v12  ;;  %v3339_v50 = vrot.slane %v3338_v48, 4  ;;  %v2880_v12 = vsel %vm9727_vm13, %v2878_v22, %v2879_v37  ;;  %v2588_v43 = vld [vmem:[#allocation2 + $0x18] sm:$0xff]  ;;  %v12516_v48 = vld [vmem:[#allocation89_spill] sm:$0xff]  ;;  %v3349_v22 = vrot.slane %v12499_v52, 6 }
 0x2b2   : > { %v3350_v37 = vrot.slane %v12500_v31, 7 }
 0x2b3   : > { %v2518_v19 = vpop.f32.mrf.mxu0  ;;  %v2660_v9 = vpop.permute.xlu2 %2659  ;;  %v2272_v53 = vadd.f32 %v2219_v62, %v2130_v17  ;;  %v3343_v62 = vsel %vm9762_vm1, %v3339_v50, %v3342_v29 }
 0x2b4   : > { %v2654_v61 = vpop.permute.xlu1 %2653  ;;  %v2376_v58 = vpop.f32.mrf.mxu3  ;;  %v2750_v55 = vadd.f32 %v2660_v9, %v2590_v2  ;;  %v3351_v52 = vor.u32 %v3350_v37, %v3349_v22 }
 0x2b5   : > { %v2747_v56 = vadd.f32 %v2654_v61, %v2587_v46  ;;  %v2431_v16 = vadd.f32 %v2376_v58, %v2271_v60  ;;  %v3347_v60 = vor.u32 %v3346_v41, %v3345_v15  ;;  %v3127_v61 = vunpack.c.l.b16 %v2875_v14 }
 0x2b6   : > { %7254 = vmatmul.msk.bf16.gmra.mxu0 %vm871_vm4, %v9832_v8  ;;  %2783 = vst.msk [vmem:[#allocation2 + $0x28] sm:$0xff] %vm2777_vm2, %v2750_v55  ;;  %v3128_v58 = vunpack.c.l.b16 %v2880_v12  ;;  %v2881_v55 = vrot.slane %v12514_v25, 4  ;;  %v2131_v15 = vadd.f32 %v9615_v49, %v9381_v5  ;;  %v3524_v41 = vunpack.c.l.b16 %v3343_v62  ;;  %v12518_v12 = vld [vmem:[#allocation57_spill] sm:$0xff] }
 0x2b7   : > { %v2570_v51 = vadd.f32 %v2515_v24, %v2431_v16  ;;  %2780 = vst.msk [vmem:[#allocation2 + $0x10] sm:$0xff] %vm2777_vm2, %v2747_v56  ;;  %v9850_v11 = vpop.f32.mrf.mxu1  ;;  %v3348_v46 = vsel %vm9762_vm1, %v3344_v0, %v3347_v60  ;;  %v12515_v56 = vld [vmem:[#allocation86_spill] sm:$0xff]  ;;  %v2885_v16 = vrot.slane %v12516_v48, 5  ;;  %v3354_v5 = vrot.slane %v12501_v57, 7 }
 0x2b8   : > { %v3525_v36 = vunpack.c.l.b16 %v3348_v46 }
 0x2b9   : > { %7237 = vmatmul.msk.bf16.gmra.mxu3 %vm871_vm4, %v3553_v32  ;;  %2683 = vrot.lane.b32.xlu2 %v2570_v51, %s7855_s12  ;;  %v2221_v27 = vpop.f32.mrf.mxu2  ;;  %v2882_v32 = vrot.slane %v12515_v56, 5  ;;  %v9874_v51 = vpack.c.b16 %v3128_v58, %v3127_v61  ;;  %v2888_v0 = vor.u32 %v2887_v45, %v2885_v16  ;;  %v3352_v61 = vrot.slane %v3351_v52, 4 }
 0x2ba   : > { %7209 = vmatmul.msk.bf16.gmra.mxu1 %vm871_vm4, %v8674_v23  ;;  %v2273_v17 = vadd.f32 %v2221_v27, %v2131_v15  ;;  %v9880_v14 = vpack.c.b16 %v3525_v36, %v3524_v41 }
 0x2bb   : > { %v2520_v28 = vpop.f32.mrf.mxu0  ;;  %v2889_v57 = vrot.slane %v2888_v0, 4 }
 0x2bc   : > { %v2656_v24 = vpop.permute.xlu1 %2655  ;;  %v2379_v18 = vpop.f32.mrf.mxu3 }
 0x2bd   : > { %v2748_v2 = vadd.f32 %v2656_v24, %v2588_v43  ;;  %v2432_v9 = vadd.f32 %v2379_v18, %v2272_v53  ;;  %v3353_v53 = vrot.slane %v12502_v7, 6  ;;  %v12519_v43 = vshrl.u32 %v12518_v12, 16 }
 0x2be   : > { %7221 = vmatmul.msk.bf16.gmra.mxu2 %vm871_vm4, %v9787_v4  ;;  %v2883_v4 = vor.u32 %v2882_v32, %v2881_v55  ;;  %v3359_v7 = vrot.slane %v12506_v13, 7 }
 0x2bf   : > { %2781 = vst.msk [vmem:[#allocation2 + $0x18] sm:$0xff] %vm2777_vm2, %v2748_v2  ;;  %v2571_v29 = vadd.f32 %v2518_v19, %v2432_v9  ;;  %v9876_v50 = vpop.f32.mrf.mxu1  ;;  %v3355_v27 = vor.u32 %v3354_v5, %v3353_v53  ;;  %v3358_v24 = vrot.slane %v12519_v43, 6  ;;  %v12520_v2 = vld [vmem:[#allocation90_spill] sm:$0xff]  ;;  %v2132_v9 = vadd.f32 %v9630_v42, %v9392_v44  ;;  %v2593_v42 = vld [vmem:[#allocation2 + $0x40] sm:$0xff] }
 0x2c0   : > { %v2884_v18 = vrot.slane %v2883_v4, 4  ;;  %v2890_v62 = vrot.slane %v12520_v2, 5  ;;  %v12522_v4 = vld [vmem:[#allocation117_spill] sm:$0xff]  ;;  %v2133_v43 = vadd.f32 %v9665_v10, %v9399_v39  ;;  %v3367_v39 = vrot.slane %v12509_v30, 7 }
 0x2c1   : > { %2685 = vrot.lane.b32.xlu0 %v2571_v29, %s7855_s12  ;;  %v2224_v19 = vpop.f32.mrf.mxu2  ;;  %v3357_v32 = vrot.slane %v3355_v27, 4  ;;  %v3360_v45 = vor.u32 %v3359_v7, %v3358_v24  ;;  %v3356_v22 = vsel %vm9762_vm1, %v3352_v61, %v3355_v27  ;;  %v2893_v0 = vrot.slane %v12522_v4, 5 }
 0x2c2   : > { %v2274_v58 = vadd.f32 %v2224_v19, %v2132_v9  ;;  %v2886_v29 = vsel %vm9727_vm13, %v2884_v18, %v2885_v16  ;;  %v2891_v44 = vsel %vm9727_vm13, %v2889_v57, %v2890_v62  ;;  %v12521_v16 = vld [vmem:[#allocation115_spill] sm:$0xff]  ;;  %v3526_v24 = vunpack.c.l.b16 %v3356_v22 }
 0x2c3   : > { %v2523_v49 = vpop.f32.mrf.mxu0  ;;  %v3129_v53 = vunpack.c.l.b16 %v2886_v29  ;;  %v3130_v5 = vunpack.c.l.b16 %v2891_v44  ;;  %v2892_v19 = vrot.slane %v12521_v16, 4  ;;  %v3362_v18 = vrot.slane %v12507_v59, 6 }
 0x2c4   : > { %v2381_v60 = vpop.f32.mrf.mxu3  ;;  %v3363_v57 = vrot.slane %v12508_v63, 7  ;;  %v3366_v61 = vrot.slane %v12510_v20, 6  ;;  %v3372_v30 = vrot.slane %v12513_v40, 7 }
 0x2c5   : > { %v2433_v31 = vadd.f32 %v2381_v60, %v2273_v17  ;;  %v3361_v17 = vsel %vm9762_vm1, %v3357_v32, %v3360_v45  ;;  %v12523_v60 = vld [vmem:[#allocation119_spill] sm:$0xff]  ;;  %v9917_v9 = vpack.c.b16 %v3130_v5, %v3129_v53  ;;  %v12528_v53 = vld [vmem:[#allocation134_spill] sm:$0xff] }
 0x2c6   : > { %7255 = vmatmul.msk.bf16.gmra.mxu0 %vm871_vm4, %v9874_v51  ;;  %v2896_v52 = vrot.slane %v12523_v60, 5  ;;  %v3527_v7 = vunpack.c.l.b16 %v3361_v17  ;;  %v2591_v32 = vld [vmem:[#allocation2 + $0x30] sm:$0xff]  ;;  %v3364_v44 = vor.u32 %v3363_v57, %v3362_v18  ;;  %v2134_v5 = vadd.f32 %v12528_v53, %v9410_v6 }
 0x2c7   : > { %v2572_v46 = vadd.f32 %v2520_v28, %v2433_v31  ;;  %v9893_v55 = vpop.f32.mrf.mxu1  ;;  %v12524_v31 = vld [vmem:[#allocation118_spill] sm:$0xff]  ;;  %v3375_v53 = vrot.slane %v12514_v25, 6 }
 0x2c8   : > { %v2898_v12 = vrot.slane %v12524_v31, 4  ;;  %v9923_v63 = vpack.c.b16 %v3527_v7, %v3526_v24 }
 0x2c9   : > { %7238 = vmatmul.msk.bf16.gmra.mxu3 %vm871_vm4, %v9880_v14  ;;  %2687 = vrot.lane.b32.xlu1 %v2572_v46, %s7855_s12  ;;  %v2226_v15 = vpop.f32.mrf.mxu2 }
 0x2ca   : > { %7210 = vmatmul.msk.bf16.gmra.mxu1 %vm871_vm4, %v8034_v54  ;;  %v2275_v62 = vadd.f32 %v2226_v15, %v2133_v43 }
 0x2cb   : > { %v2525_v13 = vpop.f32.mrf.mxu0  ;;  %v2666_v28 = vpop.permute.xlu2 %2665 }
 0x2cc   : > { %v2384_v41 = vpop.f32.mrf.mxu3  ;;  %v2753_v36 = vadd.f32 %v2666_v28, %v2593_v42  ;;  %v3368_v42 = vor.u32 %v3367_v39, %v3366_v61  ;;  %v12525_v28 = vld [vmem:[#allocation82_spill] sm:$0xff] }
 0x2cd   : > { %v2434_v37 = vadd.f32 %v2384_v41, %v2274_v58  ;;  %v2899_v58 = vor.u32 %v2898_v12, %v2896_v52  ;;  %v12526_v20 = vshrl.u32 %v12525_v28, 16  ;;  %v12529_v39 = vld [vmem:[#allocation30_spill] sm:$0xff] }
 0x2ce   : > { %2786 = vst.msk [vmem:[#allocation2 + $0x40] sm:$0xff] %vm2777_vm2, %v2753_v36  ;;  %7222 = vmatmul.msk.bf16.gmra.mxu2 %vm871_vm4, %v9832_v8  ;;  %v2894_v8 = vor.u32 %v2893_v0, %v2892_v19  ;;  %v3365_v0 = vrot.slane %v3364_v44, 4  ;;  %v3370_v40 = vrot.slane %v3368_v42, 4 }
 0x2cf   : > { %v2573_v27 = vadd.f32 %v2523_v49, %v2434_v37  ;;  %v9919_v46 = vpop.f32.mrf.mxu1  ;;  %v3371_v41 = vrot.slane %v12526_v20, 6  ;;  %v2900_v22 = vrot.slane %v2899_v58, 4  ;;  %v12527_v37 = vld [vmem:[#allocation120_spill] sm:$0xff] }
 0x2d0   : > { %v2895_v36 = vrot.slane %v2894_v8, 4  ;;  %v2901_v17 = vrot.slane %v12527_v37, 5  ;;  %v12533_v20 = vld [vmem:[#allocation12_spill] sm:$0xff] }
 0x2d1   : > { %2689 = vrot.lane.b32.xlu2 %v2573_v27, %s7855_s12  ;;  %v2229_v49 = vpop.f32.mrf.mxu2  ;;  %v3373_v27 = vor.u32 %v3372_v30, %v3371_v41  ;;  %v2909_v41 = vrot.slane %v12533_v20, 4  ;;  %v12534_v30 = vld [vmem:[#allocation147_spill] sm:$0xff] }
 0x2d2   : > { %v2276_v12 = vadd.f32 %v2229_v49, %v2134_v5  ;;  %v2897_v18 = vsel %vm9727_vm13, %v2895_v36, %v2896_v52  ;;  %v2902_v6 = vsel %vm9727_vm13, %v2900_v22, %v2901_v17  ;;  %v3369_v49 = vsel %vm9762_vm1, %v3365_v0, %v3368_v42  ;;  %v12530_v52 = vld [vmem:[#allocation10_spill] sm:$0xff] }
 0x2d3   : > { %v2528_v10 = vpop.f32.mrf.mxu0  ;;  %v2662_v45 = vpop.permute.xlu0 %2661  ;;  %v3374_v58 = vsel %vm9762_vm1, %v3370_v40, %v3373_v27  ;;  %v2135_v36 = vadd.f32 %v9735_v1, %v12534_v30  ;;  %v3528_v22 = vunpack.c.l.b16 %v3369_v49  ;;  %v3376_v5 = vrot.slane %v12515_v56, 7 }
 0x2d4   : > { %v2386_v59 = vpop.f32.mrf.mxu3  ;;  %v2751_v29 = vadd.f32 %v2662_v45, %v2591_v32  ;;  %v3131_v32 = vunpack.c.l.b16 %v2897_v18  ;;  %v3132_v45 = vunpack.c.l.b16 %v2902_v6  ;;  %v3529_v17 = vunpack.c.l.b16 %v3374_v58 }
 0x2d5   : > { %v2435_v15 = vadd.f32 %v2386_v59, %v2275_v62  ;;  %v2903_v59 = vrot.slane %v12530_v52, 4  ;;  %v3379_v40 = vrot.slane %v12517_v38, 6  ;;  %v3380_v1 = vrot.slane %v12516_v48, 7 }
 0x2d6   : > { %7256 = vmatmul.msk.bf16.gmra.mxu0 %vm871_vm4, %v9917_v9  ;;  %2784 = vst.msk [vmem:[#allocation2 + $0x30] sm:$0xff] %vm2777_vm2, %v2751_v29  ;;  %v12531_v29 = vld [vmem:[#allocation11_spill] sm:$0xff]  ;;  %v9961_v0 = vpack.c.b16 %v3132_v45, %v3131_v32  ;;  %v9967_v56 = vpack.c.b16 %v3529_v17, %v3528_v22  ;;  %v3385_v48 = vrot.slane %v12520_v2, 7 }
 0x2d7   : > { %v2574_v19 = vadd.f32 %v2525_v13, %v2435_v15  ;;  %v9937_v43 = vpop.f32.mrf.mxu1  ;;  %v2592_v13 = vld [vmem:[#allocation2 + $0x38] sm:$0xff]  ;;  %v2904_v44 = vrot.slane %v12531_v29, 5  ;;  %v12532_v15 = vld [vmem:[#allocation13_spill] sm:$0xff]  ;;  %v3381_v49 = vor.u32 %v3380_v1, %v3379_v40 }
 0x2d8   : > { %v2907_v28 = vrot.slane %v12532_v15, 5 }
 0x2d9   : > { %7239 = vmatmul.msk.bf16.gmra.mxu3 %vm871_vm4, %v9923_v63  ;;  %2691 = vrot.lane.b32.xlu0 %v2574_v19, %s7855_s12  ;;  %v2231_v7 = vpop.f32.mrf.mxu2  ;;  %v2905_v18 = vor.u32 %v2904_v44, %v2903_v59  ;;  %v12537_v59 = vld [vmem:[#allocation14_spill] sm:$0xff]  ;;  %v3383_v2 = vrot.slane %v3381_v49, 4 }
 0x2da   : > { %7211 = vmatmul.msk.bf16.gmra.mxu1 %vm871_vm4, %v12529_v39  ;;  %v2277_v19 = vadd.f32 %v2231_v7, %v2135_v36  ;;  %v2910_v6 = vor.u32 %v2909_v41, %v2907_v28  ;;  %v2912_v44 = vrot.slane %v12537_v59, 5  ;;  %v12538_v41 = vld [vmem:[#allocation148_spill] sm:$0xff] }
 0x2db   : > { %v2530_v24 = vpop.f32.mrf.mxu0  ;;  %v2664_v57 = vpop.permute.xlu1 %2663  ;;  %v2906_v32 = vrot.slane %v2905_v18, 4  ;;  %v2136_v30 = vadd.f32 %v9758_v33, %v12538_v41 }
 0x2dc   : > { %v2389_v62 = vpop.f32.mrf.mxu3  ;;  %v2752_v61 = vadd.f32 %v2664_v57, %v2592_v13  ;;  %v2596_v13 = vld [vmem:[#allocation2 + $0x58] sm:$0xff]  ;;  %v2911_v45 = vrot.slane %v2910_v6, 4 }
 0x2dd   : > { %v2436_v8 = vadd.f32 %v2389_v62, %v2276_v12  ;;  %v2908_v40 = vsel %vm9727_vm13, %v2906_v32, %v2907_v28  ;;  %v12540_v28 = vld [vmem:[#allocation16_spill] sm:$0xff]  ;;  %v12543_v32 = vld [vmem:[#allocation18_spill] sm:$0xff] }
 0x2de   : > { %2785 = vst.msk [vmem:[#allocation2 + $0x38] sm:$0xff] %vm2777_vm2, %v2752_v61  ;;  %7223 = vmatmul.msk.bf16.gmra.mxu2 %vm871_vm4, %v9874_v51  ;;  %v3377_v61 = vor.u32 %v3376_v5, %v3375_v53  ;;  %v2913_v33 = vsel %vm9727_vm13, %v2911_v45, %v2912_v44  ;;  %v2920_v45 = vrot.slane %v12543_v32, 4  ;;  %v12544_v44 = vld [vmem:[#allocation149_spill] sm:$0xff] }
 0x2df   : > { %v2575_v42 = vadd.f32 %v2528_v10, %v2436_v8  ;;  %v9963_v12 = vpop.f32.mrf.mxu1  ;;  %v12535_v8 = vld [vmem:[#allocation87_spill] sm:$0xff]  ;;  %v2137_v41 = vadd.f32 %v9789_v26, %v12544_v44  ;;  %v3393_v26 = vrot.slane %v12523_v60, 7  ;;  %v3398_v60 = vrot.slane %v12527_v37, 7 }
 0x2e0   : > { %v12536_v38 = vshrl.u32 %v12535_v8, 16  ;;  %v12541_v8 = vld [vmem:[#allocation17_spill] sm:$0xff] }
 0x2e1   : > { %2693 = vrot.lane.b32.xlu1 %v2575_v42, %s7855_s12  ;;  %v2234_v27 = vpop.f32.mrf.mxu2  ;;  %v3378_v42 = vrot.slane %v3377_v61, 4  ;;  %v3134_v61 = vunpack.c.l.b16 %v2913_v33  ;;  %v3392_v33 = vrot.slane %v12524_v31, 6 }
 0x2e2   : > { %v3384_v58 = vrot.slane %v12536_v38, 6  ;;  %v2278_v22 = vadd.f32 %v2234_v27, %v2136_v30  ;;  %v2915_v38 = vrot.slane %v12541_v8, 5 }
 0x2e3   : > { %v2533_v10 = vpop.f32.mrf.mxu0  ;;  %v2672_v57 = vpop.permute.xlu2 %2671  ;;  %v3382_v27 = vsel %vm9762_vm1, %v3378_v42, %v3381_v49  ;;  %v3388_v42 = vrot.slane %v12521_v16, 6 }
 0x2e4   : > { %v2391_v25 = vpop.f32.mrf.mxu3  ;;  %v2756_v62 = vadd.f32 %v2672_v57, %v2596_v13  ;;  %v3386_v53 = vor.u32 %v3385_v48, %v3384_v58  ;;  %v12539_v13 = vld [vmem:[#allocation54_spill] sm:$0xff]  ;;  %v12542_v58 = vld [vmem:[#allocation19_spill] sm:$0xff]  ;;  %v3530_v30 = vunpack.c.l.b16 %v3382_v27 }
 0x2e5   : > { %v2437_v7 = vadd.f32 %v2391_v25, %v2277_v19  ;;  %v2918_v48 = vrot.slane %v12542_v58, 5 }
 0x2e6   : > { %7257 = vmatmul.msk.bf16.gmra.mxu0 %vm871_vm4, %v9961_v0  ;;  %2789 = vst.msk [vmem:[#allocation2 + $0x58] sm:$0xff] %vm2777_vm2, %v2756_v62  ;;  %v3387_v25 = vsel %vm9762_vm1, %v3383_v2, %v3386_v53  ;;  %v3133_v62 = vunpack.c.l.b16 %v2908_v40 }
 0x2e7   : > { %v2576_v36 = vadd.f32 %v2530_v24, %v2437_v7  ;;  %v9981_v17 = vpop.f32.mrf.mxu1  ;;  %v2594_v24 = vld [vmem:[#allocation2 + $0x48] sm:$0xff]  ;;  %v2914_v7 = vrot.slane %v12540_v28, 4 }
 0x2e8   : > { %v10005_v53 = vpack.c.b16 %v3134_v61, %v3133_v62  ;;  %v3394_v62 = vor.u32 %v3393_v26, %v3392_v33  ;;  %v12546_v61 = vld [vmem:[#allocation114_spill] sm:$0xff] }
 0x2e9   : > { %7240 = vmatmul.msk.bf16.gmra.mxu3 %vm871_vm4, %v9967_v56  ;;  %2695 = vrot.lane.b32.xlu2 %v2576_v36, %s7855_s12  ;;  %v2236_v19 = vpop.f32.mrf.mxu2  ;;  %v3531_v36 = vunpack.c.l.b16 %v3387_v25  ;;  %v12547_v31 = vshrl.u32 %v12546_v61, 16 }
 0x2ea   : > { %7212 = vmatmul.msk.bf16.gmra.mxu1 %vm871_vm4, %v12539_v13  ;;  %v2279_v2 = vadd.f32 %v2236_v19, %v2137_v41  ;;  %12545 = vst [vmem:[#allocation138_spill] sm:$0xff] %v10005_v53  ;;  %v3396_v37 = vrot.slane %v3394_v62, 4 }
 0x2eb   : > { %v2535_v5 = vpop.f32.mrf.mxu0  ;;  %v2668_v1 = vpop.permute.xlu0 %2667  ;;  %v3397_v44 = vrot.slane %v12547_v31, 6 }
 0x2ec   : > { %v2394_v18 = vpop.f32.mrf.mxu3  ;;  %v2754_v6 = vadd.f32 %v2668_v1, %v2594_v24  ;;  %v2916_v1 = vor.u32 %v2915_v38, %v2914_v7 }
 0x2ed   : > { %v2438_v57 = vadd.f32 %v2394_v18, %v2278_v22  ;;  %v3389_v22 = vrot.slane %v12522_v4, 7  ;;  %v2921_v18 = vor.u32 %v2920_v45, %v2918_v48  ;;  %v10011_v4 = vpack.c.b16 %v3531_v36, %v3530_v30  ;;  %v12548_v45 = vld [vmem:[#allocation21_spill] sm:$0xff] }
 0x2ee   : > { %2787 = vst.msk [vmem:[#allocation2 + $0x48] sm:$0xff] %vm2777_vm2, %v2754_v6  ;;  %7224 = vmatmul.msk.bf16.gmra.mxu2 %vm871_vm4, %v9917_v9  ;;  %v2595_v6 = vld [vmem:[#allocation2 + $0x50] sm:$0xff]  ;;  %v2917_v7 = vrot.slane %v2916_v1, 4  ;;  %v2923_v41 = vrot.slane %v12548_v45, 5  ;;  %v3399_v33 = vor.u32 %v3398_v60, %v3397_v44 }
 0x2ef   : > { %v2577_v49 = vadd.f32 %v2533_v10, %v2438_v57  ;;  %v10007_v40 = vpop.f32.mrf.mxu1  ;;  %v3390_v25 = vor.u32 %v3389_v22, %v3388_v42  ;;  %v2922_v38 = vrot.slane %v2921_v18, 4  ;;  %v12552_v60 = vld [vmem:[#allocation39_spill] sm:$0xff] }
 0x2f0   : > { %v2919_v18 = vsel %vm9727_vm13, %v2917_v7, %v2918_v48  ;;  %v12551_v48 = vld [vmem:[#allocation38_spill] sm:$0xff]  ;;  %v2926_v7 = vrot.slane %v12552_v60, 5 }
 0x2f1   : > { %2697 = vrot.lane.b32.xlu0 %v2577_v49, %s7855_s12  ;;  %v2239_v24 = vpop.f32.mrf.mxu2  ;;  %v12549_v49 = vld [vmem:[#allocation150_spill] sm:$0xff]  ;;  %v3391_v42 = vrot.slane %v3390_v25, 4  ;;  %v3135_v61 = vunpack.c.l.b16 %v2919_v18  ;;  %v2925_v44 = vrot.slane %v12551_v48, 4 }
 0x2f2   : > { %v2138_v30 = vadd.f32 %v9808_v35, %v12549_v49  ;;  %v2924_v35 = vsel %vm9727_vm13, %v2922_v38, %v2923_v41  ;;  %v12553_v38 = vld [vmem:[#allocation41_spill] sm:$0xff]  ;;  %v12554_v49 = vld [vmem:[#allocation40_spill] sm:$0xff] }
 0x2f3   : > { %v2538_v10 = vpop.f32.mrf.mxu0  ;;  %v2670_v27 = vpop.permute.xlu1 %2669  ;;  %v3136_v31 = vunpack.c.l.b16 %v2924_v35  ;;  %v2929_v41 = vrot.slane %v12553_v38, 5 }
 0x2f4   : > { %v2396_v16 = vpop.f32.mrf.mxu3  ;;  %v2755_v57 = vadd.f32 %v2670_v27, %v2595_v6  ;;  %v2280_v22 = vadd.f32 %v2239_v24, %v2138_v30  ;;  %v3395_v24 = vsel %vm9762_vm1, %v3391_v42, %v3394_v62  ;;  %v2931_v30 = vrot.slane %v12554_v49, 4 }
 0x2f5   : > { %v2439_v19 = vadd.f32 %v2396_v16, %v2279_v2  ;;  %v3532_v42 = vunpack.c.l.b16 %v3395_v24  ;;  %v10049_v35 = vpack.c.b16 %v3136_v31, %v3135_v61  ;;  %v12557_v31 = vld [vmem:[#allocation9_spill] sm:$0xff] }
 0x2f6   : > { %7258 = vmatmul.msk.bf16.gmra.mxu0 %vm871_vm4, %v10005_v53  ;;  %2788 = vst.msk [vmem:[#allocation2 + $0x50] sm:$0xff] %vm2777_vm2, %v2755_v57  ;;  %v12550_v57 = vld [vmem:[#allocation84_spill] sm:$0xff]  ;;  %v2932_v24 = vor.u32 %v2931_v30, %v2929_v41  ;;  %v12559_v30 = vld [vmem:[#allocation42_spill] sm:$0xff] }
 0x2f7   : > { %v2578_v36 = vadd.f32 %v2535_v5, %v2439_v19  ;;  %v10025_v2 = vpop.f32.mrf.mxu1  ;;  %v2599_v5 = vld [vmem:[#allocation2 + $0x70] sm:$0xff]  ;;  %v3400_v19 = vsel %vm9762_vm1, %v3396_v37, %v3399_v33  ;;  %v3401_v37 = vrot.slane %v12530_v52, 6  ;;  %v3402_v33 = vrot.slane %v12531_v29, 7  ;;  %12556 = vst [vmem:[#allocation137_spill] sm:$0xff] %v10049_v35 }
 0x2f8   : > { %v2934_v13 = vrot.slane %v12559_v30, 5 }
 0x2f9   : > { %7241 = vmatmul.msk.bf16.gmra.mxu3 %vm871_vm4, %v10011_v4  ;;  %2699 = vrot.lane.b32.xlu1 %v2578_v36, %s7855_s12  ;;  %v2241_v1 = vpop.f32.mrf.mxu2  ;;  %v12555_v36 = vld [vmem:[#allocation151_spill] sm:$0xff] }
 0x2fa   : > { %7213 = vmatmul.msk.bf16.gmra.mxu1 %vm871_vm4, %v12550_v57 }
 0x2fb   : > { %v2540_v26 = vpop.f32.mrf.mxu0  ;;  %v2678_v6 = vpop.permute.xlu2 %2677 }
 0x2fc   : > { %v2399_v27 = vpop.f32.mrf.mxu3  ;;  %v2759_v16 = vadd.f32 %v2678_v6, %v2599_v5  ;;  %v2139_v5 = vadd.f32 %v9834_v3, %v12555_v36  ;;  %v3406_v3 = vrot.slane %v12532_v15, 7  ;;  %v3411_v15 = vrot.slane %v12537_v59, 7 }
 0x2fd   : > { %v2440_v25 = vadd.f32 %v2399_v27, %v2280_v22  ;;  %v3533_v22 = vunpack.c.l.b16 %v3400_v19  ;;  %v3405_v27 = vrot.slane %v12533_v20, 6  ;;  %v2597_v19 = vld [vmem:[#allocation2 + $0x60] sm:$0xff]  ;;  %v12558_v20 = vshrl.u32 %v12557_v31, 16 }
 0x2fe   : > { %2792 = vst.msk [vmem:[#allocation2 + $0x70] sm:$0xff] %vm2777_vm2, %v2759_v16  ;;  %7225 = vmatmul.msk.bf16.gmra.mxu2 %vm871_vm4, %v9961_v0  ;;  %v2281_v18 = vadd.f32 %v2241_v1, %v2139_v5 }
 0x2ff   : > { %v2579_v62 = vadd.f32 %v2538_v10, %v2440_v25  ;;  %v10051_v6 = vpop.f32.mrf.mxu1  ;;  %v2927_v25 = vor.u32 %v2926_v7, %v2925_v44  ;;  %v10055_v29 = vpack.c.b16 %v3533_v22, %v3532_v42  ;;  %v3407_v61 = vor.u32 %v3406_v3, %v3405_v27 }
 0x300   : > { %v3410_v5 = vrot.slane %v12558_v20, 6  ;;  %v2933_v7 = vrot.slane %v2932_v24, 4 }
 0x301   : > { %2701 = vrot.lane.b32.xlu2 %v2579_v62, %s7855_s12  ;;  %v2244_v16 = vpop.f32.mrf.mxu2  ;;  %v3403_v62 = vor.u32 %v3402_v33, %v3401_v37  ;;  %v2928_v44 = vrot.slane %v2927_v25, 4  ;;  %v3409_v59 = vrot.slane %v3407_v61, 4 }
 0x302   : > { %v3412_v27 = vor.u32 %v3411_v15, %v3410_v5  ;;  %v12563_v15 = vld [vmem:[#allocation71_spill] sm:$0xff] }
 0x303   : > { %v2543_v10 = vpop.f32.mrf.mxu0  ;;  %v2674_v36 = vpop.permute.xlu0 %2673  ;;  %v3404_v37 = vrot.slane %v3403_v62, 4  ;;  %v2930_v25 = vsel %vm9727_vm13, %v2928_v44, %v2929_v41  ;;  %v12561_v62 = vld [vmem:[#allocation107_spill] sm:$0xff]  ;;  %v12562_v41 = vld [vmem:[#allocation69_spill] sm:$0xff]  ;;  %v2937_v44 = vrot.slane %v12563_v15, 5 }
 0x304   : > { %v2401_v52 = vpop.f32.mrf.mxu3  ;;  %v2757_v57 = vadd.f32 %v2674_v36, %v2597_v19  ;;  %v12560_v19 = vld [vmem:[#allocation152_spill] sm:$0xff]  ;;  %v3413_v31 = vsel %vm9762_vm1, %v3409_v59, %v3412_v27  ;;  %v3137_v20 = vunpack.c.l.b16 %v2930_v25  ;;  %v3414_v59 = vrot.slane %v12540_v28, 6 }
 0x305   : > { %v2441_v1 = vadd.f32 %v2401_v52, %v2281_v18  ;;  %v2140_v42 = vadd.f32 %v9850_v11, %v12560_v19  ;;  %v2935_v11 = vsel %vm9727_vm13, %v2933_v7, %v2934_v13  ;;  %v2936_v13 = vrot.slane %v12562_v41, 4  ;;  %v12564_v7 = vld [vmem:[#allocation74_spill] sm:$0xff] }
 0x306   : > { %7259 = vmatmul.msk.bf16.gmra.mxu0 %vm871_vm4, %v10049_v35  ;;  %2790 = vst.msk [vmem:[#allocation2 + $0x60] sm:$0xff] %vm2777_vm2, %v2757_v57  ;;  %v3138_v5 = vunpack.c.l.b16 %v2935_v11  ;;  %v2940_v19 = vrot.slane %v12564_v7, 5  ;;  %v3415_v27 = vrot.slane %v12541_v8, 7 }
 0x307   : > { %v2580_v22 = vadd.f32 %v2540_v26, %v2441_v1  ;;  %v2282_v33 = vadd.f32 %v2244_v16, %v2140_v42  ;;  %v10069_v18 = vpop.f32.mrf.mxu1  ;;  %v2598_v26 = vld [vmem:[#allocation2 + $0x68] sm:$0xff]  ;;  %v3408_v16 = vsel %vm9762_vm1, %v3404_v37, %v3407_v61  ;;  %v12565_v42 = vld [vmem:[#allocation72_spill] sm:$0xff] }
 0x308   : > { %v3534_v37 = vunpack.c.l.b16 %v3408_v16  ;;  %v10093_v11 = vpack.c.b16 %v3138_v5, %v3137_v20  ;;  %v12568_v5 = vld [vmem:[#allocation15_spill] sm:$0xff] }
 0x309   : > { %7242 = vmatmul.msk.bf16.gmra.mxu3 %vm871_vm4, %v10055_v29  ;;  %2703 = vrot.lane.b32.xlu0 %v2580_v22, %s7855_s12  ;;  %v2246_v3 = vpop.f32.mrf.mxu2  ;;  %v2942_v22 = vrot.slane %v12565_v42, 4 }
 0x30a   : > { %7214 = vmatmul.msk.bf16.gmra.mxu1 %vm871_vm4, %v12561_v62  ;;  %12567 = vst [vmem:[#allocation139_spill] sm:$0xff] %v10093_v11 }
 0x30b   : > { %v2545_v57 = vpop.f32.mrf.mxu0  ;;  %v2676_v24 = vpop.permute.xlu1 %2675  ;;  %v2943_v16 = vor.u32 %v2942_v22, %v2940_v19  ;;  %v12570_v22 = vld [vmem:[#allocation75_spill] sm:$0xff] }
 0x30c   : > { %v2404_v36 = vpop.f32.mrf.mxu3  ;;  %v2758_v52 = vadd.f32 %v2676_v24, %v2598_v26  ;;  %v12566_v26 = vld [vmem:[#allocation153_spill] sm:$0xff]  ;;  %v2945_v54 = vrot.slane %v12570_v22, 5 }
 0x30d   : > { %v2442_v1 = vadd.f32 %v2404_v36, %v2282_v33  ;;  %v2141_v24 = vadd.f32 %v9876_v50, %v12566_v26  ;;  %v3535_v33 = vunpack.c.l.b16 %v3413_v31  ;;  %v3419_v50 = vrot.slane %v12542_v58, 7  ;;  %v2602_v31 = vld [vmem:[#allocation2 + $0x88] sm:$0xff] }
 0x30e   : > { %2791 = vst.msk [vmem:[#allocation2 + $0x68] sm:$0xff] %vm2777_vm2, %v2758_v52  ;;  %7226 = vmatmul.msk.bf16.gmra.mxu2 %vm871_vm4, %v10005_v53  ;;  %v3418_v52 = vrot.slane %v12543_v32, 6  ;;  %v2938_v26 = vor.u32 %v2937_v44, %v2936_v13  ;;  %v12569_v32 = vshrl.u32 %v12568_v5, 16  ;;  %v3424_v58 = vrot.slane %v12548_v45, 7 }
 0x30f   : > { %v2581_v61 = vadd.f32 %v2543_v10, %v2442_v1  ;;  %v2283_v25 = vadd.f32 %v2246_v3, %v2141_v24  ;;  %v10095_v36 = vpop.f32.mrf.mxu1  ;;  %v10099_v8 = vpack.c.b16 %v3535_v33, %v3534_v37  ;;  %v2944_v44 = vrot.slane %v2943_v16, 4 }
 0x310   : > { %v3420_v20 = vor.u32 %v3419_v50, %v3418_v52  ;;  %v3423_v24 = vrot.slane %v12569_v32, 6  ;;  %v2939_v13 = vrot.slane %v2938_v26, 4 }
 0x311   : > { %2705 = vrot.lane.b32.xlu1 %v2581_v61, %s7855_s12  ;;  %v2249_v1 = vpop.f32.mrf.mxu2  ;;  %v3416_v61 = vor.u32 %v3415_v27, %v3414_v59 }
 0x312   : > { %v3422_v45 = vrot.slane %v3420_v20, 4  ;;  %v3425_v52 = vor.u32 %v3424_v58, %v3423_v24  ;;  %v2941_v26 = vsel %vm9727_vm13, %v2939_v13, %v2940_v19  ;;  %v12573_v19 = vld [vmem:[#allocation92_spill] sm:$0xff]  ;;  %v12574_v58 = vld [vmem:[#allocation93_spill] sm:$0xff] }
 0x313   : > { %v2548_v10 = vpop.f32.mrf.mxu0  ;;  %v2684_v62 = vpop.permute.xlu2 %2683  ;;  %v3417_v59 = vrot.slane %v3416_v61, 4  ;;  %v12572_v61 = vld [vmem:[#allocation124_spill] sm:$0xff]  ;;  %v3139_v32 = vunpack.c.l.b16 %v2941_v26  ;;  %v2948_v13 = vrot.slane %v12574_v58, 5 }
 0x314   : > { %v2406_v28 = vpop.f32.mrf.mxu3  ;;  %v2762_v39 = vadd.f32 %v2684_v62, %v2602_v31  ;;  %v12571_v62 = vld [vmem:[#allocation154_spill] sm:$0xff]  ;;  %v3426_v5 = vsel %vm9762_vm1, %v3422_v45, %v3425_v52  ;;  %v3427_v45 = vrot.slane %v12551_v48, 6  ;;  %v3428_v52 = vrot.slane %v12552_v60, 7 }
 0x315   : > { %v2443_v3 = vadd.f32 %v2406_v28, %v2283_v25  ;;  %v2142_v37 = vadd.f32 %v9893_v55, %v12571_v62  ;;  %v2946_v55 = vsel %vm9727_vm13, %v2944_v44, %v2945_v54  ;;  %v2947_v54 = vrot.slane %v12573_v19, 4  ;;  %v12575_v44 = vld [vmem:[#allocation97_spill] sm:$0xff] }
 0x316   : > { %7260 = vmatmul.msk.bf16.gmra.mxu0 %vm871_vm4, %v10093_v11  ;;  %2795 = vst.msk [vmem:[#allocation2 + $0x88] sm:$0xff] %vm2777_vm2, %v2762_v39  ;;  %v3140_v24 = vunpack.c.l.b16 %v2946_v55  ;;  %v2951_v62 = vrot.slane %v12575_v44, 5 }
 0x317   : > { %v2582_v33 = vadd.f32 %v2545_v57, %v2443_v3  ;;  %v2284_v27 = vadd.f32 %v2249_v1, %v2142_v37  ;;  %v10113_v25 = vpop.f32.mrf.mxu1  ;;  %v2600_v57 = vld [vmem:[#allocation2 + $0x78] sm:$0xff]  ;;  %v3421_v1 = vsel %vm9762_vm1, %v3417_v59, %v3420_v20  ;;  %v12576_v37 = vld [vmem:[#allocation94_spill] sm:$0xff] }
 0x318   : > { %v3536_v59 = vunpack.c.l.b16 %v3421_v1  ;;  %v10137_v55 = vpack.c.b16 %v3140_v24, %v3139_v32  ;;  %v12579_v24 = vld [vmem:[#allocation37_spill] sm:$0xff] }
 0x319   : > { %7243 = vmatmul.msk.bf16.gmra.mxu3 %vm871_vm4, %v10099_v8  ;;  %2707 = vrot.lane.b32.xlu2 %v2582_v33, %s7855_s12  ;;  %v2251_v50 = vpop.f32.mrf.mxu2  ;;  %v2953_v33 = vrot.slane %v12576_v37, 4 }
 0x31a   : > { %7215 = vmatmul.msk.bf16.gmra.mxu1 %vm871_vm4, %v12572_v61  ;;  %12578 = vst [vmem:[#allocation141_spill] sm:$0xff] %v10137_v55 }
 0x31b   : > { %v2550_v39 = vpop.f32.mrf.mxu0  ;;  %v2680_v16 = vpop.permute.xlu0 %2679  ;;  %v2954_v1 = vor.u32 %v2953_v33, %v2951_v62  ;;  %v12581_v33 = vld [vmem:[#allocation98_spill] sm:$0xff] }
 0x31c   : > { %v2409_v31 = vpop.f32.mrf.mxu3  ;;  %v2760_v28 = vadd.f32 %v2680_v16, %v2600_v57  ;;  %v12577_v57 = vld [vmem:[#allocation131_spill] sm:$0xff]  ;;  %v2956_v53 = vrot.slane %v12581_v33, 5 }
 0x31d   : > { %v2444_v3 = vadd.f32 %v2409_v31, %v2284_v27  ;;  %v2143_v16 = vadd.f32 %v9919_v46, %v12577_v57  ;;  %v3537_v27 = vunpack.c.l.b16 %v3426_v5  ;;  %v3432_v46 = vrot.slane %v12553_v38, 7  ;;  %v2601_v5 = vld [vmem:[#allocation2 + $0x80] sm:$0xff] }
 0x31e   : > { %2793 = vst.msk [vmem:[#allocation2 + $0x78] sm:$0xff] %vm2777_vm2, %v2760_v28  ;;  %7227 = vmatmul.msk.bf16.gmra.mxu2 %vm871_vm4, %v10049_v35  ;;  %v3431_v28 = vrot.slane %v12554_v49, 6  ;;  %v2949_v57 = vor.u32 %v2948_v13, %v2947_v54  ;;  %v12580_v49 = vshrl.u32 %v12579_v24, 16  ;;  %v3437_v38 = vrot.slane %v12559_v30, 7 }
 0x31f   : > { %v2583_v20 = vadd.f32 %v2548_v10, %v2444_v3  ;;  %v2285_v26 = vadd.f32 %v2251_v50, %v2143_v16  ;;  %v10139_v31 = vpop.f32.mrf.mxu1  ;;  %v10143_v60 = vpack.c.b16 %v3537_v27, %v3536_v59  ;;  %v2955_v13 = vrot.slane %v2954_v1, 4 }
 0x320   : > { %v3433_v32 = vor.u32 %v3432_v46, %v3431_v28  ;;  %v3436_v16 = vrot.slane %v12580_v49, 6  ;;  %v2950_v54 = vrot.slane %v2949_v57, 4  ;;  %v2605_v46 = vld [vmem:[#allocation2 + $0xa0] sm:$0xff]  ;;  %v12584_v49 = vld [vmem:[#allocation110_spill] sm:$0xff] }
 0x321   : > { %2709 = vrot.lane.b32.xlu0 %v2583_v20, %s7855_s12  ;;  %v3227_v3 = vpop.f32.mrf.mxu2  ;;  %v3429_v20 = vor.u32 %v3428_v52, %v3427_v45 }
 0x322   : > { %v3228_v27 = vadd.f32 %v3227_v3, %v9937_v43  ;;  %v3435_v52 = vrot.slane %v3433_v32, 4 }
 0x323   : > { %v3788_v10 = vpop.f32.mrf.mxu0  ;;  %v2682_v61 = vpop.permute.xlu1 %2681  ;;  %v3430_v59 = vrot.slane %v3429_v20, 4 }
 0x324   : > { %v2411_v48 = vpop.f32.mrf.mxu3  ;;  %v2761_v35 = vadd.f32 %v2682_v61, %v2601_v5 }
 0x325   : > { %v2445_v50 = vadd.f32 %v2411_v48, %v2285_v26  ;;  %v3438_v26 = vor.u32 %v3437_v38, %v3436_v16  ;;  %v12582_v48 = vld [vmem:[#allocation36_spill] sm:$0xff]  ;;  %v3434_v43 = vsel %vm9762_vm1, %v3430_v59, %v3433_v32  ;;  %v2959_v16 = vrot.slane %v12584_v49, 5 }
 0x326   : > { %7261 = vmatmul.msk.bf16.gmra.mxu0 %vm871_vm4, %v10137_v55  ;;  %2794 = vst.msk [vmem:[#allocation2 + $0x80] sm:$0xff] %vm2777_vm2, %v2761_v35  ;;  %v2952_v35 = vsel %vm9727_vm13, %v2950_v54, %v2951_v62  ;;  %v12583_v62 = vld [vmem:[#allocation109_spill] sm:$0xff]  ;;  %v12585_v38 = vld [vmem:[#allocation112_spill] sm:$0xff]  ;;  %v3538_v59 = vunpack.c.l.b16 %v3434_v43  ;;  %v2603_v43 = vld [vmem:[#allocation2 + $0x90] sm:$0xff] }
 0x327   : > { %v2584_v61 = vadd.f32 %v2550_v39, %v2445_v50  ;;  %v10156_v45 = vpop.f32.mrf.mxu1  ;;  %v2957_v39 = vsel %vm9727_vm13, %v2955_v13, %v2956_v53  ;;  %v3439_v20 = vsel %vm9762_vm1, %v3435_v52, %v3438_v26  ;;  %v3141_v50 = vunpack.c.l.b16 %v2952_v35  ;;  %v12586_v13 = vld [vmem:[#allocation111_spill] sm:$0xff] }
 0x328   : > { %v3142_v24 = vunpack.c.l.b16 %v2957_v39  ;;  %v2958_v53 = vrot.slane %v12583_v62, 4  ;;  %v2962_v54 = vrot.slane %v12585_v38, 5  ;;  %v3440_v52 = vrot.slane %v12562_v41, 6 }
 0x329   : > { %7244 = vmatmul.msk.bf16.gmra.mxu3 %vm871_vm4, %v10143_v60  ;;  %2711 = vrot.lane.b32.xlu1 %v2584_v61, %s7855_s12  ;;  %v3229_v28 = vpop.f32.mrf.mxu2  ;;  %v2964_v61 = vrot.slane %v12586_v13, 4  ;;  %v3441_v26 = vrot.slane %v12563_v15, 7  ;;  %s7773_s12 = sshra.s32 %s6894_s10, 4  ;;  %s7774_s12 = int_to_ptr.hbm [resolvable:$true] %s7773_s12 }
 0x32a   : > { %7216 = vmatmul.msk.bf16.gmra.mxu1 %vm871_vm4, %v12582_v48  ;;  %v3230_v35 = vadd.f32 %v3229_v28, %v9963_v12  ;;  %v10180_v39 = vpack.c.b16 %v3142_v24, %v3141_v50  ;;  %v12590_v50 = vld [vmem:[#allocation70_spill] sm:$0xff]  ;;  %s7775_s14 = scalar_lea.hbm %s7774_s12, 1  ;;  %p7780_p0 = scmp.lt.s32.totalorder %s7774_s12, %s11989_s6 }
 0x32b   : > { %v3790_v30 = vpop.f32.mrf.mxu0  ;;  %v2690_v57 = vpop.permute.xlu2 %2689  ;;  %v3442_v15 = vor.u32 %v3441_v26, %v3440_v52  ;;  %p7776_p11 = scmp.ne.s32.totalorder %s7774_s12, %s7775_s14  ;;  %p7781_p1 = scmp.lt.s32.totalorder %s7779_s16, %s7775_s14 }
 0x32c   : > { %v3628_v1 = vpop.f32.mrf.mxu3  ;;  %v2765_v5 = vadd.f32 %v2690_v57, %v2605_v46  ;;  %12588 = vst [vmem:[#allocation142_spill] sm:$0xff] %v10180_v39  ;;  %v3444_v57 = vrot.slane %v12565_v42, 6  ;;  %v12591_v42 = vshrl.u32 %v12590_v50, 16 }
 0x32d   : > { %v3708_v3 = vadd.f32 %v3628_v1, %v3228_v27  ;;  %v3539_v27 = vunpack.c.l.b16 %v3439_v20  ;;  %v3445_v1 = vrot.slane %v12564_v7, 7  ;;  %v3450_v7 = vrot.slane %v12570_v22, 7  ;;  %p7777_p12 = pnand %p7776_p11, %p7932_p5  ;;  %p7782_p2 = por %p7781_p1, %p7780_p0 }
 0x32e   : > { %2798 = vst.msk [vmem:[#allocation2 + $0xa0] sm:$0xff] %vm2777_vm2, %v2765_v5  ;;  %7228 = vmatmul.msk.bf16.gmra.mxu2 %vm871_vm4, %v10093_v11  ;;  %v3449_v24 = vrot.slane %v12591_v42, 6  ;;  %v12596_v42 = vld [vmem:[#allocation23_spill] sm:$0xff] }
 0x32f   : > { %v10175_v32 = vadd.f32 %v3788_v10, %v3708_v3  ;;  %v10182_v46 = vpop.f32.mrf.mxu1  ;;  %v2960_v10 = vor.u32 %v2959_v16, %v2958_v53  ;;  %v2965_v3 = vor.u32 %v2964_v61, %v2962_v54  ;;  %v10186_v11 = vpack.c.b16 %v3539_v27, %v3538_v59  ;;  %v12592_v61 = vld [vmem:[#allocation113_spill] sm:$0xff]  ;;  %p7778_p13 = pneg %p7777_p12 }
 0x330   : > { %v3446_v28 = vor.u32 %v3445_v1, %v3444_v57  ;;  %v2967_v23 = vrot.slane %v12592_v61, 5  ;;  %v3443_v59 = vrot.slane %v3442_v15, 4  ;;  %v3451_v26 = vor.u32 %v3450_v7, %v3449_v24  ;;  %v12597_v7 = vld [vmem:[#allocation27_spill] sm:$0xff] }
 0x331   : > { %12587 = vst [vmem:[#allocation140_spill] sm:$0xff] %v10175_v32  ;;  %v3232_v48 = vpop.f32.mrf.mxu2  ;;  %v2961_v53 = vrot.slane %v2960_v10, 4  ;;  %v2966_v16 = vrot.slane %v2965_v3, 4  ;;  %v2970_v24 = vrot.slane %v12596_v42, 5  ;;  %p7783_p3 = pnand %p7782_p2, %p7778_p13 }
 0x332   : > { %12589 = vst [vmem:[#allocation143_spill] sm:$0xff] %v10186_v11  ;;  %v3448_v52 = vrot.slane %v3446_v28, 4 }
 0x333   : > { %v3793_v5 = vpop.f32.mrf.mxu0  ;;  %v2686_v20 = vpop.permute.xlu0 %2685  ;;  %v2963_v57 = vsel %vm9727_vm13, %v2961_v53, %v2962_v54  ;;  %v2968_v1 = vsel %vm9727_vm13, %v2966_v16, %v2967_v23  ;;  %v12595_v54 = vld [vmem:[#allocation22_spill] sm:$0xff]  ;;  %v2973_v53 = vrot.slane %v12597_v7, 5 }
 0x334   : > { %v3630_v32 = vpop.f32.mrf.mxu3  ;;  %v2763_v41 = vadd.f32 %v2686_v20, %v2603_v43  ;;  %v3452_v15 = vsel %vm9762_vm1, %v3448_v52, %v3451_v26  ;;  %v3144_v50 = vunpack.c.l.b16 %v2968_v1  ;;  %v2969_v23 = vrot.slane %v12595_v54, 4  ;;  %v12598_v16 = vld [vmem:[#allocation26_spill] sm:$0xff] }
 0x335   : > { %v3709_v12 = vadd.f32 %v3630_v32, %v3230_v35  ;;  %v3233_v32 = vadd.f32 %v3232_v48, %v9981_v17  ;;  %v3447_v17 = vsel %vm9762_vm1, %v3443_v59, %v3446_v28  ;;  %v3453_v52 = vrot.slane %v12573_v19, 6 }
 0x336   : > { %7262 = vmatmul.msk.bf16.gmra.mxu0 %vm871_vm4, %v10180_v39  ;;  %2796 = vst.msk [vmem:[#allocation2 + $0x90] sm:$0xff] %vm2777_vm2, %v2763_v41  ;;  %v12594_v41 = vld [vmem:[#allocation62_spill] sm:$0xff]  ;;  %v3540_v59 = vunpack.c.l.b16 %v3447_v17  ;;  %v3454_v26 = vrot.slane %v12574_v58, 7  ;;  %v2608_v17 = vld [vmem:[#allocation2 + $0xb8] sm:$0xff] }
 0x337   : > { %v10195_v43 = vadd.f32 %v3790_v30, %v3709_v12  ;;  %v10200_v27 = vpop.f32.mrf.mxu1  ;;  %v2604_v30 = vld [vmem:[#allocation2 + $0x98] sm:$0xff]  ;;  %v3143_v12 = vunpack.c.l.b16 %v2963_v57 }
 0x338   : > { %v3455_v58 = vor.u32 %v3454_v26, %v3453_v52 }
 0x339   : > { %12593 = vst [vmem:[#allocation146_spill] sm:$0xff] %v10195_v43  ;;  %7245 = vmatmul.msk.bf16.gmra.mxu3 %vm871_vm4, %v10186_v11  ;;  %v3234_v22 = vpop.f32.mrf.mxu2  ;;  %v10224_v1 = vpack.c.b16 %v3144_v50, %v3143_v12  ;;  %v12602_v12 = vld [vmem:[#allocation96_spill] sm:$0xff] }
 0x33a   : > { %7217 = vmatmul.msk.bf16.gmra.mxu1 %vm871_vm4, %v12594_v41  ;;  %v3235_v57 = vadd.f32 %v3234_v22, %v10007_v40 }
 0x33b   : > { %v3795_v35 = vpop.f32.mrf.mxu0  ;;  %v2688_v10 = vpop.permute.xlu1 %2687  ;;  %12600 = vst [vmem:[#allocation32_spill] sm:$0xff] %v10224_v1 }
 0x33c   : > { %v3633_v3 = vpop.f32.mrf.mxu3  ;;  %v2764_v20 = vadd.f32 %v2688_v10, %v2604_v30  ;;  %v2975_v30 = vrot.slane %v12598_v16, 4 }
 0x33d   : > { %v3710_v48 = vadd.f32 %v3633_v3, %v3233_v32  ;;  %v3541_v32 = vunpack.c.l.b16 %v3452_v15  ;;  %v3457_v3 = vrot.slane %v12576_v37, 6  ;;  %v12603_v37 = vshrl.u32 %v12602_v12, 16 }
 0x33e   : > { %2797 = vst.msk [vmem:[#allocation2 + $0x98] sm:$0xff] %vm2777_vm2, %v2764_v20  ;;  %7229 = vmatmul.msk.bf16.gmra.mxu2 %vm871_vm4, %v10137_v55  ;;  %v3458_v20 = vrot.slane %v12575_v44, 7  ;;  %v3463_v44 = vrot.slane %v12581_v33, 7 }
 0x33f   : > { %v10219_v28 = vadd.f32 %v3793_v5, %v3710_v48  ;;  %v10226_v10 = vpop.f32.mrf.mxu1  ;;  %v2971_v5 = vor.u32 %v2970_v24, %v2969_v23  ;;  %v2976_v48 = vor.u32 %v2975_v30, %v2973_v53  ;;  %v10230_v55 = vpack.c.b16 %v3541_v32, %v3540_v59  ;;  %v12604_v30 = vld [vmem:[#allocation28_spill] sm:$0xff] }
 0x340   : > { %v3459_v22 = vor.u32 %v3458_v20, %v3457_v3  ;;  %v3462_v50 = vrot.slane %v12603_v37, 6  ;;  %v2978_v11 = vrot.slane %v12604_v30, 5  ;;  %v3456_v59 = vrot.slane %v3455_v58, 4  ;;  %v12608_v37 = vld [vmem:[#allocation44_spill] sm:$0xff] }
 0x341   : > { %12599 = vst [vmem:[#allocation29_spill] sm:$0xff] %v10219_v28  ;;  %v3237_v43 = vpop.f32.mrf.mxu2  ;;  %v2972_v23 = vrot.slane %v2971_v5, 4  ;;  %v2977_v24 = vrot.slane %v2976_v48, 4 }
 0x342   : > { %12601 = vst [vmem:[#allocation33_spill] sm:$0xff] %v10230_v55  ;;  %v3461_v52 = vrot.slane %v3459_v22, 4  ;;  %v3464_v26 = vor.u32 %v3463_v44, %v3462_v50  ;;  %v2981_v50 = vrot.slane %v12608_v37, 5  ;;  %v12609_v44 = vld [vmem:[#allocation48_spill] sm:$0xff] }
 0x343   : > { %v3798_v41 = vpop.f32.mrf.mxu0  ;;  %v2696_v15 = vpop.permute.xlu2 %2695  ;;  %v2974_v3 = vsel %vm9727_vm13, %v2972_v23, %v2973_v53  ;;  %v2979_v20 = vsel %vm9727_vm13, %v2977_v24, %v2978_v11  ;;  %v12607_v53 = vld [vmem:[#allocation43_spill] sm:$0xff]  ;;  %v2984_v23 = vrot.slane %v12609_v44, 5 }
 0x344   : > { %v3635_v28 = vpop.f32.mrf.mxu3  ;;  %v2768_v19 = vadd.f32 %v2696_v15, %v2608_v17  ;;  %v3465_v58 = vsel %vm9762_vm1, %v3461_v52, %v3464_v26  ;;  %v3146_v12 = vunpack.c.l.b16 %v2979_v20  ;;  %v2980_v11 = vrot.slane %v12607_v53, 4  ;;  %v12610_v24 = vld [vmem:[#allocation47_spill] sm:$0xff] }
 0x345   : > { %v3711_v40 = vadd.f32 %v3635_v28, %v3235_v57  ;;  %v3238_v28 = vadd.f32 %v3237_v43, %v10025_v2  ;;  %v3460_v2 = vsel %vm9762_vm1, %v3456_v59, %v3459_v22  ;;  %v3466_v52 = vrot.slane %v12583_v62, 6 }
 0x346   : > { %7263 = vmatmul.msk.bf16.gmra.mxu0 %vm871_vm4, %v10224_v1  ;;  %2801 = vst.msk [vmem:[#allocation2 + $0xb8] sm:$0xff] %vm2777_vm2, %v2768_v19  ;;  %v12606_v19 = vld [vmem:[#allocation91_spill] sm:$0xff]  ;;  %v3542_v59 = vunpack.c.l.b16 %v3460_v2  ;;  %v3467_v26 = vrot.slane %v12584_v49, 7 }
 0x347   : > { %v10239_v17 = vadd.f32 %v3795_v35, %v3711_v40  ;;  %v10244_v32 = vpop.f32.mrf.mxu1  ;;  %v2606_v35 = vld [vmem:[#allocation2 + $0xa8] sm:$0xff]  ;;  %v3145_v40 = vunpack.c.l.b16 %v2974_v3  ;;  %v2607_v2 = vld [vmem:[#allocation2 + $0xb0] sm:$0xff] }
 0x348   : > { %v3468_v49 = vor.u32 %v3467_v26, %v3466_v52 }
 0x349   : > { %12605 = vst [vmem:[#allocation34_spill] sm:$0xff] %v10239_v17  ;;  %7246 = vmatmul.msk.bf16.gmra.mxu3 %vm871_vm4, %v10230_v55  ;;  %v3239_v33 = vpop.f32.mrf.mxu2  ;;  %v10268_v20 = vpack.c.b16 %v3146_v12, %v3145_v40  ;;  %v12613_v40 = vld [vmem:[#allocation108_spill] sm:$0xff] }
 0x34a   : > { %7218 = vmatmul.msk.bf16.gmra.mxu1 %vm871_vm4, %v12606_v19  ;;  %v3240_v3 = vadd.f32 %v3239_v33, %v10051_v6 }
 0x34b   : > { %v3800_v57 = vpop.f32.mrf.mxu0  ;;  %v2692_v5 = vpop.permute.xlu0 %2691  ;;  %12612 = vst [vmem:[#allocation50_spill] sm:$0xff] %v10268_v20 }
 0x34c   : > { %v3638_v48 = vpop.f32.mrf.mxu3  ;;  %v2766_v15 = vadd.f32 %v2692_v5, %v2606_v35  ;;  %v2986_v35 = vrot.slane %v12610_v24, 4 }
 0x34d   : > { %v3712_v43 = vadd.f32 %v3638_v48, %v3238_v28  ;;  %v3543_v28 = vunpack.c.l.b16 %v3465_v58  ;;  %v3470_v48 = vrot.slane %v12586_v13, 6  ;;  %v12614_v13 = vshrl.u32 %v12613_v40, 16  ;;  %v12618_v40 = vld [vmem:[#allocation78_spill] sm:$0xff] }
 0x34e   : > { %2799 = vst.msk [vmem:[#allocation2 + $0xa8] sm:$0xff] %vm2777_vm2, %v2766_v15  ;;  %7230 = vmatmul.msk.bf16.gmra.mxu2 %vm871_vm4, %v10180_v39  ;;  %v3471_v15 = vrot.slane %v12585_v38, 7  ;;  %v3476_v38 = vrot.slane %v12592_v61, 7 }
 0x34f   : > { %v10263_v22 = vadd.f32 %v3798_v41, %v3712_v43  ;;  %v10270_v5 = vpop.f32.mrf.mxu1  ;;  %v2982_v41 = vor.u32 %v2981_v50, %v2980_v11  ;;  %v2987_v43 = vor.u32 %v2986_v35, %v2984_v23  ;;  %v10274_v39 = vpack.c.b16 %v3543_v28, %v3542_v59  ;;  %v12615_v35 = vld [vmem:[#allocation49_spill] sm:$0xff] }
 0x350   : > { %v3472_v33 = vor.u32 %v3471_v15, %v3470_v48  ;;  %v3475_v12 = vrot.slane %v12614_v13, 6  ;;  %v2989_v55 = vrot.slane %v12615_v35, 5  ;;  %v3469_v59 = vrot.slane %v3468_v49, 4 }
 0x351   : > { %12611 = vst [vmem:[#allocation35_spill] sm:$0xff] %v10263_v22  ;;  %v3242_v17 = vpop.f32.mrf.mxu2  ;;  %v2983_v11 = vrot.slane %v2982_v41, 4  ;;  %v2988_v50 = vrot.slane %v2987_v43, 4  ;;  %v2992_v13 = vrot.slane %v12618_v40, 5 }
 0x352   : > { %v3474_v52 = vrot.slane %v3472_v33, 4  ;;  %v3477_v26 = vor.u32 %v3476_v38, %v3475_v12  ;;  %v12619_v12 = vld [vmem:[#allocation80_spill] sm:$0xff] }
 0x353   : > { %v3803_v19 = vpop.f32.mrf.mxu0  ;;  %v2694_v58 = vpop.permute.xlu1 %2693  ;;  %v2985_v48 = vsel %vm9727_vm13, %v2983_v11, %v2984_v23  ;;  %v2990_v15 = vsel %vm9727_vm13, %v2988_v50, %v2989_v55  ;;  %v12617_v23 = vld [vmem:[#allocation76_spill] sm:$0xff]  ;;  %v2995_v38 = vrot.slane %v12619_v12, 5  ;;  %v12620_v11 = vld [vmem:[#allocation79_spill] sm:$0xff] }
 0x354   : > { %v3640_v22 = vpop.f32.mrf.mxu3  ;;  %v2767_v62 = vadd.f32 %v2694_v58, %v2607_v2  ;;  %v3147_v49 = vunpack.c.l.b16 %v2985_v48  ;;  %v2991_v55 = vrot.slane %v12617_v23, 4  ;;  %v2997_v50 = vrot.slane %v12620_v11, 4 }
 0x355   : > { %v3713_v6 = vadd.f32 %v3640_v22, %v3240_v3  ;;  %v3243_v22 = vadd.f32 %v3242_v17, %v10069_v18  ;;  %v3478_v17 = vsel %vm9762_vm1, %v3474_v52, %v3477_v26  ;;  %v3480_v52 = vrot.slane %v12596_v42, 7 }
 0x356   : > { %7264 = vmatmul.msk.bf16.gmra.mxu0 %vm871_vm4, %v10268_v20  ;;  %2800 = vst.msk [vmem:[#allocation2 + $0xb0] sm:$0xff] %vm2777_vm2, %v2767_v62  ;;  %v3473_v62 = vsel %vm9762_vm1, %v3469_v59, %v3472_v33  ;;  %v3545_v59 = vunpack.c.l.b16 %v3478_v17 }
 0x357   : > { %v10283_v2 = vadd.f32 %v3800_v57, %v3713_v6  ;;  %v10288_v28 = vpop.f32.mrf.mxu1  ;;  %v2611_v57 = vld [vmem:[#allocation2 + $0xd0] sm:$0xff]  ;;  %v3148_v6 = vunpack.c.l.b16 %v2990_v15  ;;  %v3544_v33 = vunpack.c.l.b16 %v3473_v62  ;;  %v2609_v62 = vld [vmem:[#allocation2 + $0xc0] sm:$0xff] }
 0x359   : > { %12616 = vst [vmem:[#allocation51_spill] sm:$0xff] %v10283_v2  ;;  %7247 = vmatmul.msk.bf16.gmra.mxu3 %vm871_vm4, %v10274_v39  ;;  %v3244_v61 = vpop.f32.mrf.mxu2  ;;  %v10312_v48 = vpack.c.b16 %v3148_v6, %v3147_v49  ;;  %v10318_v2 = vpack.c.b16 %v3545_v59, %v3544_v33  ;;  %v12623_v49 = vld [vmem:[#allocation24_spill] sm:$0xff] }
 0x35a   : > { %7270 = vmatmul.msk.bf16.vlgmr.msra.gmra.mxu1 %vm871_vm4, %v9880_v14  ;;  %v3245_v26 = vadd.f32 %v3244_v61, %v10095_v36 }
 0x35b   : > { %v3805_v3 = vpop.f32.mrf.mxu0  ;;  %v2702_v41 = vpop.permute.xlu2 %2701  ;;  %12622 = vst [vmem:[#allocation53_spill] sm:$0xff] %v10312_v48 }
 0x35c   : > { %v3643_v43 = vpop.f32.mrf.mxu3  ;;  %v2771_v58 = vadd.f32 %v2702_v41, %v2611_v57  ;;  %v3483_v57 = vrot.slane %v12598_v16, 6  ;;  %v3484_v41 = vrot.slane %v12597_v7, 7  ;;  %v12624_v16 = vshrl.u32 %v12623_v49, 16  ;;  %v12628_v49 = vld [vmem:[#allocation101_spill] sm:$0xff] }
 0x35d   : > { %v3714_v18 = vadd.f32 %v3643_v43, %v3243_v22  ;;  %v3479_v22 = vrot.slane %v12595_v54, 6  ;;  %v3489_v7 = vrot.slane %v12604_v30, 7 }
 0x35e   : > { %2804 = vst.msk [vmem:[#allocation2 + $0xd0] sm:$0xff] %vm2777_vm2, %v2771_v58  ;;  %7231 = vmatmul.msk.bf16.gmra.mxu2 %vm871_vm4, %v10224_v1  ;;  %v3485_v61 = vor.u32 %v3484_v41, %v3483_v57  ;;  %v3488_v6 = vrot.slane %v12624_v16, 6  ;;  %v3741_v16 = vrot.slane %v12628_v49, 5 }
 0x35f   : > { %v10307_v14 = vadd.f32 %v3803_v19, %v3714_v18  ;;  %v10314_v15 = vpop.f32.mrf.mxu1  ;;  %v2993_v19 = vor.u32 %v2992_v13, %v2991_v55  ;;  %v2998_v18 = vor.u32 %v2997_v50, %v2995_v38  ;;  %v3481_v42 = vor.u32 %v3480_v52, %v3479_v22  ;;  %v12625_v50 = vld [vmem:[#allocation81_spill] sm:$0xff] }
 0x360   : > { %v3000_v1 = vrot.slane %v12625_v50, 5  ;;  %v3487_v22 = vrot.slane %v3485_v61, 4  ;;  %v3490_v52 = vor.u32 %v3489_v7, %v3488_v6  ;;  %v12629_v6 = vld [vmem:[#allocation103_spill] sm:$0xff] }
 0x361   : > { %12621 = vst [vmem:[#allocation55_spill] sm:$0xff] %v10307_v14  ;;  %v3247_v58 = vpop.f32.mrf.mxu2  ;;  %v2994_v55 = vrot.slane %v2993_v19, 4  ;;  %v2999_v13 = vrot.slane %v2998_v18, 4  ;;  %v3482_v33 = vrot.slane %v3481_v42, 4  ;;  %v3744_v7 = vrot.slane %v12629_v6, 5 }
 0x363   : > { %v3808_v43 = vpop.f32.mrf.mxu0  ;;  %v2698_v17 = vpop.permute.xlu0 %2697  ;;  %v2996_v57 = vsel %vm9727_vm13, %v2994_v55, %v2995_v38  ;;  %v3001_v41 = vsel %vm9727_vm13, %v2999_v13, %v3000_v1  ;;  %v12627_v38 = vld [vmem:[#allocation100_spill] sm:$0xff]  ;;  %v12630_v55 = vld [vmem:[#allocation102_spill] sm:$0xff] }
 0x364   : > { %v3645_v14 = vpop.f32.mrf.mxu3  ;;  %v2769_v54 = vadd.f32 %v2698_v17, %v2609_v62  ;;  %v3149_v42 = vunpack.c.l.b16 %v2996_v57  ;;  %v3740_v1 = vrot.slane %v12627_v38, 4  ;;  %v3746_v13 = vrot.slane %v12630_v55, 4 }
 0x365   : > { %v3715_v36 = vadd.f32 %v3645_v14, %v3245_v26  ;;  %v3248_v14 = vadd.f32 %v3247_v58, %v10113_v25  ;;  %v3491_v58 = vsel %vm9762_vm1, %v3487_v22, %v3490_v52  ;;  %v3493_v22 = vrot.slane %v12608_v37, 7 }
 0x366   : > { %7265 = vmatmul.msk.bf16.gmra.mxu0 %vm871_vm4, %v10312_v48  ;;  %2802 = vst.msk [vmem:[#allocation2 + $0xc0] sm:$0xff] %vm2777_vm2, %v2769_v54  ;;  %v3486_v54 = vsel %vm9762_vm1, %v3482_v33, %v3485_v61  ;;  %v3547_v33 = vunpack.c.l.b16 %v3491_v58 }
 0x367   : > { %v10327_v62 = vadd.f32 %v3805_v3, %v3715_v36  ;;  %v10332_v59 = vpop.f32.mrf.mxu1  ;;  %v2610_v3 = vld [vmem:[#allocation2 + $0xc8] sm:$0xff]  ;;  %v3150_v36 = vunpack.c.l.b16 %v3001_v41  ;;  %v3546_v61 = vunpack.c.l.b16 %v3486_v54 }
 0x368   : > { %v2614_v54 = vld [vmem:[#allocation2 + $0xe8] sm:$0xff] }
 0x369   : > { %12626 = vst [vmem:[#allocation58_spill] sm:$0xff] %v10327_v62  ;;  %7248 = vmatmul.msk.bf16.gmra.mxu3 %vm871_vm4, %v10318_v2  ;;  %v3249_v30 = vpop.f32.mrf.mxu2  ;;  %v10356_v57 = vpack.c.b16 %v3150_v36, %v3149_v42  ;;  %v10362_v62 = vpack.c.b16 %v3547_v33, %v3546_v61  ;;  %v12632_v42 = vld [vmem:[#allocation46_spill] sm:$0xff] }
 0x36a   : > { %7271 = vmatmul.msk.bf16.gmra.mxu1 %vm871_vm4, %v9923_v63  ;;  %v3250_v52 = vadd.f32 %v3249_v30, %v10139_v31 }
 0x36b   : > { %v3810_v26 = vpop.f32.mrf.mxu0  ;;  %v2700_v19 = vpop.permute.xlu1 %2699 }
 0x36c   : > { %v3648_v18 = vpop.f32.mrf.mxu3  ;;  %v2770_v17 = vadd.f32 %v2700_v19, %v2610_v3  ;;  %v3496_v3 = vrot.slane %v12610_v24, 6  ;;  %v3497_v19 = vrot.slane %v12609_v44, 7  ;;  %v12633_v24 = vshrl.u32 %v12632_v42, 16  ;;  %v12637_v42 = vld [vmem:[#allocation123_spill] sm:$0xff] }
 0x36d   : > { %v3716_v25 = vadd.f32 %v3648_v18, %v3248_v14  ;;  %v3492_v14 = vrot.slane %v12607_v53, 6  ;;  %v3502_v44 = vrot.slane %v12615_v35, 7 }
 0x36e   : > { %2803 = vst.msk [vmem:[#allocation2 + $0xc8] sm:$0xff] %vm2777_vm2, %v2770_v17  ;;  %7232 = vmatmul.msk.bf16.gmra.mxu2 %vm871_vm4, %v10268_v20  ;;  %v3498_v30 = vor.u32 %v3497_v19, %v3496_v3  ;;  %v3501_v36 = vrot.slane %v12633_v24, 6  ;;  %v3752_v24 = vrot.slane %v12637_v42, 5 }
 0x36f   : > { %v10351_v63 = vadd.f32 %v3808_v43, %v3716_v25  ;;  %v10358_v41 = vpop.f32.mrf.mxu1  ;;  %v3742_v43 = vor.u32 %v3741_v16, %v3740_v1  ;;  %v3747_v25 = vor.u32 %v3746_v13, %v3744_v7  ;;  %v3494_v37 = vor.u32 %v3493_v22, %v3492_v14  ;;  %v12634_v13 = vld [vmem:[#allocation104_spill] sm:$0xff] }
 0x370   : > { %v3749_v20 = vrot.slane %v12634_v13, 5  ;;  %v3500_v14 = vrot.slane %v3498_v30, 4  ;;  %v3503_v22 = vor.u32 %v3502_v44, %v3501_v36  ;;  %v12638_v36 = vld [vmem:[#allocation126_spill] sm:$0xff] }
 0x371   : > { %12631 = vst [vmem:[#allocation59_spill] sm:$0xff] %v10351_v63  ;;  %v3252_v17 = vpop.f32.mrf.mxu2  ;;  %v3743_v1 = vrot.slane %v3742_v43, 4  ;;  %v3748_v16 = vrot.slane %v3747_v25, 4  ;;  %v3495_v61 = vrot.slane %v3494_v37, 4  ;;  %v3755_v44 = vrot.slane %v12638_v36, 5 }
 0x373   : > { %v3813_v18 = vpop.f32.mrf.mxu0  ;;  %v2708_v58 = vpop.permute.xlu2 %2707  ;;  %v3745_v3 = vsel %vm9727_vm13, %v3743_v1, %v3744_v7  ;;  %v3750_v19 = vsel %vm9727_vm13, %v3748_v16, %v3749_v20  ;;  %v12636_v7 = vld [vmem:[#allocation121_spill] sm:$0xff] }
 0x374   : > { %v3650_v63 = vpop.f32.mrf.mxu3  ;;  %v2774_v53 = vadd.f32 %v2708_v58, %v2614_v54  ;;  %v3764_v37 = vunpack.c.l.b16 %v3745_v3  ;;  %v3751_v20 = vrot.slane %v12636_v7, 4  ;;  %v12639_v1 = vld [vmem:[#allocation125_spill] sm:$0xff] }
 0x375   : > { %v3717_v31 = vadd.f32 %v3650_v63, %v3250_v52  ;;  %v3253_v63 = vadd.f32 %v3252_v17, %v10156_v45  ;;  %v3504_v17 = vsel %vm9762_vm1, %v3500_v14, %v3503_v22  ;;  %v3757_v16 = vrot.slane %v12639_v1, 4 }
 0x376   : > { %7266 = vmatmul.msk.bf16.gmra.mxu0 %vm871_vm4, %v10356_v57  ;;  %2807 = vst.msk [vmem:[#allocation2 + $0xe8] sm:$0xff] %vm2777_vm2, %v2774_v53  ;;  %v3499_v53 = vsel %vm9762_vm1, %v3495_v61, %v3498_v30  ;;  %v3505_v14 = vrot.slane %v12617_v23, 6  ;;  %v3506_v22 = vrot.slane %v12618_v40, 7 }
 0x377   : > { %v10371_v54 = vadd.f32 %v3810_v26, %v3717_v31  ;;  %v10376_v33 = vpop.f32.mrf.mxu1  ;;  %v2612_v26 = vld [vmem:[#allocation2 + $0xd8] sm:$0xff]  ;;  %v3765_v31 = vunpack.c.l.b16 %v3750_v19  ;;  %v3548_v61 = vunpack.c.l.b16 %v3499_v53  ;;  %v2613_v53 = vld [vmem:[#allocation2 + $0xe0] sm:$0xff] }
 0x378   : > { %v3507_v40 = vor.u32 %v3506_v22, %v3505_v14 }
 0x379   : > { %12635 = vst [vmem:[#allocation61_spill] sm:$0xff] %v10371_v54  ;;  %7249 = vmatmul.msk.bf16.gmra.mxu3 %vm871_vm4, %v10362_v62  ;;  %v3254_v35 = vpop.f32.mrf.mxu2  ;;  %v10400_v19 = vpack.c.b16 %v3765_v31, %v3764_v37  ;;  %v12641_v37 = vld [vmem:[#allocation77_spill] sm:$0xff] }
 0x37a   : > { %7272 = vmatmul.msk.bf16.gmra.mxu1 %vm871_vm4, %v9967_v56  ;;  %v3255_v3 = vadd.f32 %v3254_v35, %v10182_v46 }
 0x37b   : > { %v3815_v52 = vpop.f32.mrf.mxu0  ;;  %v2704_v43 = vpop.permute.xlu0 %2703 }
 0x37c   : > { %v3653_v25 = vpop.f32.mrf.mxu3  ;;  %v2772_v58 = vadd.f32 %v2704_v43, %v2612_v26  ;;  %v3509_v43 = vrot.slane %v12620_v11, 6  ;;  %v12642_v11 = vshrl.u32 %v12641_v37, 16 }
 0x37d   : > { %v3718_v45 = vadd.f32 %v3653_v25, %v3253_v63  ;;  %v3549_v63 = vunpack.c.l.b16 %v3504_v17  ;;  %v3510_v25 = vrot.slane %v12619_v12, 7  ;;  %v3515_v12 = vrot.slane %v12625_v50, 7  ;;  %v7337_v50 = vld [vmem:[%s11985_s2 + $0x20] sm:$0x3] }
 0x37e   : > { %2805 = vst.msk [vmem:[#allocation2 + $0xd8] sm:$0xff] %vm2777_vm2, %v2772_v58  ;;  %7233 = vmatmul.msk.bf16.gmra.mxu2 %vm871_vm4, %v10312_v48  ;;  %v3514_v31 = vrot.slane %v12642_v11, 6 }
 0x37f   : > { %v10395_v30 = vadd.f32 %v3813_v18, %v3718_v45  ;;  %v10402_v26 = vpop.f32.mrf.mxu1  ;;  %v3753_v18 = vor.u32 %v3752_v24, %v3751_v20  ;;  %v3758_v45 = vor.u32 %v3757_v16, %v3755_v44  ;;  %v10406_v48 = vpack.c.b16 %v3549_v63, %v3548_v61  ;;  %v12643_v16 = vld [vmem:[#allocation127_spill] sm:$0xff] }
 0x380   : > { %v3511_v35 = vor.u32 %v3510_v25, %v3509_v43  ;;  %v3760_v36 = vrot.slane %v12643_v16, 5  ;;  %v3508_v63 = vrot.slane %v3507_v40, 4  ;;  %v3516_v22 = vor.u32 %v3515_v12, %v3514_v31 }
 0x381   : > { %12640 = vst [vmem:[#allocation60_spill] sm:$0xff] %v10395_v30  ;;  %v3257_v54 = vpop.f32.mrf.mxu2  ;;  %v3754_v20 = vrot.slane %v3753_v18, 4  ;;  %v3759_v24 = vrot.slane %v3758_v45, 4 }
 0x382   : > { %v3513_v14 = vrot.slane %v3511_v35, 4 }
 0x383   : > { %v3818_v58 = vpop.f32.mrf.mxu0  ;;  %v2706_v17 = vpop.permute.xlu1 %2705  ;;  %v3756_v25 = vsel %vm9727_vm13, %v3754_v20, %v3755_v44  ;;  %v7338_v44 = vld [vmem:[%s11985_s2 + $0x22] sm:$0x3] }
 0x384   : > { %v3655_v30 = vpop.f32.mrf.mxu3  ;;  %v2773_v23 = vadd.f32 %v2706_v17, %v2613_v53  ;;  %v3517_v37 = vsel %vm9762_vm1, %v3513_v14, %v3516_v22  ;;  %v4812_v11 = vsel %vm920_vm0, %v7338_v44, 0  ;;  %v2615_v22 = vld [vmem:[#allocation2 + $0xf0] sm:$0xff] }
 0x385   : > { %v3719_v46 = vadd.f32 %v3655_v30, %v3255_v3  ;;  %v3258_v30 = vadd.f32 %v3257_v54, %v10200_v27  ;;  %v7451_v3 = vld [vmem:[%s11985_s2 + $0x24] sm:$0x3]  ;;  %v3761_v27 = vsel %vm9727_vm13, %v3759_v24, %v3760_v36  ;;  %v5004_v54 = vsel %vm920_vm0, %v7337_v50, 0  ;;  %v7468_v36 = vld [vmem:[%s11985_s2 + $0x26] sm:$0x3]  ;;  %4821 = vmatpush.bf16.msrb.mxu1 %v4812_v11 }
 0x386   : > { %7267 = vmatmul.msk.bf16.gmra.mxu0 %vm871_vm4, %v10400_v19  ;;  %2806 = vst.msk [vmem:[#allocation2 + $0xe0] sm:$0xff] %vm2777_vm2, %v2773_v23  ;;  %v5311_v18 = vsel %vm920_vm0, %v7451_v3, 0  ;;  %5013 = vmatpush.bf16.msrb.mxu2 %v5004_v54  ;;  %v3766_v23 = vunpack.c.l.b16 %v3756_v25  ;;  %v3767_v40 = vunpack.c.l.b16 %v3761_v27  ;;  %v5455_v31 = vsel %vm920_vm0, %v7468_v36, 0 }
 0x387   : > { %v10415_v53 = vadd.f32 %v3815_v52, %v3719_v46  ;;  %v10420_v61 = vpop.f32.mrf.mxu1  ;;  %5320 = vmatpush.bf16.msrb.mxu3 %v5311_v18  ;;  %v3512_v46 = vsel %vm9762_vm1, %v3508_v63, %v3511_v35  ;;  %5464 = vmatpush.bf16.msrb.mxu0 %v5455_v31 }
 0x388   : > { %v3550_v24 = vunpack.c.l.b16 %v3512_v46  ;;  %v10453_v50 = vpack.c.b16 %v3767_v40, %v3766_v23  ;;  %v2616_v23 = vld [vmem:[#allocation2 + $0xf8] sm:$0xff] }
 0x389   : > { %7250 = vmatmul.msk.bf16.gmra.mxu3 %vm871_vm4, %v10406_v48  ;;  %v3259_v43 = vpop.f32.mrf.mxu2 }
 0x38a   : > { %7273 = vmatmul.msk.bf16.gmra.mxu1 %vm871_vm4, %v10011_v4  ;;  %v3260_v20 = vadd.f32 %v3259_v43, %v10226_v10 }
 0x38b   : > { %v3820_v52 = vpop.f32.mrf.mxu0 }
 0x38c   : > { %v3658_v45 = vpop.f32.mrf.mxu3 }
 0x38d   : > { %v3720_v17 = vadd.f32 %v3658_v45, %v3258_v30  ;;  %v3551_v30 = vunpack.c.l.b16 %v3517_v37 }
 0x38e   : > { %7234 = vmatmul.msk.bf16.gmra.mxu2 %vm871_vm4, %v10356_v57 }
 0x38f   : > { %v10450_v12 = vadd.f32 %v3818_v58, %v3720_v17  ;;  %v10455_v35 = vpop.f32.mrf.mxu1  ;;  %v10457_v18 = vpack.c.b16 %v3551_v30, %v3550_v24 }
 0x391   : > { %v3262_v14 = vpop.f32.mrf.mxu2 }
 0x392   : > { %v3263_v58 = vadd.f32 %v3262_v14, %v10244_v32  ;;  %v12644_v14 = vld [vmem:[#allocation95_spill] sm:$0xff] }
 0x393   : > { %v3823_v63 = vpop.f32.mrf.mxu0  ;;  %v2710_v3 = vpop.permute.xlu0 %2709 }
 0x394   : > { %v3660_v25 = vpop.f32.mrf.mxu3  ;;  %v2775_v27 = vadd.f32 %v2710_v3, %v2615_v22 }
 0x395   : > { %v3721_v54 = vadd.f32 %v3660_v25, %v3260_v20 }
 0x396   : > { %7268 = vmatmul.msk.bf16.gmra.mxu0 %vm871_vm4, %v10453_v50  ;;  %2808 = vst.msk [vmem:[#allocation2 + $0xf0] sm:$0xff] %vm2777_vm2, %v2775_v27 }
 0x397   : > { %v10462_v10 = vadd.f32 %v3820_v52, %v3721_v54  ;;  %v10467_v43 = vpop.f32.mrf.mxu1 }
 0x399   : > { %7251 = vmatmul.msk.bf16.gmra.mxu3 %vm871_vm4, %v10457_v18  ;;  %v3264_v17 = vpop.f32.mrf.mxu2 }
 0x39a   : > { %7274 = vmatmul.msk.bf16.gmra.mxu1 %vm871_vm4, %v10055_v29  ;;  %v3265_v32 = vadd.f32 %v3264_v17, %v10270_v5 }
 0x39b   : > { %v3825_v45 = vpop.f32.mrf.mxu0  ;;  %v2712_v40 = vpop.permute.xlu1 %2711 }
 0x39c   : > { %v3663_v44 = vpop.f32.mrf.mxu3  ;;  %v2776_v36 = vadd.f32 %v2712_v40, %v2616_v23 }
 0x39d   : > { %v3722_v46 = vadd.f32 %v3663_v44, %v3263_v58 }
 0x39e   : > { %2809 = vst.msk [vmem:[#allocation2 + $0xf8] sm:$0xff] %vm2777_vm2, %v2776_v36  ;;  %7287 = vmatmul.msk.bf16.vlgmr.msra.gmra.mxu2 %vm871_vm4, %v9874_v51 }
 0x39f   : > { %v10474_v52 = vadd.f32 %v3823_v63, %v3722_v46  ;;  %v10477_v37 = vpop.f32.mrf.mxu1 }
 0x3a1   : > { %v3267_v31 = vpop.f32.mrf.mxu2 }
 0x3a2   : > { %v3268_v51 = vadd.f32 %v3267_v31, %v10288_v28 }
 0x3a3   : > { %v3828_v11 = vpop.f32.mrf.mxu0 }
 0x3a4   : > { %v3665_v20 = vpop.f32.mrf.mxu3 }
 0x3a5   : > { %v3723_v24 = vadd.f32 %v3665_v20, %v3265_v32 }
 0x3a6   : > { %7321 = vmatmul.msk.bf16.vlgmr.msra.gmra.mxu0 %vm871_vm4, %v9967_v56 }
 0x3a7   : > { %v10481_v30 = vadd.f32 %v3825_v45, %v3723_v24  ;;  %v10486_v63 = vpop.f32.mrf.mxu1 }
 0x3a9   : > { %7304 = vmatmul.msk.bf16.vlgmr.msra.gmra.mxu3 %vm871_vm4, %v12644_v14  ;;  %v3269_v5 = vpop.f32.mrf.mxu2 }
 0x3aa   : > { %7275 = vmatmul.msk.bf16.gmra.mxu1 %vm871_vm4, %v10099_v8  ;;  %v3270_v27 = vadd.f32 %v3269_v5, %v10314_v15 }
 0x3ab   : > { %v3830_v22 = vpop.f32.mrf.mxu0 }
 0x3ac   : > { %v3668_v3 = vpop.f32.mrf.mxu3 }
 0x3ad   : > { %v3724_v25 = vadd.f32 %v3668_v3, %v3268_v51 }
 0x3ae   : > { %7288 = vmatmul.msk.bf16.gmra.mxu2 %vm871_vm4, %v9917_v9 }
 0x3af   : > { %v10492_v56 = vadd.f32 %v3828_v11, %v3724_v25  ;;  %v10495_v54 = vpop.f32.mrf.mxu1 }
 0x3b1   : > { %v3272_v28 = vpop.f32.mrf.mxu2 }
 0x3b2   : > { %v3273_v9 = vadd.f32 %v3272_v28, %v10332_v59  ;;  %v12647_v28 = vld [vmem:[#allocation138_spill] sm:$0xff] }
 0x3b3   : > { %v3833_v58 = vpop.f32.mrf.mxu0 }
 0x3b4   : > { %v3670_v45 = vpop.f32.mrf.mxu3 }
 0x3b5   : > { %v3725_v17 = vadd.f32 %v3670_v45, %v3270_v27  ;;  %v12646_v27 = vld [vmem:[#allocation143_spill] sm:$0xff] }
 0x3b6   : > { %7322 = vmatmul.msk.bf16.gmra.mxu0 %vm871_vm4, %v10011_v4 }
 0x3b7   : > { %v10499_v23 = vadd.f32 %v3830_v22, %v3725_v17  ;;  %v10504_v40 = vpop.f32.mrf.mxu1  ;;  %v12645_v22 = vld [vmem:[#allocation128_spill] sm:$0xff] }
 0x3b9   : > { %7305 = vmatmul.msk.bf16.gmra.mxu3 %vm871_vm4, %v8551_v47  ;;  %v3274_v15 = vpop.f32.mrf.mxu2 }
 0x3ba   : > { %7276 = vmatmul.msk.bf16.gmra.mxu1 %vm871_vm4, %v10143_v60  ;;  %v3275_v32 = vadd.f32 %v3274_v15, %v10358_v41 }
 0x3bb   : > { %v3835_v44 = vpop.f32.mrf.mxu0 }
 0x3bc   : > { %v3673_v36 = vpop.f32.mrf.mxu3 }
 0x3bd   : > { %v3726_v46 = vadd.f32 %v3673_v36, %v3273_v9 }
 0x3be   : > { %7289 = vmatmul.msk.bf16.gmra.mxu2 %vm871_vm4, %v9961_v0 }
 0x3bf   : > { %v10510_v4 = vadd.f32 %v3833_v58, %v3726_v46  ;;  %v10513_v11 = vpop.f32.mrf.mxu1  ;;  %v12648_v46 = vld [vmem:[#allocation25_spill] sm:$0xff] }
 0x3c1   : > { %v3277_v59 = vpop.f32.mrf.mxu2 }
 0x3c2   : > { %v3278_v0 = vadd.f32 %v3277_v59, %v10376_v33 }
 0x3c3   : > { %v3838_v31 = vpop.f32.mrf.mxu0 }
 0x3c4   : > { %v3675_v20 = vpop.f32.mrf.mxu3 }
 0x3c5   : > { %v3727_v24 = vadd.f32 %v3675_v20, %v3275_v32 }
 0x3c6   : > { %7323 = vmatmul.msk.bf16.gmra.mxu0 %vm871_vm4, %v10055_v29 }
 0x3c7   : > { %v10517_v51 = vadd.f32 %v3835_v44, %v3727_v24  ;;  %v10522_v5 = vpop.f32.mrf.mxu1  ;;  %v12649_v24 = vld [vmem:[#allocation33_spill] sm:$0xff] }
 0x3c9   : > { %7306 = vmatmul.msk.bf16.gmra.mxu3 %vm871_vm4, %v12645_v22  ;;  %v3279_v41 = vpop.f32.mrf.mxu2 }
 0x3ca   : > { %7277 = vmatmul.msk.bf16.gmra.mxu1 %vm871_vm4, %v12646_v27  ;;  %v3280_v45 = vadd.f32 %v3279_v41, %v10402_v26  ;;  %v12650_v41 = vld [vmem:[#allocation137_spill] sm:$0xff] }
 0x3cb   : > { %v3840_v3 = vpop.f32.mrf.mxu0 }
 0x3cc   : > { %v3678_v25 = vpop.f32.mrf.mxu3 }
 0x3cd   : > { %v3728_v58 = vadd.f32 %v3678_v25, %v3278_v0 }
 0x3ce   : > { %7290 = vmatmul.msk.bf16.gmra.mxu2 %vm871_vm4, %v12647_v28 }
 0x3cf   : > { %v10528_v29 = vadd.f32 %v3838_v31, %v3728_v58  ;;  %v10531_v17 = vpop.f32.mrf.mxu1 }
 0x3d1   : > { %v3282_v33 = vpop.f32.mrf.mxu2 }
 0x3d2   : > { %v3283_v32 = vadd.f32 %v3282_v33, %v10420_v61 }
 0x3d3   : > { %v3843_v9 = vpop.f32.mrf.mxu0 }
 0x3d4   : > { %v3680_v44 = vpop.f32.mrf.mxu3 }
 0x3d5   : > { %v3729_v15 = vadd.f32 %v3680_v44, %v3280_v45  ;;  %v12652_v44 = vld [vmem:[#allocation30_spill] sm:$0xff] }
 0x3d6   : > { %7324 = vmatmul.msk.bf16.gmra.mxu0 %vm871_vm4, %v10099_v8 }
 0x3d7   : > { %v10535_v36 = vadd.f32 %v3840_v3, %v3729_v15  ;;  %v10540_v31 = vpop.f32.mrf.mxu1 }
 0x3d9   : > { %7307 = vmatmul.msk.bf16.gmra.mxu3 %vm871_vm4, %v12648_v46  ;;  %v3284_v26 = vpop.f32.mrf.mxu2 }
 0x3da   : > { %7278 = vmatmul.msk.bf16.gmra.mxu1 %vm871_vm4, %v12649_v24  ;;  %v3285_v3 = vadd.f32 %v3284_v26, %v10455_v35 }
 0x3db   : > { %v3845_v59 = vpop.f32.mrf.mxu0 }
 0x3dc   : > { %v3683_v20 = vpop.f32.mrf.mxu3 }
 0x3dd   : > { %v3730_v0 = vadd.f32 %v3683_v20, %v3283_v32 }
 0x3de   : > { %7291 = vmatmul.msk.bf16.gmra.mxu2 %vm871_vm4, %v12650_v41 }
 0x3df   : > { %v10546_v8 = vadd.f32 %v3843_v9, %v3730_v0  ;;  %v10549_v25 = vpop.f32.mrf.mxu1  ;;  %v12653_v0 = vld [vmem:[#allocation139_spill] sm:$0xff] }
 0x3e1   : > { %v3287_v61 = vpop.f32.mrf.mxu2 }
 0x3e2   : > { %v3288_v15 = vadd.f32 %v3287_v61, %v10467_v43 }
 0x3e3   : > { %v3848_v58 = vpop.f32.mrf.mxu0 }
 0x3e4   : > { %v3685_v28 = vpop.f32.mrf.mxu3 }
 0x3e5   : > { %v3731_v45 = vadd.f32 %v3685_v28, %v3285_v3 }
 0x3e6   : > { %7325 = vmatmul.msk.bf16.gmra.mxu0 %vm871_vm4, %v10143_v60 }
 0x3e7   : > { %v10553_v33 = vadd.f32 %v3845_v59, %v3731_v45  ;;  %v10558_v9 = vpop.f32.mrf.mxu1 }
 0x3e9   : > { %12651 = vst [vmem:[#allocation56_spill] sm:$0xff] %v10553_v33  ;;  %7308 = vmatmul.msk.bf16.gmra.mxu3 %vm871_vm4, %v12652_v44  ;;  %v3289_v35 = vpop.f32.mrf.mxu2  ;;  %v12656_v44 = vld [vmem:[#allocation54_spill] sm:$0xff] }
 0x3ea   : > { %7279 = vmatmul.msk.bf16.gmra.mxu1 %vm871_vm4, %v10274_v39  ;;  %v3290_v59 = vadd.f32 %v3289_v35, %v10477_v37 }
 0x3eb   : > { %v3850_v32 = vpop.f32.mrf.mxu0 }
 0x3ec   : > { %v3688_v26 = vpop.f32.mrf.mxu3 }
 0x3ed   : > { %v3732_v20 = vadd.f32 %v3688_v26, %v3288_v15 }
 0x3ee   : > { %7292 = vmatmul.msk.bf16.gmra.mxu2 %vm871_vm4, %v12653_v0  ;;  %v12657_v0 = vld [vmem:[#allocation141_spill] sm:$0xff] }
 0x3ef   : > { %v10564_v60 = vadd.f32 %v3848_v58, %v3732_v20  ;;  %v10567_v41 = vpop.f32.mrf.mxu1 }
 0x3f1   : > { %12654 = vst [vmem:[#allocation52_spill] sm:$0xff] %v10564_v60  ;;  %v3292_v43 = vpop.f32.mrf.mxu2 }
 0x3f2   : > { %v3293_v15 = vadd.f32 %v3292_v43, %v10486_v63 }
 0x3f3   : > { %v3853_v3 = vpop.f32.mrf.mxu0 }
 0x3f4   : > { %v3690_v61 = vpop.f32.mrf.mxu3 }
 0x3f5   : > { %v3733_v28 = vadd.f32 %v3690_v61, %v3290_v59 }
 0x3f6   : > { %7326 = vmatmul.msk.bf16.gmra.mxu0 %vm871_vm4, %v12646_v27 }
 0x3f7   : > { %v10571_v45 = vadd.f32 %v3850_v32, %v3733_v28  ;;  %v10576_v58 = vpop.f32.mrf.mxu1 }
 0x3f9   : > { %12655 = vst [vmem:[#allocation63_spill] sm:$0xff] %v10571_v45  ;;  %7309 = vmatmul.msk.bf16.gmra.mxu3 %vm871_vm4, %v12656_v44  ;;  %v3294_v37 = vpop.f32.mrf.mxu2  ;;  %v12660_v45 = vld [vmem:[#allocation84_spill] sm:$0xff] }
 0x3fa   : > { %7280 = vmatmul.msk.bf16.gmra.mxu1 %vm871_vm4, %v10318_v2  ;;  %v3295_v32 = vadd.f32 %v3294_v37, %v10495_v54 }
 0x3fb   : > { %v3855_v26 = vpop.f32.mrf.mxu0 }
 0x3fc   : > { %v3693_v35 = vpop.f32.mrf.mxu3 }
 0x3fd   : > { %v3734_v20 = vadd.f32 %v3693_v35, %v3293_v15 }
 0x3fe   : > { %7293 = vmatmul.msk.bf16.gmra.mxu2 %vm871_vm4, %v12657_v0  ;;  %v12661_v0 = vld [vmem:[#allocation142_spill] sm:$0xff] }
 0x3ff   : > { %v10582_v27 = vadd.f32 %v3853_v3, %v3734_v20  ;;  %v10585_v59 = vpop.f32.mrf.mxu1 }
 0x401   : > { %12658 = vst [vmem:[#allocation64_spill] sm:$0xff] %v10582_v27  ;;  %v3297_v63 = vpop.f32.mrf.mxu2 }
 0x402   : > { %v3298_v15 = vadd.f32 %v3297_v63, %v10504_v40 }
 0x403   : > { %v3858_v61 = vpop.f32.mrf.mxu0 }
 0x404   : > { %v3695_v43 = vpop.f32.mrf.mxu3 }
 0x405   : > { %v3735_v28 = vadd.f32 %v3695_v43, %v3295_v32 }
 0x406   : > { %7327 = vmatmul.msk.bf16.gmra.mxu0 %vm871_vm4, %v12649_v24 }
 0x407   : > { %v10589_v44 = vadd.f32 %v3855_v26, %v3735_v28  ;;  %v10594_v3 = vpop.f32.mrf.mxu1 }
 0x409   : > { %12659 = vst [vmem:[#allocation65_spill] sm:$0xff] %v10589_v44  ;;  %7310 = vmatmul.msk.bf16.gmra.mxu3 %vm871_vm4, %v12660_v45  ;;  %v3299_v54 = vpop.f32.mrf.mxu2  ;;  %v12664_v44 = vld [vmem:[#allocation107_spill] sm:$0xff] }
 0x40a   : > { %7281 = vmatmul.msk.bf16.gmra.mxu1 %vm871_vm4, %v10362_v62  ;;  %v3300_v26 = vadd.f32 %v3299_v54, %v10513_v11 }
 0x40b   : > { %v3860_v35 = vpop.f32.mrf.mxu0 }
 0x40c   : > { %v3698_v37 = vpop.f32.mrf.mxu3 }
 0x40d   : > { %v3736_v20 = vadd.f32 %v3698_v37, %v3298_v15 }
 0x40e   : > { %7294 = vmatmul.msk.bf16.gmra.mxu2 %vm871_vm4, %v12661_v0  ;;  %v12665_v0 = vld [vmem:[#allocation32_spill] sm:$0xff] }
 0x40f   : > { %v10600_v24 = vadd.f32 %v3858_v61, %v3736_v20  ;;  %v10603_v32 = vpop.f32.mrf.mxu1 }
 0x411   : > { %12662 = vst [vmem:[#allocation67_spill] sm:$0xff] %v10600_v24  ;;  %v3302_v40 = vpop.f32.mrf.mxu2 }
 0x412   : > { %v3303_v15 = vadd.f32 %v3302_v40, %v10522_v5 }
 0x413   : > { %v3863_v43 = vpop.f32.mrf.mxu0 }
 0x414   : > { %v3700_v63 = vpop.f32.mrf.mxu3 }
 0x415   : > { %v3737_v28 = vadd.f32 %v3700_v63, %v3300_v26 }
 0x416   : > { %7328 = vmatmul.msk.bf16.gmra.mxu0 %vm871_vm4, %v10274_v39 }
 0x417   : > { %v10607_v45 = vadd.f32 %v3860_v35, %v3737_v28  ;;  %v10612_v61 = vpop.f32.mrf.mxu1  ;;  %v3900_v28 = vrot.slane %v12627_v38, 6 }
 0x419   : > { %12663 = vst [vmem:[#allocation66_spill] sm:$0xff] %v10607_v45  ;;  %7311 = vmatmul.msk.bf16.gmra.mxu3 %vm871_vm4, %v12664_v44  ;;  %v3304_v11 = vpop.f32.mrf.mxu2  ;;  %v3901_v44 = vrot.slane %v12628_v49, 7 }
 0x41a   : > { %7282 = vmatmul.msk.bf16.gmra.mxu1 %vm871_vm4, %v10406_v48  ;;  %v3305_v35 = vadd.f32 %v3304_v11, %v10531_v17 }
 0x41b   : > { %v3865_v37 = vpop.f32.mrf.mxu0 }
 0x41c   : > { %v3703_v54 = vpop.f32.mrf.mxu3 }
 0x41d   : > { %v3738_v20 = vadd.f32 %v3703_v54, %v3303_v15  ;;  %v3904_v15 = vrot.slane %v12630_v55, 6  ;;  %v12667_v54 = vld [vmem:[#allocation140_spill] sm:$0xff]  ;;  %v3910_v55 = vrot.slane %v12634_v13, 7 }
 0x41e   : > { %7295 = vmatmul.msk.bf16.gmra.mxu2 %vm871_vm4, %v12665_v0  ;;  %v4032_v17 = vadd.f32 %v10540_v31, %v12667_v54  ;;  %v12669_v0 = vld [vmem:[#allocation124_spill] sm:$0xff] }
 0x41f   : > { %v10618_v39 = vadd.f32 %v3863_v43, %v3738_v20  ;;  %v10621_v26 = vpop.f32.mrf.mxu1  ;;  %v3905_v43 = vrot.slane %v12629_v6, 7  ;;  %v3902_v20 = vor.u32 %v3901_v44, %v3900_v28  ;;  %v12672_v28 = vld [vmem:[#allocation146_spill] sm:$0xff] }
 0x421   : > { %12666 = vst [vmem:[#allocation31_spill] sm:$0xff] %v10618_v39  ;;  %v4125_v5 = vpop.f32.mrf.mxu2  ;;  %v3906_v49 = vor.u32 %v3905_v43, %v3904_v15  ;;  %v3903_v44 = vrot.slane %v3902_v20, 4  ;;  %v12673_v15 = vld [vmem:[#allocation50_spill] sm:$0xff] }
 0x422   : > { %v4205_v38 = vadd.f32 %v4125_v5, %v4032_v17  ;;  %v4033_v5 = vadd.f32 %v10549_v25, %v12672_v28 }
 0x423   : > { %v4436_v63 = vpop.f32.mrf.mxu0  ;;  %v3907_v17 = vsel %vm9762_vm1, %v3903_v44, %v3906_v49  ;;  %v12675_v44 = vld [vmem:[#allocation29_spill] sm:$0xff] }
 0x424   : > { %v3705_v40 = vpop.f32.mrf.mxu3  ;;  %v3928_v25 = vunpack.c.l.b16 %v3907_v17 }
 0x425   : > { %v3739_v45 = vadd.f32 %v3705_v40, %v3305_v35  ;;  %v12670_v35 = vld [vmem:[#allocation99_spill] sm:$0xff] }
 0x426   : > { %7329 = vmatmul.msk.bf16.gmra.mxu0 %vm871_vm4, %v10318_v2  ;;  %v12671_v40 = vshrl.u32 %v12670_v35, 16 }
 0x427   : > { %v10631_v11 = vadd.f32 %v3865_v37, %v3739_v45  ;;  %v10635_v39 = vpop.f32.mrf.mxu1  ;;  %v3908_v45 = vrot.slane %v3906_v49, 4 }
 0x428   : > { %v3909_v2 = vrot.slane %v12671_v40, 6  ;;  %v3913_v40 = vrot.slane %v12636_v7, 6 }
 0x429   : > { %12668 = vst [vmem:[#allocation83_spill] sm:$0xff] %v10631_v11  ;;  %7312 = vmatmul.msk.bf16.gmra.mxu3 %vm871_vm4, %v12669_v0  ;;  %v4127_v6 = vpop.f32.mrf.mxu2 }
 0x42a   : > { %7283 = vmatmul.msk.bf16.gmra.mxu1 %vm871_vm4, %v10457_v18  ;;  %v3911_v37 = vor.u32 %v3910_v55, %v3909_v2  ;;  %v4206_v13 = vadd.f32 %v4127_v6, %v4033_v5  ;;  %v3914_v2 = vrot.slane %v12637_v42, 7  ;;  %v3917_v6 = vrot.slane %v12639_v1, 6  ;;  %v12677_v1 = vld [vmem:[#allocation122_spill] sm:$0xff] }
 0x42b   : > { %v4438_v24 = vpop.f32.mrf.mxu0 }
 0x42c   : > { %v4272_v27 = vpop.f32.mrf.mxu3  ;;  %v3915_v5 = vor.u32 %v3914_v2, %v3913_v40  ;;  %v10674_v2 = vld [vmem:[%s7958_s17] sm:$0xf] }
 0x42d   : > { %v4352_v31 = vadd.f32 %v4272_v27, %v4205_v38  ;;  %v3912_v27 = vsel %vm9762_vm1, %v3908_v45, %v3911_v37  ;;  %v4034_v45 = vadd.f32 %v10558_v9, %v12675_v44  ;;  %v3923_v9 = vrot.slane %v12643_v16, 7  ;;  %v12680_v16 = vld [vmem:[#allocation53_spill] sm:$0xff] }
 0x42e   : > { %7296 = vmatmul.msk.bf16.gmra.mxu2 %vm871_vm4, %v12673_v15  ;;  %v12678_v15 = vshrl.u32 %v12677_v1, 16  ;;  %v4776_v44 = vshrl.u32 %v10674_v2, 16 }
 0x42f   : > { %v4516_v54 = vadd.f32 %v4436_v63, %v4352_v31  ;;  %v10647_v43 = vpop.f32.mrf.mxu1  ;;  %v3929_v63 = vunpack.c.l.b16 %v3912_v27  ;;  %v12674_v31 = vld [vmem:[#allocation126_spill] sm:$0xff] }
 0x430   : > { %v3918_v49 = vrot.slane %v12674_v31, 7 }
 0x431   : > { %4612 = vrot.lane.b32.xlu2 %v4516_v54, %s7856_s18  ;;  %v4130_v38 = vpop.f32.mrf.mxu2  ;;  %v10661_v28 = vpack.c.b16 %v3929_v63, %v3928_v25  ;;  %v12676_v54 = vld [vmem:[#allocation36_spill] sm:$0xff] }
 0x432   : > { %v4207_v7 = vadd.f32 %v4130_v38, %v4034_v45  ;;  %v3919_v42 = vor.u32 %v3918_v49, %v3917_v6  ;;  %v10677_v38 = vld [vmem:[%s7958_s17 + $0x4] sm:$0xf]  ;;  %v4779_v45 = vshll.u32 %v10674_v2, 16 }
 0x433   : > { %v4441_v20 = vpop.f32.mrf.mxu0 }
 0x434   : > { %v4274_v35 = vpop.f32.mrf.mxu3  ;;  %v3921_v63 = vrot.slane %v3919_v42, 4 }
 0x435   : > { %v4353_v55 = vadd.f32 %v4274_v35, %v4206_v13  ;;  %v3922_v13 = vrot.slane %v12678_v15, 6  ;;  %v3916_v35 = vrot.slane %v3915_v5, 4 }
 0x436   : > { %7330 = vmatmul.msk.bf16.gmra.mxu0 %vm871_vm4, %v10362_v62 }
 0x437   : > { %v4517_v37 = vadd.f32 %v4438_v24, %v4353_v55  ;;  %v10666_v62 = vpop.f32.mrf.mxu1  ;;  %v3924_v40 = vor.u32 %v3923_v9, %v3922_v13  ;;  %v12679_v55 = vld [vmem:[#allocation34_spill] sm:$0xff]  ;;  %v3920_v49 = vsel %vm9762_vm1, %v3916_v35, %v3919_v42  ;;  %v10695_v13 = vld [vmem:[%s7958_s17 + $0x8] sm:$0x7]  ;;  %v4778_v35 = vrot.slane %v4776_v44, 5 }
 0x438   : > { %v4035_v6 = vadd.f32 %v10567_v41, %v12679_v55  ;;  %v3930_v42 = vunpack.c.l.b16 %v3920_v49 }
 0x439   : > { %7313 = vmatmul.msk.bf16.gmra.mxu3 %vm871_vm4, %v12676_v54  ;;  %4614 = vrot.lane.b32.xlu0 %v4517_v37, %s7856_s18  ;;  %v4132_v17 = vpop.f32.mrf.mxu2  ;;  %v4785_v37 = vshrl.u32 %v10677_v38, 16  ;;  %v3925_v41 = vsel %vm9762_vm1, %v3921_v63, %v3924_v40  ;;  %v4798_v63 = vshll.u32 %v10695_v13, 16  ;;  %v12681_v40 = vld [vmem:[#allocation35_spill] sm:$0xff] }
 0x43a   : > { %7284 = vmatmul.msk.bf16.gmra.mxu1 %vm871_vm4, %v10661_v28  ;;  %v4208_v5 = vadd.f32 %v4132_v17, %v4035_v6  ;;  %v4795_v6 = vshrl.u32 %v10695_v13, 16 }
 0x43b   : > { %v4443_v24 = vpop.f32.mrf.mxu0  ;;  %v4787_v55 = vrot.slane %v4785_v37, 5 }
 0x43c   : > { %v4277_v27 = vpop.f32.mrf.mxu3  ;;  %v4797_v37 = vrot.slane %v4795_v6, 5 }
 0x43d   : > { %v4354_v25 = vadd.f32 %v4277_v27, %v4207_v7  ;;  %v3931_v27 = vunpack.c.l.b16 %v3925_v41  ;;  %v12682_v41 = vld [vmem:[#allocation62_spill] sm:$0xff] }
 0x43e   : > { %7297 = vmatmul.msk.bf16.gmra.mxu2 %vm871_vm4, %v12680_v16 }
 0x43f   : > { %v4518_v31 = vadd.f32 %v4441_v20, %v4354_v25  ;;  %v10689_v7 = vpop.f32.mrf.mxu1  ;;  %v4788_v20 = vshll.u32 %v10677_v38, 16  ;;  %v4781_v25 = vrot.slane %v4779_v45, 6  ;;  %v10703_v0 = vpack.c.b16 %v3931_v27, %v3930_v42 }
 0x441   : > { %4616 = vrot.lane.b32.xlu1 %v4518_v31, %s7856_s18  ;;  %v4135_v15 = vpop.f32.mrf.mxu2  ;;  %v4790_v17 = vrot.slane %v4788_v20, 6  ;;  %v4036_v31 = vadd.f32 %v10576_v58, %v12681_v40  ;;  %v4782_v49 = vor.u32 %v4781_v25, %v4778_v35  ;;  %v12683_v35 = vld [vmem:[#allocation51_spill] sm:$0xff] }
 0x442   : > { %v4037_v25 = vadd.f32 %v10585_v59, %v12683_v35 }
 0x443   : > { %v4446_v1 = vpop.f32.mrf.mxu0  ;;  %v4209_v44 = vadd.f32 %v4135_v15, %v4036_v31 }
 0x444   : > { %v4279_v9 = vpop.f32.mrf.mxu3 }
 0x445   : > { %v4355_v16 = vadd.f32 %v4279_v9, %v4208_v5  ;;  %v4800_v5 = vrot.slane %v4798_v63, 6 }
 0x446   : > { %7331 = vmatmul.msk.bf16.gmra.mxu0 %vm871_vm4, %v10406_v48  ;;  %v4791_v48 = vor.u32 %v4790_v17, %v4787_v55 }
 0x447   : > { %v4519_v54 = vadd.f32 %v4443_v24, %v4355_v16  ;;  %v10708_v45 = vpop.f32.mrf.mxu1  ;;  %v4783_v24 = vrot.slane %v4782_v49, 4  ;;  %v4801_v27 = vor.u32 %v4800_v5, %v4797_v37  ;;  %v12686_v5 = vld [vmem:[#allocation91_spill] sm:$0xff] }
 0x448   : > { %v4793_v42 = vrot.slane %v4791_v48, 4 }
 0x449   : > { %7314 = vmatmul.msk.bf16.gmra.mxu3 %vm871_vm4, %v12682_v41  ;;  %4618 = vrot.lane.b32.xlu2 %v4519_v54, %s7856_s18  ;;  %v4137_v9 = vpop.f32.mrf.mxu2  ;;  %v4792_v17 = vsel %vm8000_vm3, %v4783_v24, %v4791_v48 }
 0x44a   : > { %7285 = vmatmul.msk.bf16.gmra.mxu1 %vm871_vm4, %v10703_v0  ;;  %v4210_v15 = vadd.f32 %v4137_v9, %v4037_v25  ;;  %v4805_v31 = vunpack.c.l.b16 %v4792_v17 }
 0x44b   : > { %v4448_v20 = vpop.f32.mrf.mxu0 }
 0x44c   : > { %v4282_v11 = vpop.f32.mrf.mxu3 }
 0x44d   : > { %v4356_v58 = vadd.f32 %v4282_v11, %v4209_v44  ;;  %v4802_v11 = vsel %vm8000_vm3, %v4793_v42, %v4801_v27 }
 0x44e   : > { %7298 = vmatmul.msk.bf16.gmra.mxu2 %vm871_vm4, %v10356_v57  ;;  %v4806_v59 = vunpack.c.l.b16 %v4802_v11  ;;  %v12685_v57 = vld [vmem:[#allocation55_spill] sm:$0xff] }
 0x44f   : > { %v4520_v54 = vadd.f32 %v4446_v1, %v4356_v58  ;;  %v10717_v55 = vpop.f32.mrf.mxu1  ;;  %v4038_v49 = vadd.f32 %v10594_v3, %v12685_v57  ;;  %v12692_v57 = vld [vmem:[#allocation59_spill] sm:$0xff] }
 0x450   : > { %v4807_v37 = vpack.c.b16 %v4806_v59, %v4805_v31  ;;  %v12689_v31 = vld [vmem:[#allocation105_spill] sm:$0xff] }
 0x451   : > { %4620 = vrot.lane.b32.xlu0 %v4520_v54, %s7856_s18  ;;  %v4140_v63 = vpop.f32.mrf.mxu2 }
 0x452   : > { %v4211_v48 = vadd.f32 %v4140_v63, %v4038_v49  ;;  %v12688_v63 = vld [vmem:[#allocation132_spill] sm:$0xff]  ;;  %v4040_v49 = vadd.f32 %v10612_v61, %v12692_v57 }
 0x453   : > { %v4451_v6 = vpop.f32.mrf.mxu0 }
 0x454   : > { %v4284_v40 = vpop.f32.mrf.mxu3 }
 0x455   : > { %v4357_v1 = vadd.f32 %v4284_v40, %v4210_v15  ;;  %v4064_v40 = vrot.slane %v12688_v63, 4 }
 0x456   : > { %7332 = vmatmul.msk.bf16.gmra.mxu0 %vm871_vm4, %v10457_v18  ;;  %v12687_v18 = vld [vmem:[#allocation58_spill] sm:$0xff] }
 0x457   : > { %v4521_v44 = vadd.f32 %v4448_v20, %v4357_v1  ;;  %v10730_v9 = vpop.f32.mrf.mxu1  ;;  %v4039_v35 = vadd.f32 %v10603_v32, %v12687_v18  ;;  %v4065_v32 = vrot.slane %v12689_v31, 5  ;;  %v12691_v1 = vld [vmem:[#allocation144_spill] sm:$0xff] }
 0x459   : > { %7315 = vmatmul.msk.bf16.gmra.mxu3 %vm871_vm4, %v12686_v5  ;;  %4622 = vrot.lane.b32.xlu1 %v4521_v44, %s7856_s18  ;;  %v4142_v24 = vpop.f32.mrf.mxu2 }
 0x45a   : > { %7339 = vmatmul.msk.bf16.vlgmr.msrb.gmra.mxu1 %vm871_vm4, %v4807_v37  ;;  %v4212_v20 = vadd.f32 %v4142_v24, %v4039_v35  ;;  %v12693_v37 = vld [vmem:[#allocation116_spill] sm:$0xff]  ;;  %v4384_v35 = vrot.slane %v12688_v63, 6 }
 0x45b   : > { %v4453_v58 = vpop.f32.mrf.mxu0 }
 0x45c   : > { %v4287_v42 = vpop.f32.mrf.mxu3 }
 0x45d   : > { %v4358_v27 = vadd.f32 %v4287_v42, %v4211_v48 }
 0x45e   : > { %7299 = vmatmul.msk.bf16.gmra.mxu2 %vm871_vm4, %v10400_v19  ;;  %v4070_v19 = vrot.slane %v12691_v1, 4 }
 0x45f   : > { %v4522_v3 = vadd.f32 %v4451_v6, %v4358_v27  ;;  %v10738_v25 = vpop.f32.mrf.mxu1  ;;  %v12690_v6 = vld [vmem:[#allocation145_spill] sm:$0xff]  ;;  %v4066_v27 = vor.u32 %v4065_v32, %v4064_v40 }
 0x460   : > { %v4068_v59 = vrot.slane %v12690_v6, 5  ;;  %v4389_v61 = vrot.slane %v12690_v6, 7 }
 0x461   : > { %4624 = vrot.lane.b32.xlu2 %v4522_v3, %s7856_s18  ;;  %v4145_v15 = vpop.f32.mrf.mxu2  ;;  %v4385_v3 = vrot.slane %v12689_v31, 7  ;;  %v4067_v40 = vrot.slane %v4066_v27, 4  ;;  %v334_v27 = vld [vmem:[%s7958_s17 + $0xf4] sm:$0xf] }
 0x462   : > { %v4213_v48 = vadd.f32 %v4145_v15, %v4040_v49  ;;  %v4071_v18 = vor.u32 %v4070_v19, %v4068_v59  ;;  %v12695_v15 = vld [vmem:[#allocation61_spill] sm:$0xff]  ;;  %v12696_v19 = vld [vmem:[#allocation135_spill] sm:$0xff] }
 0x463   : > { %v4456_v54 = vpop.f32.mrf.mxu0  ;;  %v4073_v63 = vrot.slane %v12696_v19, 5  ;;  %v4386_v49 = vor.u32 %v4385_v3, %v4384_v35 }
 0x464   : > { %v4289_v17 = vpop.f32.mrf.mxu3  ;;  %v4072_v32 = vrot.slane %v4071_v18, 4 }
 0x465   : > { %v4359_v11 = vadd.f32 %v4289_v17, %v4212_v20  ;;  %v4388_v20 = vrot.slane %v12691_v1, 6  ;;  %v12694_v17 = vld [vmem:[#allocation106_spill] sm:$0xff]  ;;  %v12697_v1 = vld [vmem:[#allocation133_spill] sm:$0xff]  ;;  %v4387_v35 = vrot.slane %v4386_v49, 4 }
 0x466   : > { %7333 = vmatmul.msk.bf16.gmra.mxu0 %vm871_vm4, %v10661_v28 }
 0x467   : > { %v4523_v44 = vadd.f32 %v4453_v58, %v4359_v11  ;;  %v10751_v24 = vpop.f32.mrf.mxu1  ;;  %v4041_v11 = vadd.f32 %v10621_v26, %v12695_v15  ;;  %v4390_v6 = vor.u32 %v4389_v61, %v4388_v20 }
 0x469   : > { %7316 = vmatmul.msk.bf16.gmra.mxu3 %vm871_vm4, %v12693_v37  ;;  %4626 = vrot.lane.b32.xlu0 %v4523_v44, %s7856_s18  ;;  %v4147_v42 = vpop.f32.mrf.mxu2  ;;  %v12698_v44 = vshrl.u32 %v12697_v1, 16  ;;  %v4392_v3 = vrot.slane %v4390_v6, 4 }
 0x46a   : > { %7340 = vmatmul.msk.bf16.gmra.mxu1 %vm871_vm4, %v12694_v17  ;;  %v4394_v17 = vrot.slane %v12696_v19, 7  ;;  %v4214_v5 = vadd.f32 %v4147_v42, %v4041_v11  ;;  %v10780_v42 = vshll.u32 %v334_v27, 16  ;;  %v4089_v11 = vshrl.u32 %v334_v27, 16  ;;  %v335_v27 = vld [vmem:[%s7958_s17 + $0xf8] sm:$0x7] }
 0x46b   : > { %v4458_v28 = vpop.f32.mrf.mxu0  ;;  %v4393_v37 = vrot.slane %v12698_v44, 6  ;;  %v4095_v41 = vshll.u32 %v335_v27, 16 }
 0x46c   : > { %v4292_v58 = vpop.f32.mrf.mxu3  ;;  %v4087_v44 = vrot.slane %v10780_v42, 5  ;;  %v4241_v33 = vrot.slane %v4089_v11, 5 }
 0x46d   : > { %v4360_v57 = vadd.f32 %v4292_v58, %v4213_v48  ;;  %v333_v48 = vld [vmem:[%s7958_s17 + $0xf0] sm:$0xf]  ;;  %v4395_v20 = vor.u32 %v4394_v17, %v4393_v37  ;;  %v4391_v37 = vsel %vm9762_vm1, %v4387_v35, %v4390_v6  ;;  %v12700_v17 = vld [vmem:[#allocation129_spill] sm:$0xff] }
 0x46e   : > { %7300 = vmatmul.msk.bf16.gmra.mxu2 %vm871_vm4, %v10453_v50  ;;  %v4074_v50 = vsel %vm9727_vm13, %v4072_v32, %v4073_v63  ;;  %v10776_v15 = vshrl.u32 %v333_v48, 16 }
 0x46f   : > { %v4524_v31 = vadd.f32 %v4456_v54, %v4360_v57  ;;  %v10768_v26 = vpop.f32.mrf.mxu1  ;;  %v4069_v54 = vsel %vm9727_vm13, %v4067_v40, %v4068_v59  ;;  %v10778_v57 = vshll.u32 %v333_v48, 16  ;;  %v4102_v63 = vunpack.c.l.b16 %v4074_v50 }
 0x470   : > { %v4101_v40 = vunpack.c.l.b16 %v4069_v54  ;;  %v4396_v49 = vsel %vm9762_vm1, %v4392_v3, %v4395_v20  ;;  %v4078_v1 = vrot.slane %v10776_v15, 4  ;;  %v4412_v50 = vunpack.c.l.b16 %v4391_v37  ;;  %v12701_v20 = vld [vmem:[#allocation68_spill] sm:$0xff] }
 0x471   : > { %4628 = vrot.lane.b32.xlu1 %v4524_v31, %s7856_s18  ;;  %v4150_v58 = vpop.f32.mrf.mxu2  ;;  %v12699_v31 = vld [vmem:[#allocation60_spill] sm:$0xff]  ;;  %v4413_v35 = vunpack.c.l.b16 %v4396_v49  ;;  %v4237_v49 = vrot.slane %v10776_v15, 5  ;;  %v4238_v60 = vrot.slane %v10778_v57, 6 }
 0x472   : > { %v4042_v59 = vadd.f32 %v10635_v39, %v12699_v31  ;;  %v4105_v54 = vpack.c.b16 %v4102_v63, %v4101_v40  ;;  %v4043_v40 = vadd.f32 %v10647_v43, %v10415_v53  ;;  %v4242_v53 = vrot.slane %v10780_v42, 6 }
 0x473   : > { %v4461_v18 = vpop.f32.mrf.mxu0  ;;  %v4416_v37 = vpack.c.b16 %v4413_v35, %v4412_v50 }
 0x474   : > { %v4294_v61 = vpop.f32.mrf.mxu3  ;;  %v4215_v39 = vadd.f32 %v4150_v58, %v4042_v59  ;;  %v4398_v58 = vrot.slane %v10778_v57, 7  ;;  %v4401_v59 = vrot.slane %v4089_v11, 6 }
 0x475   : > { %v4361_v19 = vadd.f32 %v4294_v61, %v4214_v5  ;;  %v4081_v5 = vrot.slane %v10778_v57, 5  ;;  %v4239_v57 = vor.u32 %v4238_v60, %v4237_v49  ;;  %v7517_v49 = vld [vmem:[%s11985_s2 + $0x2a] sm:$0x3] }
 0x476   : > { %7334 = vmatmul.msk.bf16.gmra.mxu0 %vm871_vm4, %v10703_v0  ;;  %v4091_v0 = vrot.slane %v4089_v11, 4  ;;  %v4243_v11 = vor.u32 %v4242_v53, %v4241_v33 }
 0x477   : > { %v4525_v32 = vadd.f32 %v4458_v28, %v4361_v19  ;;  %v10796_v28 = vpop.f32.mrf.mxu1  ;;  %v4082_v61 = vor.u32 %v4081_v5, %v4078_v1  ;;  %v4240_v60 = vrot.slane %v4239_v57, 4  ;;  %v7566_v57 = vld [vmem:[%s11985_s2 + $0x2e] sm:$0x3] }
 0x478   : > { %v4092_v19 = vor.u32 %v4091_v0, %v4087_v44  ;;  %v4097_v0 = vrot.slane %v4095_v41, 5  ;;  %v4245_v33 = vrot.slane %v4243_v11, 4 }
 0x479   : > { %7317 = vmatmul.msk.bf16.gmra.mxu3 %vm871_vm4, %v12700_v17  ;;  %4630 = vrot.lane.b32.xlu2 %v4525_v32, %s7856_s18  ;;  %v4152_v6 = vpop.f32.mrf.mxu2  ;;  %v4397_v17 = vrot.slane %v10776_v15, 6  ;;  %v4402_v32 = vrot.slane %v10780_v42, 7  ;;  %v4083_v1 = vrot.slane %v4082_v61, 4  ;;  %v4407_v15 = vrot.slane %v4095_v41, 7 }
 0x47a   : > { %7341 = vmatmul.msk.bf16.gmra.mxu1 %vm871_vm4, %v12701_v20  ;;  %v4093_v5 = vrot.slane %v4092_v19, 4  ;;  %v4249_v19 = vrot.slane %v4095_v41, 6  ;;  %v4244_v34 = vsel %vm8000_vm3, %v4240_v60, %v4243_v11  ;;  %v6095_v11 = vsel %vm920_vm0, %v7566_v57, 0  ;;  %v7699_v57 = vld [vmem:[%s7958_s17 + $0x10] sm:$0xf] }
 0x47b   : > { %v4463_v48 = vpop.f32.mrf.mxu0  ;;  %v4403_v50 = vor.u32 %v4402_v32, %v4401_v59  ;;  %6104 = vmatpush.bf16.msra.mxu0 %v6095_v11  ;;  %v5102_v60 = vrot.slane %v10677_v38, 7  ;;  %v5105_v38 = vrot.slane %v10695_v13, 7  ;;  %v4047_v13 = vadd.f32 %v10717_v55, %v10481_v30 }
 0x47c   : > { %v4297_v3 = vpop.f32.mrf.mxu3  ;;  %v4048_v11 = vadd.f32 %v10730_v9, %v10492_v56 }
 0x47d   : > { %v4362_v31 = vadd.f32 %v4297_v3, %v4215_v39  ;;  %v4246_v39 = vshrl.u32 %v335_v27, 16  ;;  %v4216_v3 = vadd.f32 %v4152_v6, %v4043_v40  ;;  %v4088_v27 = vsel %vm9727_vm13, %v4083_v1, %v4087_v44  ;;  %v12702_v44 = vld [vmem:[#allocation136_spill] sm:$0xff] }
 0x47e   : > { %7301 = vmatmul.msk.bf16.gmra.mxu2 %vm871_vm4, %v4105_v54  ;;  %v4399_v54 = vor.u32 %v4398_v58, %v4397_v17  ;;  %v4098_v6 = vsel %vm9727_vm13, %v4093_v5, %v4097_v0  ;;  %v4044_v58 = vadd.f32 %v10666_v62, %v10450_v12  ;;  %v4103_v32 = vunpack.c.l.b16 %v4088_v27  ;;  %v7546_v12 = vld [vmem:[%s11985_s2 + $0x2c] sm:$0x3] }
 0x47f   : > { %v4526_v63 = vadd.f32 %v4461_v18, %v4362_v31  ;;  %v10809_v20 = vpop.f32.mrf.mxu1  ;;  %v4406_v35 = vrot.slane %v4246_v39, 6  ;;  %v4248_v42 = vrot.slane %v4246_v39, 5  ;;  %v4104_v46 = vunpack.c.l.b16 %v4098_v6 }
 0x480   : > { %v4400_v40 = vrot.slane %v4399_v54, 4  ;;  %v5768_v0 = vsel %vm920_vm0, %v7517_v49, 0  ;;  %v5928_v39 = vsel %vm920_vm0, %v7546_v12, 0 }
 0x481   : > { %4632 = vrot.lane.b32.xlu0 %v4526_v63, %s7856_s18  ;;  %v4155_v18 = vpop.f32.mrf.mxu2  ;;  %v4405_v63 = vrot.slane %v4403_v50, 4  ;;  %v4408_v17 = vor.u32 %v4407_v15, %v4406_v35  ;;  %5777 = vmatpush.bf16.msra.mxu2 %v5768_v0  ;;  %v12703_v15 = vld [vmem:[#allocation45_spill] sm:$0xff]  ;;  %v5104_v0 = vrot.slane %v5102_v60, 4 }
 0x482   : > { %v4217_v21 = vadd.f32 %v4155_v18, %v4044_v58  ;;  %v4404_v1 = vsel %vm9762_vm1, %v4400_v40, %v4403_v50  ;;  %v4106_v18 = vpack.c.b16 %v4104_v46, %v4103_v32  ;;  %5937 = vmatpush.bf16.msra.mxu3 %v5928_v39  ;;  %v4045_v46 = vadd.f32 %v10689_v7, %v10462_v10  ;;  %v12707_v39 = vld [vmem:[#allocation73_spill] sm:$0xff] }
 0x483   : > { %v4466_v43 = vpop.f32.mrf.mxu0  ;;  %v4409_v5 = vsel %vm9762_vm1, %v4405_v63, %v4408_v17  ;;  %v4414_v50 = vunpack.c.l.b16 %v4404_v1  ;;  %v4254_v63 = vunpack.c.l.b16 %v4244_v34 }
 0x484   : > { %v4299_v61 = vpop.f32.mrf.mxu3  ;;  %v4415_v27 = vunpack.c.l.b16 %v4409_v5  ;;  %v7435_v5 = vrot.slane %v10674_v2, 11 }
 0x485   : > { %v4363_v31 = vadd.f32 %v4299_v61, %v4216_v3  ;;  %v4548_v3 = vld [vmem:[#allocation2] sm:$0xff] }
 0x486   : > { %7335 = vmatmul.msk.bf16.gmra.mxu0 %vm871_vm4, %v4416_v37  ;;  %v4250_v37 = vor.u32 %v4249_v19, %v4248_v42  ;;  %v4417_v7 = vpack.c.b16 %v4415_v27, %v4414_v50 }
 0x487   : > { %v4527_v59 = vadd.f32 %v4463_v48, %v4363_v31  ;;  %v10823_v41 = vpop.f32.mrf.mxu1  ;;  %v7500_v31 = vld [vmem:[%s11985_s2 + $0x28] sm:$0x3] }
 0x488   : > { %v4251_v6 = vsel %vm8000_vm3, %v4245_v33, %v4250_v37  ;;  %v5620_v42 = vsel %vm920_vm0, %v7500_v31, 0  ;;  %v4046_v33 = vadd.f32 %v10708_v45, %v10474_v52  ;;  %vm5097_vm0 = vcmask 1040384   ;;  %v7590_v52 = vld [vmem:[%s7958_s17] sm:$0xff] }
 0x489   : > { %7318 = vmatmul.msk.bf16.gmra.mxu3 %vm871_vm4, %v12702_v44  ;;  %4634 = vrot.lane.b32.xlu1 %v4527_v59, %s7856_s18  ;;  %v4157_v48 = vpop.f32.mrf.mxu2  ;;  %v4255_v10 = vunpack.c.l.b16 %v4251_v6  ;;  %vm10873_vm7 = vmor %vm5097_vm0, %vm5098_vm6  ;;  %v4551_v6 = vld [vmem:[#allocation2 + $0x18] sm:$0xff] }
 0x48a   : > { %7342 = vmatmul.msk.bf16.gmra.mxu1 %vm871_vm4, %v12703_v15  ;;  %v4218_v40 = vadd.f32 %v4157_v48, %v4045_v46  ;;  %v5106_v2 = vsel %vm10873_vm7, %v5104_v0, %v5105_v38  ;;  %v4049_v38 = vadd.f32 %v10738_v25, %v10499_v23 }
 0x48b   : > { %v4468_v62 = vpop.f32.mrf.mxu0  ;;  %v4613_v53 = vpop.permute.xlu2 %4612  ;;  %5629 = vmatpush.bf16.msra.mxu1 %v5620_v42  ;;  %v5215_v15 = vunpack.c.l.b16 %v5106_v2  ;;  %v5109_v42 = vrot.slane %v7699_v57, 7  ;;  %v7703_v57 = vld [vmem:[%s7958_s17 + $0x18] sm:$0xf] }
 0x48c   : > { %v4302_v54 = vpop.f32.mrf.mxu3  ;;  %v4708_v35 = vadd.f32 %v4613_v53, %v4548_v3  ;;  %v5103_v53 = vsel %vm10873_vm7, %v7435_v5, %v5102_v60  ;;  %v7701_v60 = vld [vmem:[%s7958_s17 + $0x14] sm:$0x7] }
 0x48d   : > { %v4364_v61 = vadd.f32 %v4302_v54, %v4217_v21  ;;  %v10858_v21 = vpack.c.b16 %v4255_v10, %v4254_v63 }
 0x48e   : > { %4741 = vst.msk [vmem:[#allocation2] sm:$0xff] %vm4740_vm5, %v4708_v35  ;;  %7302 = vmatmul.msk.bf16.gmra.mxu2 %vm871_vm4, %v4106_v18  ;;  %v5214_v35 = vunpack.c.l.b16 %v5103_v53 }
 0x48f   : > { %v4528_v19 = vadd.f32 %v4466_v43, %v4364_v61  ;;  %v10856_v43 = vpop.f32.mrf.mxu1  ;;  %12704 = vst [vmem:[#allocation85_spill] sm:$0xff] %v10858_v21  ;;  %v10888_v61 = vld [vmem:[%s7958_s17 + $0x24] sm:$0xff] }
 0x490   : > { %v5246_v31 = vpack.c.b16 %v5215_v15, %v5214_v35 }
 0x491   : > { %4636 = vrot.lane.b32.xlu2 %v4528_v19, %s7856_s18  ;;  %v4160_v58 = vpop.f32.mrf.mxu2 }
 0x492   : > { %v4219_v49 = vadd.f32 %v4160_v58, %v4046_v33  ;;  %v7700_v58 = vld [vmem:[%s7958_s17 + $0xc] sm:$0xf]  ;;  %v5112_v33 = vrot.slane %v7701_v60, 7 }
 0x493   : > { %v4471_v17 = vpop.f32.mrf.mxu0 }
 0x494   : > { %v4304_v59 = vpop.f32.mrf.mxu3 }
 0x495   : > { %v4365_v32 = vadd.f32 %v4304_v59, %v4218_v40  ;;  %v7436_v59 = vrot.slane %v7700_v58, 11 }
 0x496   : > { %7336 = vmatmul.msk.bf16.gmra.mxu0 %vm871_vm4, %v4417_v7 }
 0x497   : > { %v4529_v37 = vadd.f32 %v4468_v62, %v4365_v32  ;;  %v10867_v12 = vpop.f32.mrf.mxu1  ;;  %v5111_v32 = vrot.slane %v5109_v42, 4  ;;  %v5110_v5 = vsel %vm10873_vm7, %v7436_v59, %v5109_v42  ;;  %v7437_v42 = vrot.slane %v7703_v57, 11  ;;  %v7592_v59 = vld [vmem:[%s7958_s17 + $0x18] sm:$0xff] }
 0x499   : > { %7319 = vmatmul.msk.bf16.gmra.mxu3 %vm871_vm4, %v10858_v21  ;;  %4638 = vrot.lane.b32.xlu0 %v4529_v37, %s7856_s18  ;;  %v4162_v1 = vpop.f32.mrf.mxu2  ;;  %v4549_v37 = vld [vmem:[#allocation2 + $0x8] sm:$0xff]  ;;  %v5113_v0 = vsel %vm10873_vm7, %v5111_v32, %v5112_v33  ;;  %v4051_v33 = vadd.f32 %v10768_v26, %v10517_v51 }
 0x49a   : > { %7343 = vmatmul.msk.bf16.gmra.mxu1 %vm871_vm4, %v12707_v39  ;;  %v4220_v54 = vadd.f32 %v4162_v1, %v4047_v13  ;;  %v7591_v1 = vld [vmem:[%s7958_s17 + $0xc] sm:$0xff]  ;;  %v5217_v39 = vunpack.c.l.b16 %v5113_v0 }
 0x49b   : > { %v4473_v48 = vpop.f32.mrf.mxu0 }
 0x49c   : > { %v4307_v62 = vpop.f32.mrf.mxu3 }
 0x49d   : > { %v4366_v3 = vadd.f32 %v4307_v62, %v4219_v49 }
 0x49e   : > { %7419 = vmatmul.msk.bf16.vlgmr.msrb.gmra.mxu2 %vm871_vm4, %v7590_v52 }
 0x49f   : > { %v4530_v18 = vadd.f32 %v4471_v17, %v4366_v3  ;;  %v10890_v50 = vpop.f32.mrf.mxu1  ;;  %v10917_v3 = vld [vmem:[%s7958_s17 + $0x30] sm:$0xff] }
 0x4a1   : > { %4640 = vrot.lane.b32.xlu1 %v4530_v18, %s7856_s18  ;;  %v4165_v34 = vpop.f32.mrf.mxu2  ;;  %v4550_v18 = vld [vmem:[#allocation2 + $0x10] sm:$0xff] }
 0x4a2   : > { %v4221_v63 = vadd.f32 %v4165_v34, %v4048_v11 }
 0x4a3   : > { %v4476_v27 = vpop.f32.mrf.mxu0  ;;  %v4619_v46 = vpop.permute.xlu2 %4618 }
 0x4a4   : > { %v4309_v19 = vpop.f32.mrf.mxu3  ;;  %v4711_v30 = vadd.f32 %v4619_v46, %v4551_v6  ;;  %v4050_v6 = vadd.f32 %v10751_v24, %v10510_v4 }
 0x4a5   : > { %v4367_v55 = vadd.f32 %v4309_v19, %v4220_v54 }
 0x4a6   : > { %7481 = vmatmul.msk.bf16.vlgmr.msrb.gmra.mxu0 %vm871_vm4, %v10888_v61  ;;  %4744 = vst.msk [vmem:[#allocation2 + $0x18] sm:$0xff] %vm4740_vm5, %v4711_v30 }
 0x4a7   : > { %v4531_v40 = vadd.f32 %v4473_v48, %v4367_v55  ;;  %v10900_v10 = vpop.f32.mrf.mxu1 }
 0x4a9   : > { %7452 = vmatmul.msk.bf16.vlgmr.msrb.gmra.mxu3 %vm871_vm4, %v5246_v31  ;;  %4642 = vrot.lane.b32.xlu2 %v4531_v40, %s7856_s18  ;;  %v4167_v17 = vpop.f32.mrf.mxu2  ;;  %v7704_v40 = vld [vmem:[%s7958_s17 + $0x20] sm:$0x7] }
 0x4aa   : > { %7344 = vmatmul.msk.bf16.gmra.mxu1 %vm871_vm4, %v12644_v14  ;;  %v4222_v62 = vadd.f32 %v4167_v17, %v4049_v38  ;;  %v5216_v14 = vunpack.c.l.b16 %v5110_v5  ;;  %v4554_v17 = vld [vmem:[#allocation2 + $0x30] sm:$0xff]  ;;  %v4552_v38 = vld [vmem:[#allocation2 + $0x20] sm:$0xff] }
 0x4ab   : > { %v4478_v7 = vpop.f32.mrf.mxu0  ;;  %v4615_v49 = vpop.permute.xlu0 %4614 }
 0x4ac   : > { %v4312_v56 = vpop.f32.mrf.mxu3  ;;  %v4709_v9 = vadd.f32 %v4615_v49, %v4549_v37  ;;  %v5247_v15 = vpack.c.b16 %v5217_v39, %v5216_v14  ;;  %v7705_v39 = vld [vmem:[%s7958_s17 + $0x28] sm:$0xf] }
 0x4ad   : > { %v4368_v48 = vadd.f32 %v4312_v56, %v4221_v63  ;;  %v5119_v63 = vrot.slane %v7704_v40, 7 }
 0x4ae   : > { %4742 = vst.msk [vmem:[#allocation2 + $0x8] sm:$0xff] %vm4740_vm5, %v4709_v9  ;;  %7420 = vmatmul.msk.bf16.gmra.mxu2 %vm871_vm4, %v7591_v1  ;;  %v10946_v9 = vld [vmem:[%s7958_s17 + $0x3c] sm:$0xff] }
 0x4af   : > { %v4532_v52 = vadd.f32 %v4476_v27, %v4368_v48  ;;  %v10919_v53 = vpop.f32.mrf.mxu1  ;;  %v7702_v27 = vld [vmem:[%s7958_s17 + $0x1c] sm:$0xf] }
 0x4b0   : > { %v5116_v34 = vrot.slane %v7702_v27, 7 }
 0x4b1   : > { %4644 = vrot.lane.b32.xlu0 %v4532_v52, %s7856_s18  ;;  %v4170_v13 = vpop.f32.mrf.mxu2 }
 0x4b2   : > { %v4223_v19 = vadd.f32 %v4170_v13, %v4050_v6  ;;  %v5118_v11 = vrot.slane %v5116_v34, 4  ;;  %v5117_v32 = vsel %vm10873_vm7, %v7437_v42, %v5116_v34  ;;  %v4052_v13 = vadd.f32 %v10796_v28, %v10528_v29  ;;  %v7707_v6 = vld [vmem:[%s7958_s17 + $0x2c] sm:$0x7] }
 0x4b3   : > { %v4481_v2 = vpop.f32.mrf.mxu0  ;;  %v4617_v54 = vpop.permute.xlu1 %4616  ;;  %v5218_v1 = vunpack.c.l.b16 %v5117_v32  ;;  %v4557_v32 = vld [vmem:[#allocation2 + $0x48] sm:$0xff] }
 0x4b4   : > { %v4314_v35 = vpop.f32.mrf.mxu3  ;;  %v4710_v23 = vadd.f32 %v4617_v54, %v4550_v18  ;;  %v5120_v60 = vsel %vm10873_vm7, %v5118_v11, %v5119_v63  ;;  %v4053_v11 = vadd.f32 %v10809_v20, %v10535_v36 }
 0x4b5   : > { %v4369_v25 = vadd.f32 %v4314_v35, %v4222_v62  ;;  %v5219_v56 = vunpack.c.l.b16 %v5120_v60 }
 0x4b6   : > { %7482 = vmatmul.msk.bf16.gmra.mxu0 %vm871_vm4, %v10917_v3  ;;  %4743 = vst.msk [vmem:[#allocation2 + $0x10] sm:$0xff] %vm4740_vm5, %v4710_v23 }
 0x4b7   : > { %v4533_v46 = vadd.f32 %v4478_v7, %v4369_v25  ;;  %v10929_v30 = vpop.f32.mrf.mxu1  ;;  %v5248_v14 = vpack.c.b16 %v5219_v56, %v5218_v1  ;;  %v4054_v1 = vadd.f32 %v10823_v41, %v10546_v8 }
 0x4b9   : > { %7453 = vmatmul.msk.bf16.gmra.mxu3 %vm871_vm4, %v5247_v15  ;;  %4646 = vrot.lane.b32.xlu1 %v4533_v46, %s7856_s18  ;;  %v4172_v31 = vpop.f32.mrf.mxu2  ;;  %v7706_v15 = vld [vmem:[%s7958_s17 + $0x24] sm:$0xf]  ;;  %v5126_v46 = vrot.slane %v7707_v6, 7 }
 0x4ba   : > { %7345 = vmatmul.msk.bf16.gmra.mxu1 %vm871_vm4, %v8551_v47  ;;  %v4224_v49 = vadd.f32 %v4172_v31, %v4051_v33  ;;  %v7438_v27 = vrot.slane %v7706_v15, 11  ;;  %v12709_v15 = vld [vmem:[#allocation56_spill] sm:$0xff] }
 0x4bb   : > { %v4483_v55 = vpop.f32.mrf.mxu0  ;;  %v4625_v58 = vpop.permute.xlu2 %4624 }
 0x4bc   : > { %v4317_v4 = vpop.f32.mrf.mxu3  ;;  %v4714_v24 = vadd.f32 %v4625_v58, %v4554_v17 }
 0x4bd   : > { %v4370_v7 = vadd.f32 %v4317_v4, %v4223_v19  ;;  %v4553_v19 = vld [vmem:[#allocation2 + $0x28] sm:$0xff] }
 0x4be   : > { %4747 = vst.msk [vmem:[#allocation2 + $0x30] sm:$0xff] %vm4740_vm5, %v4714_v24  ;;  %7421 = vmatmul.msk.bf16.gmra.mxu2 %vm871_vm4, %v7592_v59  ;;  %v10975_v59 = vld [vmem:[%s7958_s17 + $0x48] sm:$0xff] }
 0x4bf   : > { %v4534_v37 = vadd.f32 %v4481_v2, %v4370_v7  ;;  %v10948_v48 = vpop.f32.mrf.mxu1  ;;  %v5123_v2 = vrot.slane %v7705_v39, 7 }
 0x4c1   : > { %4648 = vrot.lane.b32.xlu2 %v4534_v37, %s7856_s18  ;;  %v4175_v0 = vpop.f32.mrf.mxu2  ;;  %v5125_v34 = vrot.slane %v5123_v2, 4 }
 0x4c2   : > { %v4225_v54 = vadd.f32 %v4175_v0, %v4052_v13 }
 0x4c3   : > { %v4486_v5 = vpop.f32.mrf.mxu0  ;;  %v4621_v52 = vpop.permute.xlu0 %4620  ;;  %v5127_v42 = vsel %vm10873_vm7, %v5125_v34, %v5126_v46 }
 0x4c4   : > { %v4319_v62 = vpop.f32.mrf.mxu3  ;;  %v4712_v51 = vadd.f32 %v4621_v52, %v4552_v38  ;;  %v5221_v58 = vunpack.c.l.b16 %v5127_v42 }
 0x4c5   : > { %v4371_v26 = vadd.f32 %v4319_v62, %v4224_v49  ;;  %v7709_v62 = vld [vmem:[%s7958_s17 + $0x30] sm:$0xf] }
 0x4c6   : > { %7483 = vmatmul.msk.bf16.gmra.mxu0 %vm871_vm4, %v10946_v9  ;;  %4745 = vst.msk [vmem:[#allocation2 + $0x20] sm:$0xff] %vm4740_vm5, %v4712_v51  ;;  %v7439_v51 = vrot.slane %v7709_v62, 11  ;;  %v12711_v62 = vld [vmem:[#allocation30_spill] sm:$0xff] }
 0x4c7   : > { %v4535_v18 = vadd.f32 %v4483_v55, %v4371_v26  ;;  %v10958_v35 = vpop.f32.mrf.mxu1  ;;  %v5124_v55 = vsel %vm10873_vm7, %v7438_v27, %v5123_v2  ;;  %v4555_v2 = vld [vmem:[#allocation2 + $0x38] sm:$0xff]  ;;  %v4055_v27 = vadd.f32 %v10856_v43, %v12709_v15 }
 0x4c8   : > { %v5220_v17 = vunpack.c.l.b16 %v5124_v55  ;;  %v4556_v55 = vld [vmem:[#allocation2 + $0x40] sm:$0xff] }
 0x4c9   : > { %7454 = vmatmul.msk.bf16.gmra.mxu3 %vm871_vm4, %v5248_v14  ;;  %4650 = vrot.lane.b32.xlu0 %v4535_v18, %s7856_s18  ;;  %v4177_v25 = vpop.f32.mrf.mxu2  ;;  %v7710_v14 = vld [vmem:[%s7958_s17 + $0x38] sm:$0x7]  ;;  %v12708_v18 = vld [vmem:[#allocation25_spill] sm:$0xff] }
 0x4ca   : > { %7346 = vmatmul.msk.bf16.gmra.mxu1 %vm871_vm4, %v12645_v22  ;;  %v4226_v63 = vadd.f32 %v4177_v25, %v4053_v11  ;;  %v10979_v37 = vpack.c.b16 %v5221_v58, %v5220_v17  ;;  %v5133_v39 = vrot.slane %v7710_v14, 7  ;;  %v12710_v58 = vld [vmem:[#allocation52_spill] sm:$0xff] }
 0x4cb   : > { %v4488_v23 = vpop.f32.mrf.mxu0  ;;  %v4623_v31 = vpop.permute.xlu1 %4622 }
 0x4cc   : > { %v4322_v57 = vpop.f32.mrf.mxu3  ;;  %v4713_v29 = vadd.f32 %v4623_v31, %v4553_v19  ;;  %v11007_v31 = vld [vmem:[%s7958_s17 + $0x54] sm:$0xff] }
 0x4cd   : > { %v4372_v28 = vadd.f32 %v4322_v57, %v4225_v54 }
 0x4ce   : > { %4746 = vst.msk [vmem:[#allocation2 + $0x28] sm:$0xff] %vm4740_vm5, %v4713_v29  ;;  %7422 = vmatmul.msk.bf16.gmra.mxu2 %vm871_vm4, %v10888_v61  ;;  %v7708_v61 = vld [vmem:[%s7958_s17 + $0x34] sm:$0xf] }
 0x4cf   : > { %v4536_v40 = vadd.f32 %v4486_v5, %v4372_v28  ;;  %v10977_v4 = vpop.f32.mrf.mxu1  ;;  %v5130_v49 = vrot.slane %v7708_v61, 7 }
 0x4d1   : > { %4652 = vrot.lane.b32.xlu1 %v4536_v40, %s7856_s18  ;;  %v4180_v7 = vpop.f32.mrf.mxu2  ;;  %v5132_v26 = vrot.slane %v5130_v49, 4 }
 0x4d2   : > { %v4227_v5 = vadd.f32 %v4180_v7, %v4054_v1  ;;  %v7713_v1 = vld [vmem:[%s7958_s17 + $0x44] sm:$0x7] }
 0x4d3   : > { %v4491_v24 = vpop.f32.mrf.mxu0  ;;  %v4631_v60 = vpop.permute.xlu2 %4630  ;;  %v5134_v25 = vsel %vm10873_vm7, %v5132_v26, %v5133_v39  ;;  %v12712_v39 = vld [vmem:[#allocation63_spill] sm:$0xff] }
 0x4d4   : > { %v4324_v33 = vpop.f32.mrf.mxu3  ;;  %v4717_v36 = vadd.f32 %v4631_v60, %v4557_v32  ;;  %v5223_v19 = vunpack.c.l.b16 %v5134_v25 }
 0x4d5   : > { %v4373_v20 = vadd.f32 %v4324_v33, %v4226_v63 }
 0x4d6   : > { %7484 = vmatmul.msk.bf16.gmra.mxu0 %vm871_vm4, %v10975_v59  ;;  %4750 = vst.msk [vmem:[#allocation2 + $0x48] sm:$0xff] %vm4740_vm5, %v4717_v36 }
 0x4d7   : > { %v4537_v56 = vadd.f32 %v4488_v23, %v4373_v20  ;;  %v10990_v0 = vpop.f32.mrf.mxu1  ;;  %v5131_v23 = vsel %vm10873_vm7, %v7439_v51, %v5130_v49  ;;  %v7712_v20 = vld [vmem:[%s7958_s17 + $0x3c] sm:$0xf] }
 0x4d8   : > { %v5222_v46 = vunpack.c.l.b16 %v5131_v23  ;;  %v7440_v61 = vrot.slane %v7712_v20, 11  ;;  %v11039_v23 = vld [vmem:[%s7958_s17 + $0x60] sm:$0xff]  ;;  %v4559_v20 = vld [vmem:[#allocation2 + $0x58] sm:$0xff] }
 0x4d9   : > { %7455 = vmatmul.msk.bf16.gmra.mxu3 %vm871_vm4, %v10979_v37  ;;  %4654 = vrot.lane.b32.xlu2 %v4537_v56, %s7856_s18  ;;  %v4182_v52 = vpop.f32.mrf.mxu2  ;;  %v5140_v56 = vrot.slane %v7713_v1, 7 }
 0x4da   : > { %7347 = vmatmul.msk.bf16.gmra.mxu1 %vm871_vm4, %v12708_v18  ;;  %v4228_v6 = vadd.f32 %v4182_v52, %v4055_v27  ;;  %v11011_v63 = vpack.c.b16 %v5223_v19, %v5222_v46 }
 0x4db   : > { %v4493_v38 = vpop.f32.mrf.mxu0  ;;  %v4627_v13 = vpop.permute.xlu0 %4626 }
 0x4dc   : > { %v4327_v8 = vpop.f32.mrf.mxu3  ;;  %v4715_v41 = vadd.f32 %v4627_v13, %v4555_v2  ;;  %v4057_v2 = vadd.f32 %v10890_v50, %v12712_v39  ;;  %v11071_v39 = vld [vmem:[%s7958_s17 + $0x6c] sm:$0xff] }
 0x4dd   : > { %v4374_v54 = vadd.f32 %v4327_v8, %v4227_v5  ;;  %v4560_v5 = vld [vmem:[#allocation2 + $0x60] sm:$0xff] }
 0x4de   : > { %4748 = vst.msk [vmem:[#allocation2 + $0x38] sm:$0xff] %vm4740_vm5, %v4715_v41  ;;  %7423 = vmatmul.msk.bf16.gmra.mxu2 %vm871_vm4, %v10917_v3  ;;  %v7711_v3 = vld [vmem:[%s7958_s17 + $0x40] sm:$0xf] }
 0x4df   : > { %v4538_v34 = vadd.f32 %v4491_v24, %v4374_v54  ;;  %v11009_v57 = vpop.f32.mrf.mxu1  ;;  %v5137_v17 = vrot.slane %v7711_v3, 7  ;;  %v4056_v24 = vadd.f32 %v10867_v12, %v12710_v58  ;;  %v7715_v58 = vld [vmem:[%s7958_s17 + $0x48] sm:$0xf] }
 0x4e1   : > { %4656 = vrot.lane.b32.xlu2 %v4538_v34, %s7856_s18  ;;  %v4185_v28 = vpop.f32.mrf.mxu2  ;;  %v5139_v49 = vrot.slane %v5137_v17, 4  ;;  %v5138_v26 = vsel %vm10873_vm7, %v7440_v61, %v5137_v17  ;;  %v4558_v34 = vld [vmem:[#allocation2 + $0x50] sm:$0xff] }
 0x4e2   : > { %v4229_v32 = vadd.f32 %v4185_v28, %v4056_v24  ;;  %v5224_v41 = vunpack.c.l.b16 %v5138_v26  ;;  %v7441_v24 = vrot.slane %v7715_v58, 11 }
 0x4e3   : > { %v4496_v29 = vpop.f32.mrf.mxu0  ;;  %v4629_v42 = vpop.permute.xlu1 %4628  ;;  %v5141_v14 = vsel %vm10873_vm7, %v5139_v49, %v5140_v56  ;;  %v12714_v49 = vld [vmem:[#allocation54_spill] sm:$0xff] }
 0x4e4   : > { %v4329_v11 = vpop.f32.mrf.mxu3  ;;  %v4716_v43 = vadd.f32 %v4629_v42, %v4556_v55  ;;  %v5225_v54 = vunpack.c.l.b16 %v5141_v14  ;;  %v12713_v55 = vld [vmem:[#allocation64_spill] sm:$0xff] }
 0x4e5   : > { %v4375_v40 = vadd.f32 %v4329_v11, %v4228_v6  ;;  %v4058_v42 = vadd.f32 %v10900_v10, %v12713_v55 }
 0x4e6   : > { %7485 = vmatmul.msk.bf16.gmra.mxu0 %vm871_vm4, %v11007_v31  ;;  %4749 = vst.msk [vmem:[#allocation2 + $0x40] sm:$0xff] %vm4740_vm5, %v4716_v43 }
 0x4e7   : > { %v4539_v7 = vadd.f32 %v4493_v38, %v4375_v40  ;;  %v11022_v60 = vpop.f32.mrf.mxu1 }
 0x4e9   : > { %7456 = vmatmul.msk.bf16.gmra.mxu3 %vm871_vm4, %v11011_v63  ;;  %4658 = vrot.lane.b32.xlu1 %v4539_v7, %s7856_s18  ;;  %v4187_v36 = vpop.f32.mrf.mxu2 }
 0x4ea   : > { %7348 = vmatmul.msk.bf16.gmra.mxu1 %vm871_vm4, %v12711_v62  ;;  %v4230_v8 = vadd.f32 %v4187_v36, %v4057_v2 }
 0x4eb   : > { %v4498_v33 = vpop.f32.mrf.mxu0  ;;  %v4637_v52 = vpop.permute.xlu2 %4636 }
 0x4ec   : > { %v4332_v12 = vpop.f32.mrf.mxu3  ;;  %v4720_v38 = vadd.f32 %v4637_v52, %v4560_v5  ;;  %v12715_v52 = vld [vmem:[#allocation65_spill] sm:$0xff] }
 0x4ed   : > { %v4376_v51 = vadd.f32 %v4332_v12, %v4229_v32  ;;  %v7716_v32 = vld [vmem:[%s7958_s17 + $0x50] sm:$0x7]  ;;  %v4059_v12 = vadd.f32 %v10919_v53, %v12715_v52 }
 0x4ee   : > { %4753 = vst.msk [vmem:[#allocation2 + $0x60] sm:$0xff] %vm4740_vm5, %v4720_v38  ;;  %7424 = vmatmul.msk.bf16.gmra.mxu2 %vm871_vm4, %v10946_v9  ;;  %v7714_v9 = vld [vmem:[%s7958_s17 + $0x4c] sm:$0xf]  ;;  %v5147_v36 = vrot.slane %v7716_v32, 7 }
 0x4ef   : > { %v4540_v13 = vadd.f32 %v4496_v29, %v4376_v51  ;;  %v11041_v25 = vpop.f32.mrf.mxu1  ;;  %v11043_v29 = vpack.c.b16 %v5225_v54, %v5224_v41  ;;  %v5144_v28 = vrot.slane %v7714_v9, 7  ;;  %v4563_v41 = vld [vmem:[#allocation2 + $0x78] sm:$0xff]  ;;  %v4561_v32 = vld [vmem:[#allocation2 + $0x68] sm:$0xff] }
 0x4f1   : > { %4660 = vrot.lane.b32.xlu0 %v4540_v13, %s7856_s18  ;;  %v4190_v27 = vpop.f32.mrf.mxu2  ;;  %v5146_v7 = vrot.slane %v5144_v28, 4  ;;  %v5145_v56 = vsel %vm10873_vm7, %v7441_v24, %v5144_v28  ;;  %v7719_v24 = vld [vmem:[%s7958_s17 + $0x5c] sm:$0x7] }
 0x4f2   : > { %v4231_v43 = vadd.f32 %v4190_v27, %v4058_v42  ;;  %v5226_v26 = vunpack.c.l.b16 %v5145_v56 }
 0x4f3   : > { %v4501_v15 = vpop.f32.mrf.mxu0  ;;  %v4633_v6 = vpop.permute.xlu0 %4632  ;;  %v5148_v5 = vsel %vm10873_vm7, %v5146_v7, %v5147_v36  ;;  %v5154_v7 = vrot.slane %v7719_v24, 7 }
 0x4f4   : > { %v4334_v46 = vpop.f32.mrf.mxu3  ;;  %v4718_v50 = vadd.f32 %v4633_v6, %v4558_v34  ;;  %v5227_v14 = vunpack.c.l.b16 %v5148_v5  ;;  %v7717_v6 = vld [vmem:[%s7958_s17 + $0x58] sm:$0xf] }
 0x4f5   : > { %v4377_v19 = vadd.f32 %v4334_v46, %v4230_v8  ;;  %v5151_v46 = vrot.slane %v7717_v6, 7 }
 0x4f6   : > { %7486 = vmatmul.msk.bf16.gmra.mxu0 %vm871_vm4, %v11039_v23  ;;  %4751 = vst.msk [vmem:[#allocation2 + $0x50] sm:$0xff] %vm4740_vm5, %v4718_v50  ;;  %v11075_v34 = vpack.c.b16 %v5227_v14, %v5226_v26  ;;  %v12716_v50 = vld [vmem:[#allocation67_spill] sm:$0xff] }
 0x4f7   : > { %v4541_v11 = vadd.f32 %v4498_v33, %v4377_v19  ;;  %v11054_v40 = vpop.f32.mrf.mxu1  ;;  %v4060_v19 = vadd.f32 %v10929_v30, %v12716_v50  ;;  %v5153_v58 = vrot.slane %v5151_v46, 4 }
 0x4f9   : > { %7457 = vmatmul.msk.bf16.gmra.mxu3 %vm871_vm4, %v11043_v29  ;;  %4662 = vrot.lane.b32.xlu2 %v4541_v11, %s7856_s18  ;;  %v4192_v17 = vpop.f32.mrf.mxu2 }
 0x4fa   : > { %7349 = vmatmul.msk.bf16.gmra.mxu1 %vm871_vm4, %v12714_v49  ;;  %v4232_v51 = vadd.f32 %v4192_v17, %v4059_v12 }
 0x4fb   : > { %v4503_v3 = vpop.f32.mrf.mxu0  ;;  %v4635_v61 = vpop.permute.xlu1 %4634 }
 0x4fc   : > { %v4337_v10 = vpop.f32.mrf.mxu3  ;;  %v4719_v33 = vadd.f32 %v4635_v61, %v4559_v20  ;;  %v12717_v20 = vld [vmem:[#allocation84_spill] sm:$0xff] }
 0x4fd   : > { %v4378_v1 = vadd.f32 %v4337_v10, %v4231_v43  ;;  %v7718_v43 = vld [vmem:[%s7958_s17 + $0x54] sm:$0xf] }
 0x4fe   : > { %4752 = vst.msk [vmem:[#allocation2 + $0x58] sm:$0xff] %vm4740_vm5, %v4719_v33  ;;  %7425 = vmatmul.msk.bf16.gmra.mxu2 %vm871_vm4, %v10975_v59  ;;  %v7442_v17 = vrot.slane %v7718_v43, 11  ;;  %v5155_v33 = vsel %vm10873_vm7, %v5153_v58, %v5154_v7  ;;  %v7722_v7 = vld [vmem:[%s7958_s17 + $0x68] sm:$0x7] }
 0x4ff   : > { %v4542_v38 = vadd.f32 %v4501_v15, %v4378_v1  ;;  %v11073_v2 = vpop.f32.mrf.mxu1  ;;  %v12718_v1 = vld [vmem:[#allocation66_spill] sm:$0xff] }
 0x500   : > { %v5152_v10 = vsel %vm10873_vm7, %v7442_v17, %v5151_v46  ;;  %v4061_v56 = vadd.f32 %v10948_v48, %v12718_v1  ;;  %v12719_v46 = vld [vmem:[#allocation31_spill] sm:$0xff]  ;;  %v7721_v17 = vld [vmem:[%s7958_s17 + $0x60] sm:$0xf] }
 0x501   : > { %4664 = vrot.lane.b32.xlu1 %v4542_v38, %s7856_s18  ;;  %v4195_v8 = vpop.f32.mrf.mxu2  ;;  %v5228_v12 = vunpack.c.l.b16 %v5152_v10  ;;  %v5229_v38 = vunpack.c.l.b16 %v5155_v33  ;;  %v4062_v50 = vadd.f32 %v10958_v35, %v12719_v46  ;;  %v7443_v58 = vrot.slane %v7721_v17, 11  ;;  %v12721_v1 = vld [vmem:[#allocation83_spill] sm:$0xff]  ;;  %v7723_v46 = vld [vmem:[%s7958_s17 + $0x70] sm:$0xf] }
 0x502   : > { %v4233_v28 = vadd.f32 %v4195_v8, %v4060_v19 }
 0x503   : > { %v4506_v13 = vpop.f32.mrf.mxu0  ;;  %v4643_v54 = vpop.permute.xlu2 %4642 }
 0x504   : > { %v4339_v27 = vpop.f32.mrf.mxu3  ;;  %v4723_v53 = vadd.f32 %v4643_v54, %v4563_v41  ;;  %v4562_v41 = vld [vmem:[#allocation2 + $0x70] sm:$0xff] }
 0x505   : > { %v4379_v15 = vadd.f32 %v4339_v27, %v4232_v51  ;;  %v11103_v51 = vld [vmem:[%s7958_s17 + $0x78] sm:$0xff] }
 0x506   : > { %7487 = vmatmul.msk.bf16.gmra.mxu0 %vm871_vm4, %v11071_v39  ;;  %4756 = vst.msk [vmem:[#allocation2 + $0x78] sm:$0xff] %vm4740_vm5, %v4723_v53  ;;  %v11107_v53 = vpack.c.b16 %v5229_v38, %v5228_v12 }
 0x507   : > { %v4543_v9 = vadd.f32 %v4503_v3, %v4379_v15  ;;  %v11086_v55 = vpop.f32.mrf.mxu1  ;;  %v7720_v15 = vld [vmem:[%s7958_s17 + $0x64] sm:$0xf] }
 0x508   : > { %v5158_v6 = vrot.slane %v7720_v15, 7 }
 0x509   : > { %7458 = vmatmul.msk.bf16.gmra.mxu3 %vm871_vm4, %v11075_v34  ;;  %4666 = vrot.lane.b32.xlu0 %v4543_v9, %s7856_s18  ;;  %v4197_v11 = vpop.f32.mrf.mxu2 }
 0x50a   : > { %7350 = vmatmul.msk.bf16.gmra.mxu1 %vm871_vm4, %v12717_v20  ;;  %v4234_v52 = vadd.f32 %v4197_v11, %v4061_v56  ;;  %v5160_v24 = vrot.slane %v5158_v6, 4  ;;  %v5159_v10 = vsel %vm10873_vm7, %v7443_v58, %v5158_v6  ;;  %v4063_v56 = vadd.f32 %v10977_v4, %v12721_v1 }
 0x50b   : > { %v4508_v42 = vpop.f32.mrf.mxu0  ;;  %v4639_v36 = vpop.permute.xlu0 %4638  ;;  %v5230_v12 = vunpack.c.l.b16 %v5159_v10  ;;  %v12722_v10 = vld [vmem:[#allocation124_spill] sm:$0xff] }
 0x50c   : > { %v4342_v30 = vpop.f32.mrf.mxu3  ;;  %v4721_v3 = vadd.f32 %v4639_v36, %v4561_v32  ;;  %v5161_v32 = vrot.slane %v7722_v7, 7  ;;  %v4566_v36 = vld [vmem:[#allocation2 + $0x90] sm:$0xff] }
 0x50d   : > { %v4380_v61 = vadd.f32 %v4342_v30, %v4233_v28 }
 0x50e   : > { %4754 = vst.msk [vmem:[#allocation2 + $0x68] sm:$0xff] %vm4740_vm5, %v4721_v3  ;;  %7426 = vmatmul.msk.bf16.gmra.mxu2 %vm871_vm4, %v11007_v31  ;;  %v12720_v3 = vld [vmem:[#allocation107_spill] sm:$0xff]  ;;  %v5162_v33 = vsel %vm10873_vm7, %v5160_v24, %v5161_v32  ;;  %v7724_v24 = vld [vmem:[%s7958_s17 + $0x6c] sm:$0xf] }
 0x50f   : > { %v4544_v5 = vadd.f32 %v4506_v13, %v4380_v61  ;;  %v11105_v26 = vpop.f32.mrf.mxu1  ;;  %v5231_v38 = vunpack.c.l.b16 %v5162_v33  ;;  %v7444_v7 = vrot.slane %v7724_v24, 11 }
 0x511   : > { %4668 = vrot.lane.b32.xlu2 %v4544_v5, %s7856_s18  ;;  %v4200_v8 = vpop.f32.mrf.mxu2  ;;  %v11139_v6 = vpack.c.b16 %v5231_v38, %v5230_v12  ;;  %v11166_v38 = vld [vmem:[%s7958_s17 + $0x90] sm:$0xff] }
 0x512   : > { %v4235_v9 = vadd.f32 %v4200_v8, %v4062_v50  ;;  %v11135_v8 = vld [vmem:[%s7958_s17 + $0x84] sm:$0xff]  ;;  %v5165_v50 = vrot.slane %v7723_v46, 7 }
 0x513   : > { %v4511_v14 = vpop.f32.mrf.mxu0  ;;  %v4641_v54 = vpop.permute.xlu1 %4640 }
 0x514   : > { %v4344_v27 = vpop.f32.mrf.mxu3  ;;  %v4722_v48 = vadd.f32 %v4641_v54, %v4562_v41  ;;  %v5167_v32 = vrot.slane %v5165_v50, 4 }
 0x515   : > { %v4381_v13 = vadd.f32 %v4344_v27, %v4234_v52 }
 0x516   : > { %7488 = vmatmul.msk.bf16.gmra.mxu0 %vm871_vm4, %v11103_v51  ;;  %4755 = vst.msk [vmem:[#allocation2 + $0x70] sm:$0xff] %vm4740_vm5, %v4722_v48  ;;  %v4564_v48 = vld [vmem:[#allocation2 + $0x80] sm:$0xff] }
 0x517   : > { %v4545_v19 = vadd.f32 %v4508_v42, %v4381_v13  ;;  %v11118_v28 = vpop.f32.mrf.mxu1 }
 0x519   : > { %7459 = vmatmul.msk.bf16.gmra.mxu3 %vm871_vm4, %v11107_v53  ;;  %4670 = vrot.lane.b32.xlu1 %v4545_v19, %s7856_s18  ;;  %v4202_v43 = vpop.f32.mrf.mxu2 }
 0x51a   : > { %7351 = vmatmul.msk.bf16.gmra.mxu1 %vm871_vm4, %v12720_v3  ;;  %v4236_v52 = vadd.f32 %v4202_v43, %v4063_v56 }
 0x51b   : > { %v4513_v11 = vpop.f32.mrf.mxu0  ;;  %v4649_v30 = vpop.permute.xlu2 %4648 }
 0x51c   : > { %v4347_v35 = vpop.f32.mrf.mxu3  ;;  %v4726_v42 = vadd.f32 %v4649_v30, %v4566_v36  ;;  %v7725_v36 = vld [vmem:[%s7958_s17 + $0x74] sm:$0x7] }
 0x51d   : > { %v4382_v61 = vadd.f32 %v4347_v35, %v4235_v9  ;;  %v5168_v30 = vrot.slane %v7725_v36, 7  ;;  %v4565_v35 = vld [vmem:[#allocation2 + $0x88] sm:$0xff]  ;;  %v7727_v36 = vld [vmem:[%s7958_s17 + $0x78] sm:$0xf] }
 0x51e   : > { %4759 = vst.msk [vmem:[#allocation2 + $0x90] sm:$0xff] %vm4740_vm5, %v4726_v42  ;;  %7427 = vmatmul.msk.bf16.gmra.mxu2 %vm871_vm4, %v11039_v23 }
 0x51f   : > { %v4546_v5 = vadd.f32 %v4511_v14, %v4382_v61  ;;  %v11137_v41 = vpop.f32.mrf.mxu1  ;;  %v5169_v1 = vsel %vm10873_vm7, %v5167_v32, %v5168_v30  ;;  %v7445_v30 = vrot.slane %v7727_v36, 11 }
 0x520   : > { %v5233_v12 = vunpack.c.l.b16 %v5169_v1 }
 0x521   : > { %4672 = vrot.lane.b32.xlu0 %v4546_v5, %s7856_s18  ;;  %v5015_v27 = vpop.f32.mrf.mxu2 }
 0x522   : > { %v5016_v9 = vadd.f32 %v5015_v27, %v10990_v0  ;;  %v5166_v0 = vsel %vm10873_vm7, %v7444_v7, %v5165_v50 }
 0x523   : > { %v5466_v54 = vpop.f32.mrf.mxu0  ;;  %v4645_v13 = vpop.permute.xlu0 %4644 }
 0x524   : > { %v4349_v4 = vpop.f32.mrf.mxu3  ;;  %v4724_v14 = vadd.f32 %v4645_v13, %v4564_v48 }
 0x525   : > { %v4383_v15 = vadd.f32 %v4349_v4, %v4236_v52  ;;  %v5232_v52 = vunpack.c.l.b16 %v5166_v0  ;;  %v4569_v4 = vld [vmem:[#allocation2 + $0xa8] sm:$0xff]  ;;  %v4570_v0 = vld [vmem:[#allocation2 + $0xb0] sm:$0xff] }
 0x526   : > { %7489 = vmatmul.msk.bf16.gmra.mxu0 %vm871_vm4, %v11135_v8  ;;  %4757 = vst.msk [vmem:[#allocation2 + $0x80] sm:$0xff] %vm4740_vm5, %v4724_v14 }
 0x527   : > { %v4547_v19 = vadd.f32 %v4513_v11, %v4383_v15  ;;  %v11149_v43 = vpop.f32.mrf.mxu1 }
 0x529   : > { %7460 = vmatmul.msk.bf16.gmra.mxu3 %vm871_vm4, %v11139_v6  ;;  %4674 = vrot.lane.b32.xlu2 %v4547_v19, %s7856_s18  ;;  %v5017_v58 = vpop.f32.mrf.mxu2 }
 0x52a   : > { %7352 = vmatmul.msk.bf16.gmra.mxu1 %vm871_vm4, %v12722_v10  ;;  %v5018_v5 = vadd.f32 %v5017_v58, %v11009_v57  ;;  %v7726_v57 = vld [vmem:[%s7958_s17 + $0x7c] sm:$0xf] }
 0x52b   : > { %v5468_v17 = vpop.f32.mrf.mxu0  ;;  %v4647_v42 = vpop.permute.xlu1 %4646  ;;  %v5172_v19 = vrot.slane %v7726_v57, 7  ;;  %v11199_v57 = vld [vmem:[%s7958_s17 + $0x9c] sm:$0xff] }
 0x52c   : > { %v5322_v11 = vpop.f32.mrf.mxu3  ;;  %v4725_v61 = vadd.f32 %v4647_v42, %v4565_v35  ;;  %v7728_v42 = vld [vmem:[%s7958_s17 + $0x80] sm:$0x7] }
 0x52d   : > { %v5402_v33 = vadd.f32 %v5322_v11, %v5016_v9  ;;  %v5174_v35 = vrot.slane %v5172_v19, 4  ;;  %v5175_v11 = vrot.slane %v7728_v42, 7 }
 0x52e   : > { %4758 = vst.msk [vmem:[#allocation2 + $0x88] sm:$0xff] %vm4740_vm5, %v4725_v61  ;;  %7428 = vmatmul.msk.bf16.gmra.mxu2 %vm871_vm4, %v11071_v39  ;;  %v4567_v61 = vld [vmem:[#allocation2 + $0x98] sm:$0xff] }
 0x52f   : > { %v11162_v56 = vadd.f32 %v5466_v54, %v5402_v33  ;;  %v11168_v27 = vpop.f32.mrf.mxu1  ;;  %v11170_v54 = vpack.c.b16 %v5233_v12, %v5232_v52  ;;  %v12723_v12 = vld [vmem:[#allocation36_spill] sm:$0xff] }
 0x531   : > { %v5020_v13 = vpop.f32.mrf.mxu2 }
 0x532   : > { %v5021_v58 = vadd.f32 %v5020_v13, %v11022_v60  ;;  %v5173_v13 = vsel %vm10873_vm7, %v7445_v30, %v5172_v19  ;;  %v4568_v30 = vld [vmem:[#allocation2 + $0xa0] sm:$0xff] }
 0x533   : > { %v5471_v48 = vpop.f32.mrf.mxu0  ;;  %v4655_v14 = vpop.permute.xlu2 %4654 }
 0x534   : > { %v5324_v15 = vpop.f32.mrf.mxu3  ;;  %v4729_v46 = vadd.f32 %v4655_v14, %v4569_v4  ;;  %v5176_v4 = vsel %vm10873_vm7, %v5174_v35, %v5175_v11 }
 0x535   : > { %v5403_v50 = vadd.f32 %v5324_v15, %v5018_v5 }
 0x536   : > { %7490 = vmatmul.msk.bf16.gmra.mxu0 %vm871_vm4, %v11166_v38  ;;  %4762 = vst.msk [vmem:[#allocation2 + $0xa8] sm:$0xff] %vm4740_vm5, %v4729_v46  ;;  %v5234_v46 = vunpack.c.l.b16 %v5173_v13 }
 0x537   : > { %v11176_v9 = vadd.f32 %v5468_v17, %v5403_v50  ;;  %v11181_v24 = vpop.f32.mrf.mxu1  ;;  %v5235_v50 = vunpack.c.l.b16 %v5176_v4  ;;  %v7731_v4 = vld [vmem:[%s7958_s17 + $0x8c] sm:$0x7] }
 0x539   : > { %7461 = vmatmul.msk.bf16.gmra.mxu3 %vm871_vm4, %v11170_v54  ;;  %v5022_v32 = vpop.f32.mrf.mxu2 }
 0x53a   : > { %7353 = vmatmul.msk.bf16.gmra.mxu1 %vm871_vm4, %v12723_v12  ;;  %v5023_v15 = vadd.f32 %v5022_v32, %v11041_v25  ;;  %v7729_v25 = vld [vmem:[%s7958_s17 + $0x88] sm:$0xf] }
 0x53b   : > { %v5473_v7 = vpop.f32.mrf.mxu0  ;;  %v4651_v33 = vpop.permute.xlu0 %4650  ;;  %v5179_v32 = vrot.slane %v7729_v25, 7 }
 0x53c   : > { %v4657_v17 = vpop.permute.xlu2 %4656  ;;  %v5327_v1 = vpop.f32.mrf.mxu3  ;;  %v4727_v5 = vadd.f32 %v4651_v33, %v4567_v61 }
 0x53d   : > { %v4730_v52 = vadd.f32 %v4657_v17, %v4570_v0  ;;  %v5404_v60 = vadd.f32 %v5327_v1, %v5021_v58  ;;  %v5181_v13 = vrot.slane %v5179_v32, 4 }
 0x53e   : > { %4760 = vst.msk [vmem:[#allocation2 + $0x98] sm:$0xff] %vm4740_vm5, %v4727_v5  ;;  %7429 = vmatmul.msk.bf16.gmra.mxu2 %vm871_vm4, %v11103_v51 }
 0x53f   : > { %4763 = vst.msk [vmem:[#allocation2 + $0xb0] sm:$0xff] %vm4740_vm5, %v4730_v52  ;;  %v11195_v14 = vadd.f32 %v5471_v48, %v5404_v60  ;;  %v11201_v58 = vpop.f32.mrf.mxu1  ;;  %v11203_v48 = vpack.c.b16 %v5235_v50, %v5234_v46  ;;  %v7730_v52 = vld [vmem:[%s7958_s17 + $0x84] sm:$0xf]  ;;  %v12724_v50 = vld [vmem:[#allocation62_spill] sm:$0xff] }
 0x540   : > { %v7446_v60 = vrot.slane %v7730_v52, 11 }
 0x541   : > { %v5025_v36 = vpop.f32.mrf.mxu2 }
 0x542   : > { %v5026_v0 = vadd.f32 %v5025_v36, %v11054_v40 }
 0x543   : > { %v5476_v19 = vpop.f32.mrf.mxu0  ;;  %v4653_v35 = vpop.permute.xlu1 %4652 }
 0x544   : > { %v5329_v42 = vpop.f32.mrf.mxu3  ;;  %v4728_v11 = vadd.f32 %v4653_v35, %v4568_v30  ;;  %v5180_v30 = vsel %vm10873_vm7, %v7446_v60, %v5179_v32  ;;  %v4573_v32 = vld [vmem:[#allocation2 + $0xc8] sm:$0xff] }
 0x545   : > { %v5405_v61 = vadd.f32 %v5329_v42, %v5023_v15  ;;  %v5182_v15 = vrot.slane %v7731_v4, 7  ;;  %v5236_v42 = vunpack.c.l.b16 %v5180_v30 }
 0x546   : > { %7491 = vmatmul.msk.bf16.gmra.mxu0 %vm871_vm4, %v11199_v57  ;;  %4761 = vst.msk [vmem:[#allocation2 + $0xa0] sm:$0xff] %vm4740_vm5, %v4728_v11 }
 0x547   : > { %v11209_v33 = vadd.f32 %v5473_v7, %v5405_v61  ;;  %v11214_v17 = vpop.f32.mrf.mxu1  ;;  %v5183_v40 = vsel %vm10873_vm7, %v5181_v13, %v5182_v15  ;;  %v11230_v61 = vld [vmem:[%s7958_s17 + $0xa8] sm:$0xff] }
 0x548   : > { %v5237_v11 = vunpack.c.l.b16 %v5183_v40 }
 0x549   : > { %7462 = vmatmul.msk.bf16.gmra.mxu3 %vm871_vm4, %v11203_v48  ;;  %v5027_v5 = vpop.f32.mrf.mxu2 }
 0x54a   : > { %7354 = vmatmul.msk.bf16.gmra.mxu1 %vm871_vm4, %v12724_v50  ;;  %v5028_v35 = vadd.f32 %v5027_v5, %v11073_v2  ;;  %v7732_v2 = vld [vmem:[%s7958_s17 + $0x94] sm:$0xf] }
 0x54b   : > { %v5478_v1 = vpop.f32.mrf.mxu0  ;;  %v5186_v5 = vrot.slane %v7732_v2, 7 }
 0x54c   : > { %v5332_v46 = vpop.f32.mrf.mxu3 }
 0x54d   : > { %v5406_v7 = vadd.f32 %v5332_v46, %v5026_v0 }
 0x54e   : > { %7430 = vmatmul.msk.bf16.gmra.mxu2 %vm871_vm4, %v11135_v8 }
 0x54f   : > { %v11226_v36 = vadd.f32 %v5476_v19, %v5406_v7  ;;  %v11232_v25 = vpop.f32.mrf.mxu1  ;;  %v11234_v19 = vpack.c.b16 %v5237_v11, %v5236_v42  ;;  %v7733_v42 = vld [vmem:[%s7958_s17 + $0x90] sm:$0xf] }
 0x550   : > { %v7447_v11 = vrot.slane %v7733_v42, 11 }
 0x551   : > { %12725 = vst [vmem:[#allocation86_spill] sm:$0xff] %v11226_v36  ;;  %v5030_v52 = vpop.f32.mrf.mxu2  ;;  %v4578_v36 = vld [vmem:[#allocation2 + $0xf0] sm:$0xff] }
 0x552   : > { %v5031_v7 = vadd.f32 %v5030_v52, %v11086_v55  ;;  %v5187_v55 = vsel %vm10873_vm7, %v7447_v11, %v5186_v5 }
 0x553   : > { %v5481_v0 = vpop.f32.mrf.mxu0  ;;  %v4663_v60 = vpop.permute.xlu2 %4662 }
 0x554   : > { %v5334_v13 = vpop.f32.mrf.mxu3  ;;  %v4733_v4 = vadd.f32 %v4663_v60, %v4573_v32  ;;  %v5188_v32 = vrot.slane %v5186_v5, 4  ;;  %v7734_v60 = vld [vmem:[%s7958_s17 + $0x98] sm:$0x7]  ;;  %v4572_v5 = vld [vmem:[#allocation2 + $0xc0] sm:$0xff] }
 0x555   : > { %v5407_v15 = vadd.f32 %v5334_v13, %v5028_v35  ;;  %v5189_v13 = vrot.slane %v7734_v60, 7  ;;  %v5238_v60 = vunpack.c.l.b16 %v5187_v55 }
 0x556   : > { %7492 = vmatmul.msk.bf16.gmra.mxu0 %vm871_vm4, %v11230_v61  ;;  %4766 = vst.msk [vmem:[#allocation2 + $0xc8] sm:$0xff] %vm4740_vm5, %v4733_v4  ;;  %v4571_v4 = vld [vmem:[#allocation2 + $0xb8] sm:$0xff] }
 0x557   : > { %v11240_v46 = vadd.f32 %v5478_v1, %v5407_v15  ;;  %v11245_v30 = vpop.f32.mrf.mxu1  ;;  %v5190_v52 = vsel %vm10873_vm7, %v5188_v32, %v5189_v13 }
 0x559   : > { %12726 = vst [vmem:[#allocation89_spill] sm:$0xff] %v11240_v46  ;;  %7463 = vmatmul.msk.bf16.gmra.mxu3 %vm871_vm4, %v11234_v19  ;;  %v5032_v35 = vpop.f32.mrf.mxu2 }
 0x55a   : > { %7501 = vmatmul.msk.bf16.vlgmr.msra.gmra.mxu1 %vm871_vm4, %v10979_v37  ;;  %v11262_v37 = vld [vmem:[%s7958_s17 + $0xb4] sm:$0xff] }
 0x55b   : > { %v5483_v40 = vpop.f32.mrf.mxu0  ;;  %v4659_v16 = vpop.permute.xlu1 %4658 }
 0x55c   : > { %v5337_v2 = vpop.f32.mrf.mxu3  ;;  %v4731_v1 = vadd.f32 %v4659_v16, %v4571_v4  ;;  %v5033_v16 = vadd.f32 %v5032_v35, %v11105_v26  ;;  %v5239_v4 = vunpack.c.l.b16 %v5190_v52  ;;  %v7735_v26 = vld [vmem:[%s7958_s17 + $0xa0] sm:$0xf] }
 0x55d   : > { %v5408_v15 = vadd.f32 %v5337_v2, %v5031_v7  ;;  %v5193_v35 = vrot.slane %v7735_v26, 7 }
 0x55e   : > { %4764 = vst.msk [vmem:[#allocation2 + $0xb8] sm:$0xff] %vm4740_vm5, %v4731_v1  ;;  %7431 = vmatmul.msk.bf16.gmra.mxu2 %vm871_vm4, %v11166_v38 }
 0x55f   : > { %v11258_v42 = vadd.f32 %v5481_v0, %v5408_v15  ;;  %v11264_v7 = vpop.f32.mrf.mxu1  ;;  %v11266_v0 = vpack.c.b16 %v5239_v4, %v5238_v60  ;;  %v7736_v60 = vld [vmem:[%s7958_s17 + $0x9c] sm:$0xf] }
 0x560   : > { %v7448_v4 = vrot.slane %v7736_v60, 11 }
 0x561   : > { %12727 = vst [vmem:[#allocation88_spill] sm:$0xff] %v11258_v42  ;;  %v5035_v1 = vpop.f32.mrf.mxu2 }
 0x562   : > { %v5036_v55 = vadd.f32 %v5035_v1, %v11118_v28  ;;  %v5194_v28 = vsel %vm10873_vm7, %v7448_v4, %v5193_v35 }
 0x563   : > { %v5486_v2 = vpop.f32.mrf.mxu0  ;;  %v4661_v11 = vpop.permute.xlu0 %4660 }
 0x564   : > { %v5339_v32 = vpop.f32.mrf.mxu3  ;;  %v4732_v13 = vadd.f32 %v4661_v11, %v4572_v5  ;;  %v5195_v11 = vrot.slane %v5193_v35, 4  ;;  %v4574_v35 = vld [vmem:[#allocation2 + $0xd0] sm:$0xff] }
 0x565   : > { %v5409_v21 = vadd.f32 %v5339_v32, %v5033_v16  ;;  %v7737_v32 = vld [vmem:[%s7958_s17 + $0xa4] sm:$0x7] }
 0x566   : > { %7493 = vmatmul.msk.bf16.gmra.mxu0 %vm871_vm4, %v11262_v37  ;;  %4765 = vst.msk [vmem:[#allocation2 + $0xc0] sm:$0xff] %vm4740_vm5, %v4732_v13  ;;  %v5196_v44 = vrot.slane %v7737_v32, 7  ;;  %v4576_v13 = vld [vmem:[#allocation2 + $0xe0] sm:$0xff]  ;;  %v5240_v32 = vunpack.c.l.b16 %v5194_v28 }
 0x567   : > { %v11272_v15 = vadd.f32 %v5483_v40, %v5409_v21  ;;  %v11277_v52 = vpop.f32.mrf.mxu1 }
 0x568   : > { %v5197_v1 = vsel %vm10873_vm7, %v5195_v11, %v5196_v44 }
 0x569   : > { %12728 = vst [vmem:[#allocation57_spill] sm:$0xff] %v11272_v15  ;;  %7464 = vmatmul.msk.bf16.gmra.mxu3 %vm871_vm4, %v11266_v0  ;;  %v5037_v16 = vpop.f32.mrf.mxu2 }
 0x56a   : > { %7502 = vmatmul.msk.bf16.gmra.mxu1 %vm871_vm4, %v11011_v63  ;;  %v11294_v63 = vld [vmem:[%s7958_s17 + $0xc0] sm:$0xff] }
 0x56b   : > { %v5488_v5 = vpop.f32.mrf.mxu0  ;;  %v4669_v42 = vpop.permute.xlu2 %4668  ;;  %12730 = vst [vmem:[#allocation115_spill] sm:$0xff] %v11294_v63 }
 0x56c   : > { %v5342_v26 = vpop.f32.mrf.mxu3  ;;  %v4736_v21 = vadd.f32 %v4669_v42, %v4576_v13  ;;  %v5038_v42 = vadd.f32 %v5037_v16, %v11137_v41  ;;  %v5241_v13 = vunpack.c.l.b16 %v5197_v1  ;;  %v7738_v41 = vld [vmem:[%s7958_s17 + $0xac] sm:$0xf] }
 0x56d   : > { %v5410_v40 = vadd.f32 %v5342_v26, %v5036_v55  ;;  %v5200_v16 = vrot.slane %v7738_v41, 7 }
 0x56e   : > { %4769 = vst.msk [vmem:[#allocation2 + $0xe0] sm:$0xff] %vm4740_vm5, %v4736_v21  ;;  %7432 = vmatmul.msk.bf16.gmra.mxu2 %vm871_vm4, %v11199_v57 }
 0x56f   : > { %v11288_v60 = vadd.f32 %v5486_v2, %v5410_v40  ;;  %v11296_v55 = vpop.f32.mrf.mxu1  ;;  %v11298_v40 = vpack.c.b16 %v5241_v13, %v5240_v32  ;;  %v7739_v32 = vld [vmem:[%s7958_s17 + $0xa8] sm:$0xf] }
 0x570   : > { %v7449_v13 = vrot.slane %v7739_v32, 11 }
 0x571   : > { %12729 = vst [vmem:[#allocation90_spill] sm:$0xff] %v11288_v60  ;;  %v5040_v21 = vpop.f32.mrf.mxu2 }
 0x572   : > { %v5041_v1 = vadd.f32 %v5040_v21, %v11149_v43  ;;  %v5201_v43 = vsel %vm10873_vm7, %v7449_v13, %v5200_v16 }
 0x573   : > { %v5491_v26 = vpop.f32.mrf.mxu0  ;;  %v4665_v4 = vpop.permute.xlu1 %4664 }
 0x574   : > { %v5344_v44 = vpop.f32.mrf.mxu3  ;;  %v4734_v2 = vadd.f32 %v4665_v4, %v4574_v35  ;;  %v5202_v4 = vrot.slane %v5200_v16, 4  ;;  %v4579_v16 = vld [vmem:[#allocation2 + $0xf8] sm:$0xff] }
 0x575   : > { %v5411_v11 = vadd.f32 %v5344_v44, %v5038_v42  ;;  %v7740_v44 = vld [vmem:[%s7958_s17 + $0xb0] sm:$0x7] }
 0x576   : > { %7494 = vmatmul.msk.bf16.gmra.mxu0 %vm871_vm4, %v11294_v63  ;;  %4767 = vst.msk [vmem:[#allocation2 + $0xd0] sm:$0xff] %vm4740_vm5, %v4734_v2  ;;  %v5203_v15 = vrot.slane %v7740_v44, 7  ;;  %v4575_v2 = vld [vmem:[#allocation2 + $0xd8] sm:$0xff]  ;;  %v5242_v44 = vunpack.c.l.b16 %v5201_v43 }
 0x577   : > { %v11304_v28 = vadd.f32 %v5488_v5, %v5411_v11  ;;  %v11309_v60 = vpop.f32.mrf.mxu1 }
 0x578   : > { %v5204_v21 = vsel %vm10873_vm7, %v5202_v4, %v5203_v15 }
 0x579   : > { %12731 = vst [vmem:[#allocation117_spill] sm:$0xff] %v11304_v28  ;;  %7465 = vmatmul.msk.bf16.gmra.mxu3 %vm871_vm4, %v11298_v40  ;;  %v5042_v42 = vpop.f32.mrf.mxu2 }
 0x57a   : > { %7503 = vmatmul.msk.bf16.gmra.mxu1 %vm871_vm4, %v11043_v29  ;;  %v11326_v29 = vld [vmem:[%s7958_s17 + $0xcc] sm:$0xff] }
 0x57b   : > { %v5493_v35 = vpop.f32.mrf.mxu0  ;;  %v4667_v46 = vpop.permute.xlu0 %4666  ;;  %12733 = vst [vmem:[#allocation118_spill] sm:$0xff] %v11326_v29 }
 0x57c   : > { %v5347_v41 = vpop.f32.mrf.mxu3  ;;  %v4735_v5 = vadd.f32 %v4667_v46, %v4575_v2  ;;  %v5043_v46 = vadd.f32 %v5042_v42, %v11168_v27  ;;  %v5243_v2 = vunpack.c.l.b16 %v5204_v21  ;;  %v7741_v27 = vld [vmem:[%s7958_s17 + $0xb8] sm:$0xf] }
 0x57d   : > { %v5412_v11 = vadd.f32 %v5347_v41, %v5041_v1  ;;  %v5207_v42 = vrot.slane %v7741_v27, 7 }
 0x57e   : > { %4768 = vst.msk [vmem:[#allocation2 + $0xd8] sm:$0xff] %vm4740_vm5, %v4735_v5  ;;  %7433 = vmatmul.msk.bf16.gmra.mxu2 %vm871_vm4, %v11230_v61 }
 0x57f   : > { %v11322_v32 = vadd.f32 %v5491_v26, %v5412_v11  ;;  %v11328_v1 = vpop.f32.mrf.mxu1  ;;  %v11330_v26 = vpack.c.b16 %v5243_v2, %v5242_v44  ;;  %v7742_v44 = vld [vmem:[%s7958_s17 + $0xb4] sm:$0xf] }
 0x580   : > { %v7450_v2 = vrot.slane %v7742_v44, 11 }
 0x581   : > { %12732 = vst [vmem:[#allocation119_spill] sm:$0xff] %v11322_v32  ;;  %v5045_v5 = vpop.f32.mrf.mxu2 }
 0x582   : > { %v5046_v43 = vadd.f32 %v5045_v5, %v11181_v24  ;;  %v5208_v24 = vsel %vm10873_vm7, %v7450_v2, %v5207_v42 }
 0x583   : > { %v5496_v41 = vpop.f32.mrf.mxu0  ;;  %v4675_v13 = vpop.permute.xlu2 %4674 }
 0x584   : > { %v5349_v15 = vpop.f32.mrf.mxu3  ;;  %v4739_v4 = vadd.f32 %v4675_v13, %v4579_v16  ;;  %v5209_v13 = vrot.slane %v5207_v42, 4 }
 0x585   : > { %v5413_v28 = vadd.f32 %v5349_v15, %v5043_v46  ;;  %v7743_v15 = vld [vmem:[%s7958_s17 + $0xbc] sm:$0x7] }
 0x586   : > { %7495 = vmatmul.msk.bf16.gmra.mxu0 %vm871_vm4, %v11326_v29  ;;  %4772 = vst.msk [vmem:[#allocation2 + $0xf8] sm:$0xff] %vm4740_vm5, %v4739_v4  ;;  %v5210_v32 = vrot.slane %v7743_v15, 7  ;;  %v4577_v4 = vld [vmem:[#allocation2 + $0xe8] sm:$0xff] }
 0x587   : > { %v11336_v11 = vadd.f32 %v5493_v35, %v5413_v28  ;;  %v11341_v21 = vpop.f32.mrf.mxu1 }
 0x588   : > { %v5211_v5 = vsel %vm10873_vm7, %v5209_v13, %v5210_v32 }
 0x589   : > { %12734 = vst [vmem:[#allocation82_spill] sm:$0xff] %v11336_v11  ;;  %7466 = vmatmul.msk.bf16.gmra.mxu3 %vm871_vm4, %v11330_v26  ;;  %v5047_v46 = vpop.f32.mrf.mxu2  ;;  %v11358_v11 = vld [vmem:[%s7958_s17 + $0xd8] sm:$0xff] }
 0x58a   : > { %7504 = vmatmul.msk.bf16.gmra.mxu1 %vm871_vm4, %v11075_v34  ;;  %v5048_v15 = vadd.f32 %v5047_v46, %v11201_v58 }
 0x58b   : > { %v5498_v16 = vpop.f32.mrf.mxu0  ;;  %v4671_v29 = vpop.permute.xlu1 %4670 }
 0x58c   : > { %v5352_v27 = vpop.f32.mrf.mxu3  ;;  %v4737_v28 = vadd.f32 %v4671_v29, %v4577_v4  ;;  %v5244_v29 = vunpack.c.l.b16 %v5208_v24  ;;  %v5245_v4 = vunpack.c.l.b16 %v5211_v5 }
 0x58d   : > { %v5414_v35 = vadd.f32 %v5352_v27, %v5046_v43 }
 0x58e   : > { %4770 = vst.msk [vmem:[#allocation2 + $0xe8] sm:$0xff] %vm4740_vm5, %v4737_v28  ;;  %7434 = vmatmul.msk.bf16.gmra.mxu2 %vm871_vm4, %v11262_v37  ;;  %v11362_v13 = vpack.c.b16 %v5245_v4, %v5244_v29 }
 0x58f   : > { %v11354_v44 = vadd.f32 %v5496_v41, %v5414_v35  ;;  %v11360_v43 = vpop.f32.mrf.mxu1 }
 0x591   : > { %v5050_v28 = vpop.f32.mrf.mxu2 }
 0x592   : > { %v5051_v41 = vadd.f32 %v5050_v28, %v11214_v17 }
 0x593   : > { %v5501_v27 = vpop.f32.mrf.mxu0  ;;  %v4673_v42 = vpop.permute.xlu0 %4672 }
 0x594   : > { %v5354_v2 = vpop.f32.mrf.mxu3  ;;  %v4738_v63 = vadd.f32 %v4673_v42, %v4578_v36 }
 0x595   : > { %v5415_v32 = vadd.f32 %v5354_v2, %v5048_v15 }
 0x596   : > { %7496 = vmatmul.msk.bf16.gmra.mxu0 %vm871_vm4, %v11358_v11  ;;  %4771 = vst.msk [vmem:[#allocation2 + $0xf0] sm:$0xff] %vm4740_vm5, %v4738_v63 }
 0x597   : > { %v11367_v58 = vadd.f32 %v5498_v16, %v5415_v32  ;;  %v11372_v46 = vpop.f32.mrf.mxu1 }
 0x599   : > { %7467 = vmatmul.msk.bf16.gmra.mxu3 %vm871_vm4, %v11362_v13  ;;  %v5052_v24 = vpop.f32.mrf.mxu2 }
 0x59a   : > { %7505 = vmatmul.msk.bf16.gmra.mxu1 %vm871_vm4, %v11107_v53  ;;  %v5053_v16 = vadd.f32 %v5052_v24, %v11232_v25 }
 0x59b   : > { %v5503_v35 = vpop.f32.mrf.mxu0 }
 0x59c   : > { %v5357_v36 = vpop.f32.mrf.mxu3 }
 0x59d   : > { %v5416_v5 = vadd.f32 %v5357_v36, %v5051_v41 }
 0x59e   : > { %7530 = vmatmul.msk.bf16.vlgmr.msra.gmra.mxu2 %vm871_vm4, %v10975_v59 }
 0x59f   : > { %v11378_v63 = vadd.f32 %v5501_v27, %v5416_v5  ;;  %v11381_v15 = vpop.f32.mrf.mxu1 }
 0x5a1   : > { %v5055_v17 = vpop.f32.mrf.mxu2 }
 0x5a2   : > { %v5056_v59 = vadd.f32 %v5055_v17, %v11245_v30 }
 0x5a3   : > { %v5506_v29 = vpop.f32.mrf.mxu0 }
 0x5a4   : > { %v5359_v4 = vpop.f32.mrf.mxu3 }
 0x5a5   : > { %v5417_v28 = vadd.f32 %v5359_v4, %v5053_v16 }
 0x5a6   : > { %7567 = vmatmul.msk.bf16.vlgmr.msra.gmra.mxu0 %vm871_vm4, %v11075_v34 }
 0x5a7   : > { %v11385_v42 = vadd.f32 %v5503_v35, %v5417_v28  ;;  %v11390_v27 = vpop.f32.mrf.mxu1 }
 0x5a9   : > { %7547 = vmatmul.msk.bf16.vlgmr.msra.gmra.mxu3 %vm871_vm4, %v8551_v47  ;;  %v5057_v25 = vpop.f32.mrf.mxu2 }
 0x5aa   : > { %7506 = vmatmul.msk.bf16.gmra.mxu1 %vm871_vm4, %v11139_v6  ;;  %v5058_v35 = vadd.f32 %v5057_v25, %v11264_v7 }
 0x5ab   : > { %v5508_v2 = vpop.f32.mrf.mxu0 }
 0x5ac   : > { %v5362_v32 = vpop.f32.mrf.mxu3 }
 0x5ad   : > { %v5418_v41 = vadd.f32 %v5362_v32, %v5056_v59 }
 0x5ae   : > { %7531 = vmatmul.msk.bf16.gmra.mxu2 %vm871_vm4, %v11007_v31 }
 0x5af   : > { %v11396_v34 = vadd.f32 %v5506_v29, %v5418_v41  ;;  %v11399_v36 = vpop.f32.mrf.mxu1 }
 0x5b1   : > { %v5060_v47 = vpop.f32.mrf.mxu2 }
 0x5b2   : > { %v5061_v31 = vadd.f32 %v5060_v47, %v11277_v52 }
 0x5b3   : > { %v5511_v24 = vpop.f32.mrf.mxu0 }
 0x5b4   : > { %v5364_v30 = vpop.f32.mrf.mxu3 }
 0x5b5   : > { %v5419_v5 = vadd.f32 %v5364_v30, %v5058_v35 }
 0x5b6   : > { %7568 = vmatmul.msk.bf16.gmra.mxu0 %vm871_vm4, %v11107_v53 }
 0x5b7   : > { %v11403_v16 = vadd.f32 %v5508_v2, %v5419_v5  ;;  %v11410_v28 = vpop.f32.mrf.mxu1 }
 0x5b9   : > { %7548 = vmatmul.msk.bf16.gmra.mxu3 %vm871_vm4, %v12645_v22  ;;  %v5062_v17 = vpop.f32.mrf.mxu2 }
 0x5ba   : > { %7507 = vmatmul.msk.bf16.gmra.mxu1 %vm871_vm4, %v11170_v54  ;;  %v5063_v59 = vadd.f32 %v5062_v17, %v11296_v55 }
 0x5bb   : > { %v5513_v29 = vpop.f32.mrf.mxu0 }
 0x5bc   : > { %v5367_v4 = vpop.f32.mrf.mxu3 }
 0x5bd   : > { %v5420_v7 = vadd.f32 %v5367_v4, %v5061_v31 }
 0x5be   : > { %7532 = vmatmul.msk.bf16.gmra.mxu2 %vm871_vm4, %v11039_v23 }
 0x5bf   : > { %v11414_v53 = vadd.f32 %v5511_v24, %v5420_v7  ;;  %v11419_v32 = vpop.f32.mrf.mxu1 }
 0x5c1   : > { %v5065_v22 = vpop.f32.mrf.mxu2 }
 0x5c2   : > { %v5066_v23 = vadd.f32 %v5065_v22, %v11309_v60 }
 0x5c3   : > { %v5516_v2 = vpop.f32.mrf.mxu0 }
 0x5c4   : > { %v5369_v25 = vpop.f32.mrf.mxu3 }
 0x5c5   : > { %v5421_v52 = vadd.f32 %v5369_v25, %v5063_v59 }
 0x5c6   : > { %7569 = vmatmul.msk.bf16.gmra.mxu0 %vm871_vm4, %v11139_v6 }
 0x5c7   : > { %v11421_v41 = vadd.f32 %v5513_v29, %v5421_v52  ;;  %v11433_v5 = vpop.f32.mrf.mxu1 }
 0x5c9   : > { %7549 = vmatmul.msk.bf16.gmra.mxu3 %vm871_vm4, %v12708_v18  ;;  %v5067_v24 = vpop.f32.mrf.mxu2 }
 0x5ca   : > { %7508 = vmatmul.msk.bf16.gmra.mxu1 %vm871_vm4, %v11203_v48  ;;  %v5068_v30 = vadd.f32 %v5067_v24, %v11328_v1 }
 0x5cb   : > { %v5518_v35 = vpop.f32.mrf.mxu0 }
 0x5cc   : > { %v5372_v47 = vpop.f32.mrf.mxu3 }
 0x5cd   : > { %v5422_v55 = vadd.f32 %v5372_v47, %v5066_v23 }
 0x5ce   : > { %7533 = vmatmul.msk.bf16.gmra.mxu2 %vm871_vm4, %v11071_v39 }
 0x5cf   : > { %v11430_v6 = vadd.f32 %v5516_v2, %v5422_v55  ;;  %v11442_v59 = vpop.f32.mrf.mxu1 }
 0x5d1   : > { %v5070_v18 = vpop.f32.mrf.mxu2 }
 0x5d2   : > { %v5071_v39 = vadd.f32 %v5070_v18, %v11341_v21 }
 0x5d3   : > { %v5521_v31 = vpop.f32.mrf.mxu0 }
 0x5d4   : > { %v5374_v29 = vpop.f32.mrf.mxu3 }
 0x5d5   : > { %v5423_v60 = vadd.f32 %v5374_v29, %v5068_v30 }
 0x5d6   : > { %7570 = vmatmul.msk.bf16.gmra.mxu0 %vm871_vm4, %v11170_v54 }
 0x5d7   : > { %v11437_v17 = vadd.f32 %v5518_v35, %v5423_v60  ;;  %v11451_v23 = vpop.f32.mrf.mxu1 }
 0x5d9   : > { %7550 = vmatmul.msk.bf16.gmra.mxu3 %vm871_vm4, %v12711_v62  ;;  %v5072_v7 = vpop.f32.mrf.mxu2 }
 0x5da   : > { %7509 = vmatmul.msk.bf16.gmra.mxu1 %vm871_vm4, %v11234_v19  ;;  %v5073_v22 = vadd.f32 %v5072_v7, %v11360_v43 }
 0x5db   : > { %v5523_v4 = vpop.f32.mrf.mxu0 }
 0x5dc   : > { %v5377_v1 = vpop.f32.mrf.mxu3 }
 0x5dd   : > { %v5424_v2 = vadd.f32 %v5377_v1, %v5071_v39 }
 0x5de   : > { %7534 = vmatmul.msk.bf16.gmra.mxu2 %vm871_vm4, %v11103_v51 }
 0x5df   : > { %v11448_v54 = vadd.f32 %v5521_v31, %v5424_v2  ;;  %v11462_v30 = vpop.f32.mrf.mxu1 }
 0x5e1   : > { %v5075_v62 = vpop.f32.mrf.mxu2 }
 0x5e2   : > { %v5076_v51 = vadd.f32 %v5075_v62, %v11372_v46 }
 0x5e3   : > { %v5526_v25 = vpop.f32.mrf.mxu0 }
 0x5e4   : > { %v5379_v52 = vpop.f32.mrf.mxu3 }
 0x5e5   : > { %v5425_v21 = vadd.f32 %v5379_v52, %v5073_v22 }
 0x5e6   : > { %7571 = vmatmul.msk.bf16.gmra.mxu0 %vm871_vm4, %v11203_v48 }
 0x5e7   : > { %v11455_v35 = vadd.f32 %v5523_v4, %v5425_v21  ;;  %v11473_v39 = vpop.f32.mrf.mxu1 }
 0x5e9   : > { %7551 = vmatmul.msk.bf16.gmra.mxu3 %vm871_vm4, %v12714_v49  ;;  %v5077_v47 = vpop.f32.mrf.mxu2 }
 0x5ea   : > { %7510 = vmatmul.msk.bf16.gmra.mxu1 %vm871_vm4, %v11266_v0  ;;  %v5078_v31 = vadd.f32 %v5077_v47, %v11381_v15 }
 0x5eb   : > { %v5528_v24 = vpop.f32.mrf.mxu0 }
 0x5ec   : > { %v5382_v55 = vpop.f32.mrf.mxu3 }
 0x5ed   : > { %v5426_v43 = vadd.f32 %v5382_v55, %v5076_v51 }
 0x5ee   : > { %7535 = vmatmul.msk.bf16.gmra.mxu2 %vm871_vm4, %v11135_v8 }
 0x5ef   : > { %v11466_v48 = vadd.f32 %v5526_v25, %v5426_v43  ;;  %v11485_v62 = vpop.f32.mrf.mxu1 }
 0x5f1   : > { %v5080_v49 = vpop.f32.mrf.mxu2 }
 0x5f2   : > { %v5081_v8 = vadd.f32 %v5080_v49, %v11390_v27  ;;  %v6823_v49 = vld [vmem:[%s11986_s3] sm:$0xf] }
 0x5f3   : > { %v5531_v18 = vpop.f32.mrf.mxu0  ;;  %7583 = vmatpush.msk.msrb.mxu1 %vm6827_vm8, %v6823_v49 }
 0x5f4   : > { %v5384_v29 = vpop.f32.mrf.mxu3 }
 0x5f5   : > { %v5427_v46 = vadd.f32 %v5384_v29, %v5078_v31  ;;  %v7744_v29 = vld [vmem:[%s7958_s17 + $0xc4] sm:$0xf] }
 0x5f6   : > { %7572 = vmatmul.msk.bf16.gmra.mxu0 %vm871_vm4, %v11234_v19 }
 0x5f7   : > { %v11471_v60 = vadd.f32 %v5528_v24, %v5427_v46  ;;  %v5580_v46 = vrot.slane %v7744_v29, 7 }
 0x5f9   : > { %7552 = vmatmul.msk.bf16.gmra.mxu3 %vm871_vm4, %v12717_v20  ;;  %v5082_v7 = vpop.f32.mrf.mxu2 }
 0x5fa   : > { %7511 = vmatmul.msk.bf16.gmra.mxu1 %vm871_vm4, %v11298_v40  ;;  %v5083_v2 = vadd.f32 %v5082_v7, %v11399_v36  ;;  %v11496_v36 = vpop.f32.mrf.mxu1 }
 0x5fb   : > { %v5533_v4 = vpop.f32.mrf.mxu0 }
 0x5fc   : > { %v5387_v1 = vpop.f32.mrf.mxu3 }
 0x5fd   : > { %v5428_v15 = vadd.f32 %v5387_v1, %v5081_v8  ;;  %v7745_v1 = vld [vmem:[%s7958_s17 + $0xc0] sm:$0xf] }
 0x5fe   : > { %7536 = vmatmul.msk.bf16.gmra.mxu2 %vm871_vm4, %v11166_v38 }
 0x5ff   : > { %v11482_v19 = vadd.f32 %v5531_v18, %v5428_v15  ;;  %v7497_v15 = vrot.slane %v7745_v1, 11 }
 0x601   : > { %v5085_v25 = vpop.f32.mrf.mxu2 }
 0x602   : > { %v5086_v38 = vadd.f32 %v5085_v25, %v11410_v28  ;;  %v11505_v18 = vpop.f32.mrf.mxu1 }
 0x603   : > { %v5536_v22 = vpop.f32.mrf.mxu0 }
 0x604   : > { %v5389_v20 = vpop.f32.mrf.mxu3 }
 0x605   : > { %v5429_v27 = vadd.f32 %v5389_v20, %v5083_v2  ;;  %v5582_v2 = vrot.slane %v5580_v46, 4 }
 0x606   : > { %7573 = vmatmul.msk.bf16.gmra.mxu0 %vm871_vm4, %v11266_v0 }
 0x607   : > { %v11489_v52 = vadd.f32 %v5533_v4, %v5429_v27  ;;  %v5581_v27 = vsel %vm10873_vm7, %v7497_v15, %v5580_v46 }
 0x609   : > { %7553 = vmatmul.msk.bf16.gmra.mxu3 %vm871_vm4, %v12720_v3  ;;  %v5087_v51 = vpop.f32.mrf.mxu2 }
 0x60a   : > { %7512 = vmatmul.msk.bf16.gmra.mxu1 %vm871_vm4, %v11330_v26  ;;  %v5088_v55 = vadd.f32 %v5087_v51, %v11419_v32 }
 0x60b   : > { %v5538_v21 = vpop.f32.mrf.mxu0 }
 0x60c   : > { %v5392_v24 = vpop.f32.mrf.mxu3 }
 0x60d   : > { %v5430_v47 = vadd.f32 %v5392_v24, %v5086_v38 }
 0x60e   : > { %7537 = vmatmul.msk.bf16.gmra.mxu2 %vm871_vm4, %v11199_v57 }
 0x60f   : > { %v11500_v0 = vadd.f32 %v5536_v22, %v5430_v47  ;;  %v7746_v22 = vld [vmem:[%s7958_s17 + $0xc8] sm:$0x7]  ;;  %v5601_v47 = vunpack.c.l.b16 %v5581_v27 }
 0x610   : > { %v5583_v25 = vrot.slane %v7746_v22, 7 }
 0x611   : > { %v5090_v43 = vpop.f32.mrf.mxu2 }
 0x612   : > { %v5091_v32 = vadd.f32 %v5090_v43, %v11433_v5  ;;  %v11524_v5 = vpop.f32.mrf.mxu1  ;;  %v5584_v38 = vsel %vm10873_vm7, %v5582_v2, %v5583_v25 }
 0x613   : > { %v5541_v3 = vpop.f32.mrf.mxu0 }
 0x614   : > { %v5394_v28 = vpop.f32.mrf.mxu3 }
 0x615   : > { %v5431_v31 = vadd.f32 %v5394_v28, %v5088_v55  ;;  %v5602_v55 = vunpack.c.l.b16 %v5584_v38 }
 0x616   : > { %7574 = vmatmul.msk.bf16.gmra.mxu0 %vm871_vm4, %v11298_v40 }
 0x617   : > { %v11510_v57 = vadd.f32 %v5538_v21, %v5431_v31  ;;  %v11537_v43 = vpack.c.b16 %v5602_v55, %v5601_v47  ;;  %v7747_v31 = vld [vmem:[%s7958_s17 + $0xd0] sm:$0xf]  ;;  %v7750_v55 = vld [vmem:[%s7958_s17 + $0xdc] sm:$0xf] }
 0x618   : > { %v5587_v49 = vrot.slane %v7747_v31, 7 }
 0x619   : > { %7554 = vmatmul.msk.bf16.gmra.mxu3 %vm871_vm4, %v12722_v10  ;;  %v5092_v40 = vpop.f32.mrf.mxu2 }
 0x61a   : > { %7513 = vmatmul.msk.bf16.gmra.mxu1 %vm871_vm4, %v11362_v13  ;;  %v5093_v20 = vadd.f32 %v5092_v40, %v11442_v59  ;;  %v11542_v46 = vpop.f32.mrf.mxu1 }
 0x61b   : > { %v5543_v8 = vpop.f32.mrf.mxu0 }
 0x61c   : > { %v5397_v4 = vpop.f32.mrf.mxu3 }
 0x61d   : > { %v5432_v7 = vadd.f32 %v5397_v4, %v5091_v32  ;;  %v7749_v4 = vld [vmem:[%s7958_s17 + $0xd4] sm:$0x7] }
 0x61e   : > { %7538 = vmatmul.msk.bf16.gmra.mxu2 %vm871_vm4, %v11230_v61 }
 0x61f   : > { %v11522_v10 = vadd.f32 %v5541_v3, %v5432_v7  ;;  %v5711_v3 = vadd.f32 %v11451_v23, %v11162_v56  ;;  %v5590_v7 = vrot.slane %v7749_v4, 7 }
 0x621   : > { %v5779_v51 = vpop.f32.mrf.mxu2 }
 0x622   : > { %v5859_v28 = vadd.f32 %v5779_v51, %v5711_v3 }
 0x623   : > { %v6106_v21 = vpop.f32.mrf.mxu0 }
 0x624   : > { %v5399_v24 = vpop.f32.mrf.mxu3 }
 0x625   : > { %v5433_v61 = vadd.f32 %v5399_v24, %v5093_v20 }
 0x626   : > { %7575 = vmatmul.msk.bf16.gmra.mxu0 %vm871_vm4, %v11330_v26  ;;  %v7748_v26 = vld [vmem:[%s7958_s17 + $0xcc] sm:$0xf] }
 0x627   : > { %v11535_v59 = vadd.f32 %v5543_v8, %v5433_v61  ;;  %v7498_v23 = vrot.slane %v7748_v26, 11  ;;  %v5589_v8 = vrot.slane %v5587_v49, 4  ;;  %v5594_v61 = vrot.slane %v7750_v55, 7  ;;  %v12735_v26 = vld [vmem:[#allocation115_spill] sm:$0xff] }
 0x629   : > { %7555 = vmatmul.msk.bf16.gmra.mxu3 %vm871_vm4, %v12723_v12  ;;  %v5781_v29 = vpop.f32.mrf.mxu2  ;;  %v5712_v12 = vadd.f32 %v11462_v30, %v11176_v9  ;;  %v5588_v2 = vsel %vm10873_vm7, %v7498_v23, %v5587_v49  ;;  %v5591_v22 = vsel %vm10873_vm7, %v5589_v8, %v5590_v7  ;;  %v11557_v30 = vpop.f32.mrf.mxu1  ;;  %v7751_v49 = vld [vmem:[%s7958_s17 + $0xd8] sm:$0xf] }
 0x62a   : > { %7514 = vmatmul.msk.bf16.gmra.mxu1 %vm871_vm4, %v11537_v43  ;;  %v5603_v38 = vunpack.c.l.b16 %v5588_v2  ;;  %v5604_v9 = vunpack.c.l.b16 %v5591_v22  ;;  %v12736_v2 = vld [vmem:[#allocation86_spill] sm:$0xff] }
 0x62b   : > { %v6108_v32 = vpop.f32.mrf.mxu0  ;;  %v5860_v15 = vadd.f32 %v5781_v29, %v5712_v12  ;;  %v7499_v29 = vrot.slane %v7751_v49, 11  ;;  %v5715_v22 = vadd.f32 %v11496_v36, %v12736_v2 }
 0x62c   : > { %v5939_v40 = vpop.f32.mrf.mxu3  ;;  %v5608_v24 = vpack.c.b16 %v5604_v9, %v5603_v38  ;;  %v12737_v38 = vld [vmem:[#allocation91_spill] sm:$0xff] }
 0x62d   : > { %v6019_v56 = vadd.f32 %v5939_v40, %v5859_v28  ;;  %v5714_v40 = vadd.f32 %v11485_v62, %v11209_v33  ;;  %v5595_v8 = vsel %vm10873_vm7, %v7499_v29, %v5594_v61 }
 0x62e   : > { %7539 = vmatmul.msk.bf16.gmra.mxu2 %vm871_vm4, %v11262_v37 }
 0x62f   : > { %v6186_v1 = vadd.f32 %v6106_v21, %v6019_v56  ;;  %v5713_v21 = vadd.f32 %v11473_v39, %v11195_v14  ;;  %v5596_v14 = vrot.slane %v5594_v61, 4  ;;  %v7752_v39 = vld [vmem:[%s7958_s17 + $0xe0] sm:$0x7]  ;;  %v12739_v61 = vld [vmem:[#allocation118_spill] sm:$0xff] }
 0x631   : > { %6282 = vrot.lane.b32.xlu0 %v6186_v1, %s7857_s15  ;;  %v5784_v20 = vpop.f32.mrf.mxu2 }
 0x632   : > { %v5861_v47 = vadd.f32 %v5784_v20, %v5713_v21 }
 0x633   : > { %v6111_v25 = vpop.f32.mrf.mxu0 }
 0x634   : > { %v5941_v27 = vpop.f32.mrf.mxu3 }
 0x635   : > { %v6020_v37 = vadd.f32 %v5941_v27, %v5860_v15  ;;  %v5605_v15 = vunpack.c.l.b16 %v5595_v8 }
 0x636   : > { %7576 = vmatmul.msk.bf16.gmra.mxu0 %vm871_vm4, %v11362_v13 }
 0x637   : > { %v6187_v51 = vadd.f32 %v6108_v32, %v6020_v37  ;;  %v5597_v32 = vrot.slane %v7752_v39, 7 }
 0x639   : > { %7556 = vmatmul.msk.bf16.gmra.mxu3 %vm871_vm4, %v12724_v50  ;;  %6284 = vrot.lane.b32.xlu1 %v6187_v51, %s7857_s15  ;;  %v5786_v28 = vpop.f32.mrf.mxu2  ;;  %v11572_v50 = vpop.f32.mrf.mxu1  ;;  %v5598_v4 = vsel %vm10873_vm7, %v5596_v14, %v5597_v32  ;;  %v12740_v14 = vld [vmem:[#allocation88_spill] sm:$0xff] }
 0x63a   : > { %7515 = vmatmul.msk.bf16.gmra.mxu1 %vm871_vm4, %v5608_v24  ;;  %v5862_v23 = vadd.f32 %v5786_v28, %v5714_v40  ;;  %v5606_v33 = vunpack.c.l.b16 %v5598_v4  ;;  %v5717_v39 = vadd.f32 %v11524_v5, %v12740_v14  ;;  %v12745_v14 = vld [vmem:[#allocation117_spill] sm:$0xff] }
 0x63b   : > { %v6113_v3 = vpop.f32.mrf.mxu0 }
 0x63c   : > { %v5944_v31 = vpop.f32.mrf.mxu3  ;;  %v5609_v20 = vpack.c.b16 %v5606_v33, %v5605_v15  ;;  %v7753_v33 = vld [vmem:[%s7958_s17 + $0xe8] sm:$0xf] }
 0x63d   : > { %v6021_v13 = vadd.f32 %v5944_v31, %v5861_v47 }
 0x63e   : > { %7540 = vmatmul.msk.bf16.gmra.mxu2 %vm871_vm4, %v12735_v26 }
 0x63f   : > { %v6188_v56 = vadd.f32 %v6111_v25, %v6021_v13 }
 0x641   : > { %6286 = vrot.lane.b32.xlu2 %v6188_v56, %s7857_s15  ;;  %v5789_v12 = vpop.f32.mrf.mxu2  ;;  %v11585_v27 = vpop.f32.mrf.mxu1 }
 0x642   : > { %v5863_v9 = vadd.f32 %v5789_v12, %v5715_v22 }
 0x643   : > { %v6116_v7 = vpop.f32.mrf.mxu0 }
 0x644   : > { %v5946_v1 = vpop.f32.mrf.mxu3 }
 0x645   : > { %v6022_v62 = vadd.f32 %v5946_v1, %v5862_v23 }
 0x646   : > { %7577 = vmatmul.msk.bf16.gmra.mxu0 %vm871_vm4, %v11537_v43  ;;  %v12738_v43 = vld [vmem:[#allocation89_spill] sm:$0xff] }
 0x647   : > { %v6189_v25 = vadd.f32 %v6113_v3, %v6022_v62  ;;  %v5716_v55 = vadd.f32 %v11505_v18, %v12738_v43  ;;  %v12741_v18 = vld [vmem:[#allocation116_spill] sm:$0xff]  ;;  %v6055_v62 = vrot.slane %v7753_v33, 7  ;;  %v12744_v43 = vld [vmem:[#allocation129_spill] sm:$0xff] }
 0x649   : > { %7557 = vmatmul.msk.bf16.gmra.mxu3 %vm871_vm4, %v12737_v38  ;;  %6288 = vrot.lane.b32.xlu0 %v6189_v25, %s7857_s15  ;;  %v5791_v21 = vpop.f32.mrf.mxu2  ;;  %v11596_v13 = vpop.f32.mrf.mxu1  ;;  %v7754_v25 = vld [vmem:[%s7958_s17 + $0xe4] sm:$0xf] }
 0x64a   : > { %7516 = vmatmul.msk.bf16.gmra.mxu1 %vm871_vm4, %v5609_v20  ;;  %v5864_v3 = vadd.f32 %v5791_v21, %v5716_v55  ;;  %v7563_v38 = vrot.slane %v7754_v25, 11  ;;  %v12743_v21 = vld [vmem:[#allocation90_spill] sm:$0xff]  ;;  %v12747_v25 = vld [vmem:[#allocation136_spill] sm:$0xff] }
 0x64b   : > { %v6118_v37 = vpop.f32.mrf.mxu0 }
 0x64c   : > { %v5949_v51 = vpop.f32.mrf.mxu3 }
 0x64d   : > { %v6023_v47 = vadd.f32 %v5949_v51, %v5863_v9  ;;  %v6057_v9 = vrot.slane %v6055_v62, 4 }
 0x64e   : > { %7541 = vmatmul.msk.bf16.gmra.mxu2 %vm871_vm4, %v12739_v61  ;;  %v6056_v61 = vsel %vm10873_vm7, %v7563_v38, %v6055_v62  ;;  %v12746_v62 = vld [vmem:[#allocation119_spill] sm:$0xff] }
 0x64f   : > { %v6190_v36 = vadd.f32 %v6116_v7, %v6023_v47  ;;  %v12742_v7 = vld [vmem:[#allocation57_spill] sm:$0xff] }
 0x651   : > { %6290 = vrot.lane.b32.xlu1 %v6190_v36, %s7857_s15  ;;  %v5794_v31 = vpop.f32.mrf.mxu2  ;;  %v11604_v8 = vpop.f32.mrf.mxu1 }
 0x652   : > { %v5865_v40 = vadd.f32 %v5794_v31, %v5717_v39  ;;  %v5720_v39 = vadd.f32 %v11572_v50, %v12745_v14  ;;  %v7757_v50 = vld [vmem:[%s7958_s17 + $0xf0] sm:$0xf] }
 0x653   : > { %v6121_v28 = vpop.f32.mrf.mxu0 }
 0x654   : > { %v5951_v49 = vpop.f32.mrf.mxu3 }
 0x655   : > { %v6024_v29 = vadd.f32 %v5951_v49, %v5864_v3  ;;  %v6076_v49 = vunpack.c.l.b16 %v6056_v61 }
 0x656   : > { %7578 = vmatmul.msk.bf16.gmra.mxu0 %vm871_vm4, %v5608_v24  ;;  %v5718_v24 = vadd.f32 %v11542_v46, %v12742_v7  ;;  %v7755_v46 = vld [vmem:[%s7958_s17 + $0xec] sm:$0x7] }
 0x657   : > { %v6191_v32 = vadd.f32 %v6118_v37, %v6024_v29  ;;  %v6058_v37 = vrot.slane %v7755_v46, 7 }
 0x659   : > { %7558 = vmatmul.msk.bf16.gmra.mxu3 %vm871_vm4, %v12741_v18  ;;  %6292 = vrot.lane.b32.xlu2 %v6191_v32, %s7857_s15  ;;  %v5796_v26 = vpop.f32.mrf.mxu2  ;;  %v11617_v51 = vpop.f32.mrf.mxu1  ;;  %v6059_v3 = vsel %vm10873_vm7, %v6057_v9, %v6058_v37  ;;  %v336_v37 = vld [vmem:[%s7958_s17 + $0xfc] sm:$0xf] }
 0x65a   : > { %v5866_v12 = vadd.f32 %v5796_v26, %v5718_v24  ;;  %v6077_v29 = vunpack.c.l.b16 %v6059_v3  ;;  %v7756_v26 = vld [vmem:[%s7958_s17 + $0xf4] sm:$0xf]  ;;  %v5892_v61 = vshrl.u32 %v336_v37, 16  ;;  %v5895_v3 = vshll.u32 %v336_v37, 16 }
 0x65b   : > { %v6123_v56 = vpop.f32.mrf.mxu0 }
 0x65c   : > { %v5954_v23 = vpop.f32.mrf.mxu3 }
 0x65d   : > { %v6025_v4 = vadd.f32 %v5954_v23, %v5865_v40  ;;  %v6062_v23 = vrot.slane %v7756_v26, 7 }
 0x65e   : > { %7542 = vmatmul.msk.bf16.gmra.mxu2 %vm871_vm4, %v11358_v11  ;;  %v5719_v11 = vadd.f32 %v11557_v30, %v12743_v21 }
 0x65f   : > { %v6192_v5 = vadd.f32 %v6121_v28, %v6025_v4  ;;  %v7609_v28 = vld [vmem:[%s7958_s17 + $0xe4] sm:$0xff] }
 0x661   : > { %6294 = vrot.lane.b32.xlu0 %v6192_v5, %s7857_s15  ;;  %v5799_v15 = vpop.f32.mrf.mxu2  ;;  %v11630_v18 = vpop.f32.mrf.mxu1 }
 0x662   : > { %v5867_v55 = vadd.f32 %v5799_v15, %v5719_v11  ;;  %v7758_v15 = vld [vmem:[%s7958_s17 + $0xf8] sm:$0x7] }
 0x663   : > { %v6126_v1 = vpop.f32.mrf.mxu0  ;;  %v6065_v33 = vrot.slane %v7758_v15, 7 }
 0x664   : > { %v5956_v2 = vpop.f32.mrf.mxu3 }
 0x665   : > { %v6026_v22 = vadd.f32 %v5956_v2, %v5866_v12  ;;  %v7564_v12 = vrot.slane %v7757_v50, 11  ;;  %v5721_v2 = vadd.f32 %v11585_v27, %v12746_v62  ;;  %v7610_v27 = vld [vmem:[%s7958_s17 + $0xf0] sm:$0xff] }
 0x666   : > { %7579 = vmatmul.msk.bf16.gmra.mxu0 %vm871_vm4, %v5609_v20 }
 0x667   : > { %v6193_v47 = vadd.f32 %v6123_v56, %v6026_v22  ;;  %v6082_v56 = vpack.c.b16 %v6077_v29, %v6076_v49  ;;  %v6063_v9 = vsel %vm10873_vm7, %v7564_v12, %v6062_v23  ;;  %v338_v49 = vld [vmem:[%s7958_s17 + $0x104] sm:$0x7]  ;;  %v12748_v29 = vld [vmem:[#allocation82_spill] sm:$0xff] }
 0x668   : > { %v5722_v14 = vadd.f32 %v11596_v13, %v12748_v29  ;;  %v5914_v12 = vshll.u32 %v338_v49, 16 }
 0x669   : > { %7559 = vmatmul.msk.bf16.gmra.mxu3 %vm871_vm4, %v12744_v43  ;;  %6296 = vrot.lane.b32.xlu1 %v6193_v47, %s7857_s15  ;;  %v5801_v20 = vpop.f32.mrf.mxu2  ;;  %v337_v47 = vld [vmem:[%s7958_s17 + $0x100] sm:$0xf]  ;;  %v11648_v43 = vpop.f32.mrf.mxu1 }
 0x66a   : > { %v5868_v40 = vadd.f32 %v5801_v20, %v5720_v39 }
 0x66b   : > { %v6128_v36 = vpop.f32.mrf.mxu0 }
 0x66c   : > { %v5959_v30 = vpop.f32.mrf.mxu3 }
 0x66d   : > { %v6027_v31 = vadd.f32 %v5959_v30, %v5867_v55  ;;  %v5901_v30 = vshrl.u32 %v337_v47, 16 }
 0x66e   : > { %7543 = vmatmul.msk.bf16.gmra.mxu2 %vm871_vm4, %v7609_v28 }
 0x66f   : > { %v6194_v32 = vadd.f32 %v6126_v1, %v6027_v31  ;;  %v6064_v1 = vrot.slane %v6062_v23, 4  ;;  %v5904_v31 = vshll.u32 %v337_v47, 16  ;;  %v5903_v23 = vrot.slane %v5901_v30, 5  ;;  %v7611_v30 = vld [vmem:[%s7958_s17 + $0xfc] sm:$0xff]  ;;  %s7589_s17 = sshll.u32 %s7951_s13, 7  ;;  %s11885_s13 = sand.u32 1, %s7845_s22  }
 0x670   : > { %s11696_s19 = scalar_lea.vmem %s11987_s4, %s7589_s17  ;;  %s261_s29 = scalar_lea.vmem [#allocation5], %s11885_s13 }
 0x671   : > { %6298 = vrot.lane.b32.xlu2 %v6194_v32, %s7857_s15  ;;  %v5804_v7 = vpop.f32.mrf.mxu2  ;;  %v6066_v46 = vsel %vm10873_vm7, %v6064_v1, %v6065_v33  ;;  %v6069_v1 = vrot.slane %v337_v47, 7  ;;  %v11656_v33 = vpop.f32.mrf.mxu1  ;;  %s11902_s9 = sshll.u32 %s261_s29, 4  ;;  %s6864_s11 = scalar_lea.sflag [#allocation6], %s11885_s13  ;;  %s6892_s9 = int_to_ptr.vmem [resolvable:$true] %s11902_s9 }
 0x672   : > { %v5869_v38 = vadd.f32 %v5804_v7, %v5721_v2  ;;  %v6079_v20 = vunpack.c.l.b16 %v6066_v46  ;;  %v5906_v7 = vrot.slane %v5904_v31, 6  ;;  %v5723_v46 = vadd.f32 %v11604_v8, %v11354_v44 }
 0x673   : > { %v6131_v4 = vpop.f32.mrf.mxu0 }
 0x674   : > { %v5961_v24 = vpop.f32.mrf.mxu3  ;;  %v5907_v62 = vor.u32 %v5906_v7, %v5903_v23 }
 0x675   : > { %v6028_v5 = vadd.f32 %v5961_v24, %v5868_v40  ;;  %v5894_v40 = vrot.slane %v5892_v61, 5  ;;  %v5911_v24 = vshrl.u32 %v338_v49, 16 }
 0x676   : > { %7580 = vmatmul.msk.bf16.gmra.mxu0 %vm871_vm4, %v6082_v56  ;;  %v5897_v56 = vrot.slane %v5895_v3, 6  ;;  %v5909_v61 = vrot.slane %v5907_v62, 4 }
 0x677   : > { %v6195_v22 = vadd.f32 %v6128_v36, %v6028_v5  ;;  %v6078_v36 = vunpack.c.l.b16 %v6063_v9  ;;  %v5913_v2 = vrot.slane %v5911_v24, 5  ;;  %v6072_v9 = vrot.slane %v338_v49, 7 }
 0x679   : > { %7560 = vmatmul.msk.bf16.gmra.mxu3 %vm871_vm4, %v12747_v25  ;;  %6300 = vrot.lane.b32.xlu0 %v6195_v22, %s7857_s15  ;;  %v5806_v11 = vpop.f32.mrf.mxu2  ;;  %v6083_v32 = vpack.c.b16 %v6079_v20, %v6078_v36  ;;  %v5916_v22 = vrot.slane %v5914_v12, 6  ;;  %v7565_v25 = vrot.slane %v336_v37, 11 }
 0x67a   : > { %v5870_v26 = vadd.f32 %v5806_v11, %v5722_v14 }
 0x67b   : > { %v6133_v21 = vpop.f32.mrf.mxu0  ;;  %v5917_v3 = vor.u32 %v5916_v22, %v5913_v2  ;;  %v6070_v37 = vsel %vm10873_vm7, %v7565_v25, %v6069_v1 }
 0x67c   : > { %v5964_v55 = vpop.f32.mrf.mxu3 }
 0x67d   : > { %v6029_v28 = vadd.f32 %v5964_v55, %v5869_v38  ;;  %v6071_v38 = vrot.slane %v6069_v1, 4  ;;  %v5918_v14 = vsel %vm8000_vm3, %v5909_v61, %v5917_v3  ;;  %v5727_v3 = vadd.f32 %v11656_v33, %v11396_v34 }
 0x67e   : > { %7544 = vmatmul.msk.bf16.gmra.mxu2 %vm871_vm4, %v7610_v27  ;;  %v12749_v27 = vld [vmem:[#allocation85_spill] sm:$0xff] }
 0x67f   : > { %v6196_v39 = vadd.f32 %v6131_v4, %v6029_v28  ;;  %v5898_v4 = vor.u32 %v5897_v56, %v5894_v40  ;;  %v6073_v28 = vsel %vm10873_vm7, %v6071_v38, %v6072_v9 }
 0x680   : > { %v6081_v31 = vunpack.c.l.b16 %v6073_v28 }
 0x681   : > { %6302 = vrot.lane.b32.xlu1 %v6196_v39, %s7857_s15  ;;  %v5809_v50 = vpop.f32.mrf.mxu2  ;;  %v5899_v55 = vrot.slane %v5898_v4, 4  ;;  %v5724_v39 = vadd.f32 %v11617_v51, %v11367_v58  ;;  %v5725_v58 = vadd.f32 %v11630_v18, %v11378_v63  ;;  %v5726_v63 = vadd.f32 %v11648_v43, %v11385_v42 }
 0x682   : > { %v5871_v47 = vadd.f32 %v5809_v50, %v5723_v46 }
 0x683   : > { %v6136_v5 = vpop.f32.mrf.mxu0  ;;  %v5908_v29 = vsel %vm8000_vm3, %v5899_v55, %v5907_v62  ;;  %v6220_v62 = vld [vmem:[#allocation2 + $0x10] sm:$0xff]  ;;  %vm6410_vm3 = vcmask 261312  }
 0x684   : > { %v5966_v15 = vpop.f32.mrf.mxu3  ;;  %v5921_v56 = vunpack.c.l.b16 %v5908_v29 }
 0x685   : > { %v6030_v13 = vadd.f32 %v5966_v15, %v5870_v26  ;;  %v5922_v26 = vunpack.c.l.b16 %v5918_v14 }
 0x686   : > { %7581 = vmatmul.msk.bf16.gmra.mxu0 %vm871_vm4, %v6083_v32  ;;  %v11675_v32 = vpop.f32.mrf.mxu1 }
 0x687   : > { %v6197_v11 = vadd.f32 %v6133_v21, %v6030_v13  ;;  %v6080_v21 = vunpack.c.l.b16 %v6070_v37  ;;  %v5923_v1 = vpack.c.b16 %v5922_v26, %v5921_v56  ;;  %v5728_v34 = vadd.f32 %v11675_v32, %v11403_v16 }
 0x689   : > { %7561 = vmatmul.msk.bf16.gmra.mxu3 %vm871_vm4, %v12749_v27  ;;  %6304 = vrot.lane.b32.xlu2 %v6197_v11, %s7857_s15  ;;  %v5811_v20 = vpop.f32.mrf.mxu2  ;;  %v6084_v23 = vpack.c.b16 %v6081_v31, %v6080_v21 }
 0x68a   : > { %v5872_v45 = vadd.f32 %v5811_v20, %v5724_v39 }
 0x68b   : > { %v6138_v36 = vpop.f32.mrf.mxu0 }
 0x68c   : > { %v5969_v44 = vpop.f32.mrf.mxu3 }
 0x68d   : > { %v6031_v8 = vadd.f32 %v5969_v44, %v5871_v47  ;;  %v6218_v47 = vld [vmem:[#allocation2] sm:$0xff] }
 0x68e   : > { %7545 = vmatmul.msk.bf16.gmra.mxu2 %vm871_vm4, %v7611_v30 }
 0x68f   : > { %v6198_v40 = vadd.f32 %v6136_v5, %v6031_v8  ;;  %v11682_v5 = vpop.f32.mrf.mxu1  ;;  %v6219_v8 = vld [vmem:[#allocation2 + $0x8] sm:$0xff] }
 0x691   : > { %6306 = vrot.lane.b32.xlu0 %v6198_v40, %s7857_s15  ;;  %v5814_v24 = vpop.f32.mrf.mxu2 }
 0x692   : > { %v5873_v15 = vadd.f32 %v5814_v24, %v5725_v58 }
 0x693   : > { %v6141_v7 = vpop.f32.mrf.mxu0 }
 0x694   : > { %v5971_v50 = vpop.f32.mrf.mxu3 }
 0x695   : > { %v6032_v12 = vadd.f32 %v5971_v50, %v5872_v45 }
 0x696   : > { %7582 = vmatmul.msk.bf16.gmra.mxu0 %vm871_vm4, %v6084_v23  ;;  %v6223_v23 = vld [vmem:[#allocation2 + $0x28] sm:$0xff] }
 0x697   : > { %v6199_v51 = vadd.f32 %v6138_v36, %v6032_v12  ;;  %v11691_v27 = vpop.f32.mrf.mxu1 }
 0x699   : > { %7562 = vmatmul.msk.bf16.gmra.mxu3 %vm871_vm4, %v5923_v1  ;;  %6308 = vrot.lane.b32.xlu1 %v6199_v51, %s7857_s15  ;;  %v5816_v4 = vpop.f32.mrf.mxu2 }
 0x69a   : > { %v5874_v9 = vadd.f32 %v5816_v4, %v5726_v63  ;;  %v5729_v4 = vadd.f32 %v11682_v5, %v11414_v53 }
 0x69b   : > { %v6143_v13 = vpop.f32.mrf.mxu0  ;;  %v6287_v2 = vpop.permute.xlu2 %6286 }
 0x69c   : > { %v5974_v22 = vpop.f32.mrf.mxu3  ;;  %v6380_v25 = vadd.f32 %v6287_v2, %v6220_v62 }
 0x69d   : > { %v6033_v38 = vadd.f32 %v5974_v22, %v5873_v15 }
 0x69e   : > { %6413 = vst.msk [vmem:[#allocation2 + $0x10] sm:$0xff] %vm6410_vm3, %v6380_v25 }
 0x69f   : > { %v6200_v18 = vadd.f32 %v6141_v7, %v6033_v38  ;;  %v11704_v29 = vpop.f32.mrf.mxu1 }
 0x6a1   : > { %6310 = vrot.lane.b32.xlu2 %v6200_v18, %s7857_s15  ;;  %v5819_v11 = vpop.f32.mrf.mxu2 }
 0x6a2   : > { %v5875_v28 = vadd.f32 %v5819_v11, %v5727_v3 }
 0x6a3   : > { %v6146_v46 = vpop.f32.mrf.mxu0  ;;  %v6283_v55 = vpop.permute.xlu0 %6282 }
 0x6a4   : > { %v5976_v36 = vpop.f32.mrf.mxu3  ;;  %v6378_v20 = vadd.f32 %v6283_v55, %v6218_v47  ;;  %v6221_v47 = vld [vmem:[#allocation2 + $0x18] sm:$0xff] }
 0x6a5   : > { %v6445_v42 = vld [vmem:[#allocation2 + $0x10] sm:$0xff]  ;;  %v6034_v43 = vadd.f32 %v5976_v36, %v5874_v9 }
 0x6a6   : > { %v6477_v61 = vpack.c.bf16 %v6445_v42, %v6445_v42  ;;  %6411 = vst.msk [vmem:[#allocation2] sm:$0xff] %vm6410_vm3, %v6378_v20  ;;  %v6611_v1 = vmul.f32 %v6445_v42, %v6445_v42  ;;  %v6543_v25 = vsel %vm1013_vm10, %v6445_v42, 0.0 }
 0x6a7   : > { %v6201_v37 = vadd.f32 %v6143_v13, %v6034_v43  ;;  %v11717_v62 = vpop.f32.mrf.mxu1 }
 0x6a8   : > { %6510 = vst.msk [vmem:[%s11696_s19 + $0x8] sm:$0xf] %vm6507_vm9, %v6477_v61  ;;  %v6644_v53 = vsel %vm1013_vm10, %v6611_v1, 0.0  ;;  %v6226_v1 = vld [vmem:[#allocation2 + $0x40] sm:$0xff] }
 0x6a9   : > { %6312 = vrot.lane.b32.xlu0 %v6201_v37, %s7857_s15  ;;  %v5821_v44 = vpop.f32.mrf.mxu2  ;;  %v5730_v37 = vadd.f32 %v11691_v27, %v11421_v41  ;;  %v5731_v27 = vadd.f32 %v11704_v29, %v11430_v6 }
 0x6aa   : > { %v5876_v45 = vadd.f32 %v5821_v44, %v5728_v34 }
 0x6ab   : > { %v6148_v30 = vpop.f32.mrf.mxu0  ;;  %v6285_v21 = vpop.permute.xlu1 %6284 }
 0x6ac   : > { %v5979_v31 = vpop.f32.mrf.mxu3  ;;  %v6379_v49 = vadd.f32 %v6285_v21, %v6219_v8 }
 0x6ad   : > { %v6443_v14 = vld [vmem:[#allocation2] sm:$0xff]  ;;  %v6035_v39 = vadd.f32 %v5979_v31, %v5875_v28 }
 0x6ae   : > { %v6475_v40 = vpack.c.bf16 %v6443_v14, %v6443_v14  ;;  %6412 = vst.msk [vmem:[#allocation2 + $0x8] sm:$0xff] %vm6410_vm3, %v6379_v49  ;;  %v6609_v24 = vmul.f32 %v6443_v14, %v6443_v14  ;;  %v6540_v15 = vsel %vm1013_vm10, %v6443_v14, 0.0  ;;  %v6222_v31 = vld [vmem:[#allocation2 + $0x20] sm:$0xff] }
 0x6af   : > { %v6202_v33 = vadd.f32 %v6146_v46, %v6035_v39 }
 0x6b0   : > { %6508 = vst.msk [vmem:[%s11696_s19] sm:$0xf] %vm6507_vm9, %v6475_v40  ;;  %v6641_v38 = vsel %vm1013_vm10, %v6609_v24, 0.0 }
 0x6b1   : > { %6314 = vrot.lane.b32.xlu1 %v6202_v33, %s7857_s15  ;;  %v5824_v26 = vpop.f32.mrf.mxu2 }
 0x6b2   : > { %v5877_v9 = vadd.f32 %v5824_v26, %v5729_v4 }
 0x6b3   : > { %v6151_v56 = vpop.f32.mrf.mxu0  ;;  %v6293_v7 = vpop.permute.xlu2 %6292 }
 0x6b4   : > { %v5981_v50 = vpop.f32.mrf.mxu3  ;;  %v6383_v12 = vadd.f32 %v6293_v7, %v6223_v23 }
 0x6b5   : > { %v6444_v58 = vld [vmem:[#allocation2 + $0x8] sm:$0xff]  ;;  %v6036_v51 = vadd.f32 %v5981_v50, %v5876_v45 }
 0x6b6   : > { %v6476_v16 = vpack.c.bf16 %v6444_v58, %v6444_v58  ;;  %v6541_v32 = vsel %vm1013_vm10, %v6444_v58, 0.0  ;;  %v6610_v13 = vmul.f32 %v6444_v58, %v6444_v58  ;;  %6416 = vst.msk [vmem:[#allocation2 + $0x28] sm:$0xff] %vm6410_vm3, %v6383_v12 }
 0x6b7   : > { %v6542_v2 = vadd.f32 %v6541_v32, %v6540_v15  ;;  %v6203_v22 = vadd.f32 %v6148_v30, %v6036_v51  ;;  %v5686_v30 = vpop.f32.mrf.mxu1 }
 0x6b8   : > { %6509 = vst.msk [vmem:[%s11696_s19 + $0x4] sm:$0xf] %vm6507_vm9, %v6476_v16  ;;  %v6642_v63 = vsel %vm1013_vm10, %v6610_v13, 0.0 }
 0x6b9   : > { %v6643_v18 = vadd.f32 %v6642_v63, %v6641_v38  ;;  %6316 = vrot.lane.b32.xlu0 %v6203_v22, %s7857_s15  ;;  %v6544_v46 = vadd.f32 %v6543_v25, %v6542_v2  ;;  %v5826_v11 = vpop.f32.mrf.mxu2  ;;  %v5732_v22 = vadd.f32 %v11717_v62, %v11437_v17 }
 0x6ba   : > { %v5878_v44 = vadd.f32 %v5826_v11, %v5730_v37  ;;  %v5733_v37 = vadd.f32 %v5686_v30, %v11448_v54 }
 0x6bb   : > { %v6153_v5 = vpop.f32.mrf.mxu0  ;;  %v6645_v55 = vadd.f32 %v6644_v53, %v6643_v18  ;;  %v6289_v36 = vpop.permute.xlu0 %6288 }
 0x6bc   : > { %v5984_v20 = vpop.f32.mrf.mxu3  ;;  %v6381_v42 = vadd.f32 %v6289_v36, %v6221_v47 }
 0x6bd   : > { %v6448_v43 = vld [vmem:[#allocation2 + $0x28] sm:$0xff]  ;;  %v6037_v61 = vadd.f32 %v5984_v20, %v5877_v9 }
 0x6be   : > { %v6480_v3 = vpack.c.bf16 %v6448_v43, %v6448_v43  ;;  %6414 = vst.msk [vmem:[#allocation2 + $0x18] sm:$0xff] %vm6410_vm3, %v6381_v42  ;;  %v6614_v29 = vmul.f32 %v6448_v43, %v6448_v43  ;;  %v6549_v63 = vsel %vm1013_vm10, %v6448_v43, 0.0 }
 0x6bf   : > { %v6204_v28 = vadd.f32 %v6151_v56, %v6037_v61  ;;  %v5688_v51 = vpop.f32.mrf.mxu1 }
 0x6c0   : > { %6513 = vst.msk [vmem:[%s11696_s19 + $0x14] sm:$0xf] %vm6507_vm9, %v6480_v3  ;;  %v5734_v54 = vadd.f32 %v5688_v51, %v11455_v35 }
 0x6c1   : > { %6318 = vrot.lane.b32.xlu2 %v6204_v28, %s7857_s15  ;;  %v5829_v21 = vpop.f32.mrf.mxu2 }
 0x6c2   : > { %v5879_v24 = vadd.f32 %v5829_v21, %v5731_v27 }
 0x6c3   : > { %v6156_v8 = vpop.f32.mrf.mxu0  ;;  %v6291_v49 = vpop.permute.xlu1 %6290 }
 0x6c4   : > { %v5986_v14 = vpop.f32.mrf.mxu3  ;;  %v6382_v39 = vadd.f32 %v6291_v49, %v6222_v31  ;;  %v6225_v31 = vld [vmem:[#allocation2 + $0x38] sm:$0xff] }
 0x6c5   : > { %v6446_v40 = vld [vmem:[#allocation2 + $0x18] sm:$0xff]  ;;  %v6038_v34 = vadd.f32 %v5986_v14, %v5878_v44 }
 0x6c6   : > { %v6478_v33 = vpack.c.bf16 %v6446_v40, %v6446_v40  ;;  %v6545_v45 = vsel %vm1013_vm10, %v6446_v40, 0.0  ;;  %v6612_v41 = vmul.f32 %v6446_v40, %v6446_v40  ;;  %6415 = vst.msk [vmem:[#allocation2 + $0x20] sm:$0xff] %vm6410_vm3, %v6382_v39 }
 0x6c7   : > { %v6546_v56 = vadd.f32 %v6545_v45, %v6544_v46  ;;  %v6205_v26 = vadd.f32 %v6153_v5, %v6038_v34  ;;  %v6650_v5 = vsel %vm1013_vm10, %v6614_v29, 0.0  ;;  %v5691_v61 = vpop.f32.mrf.mxu1 }
 0x6c8   : > { %6511 = vst.msk [vmem:[%s11696_s19 + $0xc] sm:$0xf] %vm6507_vm9, %v6478_v33  ;;  %v6646_v23 = vsel %vm1013_vm10, %v6612_v41, 0.0 }
 0x6c9   : > { %v6647_v7 = vadd.f32 %v6646_v23, %v6645_v55  ;;  %6320 = vrot.lane.b32.xlu1 %v6205_v26, %s7857_s15  ;;  %v5831_v12 = vpop.f32.mrf.mxu2  ;;  %v6224_v55 = vld [vmem:[#allocation2 + $0x30] sm:$0xff] }
 0x6ca   : > { %v5880_v46 = vadd.f32 %v5831_v12, %v5732_v22  ;;  %v6229_v12 = vld [vmem:[#allocation2 + $0x58] sm:$0xff] }
 0x6cb   : > { %v6158_v50 = vpop.f32.mrf.mxu0  ;;  %v6299_v58 = vpop.permute.xlu2 %6298 }
 0x6cc   : > { %v5989_v15 = vpop.f32.mrf.mxu3  ;;  %v6386_v16 = vadd.f32 %v6299_v58, %v6226_v1 }
 0x6cd   : > { %v6447_v32 = vld [vmem:[#allocation2 + $0x20] sm:$0xff]  ;;  %v6039_v6 = vadd.f32 %v5989_v15, %v5879_v24 }
 0x6ce   : > { %v6479_v13 = vpack.c.bf16 %v6447_v32, %v6447_v32  ;;  %v6547_v4 = vsel %vm1013_vm10, %v6447_v32, 0.0  ;;  %v6613_v2 = vmul.f32 %v6447_v32, %v6447_v32  ;;  %6419 = vst.msk [vmem:[#allocation2 + $0x40] sm:$0xff] %vm6410_vm3, %v6386_v16 }
 0x6cf   : > { %v6548_v25 = vadd.f32 %v6547_v4, %v6546_v56  ;;  %v6206_v38 = vadd.f32 %v6156_v8, %v6039_v6  ;;  %v5693_v56 = vpop.f32.mrf.mxu1 }
 0x6d0   : > { %6512 = vst.msk [vmem:[%s11696_s19 + $0x10] sm:$0xf] %vm6507_vm9, %v6479_v13  ;;  %v6648_v18 = vsel %vm1013_vm10, %v6613_v2, 0.0  ;;  %v5735_v13 = vadd.f32 %v5691_v61, %v11466_v48 }
 0x6d1   : > { %v6649_v9 = vadd.f32 %v6648_v18, %v6647_v7  ;;  %6322 = vrot.lane.b32.xlu0 %v6206_v38, %s7857_s15  ;;  %v6550_v53 = vadd.f32 %v6549_v63, %v6548_v25  ;;  %v5834_v47 = vpop.f32.mrf.mxu2 }
 0x6d2   : > { %v5881_v44 = vadd.f32 %v5834_v47, %v5733_v37  ;;  %v6228_v37 = vld [vmem:[#allocation2 + $0x50] sm:$0xff] }
 0x6d3   : > { %v6161_v11 = vpop.f32.mrf.mxu0  ;;  %v6651_v17 = vadd.f32 %v6650_v5, %v6649_v9  ;;  %v6295_v62 = vpop.permute.xlu0 %6294  ;;  %v6227_v5 = vld [vmem:[#allocation2 + $0x48] sm:$0xff] }
 0x6d4   : > { %v5991_v36 = vpop.f32.mrf.mxu3  ;;  %v6384_v20 = vadd.f32 %v6295_v62, %v6224_v55 }
 0x6d5   : > { %v6451_v42 = vld [vmem:[#allocation2 + $0x40] sm:$0xff]  ;;  %v6040_v43 = vadd.f32 %v5991_v36, %v5880_v46 }
 0x6d6   : > { %v6483_v3 = vpack.c.bf16 %v6451_v42, %v6451_v42  ;;  %6417 = vst.msk [vmem:[#allocation2 + $0x30] sm:$0xff] %vm6410_vm3, %v6384_v20  ;;  %v6617_v51 = vmul.f32 %v6451_v42, %v6451_v42  ;;  %v6555_v22 = vsel %vm1013_vm10, %v6451_v42, 0.0  ;;  %v5736_v42 = vadd.f32 %v5693_v56, %v11471_v60  ;;  %v6232_v56 = vld [vmem:[#allocation2 + $0x70] sm:$0xff] }
 0x6d7   : > { %v6207_v28 = vadd.f32 %v6158_v50, %v6040_v43  ;;  %v5696_v9 = vpop.f32.mrf.mxu1 }
 0x6d8   : > { %6516 = vst.msk [vmem:[%s11696_s19 + $0x20] sm:$0xf] %vm6507_vm9, %v6483_v3  ;;  %v6656_v46 = vsel %vm1013_vm10, %v6617_v51, 0.0 }
 0x6d9   : > { %6324 = vrot.lane.b32.xlu2 %v6207_v28, %s7857_s15  ;;  %v5836_v21 = vpop.f32.mrf.mxu2 }
 0x6da   : > { %v5882_v7 = vadd.f32 %v5836_v21, %v5734_v54 }
 0x6db   : > { %v6163_v8 = vpop.f32.mrf.mxu0  ;;  %v6297_v49 = vpop.permute.xlu1 %6296 }
 0x6dc   : > { %v5994_v14 = vpop.f32.mrf.mxu3  ;;  %v6385_v39 = vadd.f32 %v6297_v49, %v6225_v31 }
 0x6dd   : > { %v6449_v40 = vld [vmem:[#allocation2 + $0x30] sm:$0xff]  ;;  %v6041_v34 = vadd.f32 %v5994_v14, %v5881_v44 }
 0x6de   : > { %v6481_v33 = vpack.c.bf16 %v6449_v40, %v6449_v40  ;;  %v6551_v45 = vsel %vm1013_vm10, %v6449_v40, 0.0  ;;  %v6615_v41 = vmul.f32 %v6449_v40, %v6449_v40  ;;  %6418 = vst.msk [vmem:[#allocation2 + $0x38] sm:$0xff] %vm6410_vm3, %v6385_v39 }
 0x6df   : > { %v6552_v30 = vadd.f32 %v6551_v45, %v6550_v53  ;;  %v6208_v27 = vadd.f32 %v6161_v11, %v6041_v34  ;;  %v5698_v44 = vpop.f32.mrf.mxu1  ;;  %v5737_v34 = vadd.f32 %v5696_v9, %v11482_v19 }
 0x6e0   : > { %6514 = vst.msk [vmem:[%s11696_s19 + $0x18] sm:$0xf] %vm6507_vm9, %v6481_v33  ;;  %v6652_v26 = vsel %vm1013_vm10, %v6615_v41, 0.0  ;;  %v5738_v51 = vadd.f32 %v5698_v44, %v11489_v52  ;;  %v6230_v52 = vld [vmem:[#allocation2 + $0x60] sm:$0xff] }
 0x6e1   : > { %v6653_v23 = vadd.f32 %v6652_v26, %v6651_v17  ;;  %6326 = vrot.lane.b32.xlu1 %v6208_v27, %s7857_s15  ;;  %v5839_v50 = vpop.f32.mrf.mxu2 }
 0x6e2   : > { %v5883_v63 = vadd.f32 %v5839_v50, %v5735_v13 }
 0x6e3   : > { %v6166_v24 = vpop.f32.mrf.mxu0  ;;  %v6305_v1 = vpop.permute.xlu2 %6304 }
 0x6e4   : > { %v5996_v58 = vpop.f32.mrf.mxu3  ;;  %v6389_v15 = vadd.f32 %v6305_v1, %v6229_v12 }
 0x6e5   : > { %v6450_v16 = vld [vmem:[#allocation2 + $0x38] sm:$0xff]  ;;  %v6042_v35 = vadd.f32 %v5996_v58, %v5882_v7 }
 0x6e6   : > { %v6482_v32 = vpack.c.bf16 %v6450_v16, %v6450_v16  ;;  %v6553_v6 = vsel %vm1013_vm10, %v6450_v16, 0.0  ;;  %v6616_v29 = vmul.f32 %v6450_v16, %v6450_v16  ;;  %6422 = vst.msk [vmem:[#allocation2 + $0x58] sm:$0xff] %vm6410_vm3, %v6389_v15 }
 0x6e7   : > { %v6554_v4 = vadd.f32 %v6553_v6, %v6552_v30  ;;  %v6209_v2 = vadd.f32 %v6163_v8, %v6042_v35  ;;  %v5701_v1 = vpop.f32.mrf.mxu1 }
 0x6e8   : > { %6515 = vst.msk [vmem:[%s11696_s19 + $0x1c] sm:$0xf] %vm6507_vm9, %v6482_v32  ;;  %v6654_v25 = vsel %vm1013_vm10, %v6616_v29, 0.0 }
 0x6e9   : > { %v6655_v38 = vadd.f32 %v6654_v25, %v6653_v23  ;;  %6328 = vrot.lane.b32.xlu0 %v6209_v2, %s7857_s15  ;;  %v6556_v18 = vadd.f32 %v6555_v22, %v6554_v4  ;;  %v5841_v53 = vpop.f32.mrf.mxu2 }
 0x6ea   : > { %v5884_v61 = vadd.f32 %v5841_v53, %v5736_v42 }
 0x6eb   : > { %v6657_v48 = vadd.f32 %v6656_v46, %v6655_v38  ;;  %v6301_v11 = vpop.permute.xlu0 %6300  ;;  %v6168_v47 = vpop.f32.mrf.mxu0 }
 0x6ec   : > { %v5999_v55 = vpop.f32.mrf.mxu3  ;;  %v6387_v17 = vadd.f32 %v6301_v11, %v6227_v5 }
 0x6ed   : > { %v6454_v62 = vld [vmem:[#allocation2 + $0x58] sm:$0xff]  ;;  %v6043_v36 = vadd.f32 %v5999_v55, %v5883_v63 }
 0x6ee   : > { %v6486_v20 = vpack.c.bf16 %v6454_v62, %v6454_v62  ;;  %6420 = vst.msk [vmem:[#allocation2 + $0x48] sm:$0xff] %vm6410_vm3, %v6387_v17  ;;  %v6620_v58 = vmul.f32 %v6454_v62, %v6454_v62  ;;  %v6561_v13 = vsel %vm1013_vm10, %v6454_v62, 0.0  ;;  %v5739_v62 = vadd.f32 %v5701_v1, %v11500_v0 }
 0x6ef   : > { %v6210_v43 = vadd.f32 %v6166_v24, %v6043_v36  ;;  %v12751_v24 = vld [vmem:[#allocation130_spill] sm:$0xff] }
 0x6f0   : > { %6519 = vst.msk [vmem:[%s11696_s19 + $0x2c] sm:$0xf] %vm6507_vm9, %v6486_v20  ;;  %v6809_v50 = vrot.slane %v12751_v24, 4  ;;  %v6662_v63 = vsel %vm1013_vm10, %v6620_v58, 0.0  ;;  %v5703_v20 = vpop.f32.mrf.mxu1 }
 0x6f1   : > { %6330 = vrot.lane.b32.xlu2 %v6210_v43, %s7857_s15  ;;  %v5844_v3 = vpop.f32.mrf.mxu2 }
 0x6f2   : > { %v5885_v30 = vadd.f32 %v5844_v3, %v5737_v34  ;;  %v6810_v38 = vadd.f32 %v6809_v50, %v12751_v24 }
 0x6f3   : > { %v6303_v28 = vpop.permute.xlu1 %6302  ;;  %v6171_v14 = vpop.f32.mrf.mxu0 }
 0x6f4   : > { %v6001_v8 = vpop.f32.mrf.mxu3  ;;  %v6388_v21 = vadd.f32 %v6303_v28, %v6228_v37  ;;  %v6811_v55 = vrot.slane %v6810_v38, 2  ;;  %v6231_v28 = vld [vmem:[#allocation2 + $0x68] sm:$0xff] }
 0x6f5   : > { %v6452_v31 = vld [vmem:[#allocation2 + $0x48] sm:$0xff]  ;;  %v6044_v49 = vadd.f32 %v6001_v8, %v5884_v61 }
 0x6f6   : > { %v6484_v39 = vpack.c.bf16 %v6452_v31, %v6452_v31  ;;  %v6557_v40 = vsel %vm1013_vm10, %v6452_v31, 0.0  ;;  %v6618_v60 = vmul.f32 %v6452_v31, %v6452_v31  ;;  %6421 = vst.msk [vmem:[#allocation2 + $0x50] sm:$0xff] %vm6410_vm3, %v6388_v21  ;;  %v6812_v3 = vadd.f32 %v6811_v55, %v6810_v38 }
 0x6f7   : > { %v6558_v33 = vadd.f32 %v6557_v40, %v6556_v18  ;;  %v6211_v45 = vadd.f32 %v6168_v47, %v6044_v49 }
 0x6f8   : > { %6517 = vst.msk [vmem:[%s11696_s19 + $0x24] sm:$0xf] %vm6507_vm9, %v6484_v39  ;;  %v6658_v41 = vsel %vm1013_vm10, %v6618_v60, 0.0  ;;  %v6813_v39 = vrot.slane %v6812_v3, 1 }
 0x6f9   : > { %v6659_v54 = vadd.f32 %v6658_v41, %v6657_v48  ;;  %6332 = vrot.lane.b32.xlu1 %v6211_v45, %s7857_s15  ;;  %v5846_v27 = vpop.f32.mrf.mxu2  ;;  %v7858_v48 = vmov 256.0  }
 0x6fa   : > { %v5886_v22 = vadd.f32 %v5846_v27, %v5738_v51  ;;  %7664 = vrcp.f32 %v7858_v48 }
 0x6fb   : > { %v6311_v26 = vpop.permute.xlu2 %6310  ;;  %v6173_v29 = vpop.f32.mrf.mxu0 }
 0x6fc   : > { %v6004_v23 = vpop.f32.mrf.mxu3  ;;  %v6392_v7 = vadd.f32 %v6311_v26, %v6232_v56 }
 0x6fd   : > { %v6453_v12 = vld [vmem:[#allocation2 + $0x50] sm:$0xff]  ;;  %v6045_v19 = vadd.f32 %v6004_v23, %v5885_v30  ;;  %v5706_v23 = vpop.f32.mrf.mxu1 }
 0x6fe   : > { %v6485_v15 = vpack.c.bf16 %v6453_v12, %v6453_v12  ;;  %v6559_v16 = vsel %vm1013_vm10, %v6453_v12, 0.0  ;;  %v6619_v35 = vmul.f32 %v6453_v12, %v6453_v12  ;;  %6425 = vst.msk [vmem:[#allocation2 + $0x70] sm:$0xff] %vm6410_vm3, %v6392_v7  ;;  %v6814_v7 = vadd.f32 %v6813_v39, %v6812_v3 }
 0x6ff   : > { %v6560_v32 = vadd.f32 %v6559_v16, %v6558_v33  ;;  %v6212_v6 = vadd.f32 %v6171_v14, %v6045_v19  ;;  %v5740_v33 = vadd.f32 %v5703_v20, %v11510_v57  ;;  %v6234_v20 = vld [vmem:[#allocation2 + $0x80] sm:$0xff] }
 0x700   : > { %6518 = vst.msk [vmem:[%s11696_s19 + $0x28] sm:$0xf] %vm6507_vm9, %v6485_v15  ;;  %v6660_v4 = vsel %vm1013_vm10, %v6619_v35, 0.0  ;;  %v7665_v61 = vpop.eup %7664 }
 0x701   : > { %v6661_v2 = vadd.f32 %v6660_v4, %v6659_v54  ;;  %6334 = vrot.lane.b32.xlu0 %v6212_v6, %s7857_s15  ;;  %v6562_v25 = vadd.f32 %v6561_v13, %v6560_v32  ;;  %v5849_v18 = vpop.f32.mrf.mxu2  ;;  %v6816_v8 = vmul.f32 256.0, %v7665_v61  ;;  %vm6820_vm11 = vweird.f32 %v7665_v61 }
 0x702   : > { %v5887_v43 = vadd.f32 %v5849_v18, %v5739_v62  ;;  %v5741_v32 = vadd.f32 %v5706_v23, %v11522_v10 }
 0x703   : > { %v6663_v9 = vadd.f32 %v6662_v63, %v6661_v2  ;;  %v6307_v46 = vpop.permute.xlu0 %6306  ;;  %v6176_v42 = vpop.f32.mrf.mxu0  ;;  %v6817_v0 = vsub.f32 1.0, %v6816_v8  ;;  %v6233_v63 = vld [vmem:[#allocation2 + $0x78] sm:$0xff] }
 0x704   : > { %v6006_v53 = vpop.f32.mrf.mxu3  ;;  %v6390_v5 = vadd.f32 %v6307_v46, %v6230_v52 }
 0x705   : > { %v6457_v11 = vld [vmem:[#allocation2 + $0x70] sm:$0xff]  ;;  %v6046_v47 = vadd.f32 %v6006_v53, %v5886_v22  ;;  %v6818_v54 = vmul.f32 %v7665_v61, %v6817_v0  ;;  %v5708_v46 = vpop.f32.mrf.mxu1 }
 0x706   : > { %v6489_v17 = vpack.c.bf16 %v6457_v11, %v6457_v11  ;;  %6423 = vst.msk [vmem:[#allocation2 + $0x60] sm:$0xff] %vm6410_vm3, %v6390_v5  ;;  %v6623_v15 = vmul.f32 %v6457_v11, %v6457_v11  ;;  %v6567_v13 = vsel %vm1013_vm10, %v6457_v11, 0.0 }
 0x707   : > { %v6213_v36 = vadd.f32 %v6173_v29, %v6046_v47  ;;  %v6819_v26 = vadd.f32 %v7665_v61, %v6818_v54 }
 0x708   : > { %6522 = vst.msk [vmem:[%s11696_s19 + $0x38] sm:$0xf] %vm6507_vm9, %v6489_v17  ;;  %v6668_v38 = vsel %vm1013_vm10, %v6623_v15, 0.0  ;;  %v5742_v17 = vadd.f32 %v5708_v46, %v11535_v59 }
 0x709   : > { %6336 = vrot.lane.b32.xlu1 %v6213_v36, %s7857_s15  ;;  %v5851_v37 = vpop.f32.mrf.mxu2  ;;  %v6821_v50 = vsel %vm6820_vm11, %v7665_v61, %v6819_v26  ;;  %v6239_v26 = vld [vmem:[#allocation2 + $0xa8] sm:$0xff] }
 0x70a   : > { %v5888_v56 = vadd.f32 %v5851_v37, %v5740_v33  ;;  %v6822_v19 = vmul.f32 %v6821_v50, %v6814_v7 }
 0x70b   : > { %v6309_v44 = vpop.permute.xlu1 %6308  ;;  %v6178_v24 = vpop.f32.mrf.mxu0 }
 0x70c   : > { %v6009_v21 = vpop.f32.mrf.mxu3  ;;  %v6391_v31 = vadd.f32 %v6309_v44, %v6231_v28  ;;  %7584 = vmatmul.msk.f32.vlgmr.msrb.gmra.mxu1 %vm871_vm4, %v6822_v19  ;;  %vm6851_vm4 = vcmask 57344  }
 0x70d   : > { %v6455_v49 = vld [vmem:[#allocation2 + $0x60] sm:$0xff]  ;;  %v6047_v14 = vadd.f32 %v6009_v21, %v5887_v43 }
 0x70e   : > { %v6487_v40 = vpack.c.bf16 %v6455_v49, %v6455_v49  ;;  %v6563_v60 = vsel %vm1013_vm10, %v6455_v49, 0.0  ;;  %v6621_v34 = vmul.f32 %v6455_v49, %v6455_v49  ;;  %6424 = vst.msk [vmem:[#allocation2 + $0x68] sm:$0xff] %vm6410_vm3, %v6391_v31 }
 0x70f   : > { %v6564_v45 = vadd.f32 %v6563_v60, %v6562_v25  ;;  %v6214_v41 = vadd.f32 %v6176_v42, %v6047_v14 }
 0x710   : > { %6520 = vst.msk [vmem:[%s11696_s19 + $0x30] sm:$0xf] %vm6507_vm9, %v6487_v40  ;;  %v6664_v30 = vsel %vm1013_vm10, %v6621_v34, 0.0  ;;  %v6235_v40 = vld [vmem:[#allocation2 + $0x88] sm:$0xff] }
 0x711   : > { %v6665_v27 = vadd.f32 %v6664_v30, %v6663_v9  ;;  %6338 = vrot.lane.b32.xlu2 %v6214_v41, %s7857_s15  ;;  %v5854_v57 = vpop.f32.mrf.mxu2  ;;  %v6236_v9 = vld [vmem:[#allocation2 + $0x90] sm:$0xff] }
 0x712   : > { %v5889_v22 = vadd.f32 %v5854_v57, %v5741_v32  ;;  %v6237_v32 = vld [vmem:[#allocation2 + $0x98] sm:$0xff] }
 0x713   : > { %v6181_v11 = vpop.f32.mrf.mxu0 }
 0x714   : > { %v6011_v12 = vpop.f32.mrf.mxu3 }
 0x715   : > { %v6456_v1 = vld [vmem:[#allocation2 + $0x68] sm:$0xff]  ;;  %v6048_v58 = vadd.f32 %v6011_v12, %v5888_v56 }
 0x716   : > { %v6488_v16 = vpack.c.bf16 %v6456_v1, %v6456_v1  ;;  %v6565_v35 = vsel %vm1013_vm10, %v6456_v1, 0.0  ;;  %v6622_v51 = vmul.f32 %v6456_v1, %v6456_v1 }
 0x717   : > { %v6566_v6 = vadd.f32 %v6565_v35, %v6564_v45  ;;  %v6215_v29 = vadd.f32 %v6178_v24, %v6048_v58 }
 0x718   : > { %6521 = vst.msk [vmem:[%s11696_s19 + $0x34] sm:$0xf] %vm6507_vm9, %v6488_v16  ;;  %v6666_v4 = vsel %vm1013_vm10, %v6622_v51, 0.0 }
 0x719   : > { %v6667_v2 = vadd.f32 %v6666_v4, %v6665_v27  ;;  %6340 = vrot.lane.b32.xlu0 %v6215_v29, %s7857_s15  ;;  %v6568_v25 = vadd.f32 %v6567_v13, %v6566_v6  ;;  %v5856_v55 = vpop.f32.mrf.mxu2 }
 0x71a   : > { %v5890_v36 = vadd.f32 %v5856_v55, %v5742_v17 }
 0x71b   : > { %v6669_v18 = vadd.f32 %v6668_v38, %v6667_v2  ;;  %v6313_v52 = vpop.permute.xlu0 %6312  ;;  %v6319_v10 = vpop.permute.xlu2 %6318 }
 0x71c   : > { %v6014_v53 = vpop.f32.mrf.mxu3  ;;  %v6393_v5 = vadd.f32 %v6313_v52, %v6233_v63  ;;  %v6396_v48 = vadd.f32 %v6319_v10, %v6236_v9  ;;  %v6183_v49 = vpop.f32.mrf.mxu0 }
 0x71d   : > { %v6049_v47 = vadd.f32 %v6014_v53, %v5889_v22  ;;  %v6238_v22 = vld [vmem:[#allocation2 + $0xa0] sm:$0xff] }
 0x71e   : > { %6426 = vst.msk [vmem:[#allocation2 + $0x78] sm:$0xff] %vm6410_vm3, %v6393_v5  ;;  %v6242_v5 = vld [vmem:[#allocation2 + $0xc0] sm:$0xff] }
 0x71f   : > { %v6216_v62 = vadd.f32 %v6181_v11, %v6049_v47  ;;  %6429 = vst.msk [vmem:[#allocation2 + $0x90] sm:$0xff] %vm6410_vm3, %v6396_v48 }
 0x721   : > { %6342 = vrot.lane.b32.xlu1 %v6216_v62, %s7857_s15 }
 0x723   : > { %v6315_v42 = vpop.permute.xlu1 %6314 }
 0x724   : > { %v6016_v43 = vpop.f32.mrf.mxu3  ;;  %v6394_v61 = vadd.f32 %v6315_v42, %v6234_v20 }
 0x725   : > { %v6458_v3 = vld [vmem:[#allocation2 + $0x78] sm:$0xff]  ;;  %v6050_v37 = vadd.f32 %v6016_v43, %v5890_v36 }
 0x726   : > { %v6490_v28 = vpack.c.bf16 %v6458_v3, %v6458_v3  ;;  %v6569_v44 = vsel %vm1013_vm10, %v6458_v3, 0.0  ;;  %v6624_v8 = vmul.f32 %v6458_v3, %v6458_v3  ;;  %v6461_v21 = vld [vmem:[#allocation2 + $0x90] sm:$0xff]  ;;  %6427 = vst.msk [vmem:[#allocation2 + $0x80] sm:$0xff] %vm6410_vm3, %v6394_v61 }
 0x727   : > { %v6570_v59 = vadd.f32 %v6569_v44, %v6568_v25  ;;  %v6493_v31 = vpack.c.bf16 %v6461_v21, %v6461_v21  ;;  %v6217_v0 = vadd.f32 %v6183_v49, %v6050_v37  ;;  %v6627_v50 = vmul.f32 %v6461_v21, %v6461_v21  ;;  %v6241_v49 = vld [vmem:[#allocation2 + $0xb8] sm:$0xff] }
 0x728   : > { %6523 = vst.msk [vmem:[%s11696_s19 + $0x3c] sm:$0xf] %vm6507_vm9, %v6490_v28  ;;  %v6670_v14 = vsel %vm1013_vm10, %v6624_v8, 0.0  ;;  %v6575_v58 = vsel %vm1013_vm10, %v6461_v21, 0.0  ;;  %v6240_v28 = vld [vmem:[#allocation2 + $0xb0] sm:$0xff] }
 0x729   : > { %v6671_v39 = vadd.f32 %v6670_v14, %v6669_v18  ;;  %6526 = vst.msk [vmem:[%s11696_s19 + $0x48] sm:$0xf] %vm6507_vm9, %v6493_v31  ;;  %6344 = vrot.lane.b32.xlu2 %v6217_v0, %s7857_s15  ;;  %v6676_v51 = vsel %vm1013_vm10, %v6627_v50, 0.0 }
 0x72b   : > { %v6317_v60 = vpop.permute.xlu0 %6316 }
 0x72c   : > { %v6395_v34 = vadd.f32 %v6317_v60, %v6235_v40 }
 0x72d   : > { %v6459_v33 = vld [vmem:[#allocation2 + $0x80] sm:$0xff] }
 0x72e   : > { %v6491_v45 = vpack.c.bf16 %v6459_v33, %v6459_v33  ;;  %v6571_v41 = vsel %vm1013_vm10, %v6459_v33, 0.0  ;;  %v6625_v54 = vmul.f32 %v6459_v33, %v6459_v33  ;;  %6428 = vst.msk [vmem:[#allocation2 + $0x88] sm:$0xff] %vm6410_vm3, %v6395_v34  ;;  %v6243_v33 = vld [vmem:[#allocation2 + $0xc8] sm:$0xff] }
 0x72f   : > { %v6572_v30 = vadd.f32 %v6571_v41, %v6570_v59  ;;  %v6246_v41 = vld [vmem:[#allocation2 + $0xe0] sm:$0xff] }
 0x730   : > { %6524 = vst.msk [vmem:[%s11696_s19 + $0x40] sm:$0xf] %vm6507_vm9, %v6491_v45  ;;  %v6672_v27 = vsel %vm1013_vm10, %v6625_v54, 0.0 }
 0x731   : > { %v6673_v56 = vadd.f32 %v6672_v27, %v6671_v39 }
 0x733   : > { %v6325_v23 = vpop.permute.xlu2 %6324 }
 0x734   : > { %v6399_v7 = vadd.f32 %v6325_v23, %v6239_v26 }
 0x735   : > { %v6460_v24 = vld [vmem:[#allocation2 + $0x88] sm:$0xff] }
 0x736   : > { %v6492_v12 = vpack.c.bf16 %v6460_v24, %v6460_v24  ;;  %v6573_v57 = vsel %vm1013_vm10, %v6460_v24, 0.0  ;;  %v6626_v19 = vmul.f32 %v6460_v24, %v6460_v24  ;;  %6432 = vst.msk [vmem:[#allocation2 + $0xa8] sm:$0xff] %vm6410_vm3, %v6399_v7 }
 0x737   : > { %v6574_v1 = vadd.f32 %v6573_v57, %v6572_v30  ;;  %v6245_v57 = vld [vmem:[#allocation2 + $0xd8] sm:$0xff] }
 0x738   : > { %6525 = vst.msk [vmem:[%s11696_s19 + $0x44] sm:$0xf] %vm6507_vm9, %v6492_v12  ;;  %v6674_v15 = vsel %vm1013_vm10, %v6626_v19, 0.0 }
 0x739   : > { %v6675_v16 = vadd.f32 %v6674_v15, %v6673_v56  ;;  %v6576_v35 = vadd.f32 %v6575_v58, %v6574_v1  ;;  %v6244_v56 = vld [vmem:[#allocation2 + $0xd0] sm:$0xff] }
 0x73b   : > { %v6321_v6 = vpop.permute.xlu1 %6320  ;;  %v6677_v29 = vadd.f32 %v6676_v51, %v6675_v16  ;;  %v6249_v16 = vld [vmem:[#allocation2 + $0xf8] sm:$0xff] }
 0x73c   : > { %v6397_v13 = vadd.f32 %v6321_v6, %v6237_v32 }
 0x73d   : > { %v6464_v4 = vld [vmem:[#allocation2 + $0xa8] sm:$0xff] }
 0x73e   : > { %v6496_v2 = vpack.c.bf16 %v6464_v4, %v6464_v4  ;;  %6430 = vst.msk [vmem:[#allocation2 + $0x98] sm:$0xff] %vm6410_vm3, %v6397_v13  ;;  %v6630_v36 = vmul.f32 %v6464_v4, %v6464_v4  ;;  %v6581_v42 = vsel %vm1013_vm10, %v6464_v4, 0.0 }
 0x740   : > { %6529 = vst.msk [vmem:[%s11696_s19 + $0x54] sm:$0xf] %vm6507_vm9, %v6496_v2  ;;  %v6682_v37 = vsel %vm1013_vm10, %v6630_v36, 0.0 }
 0x743   : > { %v6323_v25 = vpop.permute.xlu0 %6322 }
 0x744   : > { %v6398_v38 = vadd.f32 %v6323_v25, %v6238_v22  ;;  %v6247_v25 = vld [vmem:[#allocation2 + $0xe8] sm:$0xff] }
 0x745   : > { %v6462_v63 = vld [vmem:[#allocation2 + $0x98] sm:$0xff] }
 0x746   : > { %v6494_v18 = vpack.c.bf16 %v6462_v63, %v6462_v63  ;;  %v6577_v52 = vsel %vm1013_vm10, %v6462_v63, 0.0  ;;  %v6628_v9 = vmul.f32 %v6462_v63, %v6462_v63  ;;  %6431 = vst.msk [vmem:[#allocation2 + $0xa0] sm:$0xff] %vm6410_vm3, %v6398_v38 }
 0x747   : > { %v6578_v10 = vadd.f32 %v6577_v52, %v6576_v35 }
 0x748   : > { %6527 = vst.msk [vmem:[%s11696_s19 + $0x4c] sm:$0xf] %vm6507_vm9, %v6494_v18  ;;  %v6678_v46 = vsel %vm1013_vm10, %v6628_v9, 0.0 }
 0x749   : > { %v6679_v53 = vadd.f32 %v6678_v46, %v6677_v29 }
 0x74b   : > { %v6331_v48 = vpop.permute.xlu2 %6330 }
 0x74c   : > { %v6402_v11 = vadd.f32 %v6331_v48, %v6242_v5 }
 0x74d   : > { %v6463_v47 = vld [vmem:[#allocation2 + $0xa0] sm:$0xff] }
 0x74e   : > { %v6495_v55 = vpack.c.bf16 %v6463_v47, %v6463_v47  ;;  %v6629_v17 = vmul.f32 %v6463_v47, %v6463_v47  ;;  %6435 = vst.msk [vmem:[#allocation2 + $0xc0] sm:$0xff] %vm6410_vm3, %v6402_v11  ;;  %v6579_v62 = vsel %vm1013_vm10, %v6463_v47, 0.0 }
 0x74f   : > { %v6580_v20 = vadd.f32 %v6579_v62, %v6578_v10 }
 0x750   : > { %6528 = vst.msk [vmem:[%s11696_s19 + $0x50] sm:$0xf] %vm6507_vm9, %v6495_v55  ;;  %v6680_v43 = vsel %vm1013_vm10, %v6629_v17, 0.0 }
 0x751   : > { %v6582_v61 = vadd.f32 %v6581_v42, %v6580_v20  ;;  %v6681_v3 = vadd.f32 %v6680_v43, %v6679_v53 }
 0x753   : > { %v6327_v44 = vpop.permute.xlu1 %6326  ;;  %v6683_v8 = vadd.f32 %v6682_v37, %v6681_v3 }
 0x754   : > { %v6400_v21 = vadd.f32 %v6327_v44, %v6240_v28 }
 0x755   : > { %v11854_v59 = vld [vmem:[#allocation2 + $0xc0] sm:$0xff] }
 0x756   : > { %6433 = vst.msk [vmem:[#allocation2 + $0xb0] sm:$0xff] %vm6410_vm3, %v6400_v21  ;;  %v6499_v31 = vpack.c.bf16 %v11854_v59, %v11854_v59  ;;  %v6633_v53 = vmul.f32 %v11854_v59, %v11854_v59  ;;  %v6587_v47 = vsel %vm1013_vm10, %v11854_v59, 0.0 }
 0x758   : > { %6532 = vst.msk [vmem:[%s11696_s19 + $0x60] sm:$0xf] %vm6507_vm9, %v6499_v31  ;;  %v6688_v42 = vsel %vm1013_vm10, %v6633_v53, 0.0 }
 0x75b   : > { %v6329_v14 = vpop.permute.xlu0 %6328 }
 0x75c   : > { %v6401_v0 = vadd.f32 %v6329_v14, %v6241_v49 }
 0x75d   : > { %v6465_v39 = vld [vmem:[#allocation2 + $0xb0] sm:$0xff] }
 0x75e   : > { %6434 = vst.msk [vmem:[#allocation2 + $0xb8] sm:$0xff] %vm6410_vm3, %v6401_v0  ;;  %v6497_v40 = vpack.c.bf16 %v6465_v39, %v6465_v39  ;;  %v6631_v29 = vmul.f32 %v6465_v39, %v6465_v39  ;;  %v6583_v13 = vsel %vm1013_vm10, %v6465_v39, 0.0 }
 0x75f   : > { %v6584_v63 = vadd.f32 %v6583_v13, %v6582_v61  ;;  %v6248_v61 = vld [vmem:[#allocation2 + $0xf0] sm:$0xff] }
 0x760   : > { %6530 = vst.msk [vmem:[%s11696_s19 + $0x58] sm:$0xf] %vm6507_vm9, %v6497_v40  ;;  %v6684_v22 = vsel %vm1013_vm10, %v6631_v29, 0.0 }
 0x761   : > { %v6685_v10 = vadd.f32 %v6684_v22, %v6683_v8 }
 0x765   : > { %v6466_v60 = vld [vmem:[#allocation2 + $0xb8] sm:$0xff] }
 0x766   : > { %v6498_v34 = vpack.c.bf16 %v6466_v60, %v6466_v60  ;;  %v6632_v4 = vmul.f32 %v6466_v60, %v6466_v60  ;;  %v6585_v2 = vsel %vm1013_vm10, %v6466_v60, 0.0 }
 0x767   : > { %v6586_v9 = vadd.f32 %v6585_v2, %v6584_v63 }
 0x768   : > { %6531 = vst.msk [vmem:[%s11696_s19 + $0x5c] sm:$0xf] %vm6507_vm9, %v6498_v34  ;;  %v6686_v52 = vsel %vm1013_vm10, %v6632_v4, 0.0 }
 0x769   : > { %v6687_v11 = vadd.f32 %v6686_v52, %v6685_v10  ;;  %v6588_v62 = vadd.f32 %v6587_v47, %v6586_v9 }
 0x76b   : > { %v6333_v45 = vpop.permute.xlu1 %6332  ;;  %v6339_v54 = vpop.permute.xlu2 %6338  ;;  %v6689_v44 = vadd.f32 %v6688_v42, %v6687_v11 }
 0x76c   : > { %v6403_v30 = vadd.f32 %v6333_v45, %v6243_v33  ;;  %v6406_v27 = vadd.f32 %v6339_v54, %v6246_v41 }
 0x76e   : > { %6436 = vst.msk [vmem:[#allocation2 + $0xc8] sm:$0xff] %vm6410_vm3, %v6403_v30 }
 0x76f   : > { %6439 = vst.msk [vmem:[#allocation2 + $0xe0] sm:$0xff] %vm6410_vm3, %v6406_v27 }
 0x773   : > { %v6335_v26 = vpop.permute.xlu0 %6334 }
 0x774   : > { %v6404_v23 = vadd.f32 %v6335_v26, %v6244_v56 }
 0x775   : > { %v6468_v7 = vld [vmem:[#allocation2 + $0xc8] sm:$0xff] }
 0x776   : > { %6437 = vst.msk [vmem:[#allocation2 + $0xd0] sm:$0xff] %vm6410_vm3, %v6404_v23  ;;  %v11869_v24 = vld [vmem:[#allocation2 + $0xe0] sm:$0xff]  ;;  %v6500_v50 = vpack.c.bf16 %v6468_v7, %v6468_v7  ;;  %v6634_v5 = vmul.f32 %v6468_v7, %v6468_v7  ;;  %v6589_v55 = vsel %vm1013_vm10, %v6468_v7, 0.0 }
 0x777   : > { %v6503_v12 = vpack.c.bf16 %v11869_v24, %v11869_v24  ;;  %v6590_v28 = vadd.f32 %v6589_v55, %v6588_v62 }
 0x778   : > { %6533 = vst.msk [vmem:[%s11696_s19 + $0x64] sm:$0xf] %vm6507_vm9, %v6500_v50  ;;  %v6690_v43 = vsel %vm1013_vm10, %v6634_v5, 0.0 }
 0x779   : > { %6536 = vst.msk [vmem:[%s11696_s19 + $0x70] sm:$0xf] %vm6507_vm9, %v6503_v12  ;;  %v6691_v14 = vadd.f32 %v6690_v43, %v6689_v44 }
 0x77b   : > { %v6337_v19 = vpop.permute.xlu1 %6336 }
 0x77c   : > { %v6405_v1 = vadd.f32 %v6337_v19, %v6245_v57 }
 0x77d   : > { %v6469_v58 = vld [vmem:[#allocation2 + $0xd0] sm:$0xff] }
 0x77e   : > { %6438 = vst.msk [vmem:[#allocation2 + $0xd8] sm:$0xff] %vm6410_vm3, %v6405_v1  ;;  %v6501_v15 = vpack.c.bf16 %v6469_v58, %v6469_v58  ;;  %v6635_v17 = vmul.f32 %v6469_v58, %v6469_v58  ;;  %v6591_v36 = vsel %vm1013_vm10, %v6469_v58, 0.0 }
 0x77f   : > { %v6592_v49 = vadd.f32 %v6591_v36, %v6590_v28 }
 0x780   : > { %6534 = vst.msk [vmem:[%s11696_s19 + $0x68] sm:$0xf] %vm6507_vm9, %v6501_v15  ;;  %v6692_v59 = vsel %vm1013_vm10, %v6635_v17, 0.0 }
 0x783   : > { %v6345_v35 = vpop.permute.xlu2 %6344 }
 0x784   : > { %v6409_v51 = vadd.f32 %v6345_v35, %v6249_v16 }
 0x785   : > { %v6470_v32 = vld [vmem:[#allocation2 + $0xd8] sm:$0xff] }
 0x786   : > { %v6502_v6 = vpack.c.bf16 %v6470_v32, %v6470_v32  ;;  %6442 = vst.msk [vmem:[#allocation2 + $0xf8] sm:$0xff] %vm6410_vm3, %v6409_v51  ;;  %v6636_v20 = vmul.f32 %v6470_v32, %v6470_v32  ;;  %v6593_v21 = vsel %vm1013_vm10, %v6470_v32, 0.0 }
 0x788   : > { %6535 = vst.msk [vmem:[%s11696_s19 + $0x6c] sm:$0xf] %vm6507_vm9, %v6502_v6 }
 0x789   : > { %v6848_v37 = vpop.f32.mrf.mxu1 }
 0x78a   : > { %6852 = vst.msk [vmem:[%s261_s29] sm:$0x1] %vm6851_vm4, %v6848_v37 }
 0x78b   : > { %v6341_v38 = vpop.permute.xlu0 %6340 }
 0x78c   : > { %v6407_v18 = vadd.f32 %v6341_v38, %v6247_v25 }
 0x78d   : > { %v11895_v46 = vld [vmem:[#allocation2 + $0xf8] sm:$0xff] }
 0x78e   : > { %6440 = vst.msk [vmem:[#allocation2 + $0xe8] sm:$0xff] %vm6410_vm3, %v6407_v18  ;;  %v6506_v48 = vpack.c.bf16 %v11895_v46, %v11895_v46 }
 0x790   : > { %6539 = vst.msk [vmem:[%s11696_s19 + $0x7c] sm:$0xf] %vm6507_vm9, %v6506_v48 }
 0x793   : > { %v6343_v3 = vpop.permute.xlu1 %6342 }
 0x794   : > { %v6408_v8 = vadd.f32 %v6343_v3, %v6248_v61 }
 0x795   : > { %v6472_v31 = vld [vmem:[#allocation2 + $0xe8] sm:$0xff] }
 0x796   : > { %7786 = shalt.err (!%p7783_p3)
}
 0x797   : > { %7617 = dma.vmem_to_hbm [thread:$0]  (%p7932_p5), %s6892_s9, 16, %s6894_s10, %s6864_s11   ;;  %6441 = vst.msk [vmem:[#allocation2 + $0xf0] sm:$0xff] %vm6410_vm3, %v6408_v8  ;;  %v6504_v0 = vpack.c.bf16 %v6472_v31, %v6472_v31  ;;  %v6694_v39 = vsel %vm1013_vm10, %v6636_v20, 0.0  ;;  %v6594_v40 = vadd.f32 %v6593_v21, %v6592_v49  ;;  %v6693_v60 = vadd.f32 %v6692_v59, %v6691_v14 }
 0x798   : > { %v6637_v34 = vmul.f32 %v11869_v24, %v11869_v24  ;;  %v6638_v33 = vmul.f32 %v6472_v31, %v6472_v31  ;;  %v6595_v41 = vsel %vm1013_vm10, %v11869_v24, 0.0  ;;  %v6597_v54 = vsel %vm1013_vm10, %v6472_v31, 0.0  ;;  %s7010_s26 = sshll.u32 %s11885_s13, 1  ;;  %s7586_s28 = sshll.u32 %s7915_s25, 1 }
 0x799   : > { %6537 = vst.msk [vmem:[%s11696_s19 + $0x74] sm:$0xf] %vm6507_vm9, %v6504_v0  ;;  %v6695_v45 = vadd.f32 %v6694_v39, %v6693_v60  ;;  %v6596_v30 = vadd.f32 %v6595_v41, %v6594_v40  ;;  %v6640_v19 = vmul.f32 %v11895_v46, %v11895_v46  ;;  %v6601_v58 = vsel %vm1013_vm10, %v11895_v46, 0.0  ;;  %s6876_s9 = scalar_lea.hbm %s11988_s5, %s7586_s28  ;;  %s255_s10 = scalar_lea.vmem [#allocation3], %s7010_s26 }
 0x79a   : > { %v6696_v27 = vsel %vm1013_vm10, %v6637_v34, 0.0  ;;  %v6698_v56 = vsel %vm1013_vm10, %v6638_v33, 0.0  ;;  %s6878_s11 = sshll.u32 %s255_s10, 4  ;;  %s6880_s12 = sshll.u32 %s6876_s9, 4  ;;  %s6879_s11 = int_to_ptr.vmem [resolvable:$true] %s6878_s11  ;;  %s6881_s12 = int_to_ptr.hbm [resolvable:$true] %s6880_s12 }
 0x79b   : > { %v6598_v23 = vadd.f32 %v6597_v54, %v6596_v30  ;;  %v6697_v7 = vadd.f32 %v6696_v27, %v6695_v45  ;;  %v6702_v51 = vsel %vm1013_vm10, %v6640_v19, 0.0  ;;  %s6859_s25 = scalar_lea.sflag [#allocation4], %s11885_s13  ;;  %s7801_s14 = sshra.s32 %s6881_s12, 4  ;;  %s7802_s14 = int_to_ptr.hbm [resolvable:$true] %s7801_s14 }
 0x79c   : > { %s7803_s15 = scalar_lea.hbm %s7802_s14, 2  ;;  %s7807_s18 = scalar_lea.hbm %s11988_s5, 4 }
 0x79d   : > { %v6699_v1 = vadd.f32 %v6698_v56, %v6697_v7  ;;  %p7804_p4 = scmp.ne.s32.totalorder %s7802_s14, %s7803_s15  ;;  %p7808_p9 = scmp.lt.s32.totalorder %s7802_s14, %s11988_s5 }
 0x79e   : > { %v6473_v26 = vld [vmem:[#allocation2 + $0xf0] sm:$0xff]  ;;  %p7809_p10 = scmp.lt.s32.totalorder %s7807_s18, %s7803_s15 }
 0x79f   : > { %v6505_v50 = vpack.c.bf16 %v6473_v26, %v6473_v26  ;;  %v6599_v12 = vsel %vm1013_vm10, %v6473_v26, 0.0  ;;  %v6639_v57 = vmul.f32 %v6473_v26, %v6473_v26  ;;  %p7805_p7 = pnand %p7804_p4, %p7932_p5 }
 0x7a0   : > { %v6600_v24 = vadd.f32 %v6599_v12, %v6598_v23  ;;  %p7810_p11 = por %p7809_p10, %p7808_p9 }
 0x7a1   : > { %6538 = vst.msk [vmem:[%s11696_s19 + $0x78] sm:$0xf] %vm6507_vm9, %v6505_v50  ;;  %v6700_v15 = vsel %vm1013_vm10, %v6639_v57, 0.0  ;;  %vm6712_vm10 = vcmask 254976   ;;  %p7806_p8 = pneg %p7805_p7 }
 0x7a2   : > { %v6602_v16 = vadd.f32 %v6601_v58, %v6600_v24  ;;  %v6701_v35 = vadd.f32 %v6700_v15, %v6699_v1 }
 0x7a3   : > { %p7811_p12 = pnand %p7810_p11, %p7806_p8 }
 0x7a4   : > { %v6603_v32 = vrot.slane %v6602_v16, 4  ;;  %v6703_v6 = vadd.f32 %v6702_v51, %v6701_v35 }
 0x7a6   : > { %v6604_v29 = vadd.f32 %v6603_v32, %v6602_v16  ;;  %v6704_v13 = vrot.slane %v6703_v6, 4 }
 0x7a8   : > { %v6605_v4 = vrot.slane %v6604_v29, 2  ;;  %v6705_v2 = vadd.f32 %v6704_v13, %v6703_v6 }
 0x7aa   : > { %v6606_v22 = vadd.f32 %v6605_v4, %v6604_v29  ;;  %v6706_v25 = vrot.slane %v6705_v2, 2 }
 0x7ac   : > { %v6607_v38 = vrot.slane %v6606_v22, 1  ;;  %v6707_v63 = vadd.f32 %v6706_v25, %v6705_v2 }
 0x7ae   : > { %v6708_v18 = vrot.slane %v6707_v63, 1  ;;  %v6608_v52 = vadd.f32 %v6607_v38, %v6606_v22 }
 0x7b0   : > { %v6709_v9 = vadd.f32 %v6708_v18, %v6707_v63 }
 0x7b2   : > { %v6711_v10 = vsel %vm5097_vm0, %v6608_v52, %v6709_v9 }
 0x7b3   : > { %6713 = vst.msk [vmem:[%s255_s10] sm:$0x3] %vm6712_vm10, %v6711_v10 }
 0x7b4   : > { %7814 = shalt.err (!%p7811_p12)
}
 0x7b5   : > { %7616 = dma.vmem_to_hbm [thread:$0]  (%p7932_p5), %s6879_s11, 32, %s6881_s12, %s6859_s25  }
 0x7b6 PF: > { %p7627_p13 = scmp.ge.s32.totalorder %s7853_s24, 2  ;;  %s6913_s13 = sand.u32 1, %s7841_s21  }
 0x7b7   : > { %s6914_s28 = scalar_lea.sflag [#allocation4], %s6913_s13 }
 0x7b8   : > { %p7621_p0 = pnand %p7627_p13, %p7936_p6 }
 0x7ba   : > { %p7622_p1 = pneg %p7621_p0 }
 0x7bc   : > { %7832 = dma.done.wait (%p7622_p1), %s6914_s28, 32  }
 0x7bd   : > { %7834 = vsyncadd (%p7622_p1), %s6914_s28, 4294967264  ;;  %s6924_s19 = scalar_lea.sflag [#allocation6], %s6913_s13 }
 0x7be   : > { %7836 = dma.done.wait (%p7622_p1), %s6924_s19, 16  }
 0x7bf   : > { %7838 = vsyncadd (%p7622_p1), %s6924_s19, 4294967280  ;;  %p20_p5 = scmp.ge.s32.totalorder %s7919_s27, 4   ;;  %s12752_s21 = smov %s7845_s22 }
 0x7c0   : > { %s12753_s22 = smov %s7849_s23  ;;  %s12754_s23 = smov %s7930_s30 }
 0x7c1   : > { %s12755_s24 = smov %s7919_s27  ;;  %22 = sbr.rel (!%p20_p5) target bundleno = 5 (0x5), region = 123 }
 0x7c6   :  { %6929 = vsyncpa [#allocation4], 1 }
 0x7c7   :  { %6931 = vsyncpa [#allocation4 + $0x1], 1 }
 0x7c8   :  { %6932 = vsyncpa [#allocation6], 1 }
 0x7c9   :  { %6934 = vsyncpa [#allocation6 + $0x1], 1 }

</bundles_post_ra>
